<compile_context>
chip_gen: v5e
topology: v5e:2x2
jax: 0.10.0
libtpu: 0.0.40
codegen_flags: <defaults>
</compile_context>

<pallas_src>
import functools

import jax
import jax.numpy as jnp
from jax.experimental import pallas as pl
from jax.experimental.pallas import tpu as pltpu


# ----------------------------- Pallas kernel ---------------------------------

def _dysample_kernel(x_ref, xhr_ref, w_ref, cb_ref, o_ref, *, H, W, groups):
    """One (batch, output-column-tile) step of DySample.

    x_ref  : (1, C, H*W)        all source channels of this batch (low-res)
    xhr_ref: (1, Cps, tile_n)   pixel-shuffled x, this output-column tile (conv input)
    w_ref  : (2g, Cps)          0.25 * offset-conv weight (rows 0..g-1 = x, g..2g-1 = y)
    cb_ref : (2g, tile_n)       base coord + init_pos + 0.25*bias (precomputed)
    o_ref  : (1, g, Cg, tile_n) upsampled output tile
    """
    HW = H * W
    tile_n = o_ref.shape[-1]
    g = groups
    C = x_ref.shape[1]
    Cg = C // g
    Cps = xhr_ref.shape[1]

    xhr = xhr_ref[0]                       # (Cps, tile_n)   lane-dense
    w = w_ref[...]                         # (2g, Cps)

    # 1x1 offset conv, all 2g channels at once (full 8-sublane block), computed once
    # per (batch, tile) instead of per group.  K = Cps is tiny -> VPU broadcast FMAs.
    conv = jnp.zeros((2 * g, tile_n), jnp.float32)
    for c in range(Cps):
        conv = conv + w[:, c:c + 1] * xhr[c:c + 1, :]

    # Absolute sampling coordinates in low-res pixel space (border clamp).  The 0.25
    # offset scale is folded into w; bias + init_pos + base pixel are folded into cb,
    # so the epilogue is a single add + clip.
    coord = cb_ref[...] + conv             # (2g, tile_n)
    xcs = jnp.clip(coord[:g, :], 0.0, float(W - 1))    # (g, tile_n) x coords
    ycs = jnp.clip(coord[g:, :], 0.0, float(H - 1))    # (g, tile_n) y coords

    # Integer lattice indices (hoisted out of the group loop).
    qx = jax.lax.broadcasted_iota(jnp.int32, (W, tile_n), 0).astype(jnp.float32)
    qy = jax.lax.broadcasted_iota(jnp.int32, (H, tile_n), 0).astype(jnp.float32)

    for gi in range(g):                    # g is small & static; unrolled
        # Separable bilinear "tent" factors: numerically identical to the 4-corner
        # one-hot sum (border-clamped corners included).  Two tiny builds + ONE big
        # multiply pass replace the old dense iota/compare/select construction.
        sx = jnp.maximum(0.0, 1.0 - jnp.abs(qx - xcs[gi:gi + 1, :]))   # (W, tile_n)
        sy = jnp.maximum(0.0, 1.0 - jnp.abs(qy - ycs[gi:gi + 1, :]))   # (H, tile_n)
        S = (sy[:, None, :] * sx[None, :, :]).reshape(HW, tile_n)
        S = S.astype(jnp.bfloat16)                      # bf16 -> native MXU path
        src = x_ref[0, gi * Cg:(gi + 1) * Cg, :].astype(jnp.bfloat16)  # (Cg, HW)
        out = jnp.dot(src, S, preferred_element_type=jnp.float32)      # (Cg, tile_n)
        o_ref[0, gi] = out.astype(o_ref.dtype)


# ------------------------- tiling / VMEM sizing --------------------------------

def _vmem_capacity_bytes():
    try:
        cap = getattr(pltpu.get_tpu_info(), "vmem_capacity_bytes", None)
        if cap:
            return int(cap)
    except Exception:
        pass
    return 64 * 1024 * 1024            # v7x floor (v5e/v6e have 128 MiB)


def _pick_tile_n(B, C, Cps, g, HW, sHW, budget_bytes):
    """Largest multiple-of-128 divisor of sHW whose VMEM footprint fits the budget."""
    fixed = 2 * C * HW * 4                               # resident x (double-buffered)
    per_col = (2 * Cps * 4                               # xhr stream (x2 buffers)
               + 2 * 2 * g * 4                           # cb stream
               + 2 * C * 4                               # output stream
               + 8 * 2 * g * 4                           # conv / coord temporaries
               + g * HW * 6)                             # S (f32 + bf16), conservative
    cands = [n for n in range(128, sHW + 1, 128) if sHW % n == 0] or [sHW]
    tile_n = cands[0]
    for n in cands:                                      # cands ascending
        if fixed + per_col * n <= budget_bytes:
            tile_n = n
    # Prefer >= 2 grid steps so both v7x TensorCores get work.
    if B * (sHW // tile_n) < 2:
        smaller = [n for n in cands if n < tile_n]
        if smaller:
            tile_n = smaller[-1]
    return tile_n, fixed + per_col * tile_n


# ------------------------------- wrapper --------------------------------------

def dysample_forward(x, w_off, b_off, *, scale=2, groups=4):
    """DySample forward (style='pl', dyscope=False) via one fused Pallas kernel.

    x     : (B, C, H, W) float32 (NCHW, PyTorch layout)
    w_off : (2*groups, C // scale**2)   nn.Conv2d(C//s^2, 2*groups, 1) weight
    b_off : (2*groups,)                 its bias
    returns (B, C, scale*H, scale*W)
    """
    B, C, H, W = x.shape
    s, g = scale, groups
    assert C % (s * s) == 0 and C % g == 0
    Cg = C // g
    Cps = C // (s * s)
    sH, sW = s * H, s * W
    HW, sHW = H * W, sH * sW

    x = x.astype(jnp.float32)
    w_off = w_off.astype(jnp.float32)
    b_off = b_off.astype(jnp.float32)

    # Source pixels, read once per batch: (B, C, H*W) -- a free reshape of x; per-group
    # rows are sliced in-kernel.
    x_flat = x.reshape(B, C, HW)

    # pixel_shuffle(x, s) flattened to (B, Cps, s^2*H*W) -- the 1x1 conv input.
    # TODO(synk): this duplicates the input bytes in HBM (pixel-shuffled layout);
    #             removing it needs an in-kernel lane interleave of the (2g, s^2, HW)
    #             conv output (strided scatter), left out for robustness.
    x_hr = (x.reshape(B, Cps, s, s, H, W)
              .transpose(0, 1, 4, 2, 5, 3)
              .reshape(B, Cps, sHW))

    # Offset-conv weight with the 0.25 offset scale folded in.
    # Rows 0..g-1 produce x offsets, rows g..2g-1 produce y offsets.
    w_arr = 0.25 * w_off                                            # (2g, Cps)

    # Fold base pixel coordinate + init_pos + 0.25*bias into one constant per
    # (offset row, high-res pixel): cb[0..g-1] = x component, cb[g..2g-1] = y.
    Ig, Jg = jnp.meshgrid(jnp.arange(sH), jnp.arange(sW), indexing="ij")
    sub = (jnp.arange(s, dtype=jnp.float32) - (s - 1) / 2.0) / s    # init_pos values
    cbx = ((Jg // s).astype(jnp.float32) + sub[Jg % s]).reshape(sHW)
    cby = ((Ig // s).astype(jnp.float32) + sub[Ig % s]).reshape(sHW)
    cb = jnp.concatenate([cbx[None, :] + 0.25 * b_off[:g, None],
                          cby[None, :] + 0.25 * b_off[g:, None]], axis=0)  # (2g, sHW)

    vmem_cap = _vmem_capacity_bytes()
    tile_n, footprint = _pick_tile_n(B, C, Cps, g, HW, sHW, vmem_cap // 2)
    num_tiles = sHW // tile_n
    vmem_limit = int(min(vmem_cap, max(2 * footprint, 32 * 1024 * 1024)))

    kernel = functools.partial(_dysample_kernel, H=H, W=W, groups=g)
    out = pl.pallas_call(
        kernel,
        out_shape=jax.ShapeDtypeStruct((B, g, Cg, sHW), jnp.float32),
        grid=(B, num_tiles),
        in_specs=[
            # x: full channel slab per batch; block index constant along the tile axis
            # (the innermost grid axis), so it stays VMEM-resident across tiles.
            pl.BlockSpec((1, C, HW), lambda b, t: (b, 0, 0)),
            pl.BlockSpec((1, Cps, tile_n), lambda b, t: (b, 0, t)),
            pl.BlockSpec((2 * g, Cps), lambda b, t: (0, 0)),
            pl.BlockSpec((2 * g, tile_n), lambda b, t: (0, t)),
        ],
        out_specs=pl.BlockSpec((1, g, Cg, tile_n), lambda b, t: (b, 0, 0, t)),
        compiler_params=pltpu.CompilerParams(
            dimension_semantics=("parallel", "parallel"),
            vmem_limit_bytes=vmem_limit,
        ),
    )(x_flat, x_hr, w_arr, cb)

    return out.reshape(B, C, sH, sW)


# ------------------------- reference (literal op chain) -----------------------

def _init_pos(scale, groups):
    h = (jnp.arange(scale, dtype=jnp.float32) - (scale - 1) / 2.0) / scale
    gy, gx = jnp.meshgrid(h, h, indexing="ij")
    t = jnp.transpose(jnp.stack([gy, gx]), (0, 2, 1))        # .transpose(1, 2)
    t = jnp.tile(t, (1, groups, 1))                          # .repeat(1, groups, 1)
    return t.reshape(1, -1, 1, 1)


def _grid_sample_bilinear_border(inp, grid):
    # inp: (N, Cc, H, W); grid: (N, Ho, Wo, 2) with grid[...,0]=x, [...,1]=y in [-1,1]
    N, Cc, H, W = inp.shape
    ix = ((grid[..., 0] + 1.0) * W - 1.0) / 2.0
    iy = ((grid[..., 1] + 1.0) * H - 1.0) / 2.0
    ix = jnp.clip(ix, 0.0, W - 1.0)
    iy = jnp.clip(iy, 0.0, H - 1.0)
    x0f = jnp.floor(ix)
    y0f = jnp.floor(iy)
    wx = ix - x0f
    wy = iy - y0f
    x0 = x0f.astype(jnp.int32)
    y0 = y0f.astype(jnp.int32)
    x1 = jnp.clip(x0 + 1, 0, W - 1)
    y1 = jnp.clip(y0 + 1, 0, H - 1)

    flat = inp.reshape(N, Cc, H * W)

    def gather(yi, xi):
        idx = (yi * W + xi).reshape(N, 1, -1)
        idx = jnp.broadcast_to(idx, (N, Cc, idx.shape[-1]))
        return jnp.take_along_axis(flat, idx, axis=2).reshape(N, Cc, *yi.shape[1:])

    v00 = gather(y0, x0)
    v01 = gather(y0, x1)
    v10 = gather(y1, x0)
    v11 = gather(y1, x1)
    wx = wx[:, None]
    wy = wy[:, None]
    return (v00 * (1 - wy) * (1 - wx) + v01 * (1 - wy) * wx
            + v10 * wy * (1 - wx) + v11 * wy * wx)


def _ref_dysample(x, w_off, b_off, *, scale=2, groups=4):
    """Pure-JAX transcription of DySample.forward_pl + DySample.sample."""
    B, C, H, W = x.shape
    s, g = scale, groups
    Cps = C // (s * s)
    sH, sW = s * H, s * W

    # x_ = F.pixel_shuffle(x, s)
    x_ = (x.reshape(B, Cps, s, s, H, W)
            .transpose(0, 1, 4, 2, 5, 3)
            .reshape(B, Cps, sH, sW))
    # offset = F.pixel_unshuffle(self.offset(x_), s) * 0.25 + init_pos
    off_hr = jnp.einsum("oc,bchw->bohw", w_off, x_) + b_off[None, :, None, None]
    off_lr = (off_hr.reshape(B, 2 * g, H, s, W, s)
                    .transpose(0, 1, 3, 5, 2, 4)
                    .reshape(B, 2 * g * s * s, H, W))
    offset = off_lr * 0.25 + _init_pos(s, g)

    # sample(x, offset)
    offset = offset.reshape(B, 2, g * s * s, H, W)
    coords_w = jnp.arange(W, dtype=jnp.float32) + 0.5
    coords_h = jnp.arange(H, dtype=jnp.float32) + 0.5
    mw, mh = jnp.meshgrid(coords_w, coords_h, indexing="ij")            # (W, H)
    coords = jnp.transpose(jnp.stack([mw, mh]), (0, 2, 1))[None, :, None]  # (1,2,1,H,W)
    normalizer = jnp.array([W, H], dtype=jnp.float32).reshape(1, 2, 1, 1, 1)
    coords = 2.0 * (coords + offset) / normalizer - 1.0                 # (B,2,g*s*s,H,W)

    cflat = coords.reshape(B, 2 * g * s * s, H, W)
    csh = (cflat.reshape(B, 2 * g, s, s, H, W)
                .transpose(0, 1, 4, 2, 5, 3)
                .reshape(B, 2 * g, sH, sW))
    grid = (csh.reshape(B, 2, g, sH, sW)
               .transpose(0, 2, 3, 4, 1)
               .reshape(B * g, sH, sW, 2))

    sampled = _grid_sample_bilinear_border(x.reshape(B * g, C // g, H, W), grid)
    return sampled.reshape(B, C, sH, sW)


# --------------------------------- main ----------------------------------------

if __name__ == "__main__":
    B, C, H, W = 2, 32, 16, 16
    scale, groups = 2, 4

    key = jax.random.PRNGKey(0)
    kx, kw, kb = jax.random.split(key, 3)
    x = jax.random.normal(kx, (B, C, H, W), jnp.float32)

    Cps = C // (scale * scale)
    # nn.Conv2d(Cps, 2*groups, 1) parameters.  (The module inits weight std=0.001 and
    # bias=0; larger values are used here so the test exercises multi-pixel offsets
    # and the border clamp.)
    w_off = 0.5 * jax.random.normal(kw, (2 * groups, Cps), jnp.float32)
    b_off = 0.1 * jax.random.normal(kb, (2 * groups,), jnp.float32)

    out = jax.block_until_ready(
        dysample_forward(x, w_off, b_off, scale=scale, groups=groups))
    ref = jax.block_until_ready(
        _ref_dysample(x, w_off, b_off, scale=scale, groups=groups))

    assert out.shape == (B, C, scale * H, scale * W)
    # Tolerance: bf16 MXU operands quantize the bilinear weights and source pixels to
    # ~2^-9 relative -> per-output error bound ~ 2^-8 * max|x| ~= 2e-2; the reference's
    # own default-precision einsums add a little more.
    assert jnp.allclose(out, ref, atol=4e-2, rtol=2e-2), (
        f"mismatch vs JAX reference (max abs err "
        f"{float(jnp.max(jnp.abs(out - ref))):.3e})")
    print("KERNEL_OK")
</pallas_src>

<mosaic_0001>
module attributes {stable_mosaic.version = 11 : i64} {
  func.func @_dysample_kernel(%arg0: i32, %arg1: i32, %arg2: memref<1x32x256xf32, #tpu.memory_space<vmem>>, %arg3: memref<1x8x1024xf32, #tpu.memory_space<vmem>>, %arg4: memref<8x8xf32, #tpu.memory_space<vmem>>, %arg5: memref<8x1024xf32, #tpu.memory_space<vmem>>, %arg6: memref<1x4x8x1024xf32, #tpu.memory_space<vmem>>) attributes {dimension_semantics = [#tpu.dimension_semantics<parallel>, #tpu.dimension_semantics<parallel>], iteration_bounds = array<i64: 2, 1>, scalar_prefetch = 0 : i64, scratch_operands = 0 : i64, tpu.core_type = #tpu.core_type<tc>, window_params = [{transform_indices = @transform_0, window_bounds = array<i64: 1, 32, 256>}, {transform_indices = @transform_1, window_bounds = array<i64: 1, 8, 1024>}, {pipeline_mode = #tpu.pipeline_mode<synchronous>, transform_indices = @transform_2, window_bounds = array<i64: 8, 8>}, {transform_indices = @transform_3, window_bounds = array<i64: 8, 1024>}, {transform_indices = @transform_4, window_bounds = array<i64: 1, 4, 8, 1024>}]} {
    %c0 = arith.constant 0 : index
    %c0_0 = arith.constant 0 : index
    %c0_1 = arith.constant 0 : index
    %0 = vector.load %arg3[%c0, %c0_0, %c0_1] : memref<1x8x1024xf32, #tpu.memory_space<vmem>>, vector<1x8x1024xf32>
    %1 = vector.shape_cast %0 : vector<1x8x1024xf32> to vector<8x1024xf32>
    %c0_2 = arith.constant 0 : index
    %c0_3 = arith.constant 0 : index
    %2 = vector.load %arg4[%c0_2, %c0_3] : memref<8x8xf32, #tpu.memory_space<vmem>>, vector<8x8xf32>
    %cst = arith.constant 0.000000e+00 : f32
    %3 = vector.broadcast %cst : f32 to vector<8x1024xf32>
    %4 = vector.extract_strided_slice %2 {offsets = [0, 0], sizes = [8, 1], strides = [1, 1]} : vector<8x8xf32> to vector<8x1xf32>
    %5 = vector.extract_strided_slice %1 {offsets = [0, 0], sizes = [1, 1024], strides = [1, 1]} : vector<8x1024xf32> to vector<1x1024xf32>
    %6 = vector.broadcast %4 : vector<8x1xf32> to vector<8x1024xf32>
    %7 = vector.broadcast %5 : vector<1x1024xf32> to vector<8x1024xf32>
    %8 = arith.mulf %6, %7 : vector<8x1024xf32>
    %9 = arith.addf %3, %8 : vector<8x1024xf32>
    %10 = vector.extract_strided_slice %2 {offsets = [0, 1], sizes = [8, 1], strides = [1, 1]} : vector<8x8xf32> to vector<8x1xf32>
    %11 = vector.extract_strided_slice %1 {offsets = [1, 0], sizes = [1, 1024], strides = [1, 1]} : vector<8x1024xf32> to vector<1x1024xf32>
    %12 = vector.broadcast %10 : vector<8x1xf32> to vector<8x1024xf32>
    %13 = vector.broadcast %11 : vector<1x1024xf32> to vector<8x1024xf32>
    %14 = arith.mulf %12, %13 : vector<8x1024xf32>
    %15 = arith.addf %9, %14 : vector<8x1024xf32>
    %16 = vector.extract_strided_slice %2 {offsets = [0, 2], sizes = [8, 1], strides = [1, 1]} : vector<8x8xf32> to vector<8x1xf32>
    %17 = vector.extract_strided_slice %1 {offsets = [2, 0], sizes = [1, 1024], strides = [1, 1]} : vector<8x1024xf32> to vector<1x1024xf32>
    %18 = vector.broadcast %16 : vector<8x1xf32> to vector<8x1024xf32>
    %19 = vector.broadcast %17 : vector<1x1024xf32> to vector<8x1024xf32>
    %20 = arith.mulf %18, %19 : vector<8x1024xf32>
    %21 = arith.addf %15, %20 : vector<8x1024xf32>
    %22 = vector.extract_strided_slice %2 {offsets = [0, 3], sizes = [8, 1], strides = [1, 1]} : vector<8x8xf32> to vector<8x1xf32>
    %23 = vector.extract_strided_slice %1 {offsets = [3, 0], sizes = [1, 1024], strides = [1, 1]} : vector<8x1024xf32> to vector<1x1024xf32>
    %24 = vector.broadcast %22 : vector<8x1xf32> to vector<8x1024xf32>
    %25 = vector.broadcast %23 : vector<1x1024xf32> to vector<8x1024xf32>
    %26 = arith.mulf %24, %25 : vector<8x1024xf32>
    %27 = arith.addf %21, %26 : vector<8x1024xf32>
    %28 = vector.extract_strided_slice %2 {offsets = [0, 4], sizes = [8, 1], strides = [1, 1]} : vector<8x8xf32> to vector<8x1xf32>
    %29 = vector.extract_strided_slice %1 {offsets = [4, 0], sizes = [1, 1024], strides = [1, 1]} : vector<8x1024xf32> to vector<1x1024xf32>
    %30 = vector.broadcast %28 : vector<8x1xf32> to vector<8x1024xf32>
    %31 = vector.broadcast %29 : vector<1x1024xf32> to vector<8x1024xf32>
    %32 = arith.mulf %30, %31 : vector<8x1024xf32>
    %33 = arith.addf %27, %32 : vector<8x1024xf32>
    %34 = vector.extract_strided_slice %2 {offsets = [0, 5], sizes = [8, 1], strides = [1, 1]} : vector<8x8xf32> to vector<8x1xf32>
    %35 = vector.extract_strided_slice %1 {offsets = [5, 0], sizes = [1, 1024], strides = [1, 1]} : vector<8x1024xf32> to vector<1x1024xf32>
    %36 = vector.broadcast %34 : vector<8x1xf32> to vector<8x1024xf32>
    %37 = vector.broadcast %35 : vector<1x1024xf32> to vector<8x1024xf32>
    %38 = arith.mulf %36, %37 : vector<8x1024xf32>
    %39 = arith.addf %33, %38 : vector<8x1024xf32>
    %40 = vector.extract_strided_slice %2 {offsets = [0, 6], sizes = [8, 1], strides = [1, 1]} : vector<8x8xf32> to vector<8x1xf32>
    %41 = vector.extract_strided_slice %1 {offsets = [6, 0], sizes = [1, 1024], strides = [1, 1]} : vector<8x1024xf32> to vector<1x1024xf32>
    %42 = vector.broadcast %40 : vector<8x1xf32> to vector<8x1024xf32>
    %43 = vector.broadcast %41 : vector<1x1024xf32> to vector<8x1024xf32>
    %44 = arith.mulf %42, %43 : vector<8x1024xf32>
    %45 = arith.addf %39, %44 : vector<8x1024xf32>
    %46 = vector.extract_strided_slice %2 {offsets = [0, 7], sizes = [8, 1], strides = [1, 1]} : vector<8x8xf32> to vector<8x1xf32>
    %47 = vector.extract_strided_slice %1 {offsets = [7, 0], sizes = [1, 1024], strides = [1, 1]} : vector<8x1024xf32> to vector<1x1024xf32>
    %48 = vector.broadcast %46 : vector<8x1xf32> to vector<8x1024xf32>
    %49 = vector.broadcast %47 : vector<1x1024xf32> to vector<8x1024xf32>
    %50 = arith.mulf %48, %49 : vector<8x1024xf32>
    %51 = arith.addf %45, %50 : vector<8x1024xf32>
    %c0_4 = arith.constant 0 : index
    %c0_5 = arith.constant 0 : index
    %52 = vector.load %arg5[%c0_4, %c0_5] : memref<8x1024xf32, #tpu.memory_space<vmem>>, vector<8x1024xf32>
    %53 = arith.addf %52, %51 : vector<8x1024xf32>
    %54 = vector.extract_strided_slice %53 {offsets = [0, 0], sizes = [4, 1024], strides = [1, 1]} : vector<8x1024xf32> to vector<4x1024xf32>
    %cst_6 = arith.constant 0.000000e+00 : f32
    %cst_7 = arith.constant 1.500000e+01 : f32
    %55 = vector.broadcast %cst_6 : f32 to vector<4x1024xf32>
    %56 = arith.maximumf %55, %54 : vector<4x1024xf32>
    %57 = vector.broadcast %cst_7 : f32 to vector<4x1024xf32>
    %58 = arith.minimumf %57, %56 : vector<4x1024xf32>
    %59 = vector.extract_strided_slice %53 {offsets = [4, 0], sizes = [4, 1024], strides = [1, 1]} : vector<8x1024xf32> to vector<4x1024xf32>
    %cst_8 = arith.constant 0.000000e+00 : f32
    %cst_9 = arith.constant 1.500000e+01 : f32
    %60 = vector.broadcast %cst_8 : f32 to vector<4x1024xf32>
    %61 = arith.maximumf %60, %59 : vector<4x1024xf32>
    %62 = vector.broadcast %cst_9 : f32 to vector<4x1024xf32>
    %63 = arith.minimumf %62, %61 : vector<4x1024xf32>
    %64 = tpu.iota {dimensions = array<i32: 0>} : vector<16x1024xi32>
    %65 = arith.sitofp %64 : vector<16x1024xi32> to vector<16x1024xf32>
    %66 = tpu.iota {dimensions = array<i32: 0>} : vector<16x1024xi32>
    %67 = arith.sitofp %66 : vector<16x1024xi32> to vector<16x1024xf32>
    %68 = vector.extract_strided_slice %58 {offsets = [0, 0], sizes = [1, 1024], strides = [1, 1]} : vector<4x1024xf32> to vector<1x1024xf32>
    %69 = vector.broadcast %68 : vector<1x1024xf32> to vector<16x1024xf32>
    %70 = arith.subf %65, %69 : vector<16x1024xf32>
    %71 = math.absf %70 : vector<16x1024xf32>
    %cst_10 = arith.constant 1.000000e+00 : f32
    %72 = vector.broadcast %cst_10 : f32 to vector<16x1024xf32>
    %73 = arith.subf %72, %71 : vector<16x1024xf32>
    %cst_11 = arith.constant 0.000000e+00 : f32
    %74 = vector.broadcast %cst_11 : f32 to vector<16x1024xf32>
    %75 = arith.maximumf %74, %73 : vector<16x1024xf32>
    %76 = vector.extract_strided_slice %63 {offsets = [0, 0], sizes = [1, 1024], strides = [1, 1]} : vector<4x1024xf32> to vector<1x1024xf32>
    %77 = vector.broadcast %76 : vector<1x1024xf32> to vector<16x1024xf32>
    %78 = arith.subf %67, %77 : vector<16x1024xf32>
    %79 = math.absf %78 : vector<16x1024xf32>
    %cst_12 = arith.constant 1.000000e+00 : f32
    %80 = vector.broadcast %cst_12 : f32 to vector<16x1024xf32>
    %81 = arith.subf %80, %79 : vector<16x1024xf32>
    %cst_13 = arith.constant 0.000000e+00 : f32
    %82 = vector.broadcast %cst_13 : f32 to vector<16x1024xf32>
    %83 = arith.maximumf %82, %81 : vector<16x1024xf32>
    %84 = vector.shape_cast %83 : vector<16x1024xf32> to vector<16x1x1024xf32>
    %85 = vector.shape_cast %75 : vector<16x1024xf32> to vector<1x16x1024xf32>
    %86 = vector.broadcast %84 : vector<16x1x1024xf32> to vector<16x16x1024xf32>
    %87 = vector.broadcast %85 : vector<1x16x1024xf32> to vector<16x16x1024xf32>
    %88 = arith.mulf %86, %87 : vector<16x16x1024xf32>
    %89 = vector.shape_cast %88 : vector<16x16x1024xf32> to vector<256x1024xf32>
    %90 = arith.truncf %89 : vector<256x1024xf32> to vector<256x1024xbf16>
    %c0_14 = arith.constant 0 : index
    %c0_15 = arith.constant 0 : index
    %c0_16 = arith.constant 0 : index
    %91 = vector.load %arg2[%c0_14, %c0_15, %c0_16] : memref<1x32x256xf32, #tpu.memory_space<vmem>>, vector<1x8x256xf32>
    %92 = vector.shape_cast %91 : vector<1x8x256xf32> to vector<8x256xf32>
    %93 = arith.truncf %92 : vector<8x256xf32> to vector<8x256xbf16>
    %cst_17 = arith.constant dense<0.000000e+00> : vector<8x1024xf32>
    %94 = tpu.matmul %93, %90, %cst_17 {dimension_numbers = #tpu.dot_dimension_numbers<[1], [0], [0], [1], [0, 0, 1, 1], [], []>} : vector<8x256xbf16>, vector<256x1024xbf16>, vector<8x1024xf32> -> vector<8x1024xf32>
    %c0_18 = arith.constant 0 : index
    %c0_19 = arith.constant 0 : index
    %c0_20 = arith.constant 0 : index
    %c0_21 = arith.constant 0 : index
    %95 = vector.load %arg6[%c0_18, %c0_19, %c0_20, %c0_21] : memref<1x4x8x1024xf32, #tpu.memory_space<vmem>>, vector<1x1x8x1024xf32>
    %96 = vector.shape_cast %95 : vector<1x1x8x1024xf32> to vector<8x1024xf32>
    %97 = vector.shape_cast %94 : vector<8x1024xf32> to vector<1x1x8x1024xf32>
    tpu.vector_store %arg6[%c0_18, %c0_19, %c0_20, %c0_21], %97 {strides = array<i32>} : memref<1x4x8x1024xf32, #tpu.memory_space<vmem>>, vector<1x1x8x1024xf32>,
    %98 = vector.extract_strided_slice %58 {offsets = [1, 0], sizes = [1, 1024], strides = [1, 1]} : vector<4x1024xf32> to vector<1x1024xf32>
    %99 = vector.broadcast %98 : vector<1x1024xf32> to vector<16x1024xf32>
    %100 = arith.subf %65, %99 : vector<16x1024xf32>
    %101 = math.absf %100 : vector<16x1024xf32>
    %cst_22 = arith.constant 1.000000e+00 : f32
    %102 = vector.broadcast %cst_22 : f32 to vector<16x1024xf32>
    %103 = arith.subf %102, %101 : vector<16x1024xf32>
    %cst_23 = arith.constant 0.000000e+00 : f32
    %104 = vector.broadcast %cst_23 : f32 to vector<16x1024xf32>
    %105 = arith.maximumf %104, %103 : vector<16x1024xf32>
    %106 = vector.extract_strided_slice %63 {offsets = [1, 0], sizes = [1, 1024], strides = [1, 1]} : vector<4x1024xf32> to vector<1x1024xf32>
    %107 = vector.broadcast %106 : vector<1x1024xf32> to vector<16x1024xf32>
    %108 = arith.subf %67, %107 : vector<16x1024xf32>
    %109 = math.absf %108 : vector<16x1024xf32>
    %cst_24 = arith.constant 1.000000e+00 : f32
    %110 = vector.broadcast %cst_24 : f32 to vector<16x1024xf32>
    %111 = arith.subf %110, %109 : vector<16x1024xf32>
    %cst_25 = arith.constant 0.000000e+00 : f32
    %112 = vector.broadcast %cst_25 : f32 to vector<16x1024xf32>
    %113 = arith.maximumf %112, %111 : vector<16x1024xf32>
    %114 = vector.shape_cast %113 : vector<16x1024xf32> to vector<16x1x1024xf32>
    %115 = vector.shape_cast %105 : vector<16x1024xf32> to vector<1x16x1024xf32>
    %116 = vector.broadcast %114 : vector<16x1x1024xf32> to vector<16x16x1024xf32>
    %117 = vector.broadcast %115 : vector<1x16x1024xf32> to vector<16x16x1024xf32>
    %118 = arith.mulf %116, %117 : vector<16x16x1024xf32>
    %119 = vector.shape_cast %118 : vector<16x16x1024xf32> to vector<256x1024xf32>
    %120 = arith.truncf %119 : vector<256x1024xf32> to vector<256x1024xbf16>
    %c0_26 = arith.constant 0 : index
    %c8 = arith.constant 8 : index
    %c0_27 = arith.constant 0 : index
    %121 = vector.load %arg2[%c0_26, %c8, %c0_27] : memref<1x32x256xf32, #tpu.memory_space<vmem>>, vector<1x8x256xf32>
    %122 = vector.shape_cast %121 : vector<1x8x256xf32> to vector<8x256xf32>
    %123 = arith.truncf %122 : vector<8x256xf32> to vector<8x256xbf16>
    %cst_28 = arith.constant dense<0.000000e+00> : vector<8x1024xf32>
    %124 = tpu.matmul %123, %120, %cst_28 {dimension_numbers = #tpu.dot_dimension_numbers<[1], [0], [0], [1], [0, 0, 1, 1], [], []>} : vector<8x256xbf16>, vector<256x1024xbf16>, vector<8x1024xf32> -> vector<8x1024xf32>
    %c0_29 = arith.constant 0 : index
    %c1 = arith.constant 1 : index
    %c0_30 = arith.constant 0 : index
    %c0_31 = arith.constant 0 : index
    %125 = vector.load %arg6[%c0_29, %c1, %c0_30, %c0_31] : memref<1x4x8x1024xf32, #tpu.memory_space<vmem>>, vector<1x1x8x1024xf32>
    %126 = vector.shape_cast %125 : vector<1x1x8x1024xf32> to vector<8x1024xf32>
    %127 = vector.shape_cast %124 : vector<8x1024xf32> to vector<1x1x8x1024xf32>
    tpu.vector_store %arg6[%c0_29, %c1, %c0_30, %c0_31], %127 {strides = array<i32>} : memref<1x4x8x1024xf32, #tpu.memory_space<vmem>>, vector<1x1x8x1024xf32>,
    %128 = vector.extract_strided_slice %58 {offsets = [2, 0], sizes = [1, 1024], strides = [1, 1]} : vector<4x1024xf32> to vector<1x1024xf32>
    %129 = vector.broadcast %128 : vector<1x1024xf32> to vector<16x1024xf32>
    %130 = arith.subf %65, %129 : vector<16x1024xf32>
    %131 = math.absf %130 : vector<16x1024xf32>
    %cst_32 = arith.constant 1.000000e+00 : f32
    %132 = vector.broadcast %cst_32 : f32 to vector<16x1024xf32>
    %133 = arith.subf %132, %131 : vector<16x1024xf32>
    %cst_33 = arith.constant 0.000000e+00 : f32
    %134 = vector.broadcast %cst_33 : f32 to vector<16x1024xf32>
    %135 = arith.maximumf %134, %133 : vector<16x1024xf32>
    %136 = vector.extract_strided_slice %63 {offsets = [2, 0], sizes = [1, 1024], strides = [1, 1]} : vector<4x1024xf32> to vector<1x1024xf32>
    %137 = vector.broadcast %136 : vector<1x1024xf32> to vector<16x1024xf32>
    %138 = arith.subf %67, %137 : vector<16x1024xf32>
    %139 = math.absf %138 : vector<16x1024xf32>
    %cst_34 = arith.constant 1.000000e+00 : f32
    %140 = vector.broadcast %cst_34 : f32 to vector<16x1024xf32>
    %141 = arith.subf %140, %139 : vector<16x1024xf32>
    %cst_35 = arith.constant 0.000000e+00 : f32
    %142 = vector.broadcast %cst_35 : f32 to vector<16x1024xf32>
    %143 = arith.maximumf %142, %141 : vector<16x1024xf32>
    %144 = vector.shape_cast %143 : vector<16x1024xf32> to vector<16x1x1024xf32>
    %145 = vector.shape_cast %135 : vector<16x1024xf32> to vector<1x16x1024xf32>
    %146 = vector.broadcast %144 : vector<16x1x1024xf32> to vector<16x16x1024xf32>
    %147 = vector.broadcast %145 : vector<1x16x1024xf32> to vector<16x16x1024xf32>
    %148 = arith.mulf %146, %147 : vector<16x16x1024xf32>
    %149 = vector.shape_cast %148 : vector<16x16x1024xf32> to vector<256x1024xf32>
    %150 = arith.truncf %149 : vector<256x1024xf32> to vector<256x1024xbf16>
    %c0_36 = arith.constant 0 : index
    %c16 = arith.constant 16 : index
    %c0_37 = arith.constant 0 : index
    %151 = vector.load %arg2[%c0_36, %c16, %c0_37] : memref<1x32x256xf32, #tpu.memory_space<vmem>>, vector<1x8x256xf32>
    %152 = vector.shape_cast %151 : vector<1x8x256xf32> to vector<8x256xf32>
    %153 = arith.truncf %152 : vector<8x256xf32> to vector<8x256xbf16>
    %cst_38 = arith.constant dense<0.000000e+00> : vector<8x1024xf32>
    %154 = tpu.matmul %153, %150, %cst_38 {dimension_numbers = #tpu.dot_dimension_numbers<[1], [0], [0], [1], [0, 0, 1, 1], [], []>} : vector<8x256xbf16>, vector<256x1024xbf16>, vector<8x1024xf32> -> vector<8x1024xf32>
    %c0_39 = arith.constant 0 : index
    %c2 = arith.constant 2 : index
    %c0_40 = arith.constant 0 : index
    %c0_41 = arith.constant 0 : index
    %155 = vector.load %arg6[%c0_39, %c2, %c0_40, %c0_41] : memref<1x4x8x1024xf32, #tpu.memory_space<vmem>>, vector<1x1x8x1024xf32>
    %156 = vector.shape_cast %155 : vector<1x1x8x1024xf32> to vector<8x1024xf32>
    %157 = vector.shape_cast %154 : vector<8x1024xf32> to vector<1x1x8x1024xf32>
    tpu.vector_store %arg6[%c0_39, %c2, %c0_40, %c0_41], %157 {strides = array<i32>} : memref<1x4x8x1024xf32, #tpu.memory_space<vmem>>, vector<1x1x8x1024xf32>,
    %158 = vector.extract_strided_slice %58 {offsets = [3, 0], sizes = [1, 1024], strides = [1, 1]} : vector<4x1024xf32> to vector<1x1024xf32>
    %159 = vector.broadcast %158 : vector<1x1024xf32> to vector<16x1024xf32>
    %160 = arith.subf %65, %159 : vector<16x1024xf32>
    %161 = math.absf %160 : vector<16x1024xf32>
    %cst_42 = arith.constant 1.000000e+00 : f32
    %162 = vector.broadcast %cst_42 : f32 to vector<16x1024xf32>
    %163 = arith.subf %162, %161 : vector<16x1024xf32>
    %cst_43 = arith.constant 0.000000e+00 : f32
    %164 = vector.broadcast %cst_43 : f32 to vector<16x1024xf32>
    %165 = arith.maximumf %164, %163 : vector<16x1024xf32>
    %166 = vector.extract_strided_slice %63 {offsets = [3, 0], sizes = [1, 1024], strides = [1, 1]} : vector<4x1024xf32> to vector<1x1024xf32>
    %167 = vector.broadcast %166 : vector<1x1024xf32> to vector<16x1024xf32>
    %168 = arith.subf %67, %167 : vector<16x1024xf32>
    %169 = math.absf %168 : vector<16x1024xf32>
    %cst_44 = arith.constant 1.000000e+00 : f32
    %170 = vector.broadcast %cst_44 : f32 to vector<16x1024xf32>
    %171 = arith.subf %170, %169 : vector<16x1024xf32>
    %cst_45 = arith.constant 0.000000e+00 : f32
    %172 = vector.broadcast %cst_45 : f32 to vector<16x1024xf32>
    %173 = arith.maximumf %172, %171 : vector<16x1024xf32>
    %174 = vector.shape_cast %173 : vector<16x1024xf32> to vector<16x1x1024xf32>
    %175 = vector.shape_cast %165 : vector<16x1024xf32> to vector<1x16x1024xf32>
    %176 = vector.broadcast %174 : vector<16x1x1024xf32> to vector<16x16x1024xf32>
    %177 = vector.broadcast %175 : vector<1x16x1024xf32> to vector<16x16x1024xf32>
    %178 = arith.mulf %176, %177 : vector<16x16x1024xf32>
    %179 = vector.shape_cast %178 : vector<16x16x1024xf32> to vector<256x1024xf32>
    %180 = arith.truncf %179 : vector<256x1024xf32> to vector<256x1024xbf16>
    %c0_46 = arith.constant 0 : index
    %c24 = arith.constant 24 : index
    %c0_47 = arith.constant 0 : index
    %181 = vector.load %arg2[%c0_46, %c24, %c0_47] : memref<1x32x256xf32, #tpu.memory_space<vmem>>, vector<1x8x256xf32>
    %182 = vector.shape_cast %181 : vector<1x8x256xf32> to vector<8x256xf32>
    %183 = arith.truncf %182 : vector<8x256xf32> to vector<8x256xbf16>
    %cst_48 = arith.constant dense<0.000000e+00> : vector<8x1024xf32>
    %184 = tpu.matmul %183, %180, %cst_48 {dimension_numbers = #tpu.dot_dimension_numbers<[1], [0], [0], [1], [0, 0, 1, 1], [], []>} : vector<8x256xbf16>, vector<256x1024xbf16>, vector<8x1024xf32> -> vector<8x1024xf32>
    %c0_49 = arith.constant 0 : index
    %c3 = arith.constant 3 : index
    %c0_50 = arith.constant 0 : index
    %c0_51 = arith.constant 0 : index
    %185 = vector.load %arg6[%c0_49, %c3, %c0_50, %c0_51] : memref<1x4x8x1024xf32, #tpu.memory_space<vmem>>, vector<1x1x8x1024xf32>
    %186 = vector.shape_cast %185 : vector<1x1x8x1024xf32> to vector<8x1024xf32>
    %187 = vector.shape_cast %184 : vector<8x1024xf32> to vector<1x1x8x1024xf32>
    tpu.vector_store %arg6[%c0_49, %c3, %c0_50, %c0_51], %187 {strides = array<i32>} : memref<1x4x8x1024xf32, #tpu.memory_space<vmem>>, vector<1x1x8x1024xf32>,
    return
  }
  func.func @transform_0(%arg0: i32, %arg1: i32) -> (i32, i32, i32) {
    %c0_i32 = arith.constant 0 : i32
    %c0_i32_0 = arith.constant 0 : i32
    %c0_i32_1 = arith.constant 0 : i32
    return %arg0, %c0_i32, %c0_i32_0 : i32, i32, i32
  }
  func.func @transform_1(%arg0: i32, %arg1: i32) -> (i32, i32, i32) {
    %c0_i32 = arith.constant 0 : i32
    %c0_i32_0 = arith.constant 0 : i32
    return %arg0, %c0_i32, %arg1 : i32, i32, i32
  }
  func.func @transform_2(%arg0: i32, %arg1: i32) -> (i32, i32) {
    %c0_i32 = arith.constant 0 : i32
    %c0_i32_0 = arith.constant 0 : i32
    %c0_i32_1 = arith.constant 0 : i32
    return %c0_i32, %c0_i32_0 : i32, i32
  }
  func.func @transform_3(%arg0: i32, %arg1: i32) -> (i32, i32) {
    %c0_i32 = arith.constant 0 : i32
    %c0_i32_0 = arith.constant 0 : i32
    return %c0_i32, %arg1 : i32, i32
  }
  func.func @transform_4(%arg0: i32, %arg1: i32) -> (i32, i32, i32, i32) {
    %c0_i32 = arith.constant 0 : i32
    %c0_i32_0 = arith.constant 0 : i32
    %c0_i32_1 = arith.constant 0 : i32
    return %arg0, %c0_i32, %c0_i32_0, %arg1 : i32, i32, i32, i32
  }
}

</mosaic_0001>

<bundles_post_ra>
// kernel: tpu_custom_call.1
= control target key start
LH: loop header
LB: loop body
LE: loop exit
PB: predicated region body
PF: predicated region fallthrough
CT: control target
= control target key end

     0   :  { %s9603_s0 = inlined_call_operand.hbm [shape: f32[2,32,256], index: 0, kind: input, shape index: {}]   ;;  %s9604_s1 = inlined_call_operand.hbm [shape: f32[2,8,1024], index: 1, kind: input, shape index: {}]   ;;  %s9605_s2 = inlined_call_operand.hbm [shape: f32[8,8], index: 2, kind: input, shape index: {}]   ;;  %s9606_s3 = inlined_call_operand.hbm [shape: f32[8,1024], index: 3, kind: input, shape index: {}]   ;;  %s9607_s4 = inlined_call_operand.hbm [shape: f32[2,4,8,1024], index: 4, kind: output, shape index: {}]  }
   0x1   :  { %9717 = sst [smem:[#allocation116_spill]] %s9603_s0 }
   0x2   :  { %9718 = sst [smem:[#allocation117_spill]] %s9605_s2 }
   0x3   :  { %9719 = sst [smem:[#allocation118_spill]] %s9606_s3 }
   0x4   :  { %9 = vsyncpa [#allocation3], 0 }
   0x5   :  { %11 = vsyncpa [#allocation3 + $0x1], 0 }
   0x6   :  { %12 = vsyncpa [#allocation6], 0 }
   0x7   :  { %14 = vsyncpa [#allocation6 + $0x1], 0 }
   0x8   :  { %15 = vsyncpa [#allocation9], 0 }
   0x9   :  { %16 = vsyncpa [#allocation4], 0 }
   0xa   :  { %18 = vsyncpa [#allocation4 + $0x1], 0  ;;  %s5813_s15 = smov 0   ;;  %s5815_s16 = smov 0  }
   0xb   :  { %s5817_s17 = smov 0   ;;  %s5819_s18 = smov 0  }
   0xc   :  { %s5821_s19 = smov 0   ;;  %s5823_s20 = smov 0  }
   0xd LB: > { %9720 = sst [smem:[#allocation16_spill]] %s5752_s15  ;;  %s5844_s21 = sadd.s32 4294967295, %s5772_s20   ;;  %s5772_s20 = sphi %s5823_s20, %s24_s20   ;;  %s5768_s19 = sphi %s5821_s19, %s10068_s19   ;;  %s5764_s18 = sphi %s5819_s18, %s10067_s18   ;;  %s5760_s17 = sphi %s5817_s17, %s10066_s17   ;;  %s5756_s16 = sphi %s5815_s16, %s10065_s16   ;;  %s5752_s15 = sphi %s5813_s15, %s10064_s15  }
   0xe   : > { %s5400_s22 = sadd.s32 4294967294, %s5772_s20   ;;  %s43_s23 = sadd.s32 1, %s5760_s17 }
   0xf   : > { %p50_p0 = scmp.ne.s32.totalorder %s5760_s17, %s5756_s16  ;;  %p51_p1 = scmp.eq.s32.totalorder %s5772_s20, 0 }
  0x10   : > { %p56_p2 = scmp.ne.s32.totalorder %s5756_s16, %s5752_s15  ;;  %p57_p3 = scmp.eq.s32.totalorder %s5844_s21, 0 }
  0x11   : > { %p157_p4 = scmp.eq.s32.totalorder %s5844_s21, 1  ;;  %p5855_p5 = por %p51_p1, %p50_p0 }
  0x12   : > { %p163_p6 = scmp.eq.s32.totalorder %s5400_s22, 1  ;;  %p5861_p7 = por %p57_p3, %p56_p2 }
  0x13   : > { %p5865_p8 = por %p157_p4, %p50_p0  ;;  %p5401_p10 = scmp.ge.s32.totalorder %s5772_s20, 1 }
  0x14   : > { %p5869_p9 = por %p163_p6, %p56_p2  ;;  %p170_p11 = scmp.lt.s32.totalorder %s5772_s20, 3 }
  0x15   : > { %s9726_s2 = sld [smem:[#allocation117_spill]]  ;;  %s5774_s6 = smov [#allocation7]  }
  0x16   : > { %s9724_s27 = scalar_select %p5869_p9, 1, 0 }
  0x17   : > { %p5878_p12 = pnand %p5401_p10, %p170_p11  ;;  %s184_s7 = sshll.u32 %s5774_s6, 4  ;;  %s185_s7 = int_to_ptr.vmem [resolvable:$true] %s184_s7 }
  0x18   : > { %9725 = sst [smem:[#allocation17_spill]] %s9724_s27  ;;  %p5404_p13 = scmp.ge.s32.totalorder %s5772_s20, 2 }
  0x19   : > { %p5463_p0 = pneg %p5878_p12  ;;  %p5483_p1 = scmp.lt.s32.totalorder %s5772_s20, 2 }
  0x1a   : > { %s9728_s3 = sld [smem:[#allocation118_spill]]  ;;  %s5775_s12 = smov [#allocation8]  }
  0x1b   : > { %s182_s30 = sshll.u32 %s9726_s2, 4  ;;  %p5464_p2 = pnand %p5463_p0, %p57_p3  ;;  %s183_s30 = int_to_ptr.hbm [resolvable:$true] %s182_s30 }
  0x1c   : > { %p5893_p4 = pnand %p5483_p1, %p5855_p5  ;;  %s199_s13 = sshll.u32 %s5775_s12, 4  ;;  %s200_s13 = int_to_ptr.vmem [resolvable:$true] %s199_s13 }
  0x1d   : > { %5466 = dma.hbm_to_vmem [thread:$0]  (!%p5464_p2), %s183_s30, 128, %s185_s7, [#allocation6]  }
  0x1e   : > { %s210_s14 = sand.u32 1, %s5760_s17   ;;  %s36_s22 = sadd.s32 1, %s5768_s19 }
  0x1f   : > { %s5405_s28 = sshll.u32 %s210_s14, 6  ;;  %p38_p6 = scmp.ge.s32.totalorder %s36_s22, 2 }
  0x20   : > { %s197_s10 = sshll.u32 %s9728_s3, 4  ;;  %s5446_s29 = sshll.u32 %s5768_s19, 6  ;;  %s198_s10 = int_to_ptr.hbm [resolvable:$true] %s197_s10 }
  0x21   : > { %5469 = dma.hbm_to_vmem [thread:$0]  (!%p5464_p2), %s198_s10, 1024, %s200_s13, [#allocation9]  }
  0x22   : > { %s214_s24 = scalar_lea.vmem [#allocation2], %s5405_s28  ;;  %s10070_s22 = smov (%p38_p6, %s36_s22), 0 }
  0x23   : > { %s222_s6 = sshll.u32 %s214_s24, 4  ;;  %9730 = sst [smem:[#allocation18_spill]] %s10070_s22  ;;  %s223_s6 = int_to_ptr.vmem [resolvable:$true] %s222_s6 }
  0x24   : > { %s9731_s0 = sld [smem:[#allocation116_spill]]  ;;  %s40_s7 = ssub.s32 %s5768_s19, %s10070_s22 }
  0x25   : > { %p41_p5 = scmp.eq.s32.totalorder %s40_s7, 0  ;;  %s211_s13 = scalar_lea.sflag [#allocation3], %s210_s14 }
  0x26   : > { %s5776_s2 = smov 256   ;;  %s5777_s3 = smov 16  }
  0x27   : > { %s5910_s10 = scalar_select %p41_p5, %s5760_s17, %s43_s23  }
  0x28   : > { %s232_s24 = sand.u32 1, %s5772_s20   ;;  %s243_s8 = scalar_lea.hbm %s9604_s1, %s5446_s29 }
  0x29   : > { %s245_s9 = sshll.u32 %s243_s8, 4  ;;  %s246_s9 = int_to_ptr.hbm [resolvable:$true] %s245_s9 }
  0x2a   : > { %s219_s30 = scalar_lea.hbm %s9731_s0, %s5446_s29  ;;  %s236_s0 = scalar_lea.vmem [#allocation5], %s5405_s28 }
  0x2b   : > { %s220_s12 = sshll.u32 %s219_s30, 4  ;;  %s247_s22 = sshll.u32 %s236_s0, 4  ;;  %s221_s12 = int_to_ptr.hbm [resolvable:$true] %s220_s12  ;;  %s248_s22 = int_to_ptr.vmem [resolvable:$true] %s247_s22 }
  0x2c   : > { %5473 = dma.hbm_to_vmem [thread:$0]  (!%p5893_p4), %s221_s12, 1024, %s223_s6, %s211_s13, %s5776_s2, %s5776_s2, %s5777_s3  }
  0x2d   : > { %s233_s30 = scalar_lea.sflag [#allocation6], %s232_s24  ;;  %256 = sbr.rel (%p5878_p12) target bundleno = 1194 (0x4aa), region = 36 }
  0x2e   : > { %5476 = dma.hbm_to_vmem [thread:$0]  (!%p5893_p4), %s246_s9, 1024, %s248_s22, %s233_s30  }
  0x32   : > { %s5923_s23 = sand.u32 1, %s5756_s16  }
  0x33   : > { %s5412_s2 = sshll.u32 %s5923_s23, 6  ;;  %s259_s3 = scalar_lea.sflag [#allocation3], %s5923_s23 }
  0x34   : > { %s5927_s15 = scalar_lea.vmem [#allocation2], %s5412_s2 }
  0x35   : > { %5731 = dma.done.wait (%p5861_p7), %s259_s3, 1024  }
  0x36   : > { %5733 = vsyncadd (%p5861_p7), %s259_s3, 4294966272  ;;  %s268_s0 = sand.u32 1, %s5844_s21   ;;  %s5934_s5 = scalar_lea.vmem [#allocation5], %s5412_s2 }
  0x37   : > { %s269_s27 = scalar_lea.sflag [#allocation6], %s268_s0 }
  0x38   : > { %5735 = dma.done.wait (%p5861_p7), %s269_s27, 1024  }
  0x39   : > { %5737 = vsyncadd (%p5861_p7), %s269_s27, 4294966272 }
  0x3a   : > { %5739 = dma.done.wait (%p57_p3), [#allocation6], 128  }
  0x3b   : > { %5741 = vsyncadd (%p57_p3), [#allocation6], 4294967168 }
  0x3c   : > { %5743 = dma.done.wait (%p57_p3), [#allocation9], 1024  }
  0x3d   : > { %5745 = vsyncadd (%p57_p3), [#allocation9], 4294966272  ;;  %v5778_v0 = vmov 0   ;;  %v5779_v1 = vmov 2   ;;  %v5780_v2 = vmov 4   ;;  %v324_v3 = vld [vmem:[#allocation7] sm:$0xff] }
  0x3e   : > { %5549 = vset.pattern.permute.xlu0 %v5778_v0  ;;  %5551 = vset.pattern.permute.xlu1 %v5779_v1  ;;  %v5781_v4 = vmov 1   ;;  %v5782_v5 = vmov 3   ;;  %v5783_v6 = vmov 5   ;;  %v5784_v7 = vmov 6   ;;  %v5949_v9 = vld [vmem:[%s5934_s5] sm:$0xff]  ;;  %v5952_v10 = vld [vmem:[%s5934_s5 + $0x8] sm:$0xff] }
  0x3f   : > { %5553 = vset.pattern.permute.xlu2 %v5780_v2  ;;  %327 = vperm.xlu0 %5549, %v324_v3   ;;  %v5785_v8 = vmov 7   ;;  %v5955_v11 = vld [vmem:[%s5934_s5 + $0x10] sm:$0xff]  ;;  %v5958_v12 = vld [vmem:[%s5934_s5 + $0x18] sm:$0xff]  ;;  %v5961_v14 = vld [vmem:[%s5934_s5 + $0x20] sm:$0xff]  ;;  %v330_v18 = vperm.slane %v5949_v9, 0  ;;  %v331_v19 = vperm.slane %v5952_v10, 0 }
  0x40   : > { %383 = vperm.xlu1 %5551, %v324_v3   ;;  %439 = vperm.xlu2 %5553, %v324_v3   ;;  %v5964_v15 = vld [vmem:[%s5934_s5 + $0x28] sm:$0xff]  ;;  %v5967_v16 = vld [vmem:[%s5934_s5 + $0x30] sm:$0xff]  ;;  %v5970_v17 = vld [vmem:[%s5934_s5 + $0x38] sm:$0xff]  ;;  %v386_v20 = vperm.slane %v5949_v9, 2  ;;  %v387_v21 = vperm.slane %v5952_v10, 2  ;;  %v388_v22 = vperm.slane %v5955_v11, 2 }
  0x41   : > { %v332_v23 = vperm.slane %v5955_v11, 0  ;;  %v389_v24 = vperm.slane %v5958_v12, 2  ;;  %v390_v25 = vperm.slane %v5961_v14, 2  ;;  %v391_v26 = vperm.slane %v5964_v15, 2  ;;  %s5416_s21 = sshll.u32 %s5923_s23, 8  ;;  %s5448_s11 = sshll.u32 %s5764_s18, 8 }
  0x42   : > { %v392_v27 = vperm.slane %v5967_v16, 2  ;;  %v393_v28 = vperm.slane %v5970_v17, 2  ;;  %v442_v29 = vperm.slane %v5949_v9, 4  ;;  %v443_v30 = vperm.slane %v5952_v10, 4  ;;  %s7860_s25 = scalar_lea.vmem [#allocation10], %s5416_s21  ;;  %s5264_s28 = scalar_lea.hbm %s9607_s4, %s5448_s11 }
  0x43   : > { %v444_v31 = vperm.slane %v5955_v11, 4  ;;  %v445_v32 = vperm.slane %v5958_v12, 4  ;;  %v446_v33 = vperm.slane %v5961_v14, 4  ;;  %v447_v34 = vperm.slane %v5964_v15, 4  ;;  %s5265_s29 = sshll.u32 %s7860_s25, 4  ;;  %s5267_s6 = sshll.u32 %s5264_s28, 4  ;;  %s5266_s29 = int_to_ptr.vmem [resolvable:$true] %s5265_s29  ;;  %s5268_s6 = int_to_ptr.hbm [resolvable:$true] %s5267_s6 }
  0x44   : > { %v448_v35 = vperm.slane %v5967_v16, 4  ;;  %v449_v36 = vperm.slane %v5970_v17, 4  ;;  %v333_v37 = vperm.slane %v5958_v12, 0  ;;  %v334_v38 = vperm.slane %v5961_v14, 0  ;;  %s5251_s7 = scalar_lea.sflag [#allocation4], %s5923_s23  ;;  %s5692_s18 = sshra.s32 %s5268_s6, 4  ;;  %s5693_s18 = int_to_ptr.hbm [resolvable:$true] %s5692_s18 }
  0x45   : > { %v335_v39 = vperm.slane %v5964_v15, 0  ;;  %v336_v40 = vperm.slane %v5967_v16, 0  ;;  %v337_v41 = vperm.slane %v5970_v17, 0  ;;  %v358_v42 = vperm.slane %v5949_v9, 1  ;;  %s5694_s12 = scalar_lea.hbm %s5693_s18, 256  ;;  %s5698_s8 = scalar_lea.hbm %s9607_s4, 512 }
  0x46   : > { %v470_v59 = vperm.slane %v5949_v9, 5  ;;  %v471_v60 = vperm.slane %v5952_v10, 5  ;;  %v472_v61 = vperm.slane %v5955_v11, 5  ;;  %v473_v62 = vperm.slane %v5958_v12, 5  ;;  %p5695_p3 = scmp.ne.s32.totalorder %s5693_s18, %s5694_s12  ;;  %p5699_p11 = scmp.lt.s32.totalorder %s5693_s18, %s9607_s4 }
  0x47   : > { %5550 = vset.pattern.permute.xlu0 %v5781_v4  ;;  %v474_v63 = vperm.slane %v5961_v14, 5  ;;  %v475_v0 = vperm.slane %v5964_v15, 5  ;;  %v477_v4 = vperm.slane %v5970_v17, 5  ;;  %vm775_vm0 = vcmask 1041409   ;;  %p5700_p12 = scmp.lt.s32.totalorder %s5698_s8, %s5694_s12 }
  0x48   : > { %5552 = vset.pattern.permute.xlu1 %v5782_v5  ;;  %355 = vperm.xlu0 %5550, %v324_v3   ;;  %vm777_vm1 = vcmask 1043459   ;;  %vm781_vm2 = vcmask 1045509   ;;  %vm783_vm3 = vcmask 1046528   ;;  %vm9709_vm4 = vcmask 1044483   ;;  %p5696_p7 = pnand %p5695_p3, %p5865_p8 }
  0x49   : > { %411 = vperm.xlu1 %5552, %v324_v3   ;;  %5554 = vset.pattern.permute.xlu2 %v5783_v6  ;;  %vm9712_vm5 = vcmask 1046529   ;;  %vm9700_vm6 = vcmask 1046531   ;;  %vm761_vm7 = vcmask 1040384   ;;  %vm763_vm8 = vcmask 1042434   ;;  %p5701_p0 = por %p5700_p12, %p5699_p11 }
  0x4a   : > { %467 = vperm.xlu2 %5554, %v324_v3   ;;  %vm767_vm9 = vcmask 1044484   ;;  %vm769_vm10 = vcmask 1046534   ;;  %vm792_vm11 = vcmask 1043458   ;;  %vm9703_vm12 = vcmask 1045504   ;;  %p5697_p10 = pneg %p5696_p7 }
  0x4b   : > { %vm9702_vm13 = vcmask 1045506   ;;  %vm779_vm14 = vcmask 1042433   ;;  %vm9701_vm15 = vcmask 1046533  }
  0x4c   : > { %p5702_p1 = pnand %p5701_p0, %p5697_p10 }
  0x50   : > { %5557 = vset.pattern.permute.xlu0 %v5785_v8 }
  0x51   : > { %5555 = vset.pattern.permute.xlu1 %v5784_v7 }
  0x52   : > { %495 = vperm.xlu1 %5555, %v324_v3   ;;  %5556 = vset.pattern.permute.xlu2 %v5785_v8  ;;  %v582_v8 = vlaneseq }
  0x53   : > { %523 = vperm.xlu2 %5556, %v324_v3   ;;  %v476_v3 = vperm.slane %v5967_v16, 5 }
  0x54   : > { %v6068_v55 = vshrl.u32 %v582_v8, 7 }
  0x56   : > { %9736 = vst [vmem:[#allocation23_spill] sm:$0xff] %v6068_v55 }
  0x9a   : > { %v440_v13 = vpop.permute.xlu2 %439 }
  0x9b   : > { %v5998_v44 = vmul.f32 %v442_v29, %v440_v13  ;;  %v6000_v45 = vmul.f32 %v443_v30, %v440_v13  ;;  %v6004_v48 = vmul.f32 %v444_v31, %v440_v13  ;;  %v6006_v49 = vmul.f32 %v445_v32, %v440_v13 }
  0x9c   : > { %v6008_v50 = vmul.f32 %v446_v33, %v440_v13  ;;  %v6010_v51 = vmul.f32 %v447_v34, %v440_v13  ;;  %v6012_v53 = vmul.f32 %v448_v35, %v440_v13  ;;  %v6014_v54 = vmul.f32 %v449_v36, %v440_v13 }
  0xa4   : > { %v468_v52 = vpop.permute.xlu2 %467 }
  0xa5   : > { %v6036_v30 = vmul.f32 %v470_v59, %v468_v52  ;;  %v6038_v31 = vmul.f32 %v471_v60, %v468_v52  ;;  %v6040_v32 = vmul.f32 %v472_v61, %v468_v52  ;;  %v6042_v33 = vmul.f32 %v473_v62, %v468_v52 }
  0xa6   : > { %v6044_v34 = vmul.f32 %v474_v63, %v468_v52  ;;  %v6046_v35 = vmul.f32 %v475_v0, %v468_v52  ;;  %v6048_v36 = vmul.f32 %v476_v3, %v468_v52  ;;  %v6050_v7 = vmul.f32 %v477_v4, %v468_v52 }
  0xa7   : > { %v526_v59 = vperm.slane %v5949_v9, 7  ;;  %v527_v60 = vperm.slane %v5952_v10, 7  ;;  %v528_v61 = vperm.slane %v5955_v11, 7  ;;  %v529_v62 = vperm.slane %v5958_v12, 7 }
  0xa8   : > { %9732 = vst [vmem:[#allocation19_spill] sm:$0xff] %v6044_v34  ;;  %v530_v0 = vperm.slane %v5961_v14, 7  ;;  %v531_v3 = vperm.slane %v5964_v15, 7  ;;  %v532_v52 = vperm.slane %v5967_v16, 7  ;;  %v533_v4 = vperm.slane %v5970_v17, 7 }
  0xa9   : > { %9733 = vst [vmem:[#allocation20_spill] sm:$0xff] %v6046_v35  ;;  %v9752_v34 = vperm.slane %v5949_v9, 3 }
  0xaa   : > { %9734 = vst [vmem:[#allocation21_spill] sm:$0xff] %v6048_v36 }
  0xab   : > { %9735 = vst [vmem:[#allocation22_spill] sm:$0xff] %v6050_v7 }
  0xad   : > { %v524_v6 = vpop.permute.xlu2 %523 }
  0xae   : > { %v6070_v47 = vmul.f32 %v526_v59, %v524_v6  ;;  %v6072_v46 = vmul.f32 %v527_v60, %v524_v6  ;;  %v6074_v43 = vmul.f32 %v528_v61, %v524_v6  ;;  %v6076_v13 = vmul.f32 %v529_v62, %v524_v6 }
  0xaf   : > { %v6078_v5 = vmul.f32 %v530_v0, %v524_v6  ;;  %v6080_v2 = vmul.f32 %v531_v3, %v524_v6  ;;  %v6082_v1 = vmul.f32 %v532_v52, %v524_v6  ;;  %v6084_v58 = vmul.f32 %v533_v4, %v524_v6 }
  0xb0   : > { %9737 = vst [vmem:[#allocation24_spill] sm:$0xff] %v6070_v47 }
  0xb1   : > { %v328_v29 = vpop.permute.xlu0 %327  ;;  %9738 = vst [vmem:[#allocation25_spill] sm:$0xff] %v6072_v46 }
  0xb2   : > { %v384_v63 = vpop.permute.xlu1 %383  ;;  %9739 = vst [vmem:[#allocation26_spill] sm:$0xff] %v6074_v43 }
  0xb3   : > { %9740 = vst [vmem:[#allocation27_spill] sm:$0xff] %v6076_v13  ;;  %v394_v8 = vmul.f32 %v386_v20, %v384_v63  ;;  %v395_v59 = vmul.f32 %v387_v21, %v384_v63  ;;  %v396_v60 = vmul.f32 %v388_v22, %v384_v63  ;;  %v397_v61 = vmul.f32 %v389_v24, %v384_v63 }
  0xb4   : > { %9741 = vst [vmem:[#allocation28_spill] sm:$0xff] %v6078_v5  ;;  %v398_v62 = vmul.f32 %v390_v25, %v384_v63  ;;  %v399_v0 = vmul.f32 %v391_v26, %v384_v63  ;;  %v400_v6 = vmul.f32 %v392_v27, %v384_v63  ;;  %v401_v20 = vmul.f32 %v393_v28, %v384_v63 }
  0xb5   : > { %9742 = vst [vmem:[#allocation29_spill] sm:$0xff] %v6080_v2  ;;  %v338_v21 = vmul.f32 %v330_v18, %v328_v29  ;;  %v339_v22 = vmul.f32 %v331_v19, %v328_v29  ;;  %v340_v24 = vmul.f32 %v332_v23, %v328_v29  ;;  %v341_v25 = vmul.f32 %v333_v37, %v328_v29 }
  0xb6   : > { %9743 = vst [vmem:[#allocation30_spill] sm:$0xff] %v6082_v1  ;;  %v342_v26 = vmul.f32 %v334_v38, %v328_v29  ;;  %v343_v27 = vmul.f32 %v335_v39, %v328_v29  ;;  %v344_v28 = vmul.f32 %v336_v40, %v328_v29  ;;  %v345_v18 = vmul.f32 %v337_v41, %v328_v29 }
  0xb7   : > { %9744 = vst [vmem:[#allocation31_spill] sm:$0xff] %v6084_v58  ;;  %v9745_v23 = vperm.slane %v5952_v10, 1  ;;  %v9746_v37 = vperm.slane %v5955_v11, 1  ;;  %v9747_v38 = vperm.slane %v5958_v12, 1  ;;  %v9748_v39 = vperm.slane %v5961_v14, 1 }
  0xb8   : > { %v9749_v40 = vperm.slane %v5964_v15, 1  ;;  %v9750_v41 = vperm.slane %v5967_v16, 1 }
  0xba   : > { %v356_v3 = vpop.permute.xlu0 %355 }
  0xbb   : > { %v366_v19 = vmul.f32 %v358_v42, %v356_v3  ;;  %v367_v63 = vmul.f32 %v9745_v23, %v356_v3  ;;  %v368_v52 = vmul.f32 %v9746_v37, %v356_v3  ;;  %v369_v4 = vmul.f32 %v9747_v38, %v356_v3  ;;  %v412_v58 = vpop.permute.xlu1 %411 }
  0xbc   : > { %v370_v56 = vmul.f32 %v9748_v39, %v356_v3  ;;  %v371_v57 = vmul.f32 %v9749_v40, %v356_v3  ;;  %v372_v29 = vmul.f32 %v9750_v41, %v356_v3  ;;  %v9751_v42 = vperm.slane %v5970_v17, 1 }
  0xbd   : > { %v374_v23 = vadd.f32 %v366_v19, %v338_v21  ;;  %v375_v1 = vadd.f32 %v367_v63, %v339_v22  ;;  %v376_v2 = vadd.f32 %v368_v52, %v340_v24  ;;  %v377_v37 = vadd.f32 %v369_v4, %v341_v25 }
  0xbe   : > { %v373_v55 = vmul.f32 %v9751_v42, %v356_v3  ;;  %v378_v5 = vadd.f32 %v370_v56, %v342_v26  ;;  %v379_v13 = vadd.f32 %v371_v57, %v343_v27  ;;  %v380_v38 = vadd.f32 %v372_v29, %v344_v28  ;;  %v9762_v29 = vld [vmem:[#allocation21_spill] sm:$0xff]  ;;  %v9763_v42 = vld [vmem:[#allocation22_spill] sm:$0xff] }
  0xbf   : > { %v402_v46 = vadd.f32 %v394_v8, %v374_v23  ;;  %v403_v39 = vadd.f32 %v395_v59, %v375_v1  ;;  %v404_v47 = vadd.f32 %v396_v60, %v376_v2  ;;  %v405_v7 = vadd.f32 %v397_v61, %v377_v37 }
  0xc0   : > { %v381_v43 = vadd.f32 %v373_v55, %v345_v18  ;;  %v406_v40 = vadd.f32 %v398_v62, %v378_v5  ;;  %v407_v36 = vadd.f32 %v399_v0, %v379_v13  ;;  %v408_v35 = vadd.f32 %v400_v6, %v380_v38 }
  0xc1   : > { %v422_v3 = vmul.f32 %v9752_v34, %v412_v58  ;;  %v9753_v21 = vperm.slane %v5952_v10, 3  ;;  %v9754_v24 = vperm.slane %v5955_v11, 3  ;;  %v9755_v57 = vperm.slane %v5958_v12, 3 }
  0xc2   : > { %v409_v41 = vadd.f32 %v401_v20, %v381_v43  ;;  %v9756_v1 = vperm.slane %v5961_v14, 3  ;;  %v9757_v5 = vperm.slane %v5964_v15, 3  ;;  %v9758_v43 = vperm.slane %v5967_v16, 3 }
  0xc3   : > { %v423_v22 = vmul.f32 %v9753_v21, %v412_v58  ;;  %v424_v56 = vmul.f32 %v9754_v24, %v412_v58  ;;  %v425_v55 = vmul.f32 %v9755_v57, %v412_v58  ;;  %v9759_v34 = vperm.slane %v5970_v17, 3  ;;  %v550_v57 = vld [vmem:[#allocation8] sm:$0xff] }
  0xc4   : > { %v426_v2 = vmul.f32 %v9756_v1, %v412_v58  ;;  %v427_v13 = vmul.f32 %v9757_v5, %v412_v58  ;;  %v428_v8 = vmul.f32 %v9758_v43, %v412_v58  ;;  %v430_v60 = vadd.f32 %v422_v3, %v402_v46  ;;  %v496_v63 = vpop.permute.xlu1 %495  ;;  %v552_v5 = vld [vmem:[#allocation8 + $0x10] sm:$0xff]  ;;  %v555_v43 = vld [vmem:[#allocation8 + $0x28] sm:$0xff] }
  0xc5   : > { %v429_v59 = vmul.f32 %v9759_v34, %v412_v58  ;;  %v431_v61 = vadd.f32 %v423_v22, %v403_v39  ;;  %v432_v62 = vadd.f32 %v424_v56, %v404_v47  ;;  %v433_v0 = vadd.f32 %v425_v55, %v405_v7  ;;  %v551_v55 = vld [vmem:[#allocation8 + $0x8] sm:$0xff] }
  0xc6   : > { %v434_v6 = vadd.f32 %v426_v2, %v406_v40  ;;  %v435_v20 = vadd.f32 %v427_v13, %v407_v36  ;;  %v436_v25 = vadd.f32 %v428_v8, %v408_v35  ;;  %v458_v27 = vadd.f32 %v5998_v44, %v430_v60  ;;  %v553_v13 = vld [vmem:[#allocation8 + $0x18] sm:$0xff]  ;;  %v556_v8 = vld [vmem:[#allocation8 + $0x30] sm:$0xff]  ;;  %v9772_v34 = vld [vmem:[#allocation24_spill] sm:$0xff] }
  0xc7   : > { %v437_v26 = vadd.f32 %v429_v59, %v409_v41  ;;  %v459_v28 = vadd.f32 %v6000_v45, %v431_v61  ;;  %v460_v18 = vadd.f32 %v6004_v48, %v432_v62  ;;  %v461_v19 = vadd.f32 %v6006_v49, %v433_v0  ;;  %v9760_v48 = vld [vmem:[#allocation19_spill] sm:$0xff]  ;;  %v9761_v49 = vld [vmem:[#allocation20_spill] sm:$0xff]  ;;  %v9774_v61 = vld [vmem:[#allocation26_spill] sm:$0xff] }
  0xc8   : > { %v462_v52 = vadd.f32 %v6008_v50, %v434_v6  ;;  %v463_v46 = vadd.f32 %v6010_v51, %v435_v20  ;;  %v464_v47 = vadd.f32 %v6012_v53, %v436_v25  ;;  %v486_v7 = vadd.f32 %v6036_v30, %v458_v27  ;;  %v9775_v0 = vld [vmem:[#allocation27_spill] sm:$0xff]  ;;  %v9776_v20 = vld [vmem:[#allocation28_spill] sm:$0xff] }
  0xc9   : > { %v465_v58 = vadd.f32 %v6014_v54, %v437_v26  ;;  %v487_v35 = vadd.f32 %v6038_v31, %v459_v28  ;;  %v488_v44 = vadd.f32 %v6040_v32, %v460_v18  ;;  %v489_v45 = vadd.f32 %v6042_v33, %v461_v19  ;;  %v9777_v26 = vld [vmem:[#allocation29_spill] sm:$0xff]  ;;  %v9778_v28 = vld [vmem:[#allocation30_spill] sm:$0xff]  ;;  %v9779_v19 = vld [vmem:[#allocation31_spill] sm:$0xff] }
  0xca   : > { %v490_v36 = vadd.f32 %v9760_v48, %v462_v52  ;;  %v491_v4 = vadd.f32 %v9761_v49, %v463_v46  ;;  %v492_v50 = vadd.f32 %v9762_v29, %v464_v47  ;;  %v9764_v53 = vperm.slane %v5949_v9, 6 }
  0xcb   : > { %v493_v51 = vadd.f32 %v9763_v42, %v465_v58  ;;  %v9765_v54 = vperm.slane %v5952_v10, 6  ;;  %v9766_v31 = vperm.slane %v5955_v11, 6  ;;  %v9767_v32 = vperm.slane %v5958_v12, 6 }
  0xcc   : > { %v506_v23 = vmul.f32 %v9764_v53, %v496_v63  ;;  %v9768_v38 = vperm.slane %v5961_v14, 6  ;;  %v9769_v40 = vperm.slane %v5964_v15, 6  ;;  %v9770_v3 = vperm.slane %v5967_v16, 6  ;;  %v554_v15 = vld [vmem:[#allocation8 + $0x20] sm:$0xff]  ;;  %v557_v16 = vld [vmem:[#allocation8 + $0x38] sm:$0xff] }
  0xcd   : > { %v507_v30 = vmul.f32 %v9765_v54, %v496_v63  ;;  %v508_v37 = vmul.f32 %v9766_v31, %v496_v63  ;;  %v509_v33 = vmul.f32 %v9767_v32, %v496_v63  ;;  %v9771_v9 = vperm.slane %v5970_v17, 6  ;;  %v9773_v17 = vld [vmem:[#allocation25_spill] sm:$0xff] }
  0xce   : > { %v510_v39 = vmul.f32 %v9768_v38, %v496_v63  ;;  %v511_v41 = vmul.f32 %v9769_v40, %v496_v63  ;;  %v512_v21 = vmul.f32 %v9770_v3, %v496_v63  ;;  %v514_v10 = vadd.f32 %v506_v23, %v486_v7 }
  0xcf   : > { %v513_v22 = vmul.f32 %v9771_v9, %v496_v63  ;;  %v515_v24 = vadd.f32 %v507_v30, %v487_v35  ;;  %v516_v56 = vadd.f32 %v508_v37, %v488_v44  ;;  %v517_v11 = vadd.f32 %v509_v33, %v489_v45  ;;  %v9780_v37 = vld [vmem:[#allocation23_spill] sm:$0xff] }
  0xd0   : > { %v518_v12 = vadd.f32 %v510_v39, %v490_v36  ;;  %v519_v1 = vadd.f32 %v511_v41, %v491_v4  ;;  %v520_v2 = vadd.f32 %v512_v21, %v492_v50  ;;  %v542_v59 = vadd.f32 %v9772_v34, %v514_v10 }
  0xd1   : > { %v521_v14 = vadd.f32 %v513_v22, %v493_v51  ;;  %v543_v60 = vadd.f32 %v9773_v17, %v515_v24  ;;  %v544_v62 = vadd.f32 %v9774_v61, %v516_v56  ;;  %v545_v6 = vadd.f32 %v9775_v0, %v517_v11 }
  0xd2   : > { %v546_v25 = vadd.f32 %v9776_v20, %v518_v12  ;;  %v547_v27 = vadd.f32 %v9777_v26, %v519_v1  ;;  %v548_v18 = vadd.f32 %v9778_v28, %v520_v2  ;;  %v558_v52 = vadd.f32 %v550_v57, %v542_v59 }
  0xd3   : > { %v549_v63 = vadd.f32 %v9779_v19, %v521_v14  ;;  %v559_v46 = vadd.f32 %v551_v55, %v543_v60  ;;  %v560_v47 = vadd.f32 %v552_v5, %v544_v62  ;;  %v561_v58 = vadd.f32 %v553_v13, %v545_v6 }
  0xd4   : > { %v562_v7 = vadd.f32 %v554_v15, %v546_v25  ;;  %v563_v35 = vadd.f32 %v555_v43, %v547_v27  ;;  %v564_v44 = vadd.f32 %v556_v8, %v548_v18  ;;  %v566_v48 = vmax.f32 %v558_v52, 0.0 }
  0xd5   : > { %v565_v45 = vadd.f32 %v557_v16, %v549_v63  ;;  %v567_v36 = vmax.f32 %v559_v46, 0.0  ;;  %v568_v49 = vmax.f32 %v560_v47, 0.0  ;;  %v569_v4 = vmax.f32 %v561_v58, 0.0 }
  0xd6   : > { %v570_v29 = vmax.f32 %v562_v7, 0.0  ;;  %v571_v50 = vmax.f32 %v563_v35, 0.0  ;;  %v572_v42 = vmax.f32 %v564_v44, 0.0  ;;  %v6190_v53 = vmin.f32 %v566_v48, 15.0 }
  0xd7   : > { %v573_v51 = vmax.f32 %v565_v45, 0.0  ;;  %v6192_v23 = vmin.f32 %v567_v36, 15.0  ;;  %v6194_v54 = vmin.f32 %v568_v49, 15.0  ;;  %v6196_v30 = vmin.f32 %v569_v4, 15.0 }
  0xd8   : > { %v6198_v31 = vmin.f32 %v570_v29, 15.0  ;;  %v584_v32 = vadd.s32 8, %v9780_v37  ;;  %v6201_v33 = vmin.f32 %v571_v50, 15.0  ;;  %v6203_v38 = vmin.f32 %v572_v42, 15.0 }
  0xd9   : > { %v6205_v39 = vmin.f32 %v573_v51, 15.0  ;;  %v6208_v40 = vcvt.s32.f32 %v9780_v37  ;;  %v587_v41 = vperm.slane %v6190_v53, 0  ;;  %v588_v3 = vperm.slane %v6192_v23, 0 }
  0xda   : > { %v589_v21 = vperm.slane %v6194_v54, 0  ;;  %v590_v9 = vperm.slane %v6196_v30, 0  ;;  %v591_v22 = vperm.slane %v6198_v31, 0  ;;  %v6215_v10 = vcvt.s32.f32 %v584_v32 }
  0xdb   : > { %v592_v24 = vperm.slane %v6201_v33, 0  ;;  %v593_v56 = vperm.slane %v6203_v38, 0  ;;  %v594_v11 = vperm.slane %v6205_v39, 0  ;;  %v595_v57 = vsub.f32 %v6208_v40, %v587_v41 }
  0xdc   : > { %v596_v55 = vsub.f32 %v6208_v40, %v588_v3  ;;  %v597_v12 = vsub.f32 %v6208_v40, %v589_v21  ;;  %v598_v1 = vsub.f32 %v6208_v40, %v590_v9  ;;  %v599_v2 = vsub.f32 %v6208_v40, %v591_v22 }
  0xdd   : > { %v600_v14 = vsub.f32 %v6208_v40, %v592_v24  ;;  %v601_v5 = vsub.f32 %v6208_v40, %v593_v56  ;;  %v602_v13 = vsub.f32 %v6208_v40, %v594_v11  ;;  %v603_v15 = vsub.f32 %v6215_v10, %v587_v41 }
  0xde   : > { %v604_v43 = vsub.f32 %v6215_v10, %v588_v3  ;;  %v605_v8 = vsub.f32 %v6215_v10, %v589_v21  ;;  %v606_v16 = vsub.f32 %v6215_v10, %v590_v9  ;;  %v607_v34 = vsub.f32 %v6215_v10, %v591_v22 }
  0xdf   : > { %v608_v59 = vsub.f32 %v6215_v10, %v592_v24  ;;  %v609_v17 = vsub.f32 %v6215_v10, %v593_v56  ;;  %v611_v60 = vand.u32 2147483647, %v595_v57  ;;  %v612_v61 = vand.u32 2147483647, %v596_v55 }
  0xe0   : > { %v610_v62 = vsub.f32 %v6215_v10, %v594_v11  ;;  %v613_v0 = vand.u32 2147483647, %v597_v12  ;;  %v614_v6 = vand.u32 2147483647, %v598_v1  ;;  %v615_v20 = vand.u32 2147483647, %v599_v2 }
  0xe1   : > { %v616_v25 = vand.u32 2147483647, %v600_v14  ;;  %v617_v26 = vand.u32 2147483647, %v601_v5  ;;  %v618_v27 = vand.u32 2147483647, %v602_v13 }
  0xe2   : > { %v619_v28 = vand.u32 2147483647, %v603_v15  ;;  %v620_v18 = vand.u32 2147483647, %v604_v43  ;;  %v621_v19 = vand.u32 2147483647, %v605_v8 }
  0xe3   : > { %v622_v63 = vand.u32 2147483647, %v606_v16  ;;  %v623_v52 = vand.u32 2147483647, %v607_v34  ;;  %v624_v46 = vand.u32 2147483647, %v608_v59 }
  0xe4   : > { %v625_v47 = vand.u32 2147483647, %v609_v17  ;;  %v626_v58 = vand.u32 2147483647, %v610_v62  ;;  %v627_v7 = vsub.f32 1.0, %v611_v60  ;;  %v628_v35 = vsub.f32 1.0, %v612_v61 }
  0xe5   : > { %v629_v44 = vsub.f32 1.0, %v613_v0  ;;  %v630_v45 = vsub.f32 1.0, %v614_v6  ;;  %v631_v48 = vsub.f32 1.0, %v615_v20  ;;  %v632_v36 = vsub.f32 1.0, %v616_v25 }
  0xe6   : > { %v633_v49 = vsub.f32 1.0, %v617_v26  ;;  %v634_v4 = vsub.f32 1.0, %v618_v27  ;;  %v635_v29 = vsub.f32 1.0, %v619_v28  ;;  %v636_v50 = vsub.f32 1.0, %v620_v18 }
  0xe7   : > { %v637_v42 = vsub.f32 1.0, %v621_v19  ;;  %v638_v51 = vsub.f32 1.0, %v622_v63  ;;  %v639_v37 = vsub.f32 1.0, %v623_v52  ;;  %v640_v32 = vsub.f32 1.0, %v624_v46 }
  0xe8   : > { %v641_v41 = vsub.f32 1.0, %v625_v47  ;;  %v642_v3 = vsub.f32 1.0, %v626_v58  ;;  %v6236_v21 = vmax.f32 %v627_v7, 0.0  ;;  %v6238_v9 = vmax.f32 %v628_v35, 0.0 }
  0xe9   : > { %v6240_v22 = vmax.f32 %v629_v44, 0.0  ;;  %v6242_v24 = vmax.f32 %v630_v45, 0.0  ;;  %v6244_v56 = vmax.f32 %v631_v48, 0.0  ;;  %v6246_v11 = vmax.f32 %v632_v36, 0.0 }
  0xea   : > { %9781 = vst [vmem:[#allocation19_spill] sm:$0xff] %v6238_v9  ;;  %v6248_v57 = vmax.f32 %v633_v49, 0.0  ;;  %v659_v55 = vperm.slane %v6190_v53, 4  ;;  %v660_v12 = vperm.slane %v6192_v23, 4  ;;  %v661_v1 = vperm.slane %v6194_v54, 4 }
  0xeb   : > { %9782 = vst [vmem:[#allocation20_spill] sm:$0xff] %v6240_v22  ;;  %v6253_v2 = vmax.f32 %v634_v4, 0.0  ;;  %v662_v14 = vperm.slane %v6196_v30, 4  ;;  %v663_v5 = vperm.slane %v6198_v31, 4  ;;  %v664_v13 = vperm.slane %v6201_v33, 4 }
  0xec   : > { %9783 = vst [vmem:[#allocation21_spill] sm:$0xff] %v6242_v24  ;;  %v6258_v15 = vmax.f32 %v635_v29, 0.0  ;;  %v6260_v43 = vmax.f32 %v636_v50, 0.0  ;;  %v665_v8 = vperm.slane %v6203_v38, 4  ;;  %v666_v16 = vperm.slane %v6205_v39, 4 }
  0xed   : > { %9784 = vst [vmem:[#allocation22_spill] sm:$0xff] %v6244_v56  ;;  %v6264_v34 = vmax.f32 %v637_v42, 0.0  ;;  %v6266_v59 = vmax.f32 %v638_v51, 0.0  ;;  %v6268_v17 = vmax.f32 %v639_v37, 0.0  ;;  %v6270_v60 = vmax.f32 %v640_v32, 0.0 }
  0xee   : > { %9785 = vst [vmem:[#allocation24_spill] sm:$0xff] %v6246_v11  ;;  %v6272_v61 = vmax.f32 %v641_v41, 0.0  ;;  %v667_v62 = vsub.f32 %v6208_v40, %v659_v55  ;;  %v668_v0 = vsub.f32 %v6208_v40, %v660_v12  ;;  %v669_v6 = vsub.f32 %v6208_v40, %v661_v1 }
  0xef   : > { %9786 = vst [vmem:[#allocation25_spill] sm:$0xff] %v6248_v57  ;;  %v6277_v20 = vmax.f32 %v642_v3, 0.0  ;;  %v670_v25 = vsub.f32 %v6208_v40, %v662_v14  ;;  %v671_v26 = vsub.f32 %v6208_v40, %v663_v5  ;;  %v672_v27 = vsub.f32 %v6208_v40, %v664_v13 }
  0xf0   : > { %9787 = vst [vmem:[#allocation26_spill] sm:$0xff] %v6253_v2  ;;  %v673_v28 = vsub.f32 %v6208_v40, %v665_v8  ;;  %v674_v18 = vsub.f32 %v6208_v40, %v666_v16  ;;  %v675_v19 = vsub.f32 %v6215_v10, %v659_v55  ;;  %v676_v63 = vsub.f32 %v6215_v10, %v660_v12 }
  0xf1   : > { %9788 = vst [vmem:[#allocation27_spill] sm:$0xff] %v6260_v43  ;;  %v677_v52 = vsub.f32 %v6215_v10, %v661_v1  ;;  %v678_v46 = vsub.f32 %v6215_v10, %v662_v14  ;;  %v679_v47 = vsub.f32 %v6215_v10, %v663_v5  ;;  %v680_v58 = vsub.f32 %v6215_v10, %v664_v13 }
  0xf2   : > { %9789 = vst [vmem:[#allocation28_spill] sm:$0xff] %v6264_v34  ;;  %v681_v7 = vsub.f32 %v6215_v10, %v665_v8  ;;  %v683_v35 = vand.u32 2147483647, %v667_v62  ;;  %v684_v44 = vand.u32 2147483647, %v668_v0  ;;  %v682_v48 = vsub.f32 %v6215_v10, %v666_v16 }
  0xf3   : > { %9790 = vst [vmem:[#allocation29_spill] sm:$0xff] %v6266_v59  ;;  %v685_v45 = vand.u32 2147483647, %v669_v6  ;;  %v686_v36 = vand.u32 2147483647, %v670_v25 }
  0xf4   : > { %9791 = vst [vmem:[#allocation30_spill] sm:$0xff] %v6268_v17  ;;  %v687_v49 = vand.u32 2147483647, %v671_v26  ;;  %v688_v4 = vand.u32 2147483647, %v672_v27  ;;  %v700_v1 = vsub.f32 1.0, %v684_v44 }
  0xf5   : > { %9792 = vst [vmem:[#allocation31_spill] sm:$0xff] %v6270_v60  ;;  %v689_v29 = vand.u32 2147483647, %v673_v28  ;;  %v690_v50 = vand.u32 2147483647, %v674_v18  ;;  %v701_v14 = vsub.f32 1.0, %v685_v45 }
  0xf6   : > { %9793 = vst [vmem:[#allocation23_spill] sm:$0xff] %v6272_v61  ;;  %v691_v42 = vand.u32 2147483647, %v675_v19  ;;  %v692_v51 = vand.u32 2147483647, %v676_v63  ;;  %v702_v5 = vsub.f32 1.0, %v686_v36 }
  0xf7   : > { %9794 = vst [vmem:[#allocation32_spill] sm:$0xff] %v6277_v20  ;;  %v693_v37 = vand.u32 2147483647, %v677_v52  ;;  %v694_v32 = vand.u32 2147483647, %v678_v46  ;;  %v699_v13 = vsub.f32 1.0, %v683_v35 }
  0xf8   : > { %v695_v41 = vand.u32 2147483647, %v679_v47  ;;  %v696_v3 = vand.u32 2147483647, %v680_v58  ;;  %v697_v55 = vand.u32 2147483647, %v681_v7 }
  0xf9   : > { %v698_v12 = vand.u32 2147483647, %v682_v48  ;;  %v703_v8 = vsub.f32 1.0, %v687_v49  ;;  %v704_v62 = vsub.f32 1.0, %v688_v4  ;;  %v705_v16 = vsub.f32 1.0, %v689_v29 }
  0xfa   : > { %v706_v0 = vsub.f32 1.0, %v690_v50  ;;  %v707_v6 = vsub.f32 1.0, %v691_v42  ;;  %v708_v25 = vsub.f32 1.0, %v692_v51  ;;  %v709_v26 = vsub.f32 1.0, %v693_v37 }
  0xfb   : > { %v710_v27 = vsub.f32 1.0, %v694_v32  ;;  %v711_v28 = vsub.f32 1.0, %v695_v41  ;;  %v712_v18 = vsub.f32 1.0, %v696_v3  ;;  %v713_v19 = vsub.f32 1.0, %v697_v55 }
  0xfc   : > { %v714_v63 = vsub.f32 1.0, %v698_v12  ;;  %v716_v52 = vmax.f32 %v700_v1, 0.0  ;;  %v717_v46 = vmax.f32 %v701_v14, 0.0  ;;  %v718_v47 = vmax.f32 %v702_v5, 0.0 }
  0xfd   : > { %v6292_v58 = vmax.f32 %v699_v13, 0.0  ;;  %v719_v7 = vmax.f32 %v703_v8, 0.0  ;;  %v720_v44 = vmax.f32 %v704_v62, 0.0  ;;  %v721_v35 = vmax.f32 %v705_v16, 0.0 }
  0xfe   : > { %v722_v45 = vmax.f32 %v706_v0, 0.0  ;;  %v6294_v48 = vmax.f32 %v707_v6, 0.0  ;;  %v724_v36 = vmax.f32 %v708_v25, 0.0  ;;  %v725_v49 = vmax.f32 %v709_v26, 0.0 }
  0xff   : > { %v726_v4 = vmax.f32 %v710_v27, 0.0  ;;  %v727_v29 = vmax.f32 %v711_v28, 0.0  ;;  %v728_v50 = vmax.f32 %v712_v18, 0.0  ;;  %v729_v42 = vmax.f32 %v713_v19, 0.0 }
 0x100   : > { %v730_v51 = vmax.f32 %v714_v63, 0.0  ;;  %v6296_v37 = vrot.slane %v716_v52, 7  ;;  %v6298_v32 = vrot.slane %v717_v46, 6  ;;  %v6300_v41 = vrot.slane %v718_v47, 5 }
 0x101   : > { %v6302_v3 = vrot.slane %v719_v7, 4  ;;  %v6304_v55 = vrot.slane %v720_v44, 3  ;;  %v1767_v12 = vperm.slane %v6190_v53, 1  ;;  %v1768_v1 = vperm.slane %v6192_v23, 1 }
 0x102   : > { %v6308_v14 = vrot.slane %v721_v35, 2  ;;  %v1769_v5 = vperm.slane %v6194_v54, 1  ;;  %v1770_v13 = vperm.slane %v6196_v30, 1  ;;  %v1771_v8 = vperm.slane %v6198_v31, 1 }
 0x103   : > { %v6313_v62 = vrot.slane %v722_v45, 1  ;;  %v1772_v16 = vperm.slane %v6201_v33, 1  ;;  %v1773_v0 = vperm.slane %v6203_v38, 1  ;;  %v1774_v6 = vperm.slane %v6205_v39, 1 }
 0x104   : > { %v6318_v25 = vrot.slane %v724_v36, 7  ;;  %v6320_v26 = vrot.slane %v725_v49, 6  ;;  %v6322_v27 = vrot.slane %v726_v4, 5  ;;  %v6324_v28 = vrot.slane %v727_v29, 4 }
 0x105   : > { %v6326_v18 = vrot.slane %v728_v50, 3  ;;  %v6328_v19 = vrot.slane %v729_v42, 2  ;;  %v1775_v63 = vsub.f32 %v6208_v40, %v1767_v12  ;;  %v1776_v52 = vsub.f32 %v6208_v40, %v1768_v1 }
 0x106   : > { %v6332_v46 = vrot.slane %v730_v51, 1  ;;  %v1777_v47 = vsub.f32 %v6208_v40, %v1769_v5  ;;  %v1778_v7 = vsub.f32 %v6208_v40, %v1770_v13  ;;  %v1779_v44 = vsub.f32 %v6208_v40, %v1771_v8 }
 0x107   : > { %v1780_v35 = vsub.f32 %v6208_v40, %v1772_v16  ;;  %v1781_v45 = vsub.f32 %v6208_v40, %v1773_v0  ;;  %v1782_v36 = vsub.f32 %v6208_v40, %v1774_v6  ;;  %v1783_v49 = vsub.f32 %v6215_v10, %v1767_v12 }
 0x108   : > { %v1784_v4 = vsub.f32 %v6215_v10, %v1768_v1  ;;  %v1785_v29 = vsub.f32 %v6215_v10, %v1769_v5  ;;  %v1786_v50 = vsub.f32 %v6215_v10, %v1770_v13  ;;  %v1787_v42 = vsub.f32 %v6215_v10, %v1771_v8 }
 0x109   : > { %v1788_v51 = vsub.f32 %v6215_v10, %v1772_v16  ;;  %v1789_v20 = vsub.f32 %v6215_v10, %v1773_v0  ;;  %v1791_v2 = vand.u32 2147483647, %v1775_v63  ;;  %v1792_v61 = vand.u32 2147483647, %v1776_v52 }
 0x10a   : > { %v1790_v57 = vsub.f32 %v6215_v10, %v1774_v6  ;;  %v1793_v60 = vand.u32 2147483647, %v1777_v47  ;;  %v1794_v11 = vand.u32 2147483647, %v1778_v7  ;;  %v1795_v17 = vand.u32 2147483647, %v1779_v44 }
 0x10b   : > { %v1796_v12 = vand.u32 2147483647, %v1780_v35  ;;  %v1797_v56 = vand.u32 2147483647, %v1781_v45  ;;  %v1798_v1 = vand.u32 2147483647, %v1782_v36 }
 0x10c   : > { %v1799_v59 = vand.u32 2147483647, %v1783_v49  ;;  %v1800_v5 = vand.u32 2147483647, %v1784_v4  ;;  %v1801_v24 = vand.u32 2147483647, %v1785_v29 }
 0x10d   : > { %v1802_v13 = vand.u32 2147483647, %v1786_v50  ;;  %v1803_v34 = vand.u32 2147483647, %v1787_v42  ;;  %v1804_v8 = vand.u32 2147483647, %v1788_v51 }
 0x10e   : > { %v1805_v22 = vand.u32 2147483647, %v1789_v20  ;;  %v1806_v16 = vand.u32 2147483647, %v1790_v57  ;;  %v1807_v43 = vsub.f32 1.0, %v1791_v2  ;;  %v1808_v0 = vsub.f32 1.0, %v1792_v61 }
 0x10f   : > { %v1809_v63 = vsub.f32 1.0, %v1793_v60  ;;  %v1810_v52 = vsub.f32 1.0, %v1794_v11  ;;  %v1811_v9 = vsub.f32 1.0, %v1795_v17  ;;  %v1812_v6 = vsub.f32 1.0, %v1796_v12 }
 0x110   : > { %v1813_v47 = vsub.f32 1.0, %v1797_v56  ;;  %v1814_v7 = vsub.f32 1.0, %v1798_v1  ;;  %v1815_v44 = vsub.f32 1.0, %v1799_v59  ;;  %v1816_v35 = vsub.f32 1.0, %v1800_v5 }
 0x111   : > { %v1817_v45 = vsub.f32 1.0, %v1801_v24  ;;  %v1818_v36 = vsub.f32 1.0, %v1802_v13  ;;  %v1819_v49 = vsub.f32 1.0, %v1803_v34  ;;  %v1820_v4 = vsub.f32 1.0, %v1804_v8 }
 0x112   : > { %v1821_v29 = vsub.f32 1.0, %v1805_v22  ;;  %v1822_v50 = vsub.f32 1.0, %v1806_v16  ;;  %v6348_v42 = vmax.f32 %v1807_v43, 0.0  ;;  %v6350_v20 = vmax.f32 %v1808_v0, 0.0 }
 0x113   : > { %v6352_v57 = vmax.f32 %v1809_v63, 0.0  ;;  %v6354_v2 = vmax.f32 %v1810_v52, 0.0  ;;  %v6356_v11 = vmax.f32 %v1811_v9, 0.0  ;;  %v6358_v56 = vmax.f32 %v1812_v6, 0.0 }
 0x114   : > { %9795 = vst [vmem:[#allocation33_spill] sm:$0xff] %v6348_v42  ;;  %v6360_v59 = vmax.f32 %v1813_v47, 0.0  ;;  %v1839_v24 = vperm.slane %v6190_v53, 5  ;;  %v1840_v34 = vperm.slane %v6192_v23, 5  ;;  %v1841_v22 = vperm.slane %v6194_v54, 5 }
 0x115   : > { %9796 = vst [vmem:[#allocation34_spill] sm:$0xff] %v6350_v20  ;;  %v6365_v43 = vmax.f32 %v1814_v7, 0.0  ;;  %v1842_v17 = vperm.slane %v6196_v30, 5  ;;  %v1843_v60 = vperm.slane %v6198_v31, 5  ;;  %v1844_v61 = vperm.slane %v6201_v33, 5 }
 0x116   : > { %9797 = vst [vmem:[#allocation35_spill] sm:$0xff] %v6352_v57  ;;  %v6370_v9 = vmax.f32 %v1815_v44, 0.0  ;;  %v6372_v51 = vmax.f32 %v1816_v35, 0.0  ;;  %v1845_v12 = vperm.slane %v6203_v38, 5  ;;  %v1846_v1 = vperm.slane %v6205_v39, 5 }
 0x117   : > { %9798 = vst [vmem:[#allocation36_spill] sm:$0xff] %v6354_v2  ;;  %v6376_v5 = vmax.f32 %v1817_v45, 0.0  ;;  %v6378_v13 = vmax.f32 %v1818_v36, 0.0  ;;  %v6380_v8 = vmax.f32 %v1819_v49, 0.0  ;;  %v6382_v16 = vmax.f32 %v1820_v4, 0.0 }
 0x118   : > { %9799 = vst [vmem:[#allocation37_spill] sm:$0xff] %v6356_v11  ;;  %v6384_v0 = vmax.f32 %v1821_v29, 0.0  ;;  %v1847_v63 = vsub.f32 %v6208_v40, %v1839_v24  ;;  %v1848_v52 = vsub.f32 %v6208_v40, %v1840_v34  ;;  %v1849_v6 = vsub.f32 %v6208_v40, %v1841_v22 }
 0x119   : > { %9800 = vst [vmem:[#allocation38_spill] sm:$0xff] %v6358_v56  ;;  %v6389_v47 = vmax.f32 %v1822_v50, 0.0  ;;  %v1850_v7 = vsub.f32 %v6208_v40, %v1842_v17  ;;  %v1851_v44 = vsub.f32 %v6208_v40, %v1843_v60  ;;  %v1852_v35 = vsub.f32 %v6208_v40, %v1844_v61 }
 0x11a   : > { %9801 = vst [vmem:[#allocation39_spill] sm:$0xff] %v6360_v59  ;;  %v1853_v45 = vsub.f32 %v6208_v40, %v1845_v12  ;;  %v1854_v36 = vsub.f32 %v6208_v40, %v1846_v1  ;;  %v1855_v49 = vsub.f32 %v6215_v10, %v1839_v24  ;;  %v1856_v4 = vsub.f32 %v6215_v10, %v1840_v34 }
 0x11b   : > { %9802 = vst [vmem:[#allocation40_spill] sm:$0xff] %v6365_v43  ;;  %v1857_v29 = vsub.f32 %v6215_v10, %v1841_v22  ;;  %v1858_v43 = vsub.f32 %v6215_v10, %v1842_v17  ;;  %v1859_v50 = vsub.f32 %v6215_v10, %v1843_v60  ;;  %v1863_v59 = vand.u32 2147483647, %v1847_v63 }
 0x11c   : > { %9803 = vst [vmem:[#allocation41_spill] sm:$0xff] %v6370_v9  ;;  %v1865_v56 = vand.u32 2147483647, %v1849_v6  ;;  %v1866_v11 = vand.u32 2147483647, %v1850_v7 }
 0x11d   : > { %9804 = vst [vmem:[#allocation42_spill] sm:$0xff] %v6372_v51  ;;  %v1868_v24 = vand.u32 2147483647, %v1852_v35  ;;  %v1869_v2 = vand.u32 2147483647, %v1853_v45 }
 0x11e   : > { %9805 = vst [vmem:[#allocation43_spill] sm:$0xff] %v6376_v5  ;;  %v1870_v34 = vand.u32 2147483647, %v1854_v36  ;;  %v1871_v5 = vand.u32 2147483647, %v1855_v49  ;;  %v1882_v63 = vsub.f32 1.0, %v1866_v11 }
 0x11f   : > { %9806 = vst [vmem:[#allocation44_spill] sm:$0xff] %v6378_v13  ;;  %v1867_v13 = vand.u32 2147483647, %v1851_v44  ;;  %v1872_v22 = vand.u32 2147483647, %v1856_v4  ;;  %v1884_v42 = vsub.f32 1.0, %v1868_v24 }
 0x120   : > { %9807 = vst [vmem:[#allocation45_spill] sm:$0xff] %v6380_v8  ;;  %v1862_v8 = vsub.f32 %v6215_v10, %v1846_v1  ;;  %v1873_v57 = vand.u32 2147483647, %v1857_v29  ;;  %v1874_v17 = vand.u32 2147483647, %v1858_v43  ;;  %v1885_v1 = vsub.f32 1.0, %v1869_v2 }
 0x121   : > { %9808 = vst [vmem:[#allocation46_spill] sm:$0xff] %v6382_v16  ;;  %v1864_v16 = vand.u32 2147483647, %v1848_v52  ;;  %v1875_v51 = vand.u32 2147483647, %v1859_v50  ;;  %v1879_v52 = vsub.f32 1.0, %v1863_v59 }
 0x122   : > { %9809 = vst [vmem:[#allocation47_spill] sm:$0xff] %v6384_v0  ;;  %v1861_v0 = vsub.f32 %v6215_v10, %v1845_v12  ;;  %v1881_v12 = vsub.f32 1.0, %v1865_v56  ;;  %v1883_v6 = vsub.f32 1.0, %v1867_v13  ;;  %v1886_v7 = vsub.f32 1.0, %v1870_v34 }
 0x123   : > { %9810 = vst [vmem:[#allocation48_spill] sm:$0xff] %v6389_v47  ;;  %v1860_v47 = vsub.f32 %v6215_v10, %v1844_v61  ;;  %v1878_v61 = vand.u32 2147483647, %v1862_v8  ;;  %v1880_v9 = vsub.f32 1.0, %v1864_v16  ;;  %v1887_v44 = vsub.f32 1.0, %v1871_v5 }
 0x124   : > { %v1877_v20 = vand.u32 2147483647, %v1861_v0  ;;  %v1888_v35 = vsub.f32 1.0, %v1872_v22  ;;  %v1889_v45 = vsub.f32 1.0, %v1873_v57  ;;  %v1890_v36 = vsub.f32 1.0, %v1874_v17 }
 0x125   : > { %v1876_v60 = vand.u32 2147483647, %v1860_v47  ;;  %v1891_v49 = vsub.f32 1.0, %v1875_v51  ;;  %v1894_v43 = vsub.f32 1.0, %v1878_v61  ;;  %v1896_v50 = vmax.f32 %v1880_v9, 0.0 }
 0x126   : > { %v1893_v29 = vsub.f32 1.0, %v1877_v20  ;;  %v1897_v47 = vmax.f32 %v1881_v12, 0.0  ;;  %v1898_v0 = vmax.f32 %v1882_v63, 0.0  ;;  %v6404_v8 = vmax.f32 %v1879_v52, 0.0 }
 0x127   : > { %v1892_v4 = vsub.f32 1.0, %v1876_v60  ;;  %v1899_v56 = vmax.f32 %v1883_v6, 0.0  ;;  %v1900_v11 = vmax.f32 %v1884_v42, 0.0  ;;  %v1901_v59 = vmax.f32 %v1885_v1, 0.0 }
 0x128   : > { %9811 = vst [vmem:[#allocation49_spill] sm:$0xff] %v6404_v8  ;;  %v1902_v13 = vmax.f32 %v1886_v7, 0.0  ;;  %v6406_v16 = vmax.f32 %v1887_v44, 0.0  ;;  %v1904_v2 = vmax.f32 %v1888_v35, 0.0  ;;  %v1905_v5 = vmax.f32 %v1889_v45, 0.0 }
 0x129   : > { %v1906_v24 = vmax.f32 %v1890_v36, 0.0  ;;  %v1907_v57 = vmax.f32 %v1891_v49, 0.0  ;;  %v1908_v34 = vmax.f32 %v1892_v4, 0.0  ;;  %v1909_v51 = vmax.f32 %v1893_v29, 0.0 }
 0x12a   : > { %9812 = vst [vmem:[#allocation50_spill] sm:$0xff] %v6406_v16  ;;  %v1910_v22 = vmax.f32 %v1894_v43, 0.0  ;;  %v6408_v20 = vrot.slane %v1896_v50, 7  ;;  %v6410_v9 = vrot.slane %v1897_v47, 6  ;;  %v6412_v17 = vrot.slane %v1898_v0, 5 }
 0x12b   : > { %v6414_v60 = vrot.slane %v1899_v56, 4  ;;  %v6416_v42 = vrot.slane %v1900_v11, 3  ;;  %v2928_v61 = vperm.slane %v6190_v53, 2  ;;  %v2929_v12 = vperm.slane %v6192_v23, 2 }
 0x12c   : > { %9813 = vst [vmem:[#allocation51_spill] sm:$0xff] %v6408_v20  ;;  %v6420_v63 = vrot.slane %v1901_v59, 2  ;;  %v2930_v52 = vperm.slane %v6194_v54, 2  ;;  %v2931_v6 = vperm.slane %v6196_v30, 2  ;;  %v2932_v1 = vperm.slane %v6198_v31, 2 }
 0x12d   : > { %9814 = vst [vmem:[#allocation52_spill] sm:$0xff] %v6410_v9  ;;  %v6425_v7 = vrot.slane %v1902_v13, 1  ;;  %v2933_v44 = vperm.slane %v6201_v33, 2  ;;  %v2934_v35 = vperm.slane %v6203_v38, 2  ;;  %v2935_v45 = vperm.slane %v6205_v39, 2 }
 0x12e   : > { %9815 = vst [vmem:[#allocation53_spill] sm:$0xff] %v6412_v17  ;;  %v6430_v36 = vrot.slane %v1904_v2, 7  ;;  %v6432_v49 = vrot.slane %v1905_v5, 6  ;;  %v6434_v4 = vrot.slane %v1906_v24, 5  ;;  %v6436_v29 = vrot.slane %v1907_v57, 4 }
 0x12f   : > { %9816 = vst [vmem:[#allocation54_spill] sm:$0xff] %v6414_v60  ;;  %v6438_v43 = vrot.slane %v1908_v34, 3  ;;  %v6440_v50 = vrot.slane %v1909_v51, 2  ;;  %v2936_v47 = vsub.f32 %v6208_v40, %v2928_v61  ;;  %v2937_v0 = vsub.f32 %v6208_v40, %v2929_v12 }
 0x130   : > { %9817 = vst [vmem:[#allocation55_spill] sm:$0xff] %v6416_v42  ;;  %v6444_v56 = vrot.slane %v1910_v22, 1  ;;  %v2938_v11 = vsub.f32 %v6208_v40, %v2930_v52  ;;  %v2939_v59 = vsub.f32 %v6208_v40, %v2931_v6  ;;  %v2940_v13 = vsub.f32 %v6208_v40, %v2932_v1 }
 0x131   : > { %9818 = vst [vmem:[#allocation56_spill] sm:$0xff] %v6420_v63  ;;  %v2941_v2 = vsub.f32 %v6208_v40, %v2933_v44  ;;  %v2942_v5 = vsub.f32 %v6208_v40, %v2934_v35  ;;  %v2943_v24 = vsub.f32 %v6208_v40, %v2935_v45  ;;  %v2944_v57 = vsub.f32 %v6215_v10, %v2928_v61 }
 0x132   : > { %9819 = vst [vmem:[#allocation57_spill] sm:$0xff] %v6425_v7  ;;  %v2945_v34 = vsub.f32 %v6215_v10, %v2929_v12  ;;  %v2946_v51 = vsub.f32 %v6215_v10, %v2930_v52  ;;  %v2947_v22 = vsub.f32 %v6215_v10, %v2931_v6  ;;  %v2955_v16 = vand.u32 2147483647, %v2939_v59 }
 0x133   : > { %9820 = vst [vmem:[#allocation58_spill] sm:$0xff] %v6430_v36  ;;  %v2954_v36 = vand.u32 2147483647, %v2938_v11  ;;  %v2956_v63 = vand.u32 2147483647, %v2940_v13 }
 0x134   : > { %9821 = vst [vmem:[#allocation59_spill] sm:$0xff] %v6432_v49  ;;  %v2953_v49 = vand.u32 2147483647, %v2937_v0  ;;  %v2957_v61 = vand.u32 2147483647, %v2941_v2  ;;  %v2971_v0 = vsub.f32 1.0, %v2955_v16 }
 0x135   : > { %9822 = vst [vmem:[#allocation60_spill] sm:$0xff] %v6434_v4  ;;  %v2951_v4 = vsub.f32 %v6215_v10, %v2935_v45  ;;  %v2958_v7 = vand.u32 2147483647, %v2942_v5  ;;  %v2959_v12 = vand.u32 2147483647, %v2943_v24  ;;  %v2972_v8 = vsub.f32 1.0, %v2956_v63 }
 0x136   : > { %9823 = vst [vmem:[#allocation61_spill] sm:$0xff] %v6436_v29  ;;  %v2950_v29 = vsub.f32 %v6215_v10, %v2934_v35  ;;  %v2960_v60 = vand.u32 2147483647, %v2944_v57  ;;  %v2961_v52 = vand.u32 2147483647, %v2945_v34  ;;  %v2969_v35 = vsub.f32 1.0, %v2953_v49 }
 0x137   : > { %9824 = vst [vmem:[#allocation62_spill] sm:$0xff] %v6438_v43  ;;  %v2952_v43 = vand.u32 2147483647, %v2936_v47  ;;  %v2962_v42 = vand.u32 2147483647, %v2946_v51  ;;  %v2970_v47 = vsub.f32 1.0, %v2954_v36 }
 0x138   : > { %9825 = vst [vmem:[#allocation63_spill] sm:$0xff] %v6440_v50  ;;  %v2948_v50 = vsub.f32 %v6215_v10, %v2932_v1  ;;  %v2963_v6 = vand.u32 2147483647, %v2947_v22  ;;  %v2966_v17 = vand.u32 2147483647, %v2950_v29  ;;  %v2973_v45 = vsub.f32 1.0, %v2957_v61 }
 0x139   : > { %9826 = vst [vmem:[#allocation64_spill] sm:$0xff] %v6444_v56  ;;  %v2949_v56 = vsub.f32 %v6215_v10, %v2933_v44  ;;  %v2967_v44 = vand.u32 2147483647, %v2951_v4  ;;  %v2968_v20 = vsub.f32 1.0, %v2952_v43  ;;  %v2974_v11 = vsub.f32 1.0, %v2958_v7 }
 0x13a   : > { %v2964_v9 = vand.u32 2147483647, %v2948_v50  ;;  %v2975_v59 = vsub.f32 1.0, %v2959_v12  ;;  %v2976_v13 = vsub.f32 1.0, %v2960_v60  ;;  %v2977_v2 = vsub.f32 1.0, %v2961_v52 }
 0x13b   : > { %v2965_v1 = vand.u32 2147483647, %v2949_v56  ;;  %v2978_v5 = vsub.f32 1.0, %v2962_v42  ;;  %v2979_v24 = vsub.f32 1.0, %v2963_v6  ;;  %v2982_v51 = vsub.f32 1.0, %v2966_v17 }
 0x13c   : > { %v2980_v57 = vsub.f32 1.0, %v2964_v9  ;;  %v2983_v22 = vsub.f32 1.0, %v2967_v44  ;;  %v6460_v50 = vmax.f32 %v2968_v20, 0.0  ;;  %v6462_v29 = vmax.f32 %v2969_v35, 0.0 }
 0x13d   : > { %v2981_v34 = vsub.f32 1.0, %v2965_v1  ;;  %v6464_v4 = vmax.f32 %v2970_v47, 0.0  ;;  %v6466_v36 = vmax.f32 %v2971_v0, 0.0  ;;  %v6468_v16 = vmax.f32 %v2972_v8, 0.0 }
 0x13e   : > { %9827 = vst [vmem:[#allocation65_spill] sm:$0xff] %v6460_v50  ;;  %v6470_v63 = vmax.f32 %v2973_v45, 0.0  ;;  %v6472_v60 = vmax.f32 %v2974_v11, 0.0  ;;  %v3000_v42 = vperm.slane %v6190_v53, 6  ;;  %v3001_v9 = vperm.slane %v6192_v23, 6 }
 0x13f   : > { %9828 = vst [vmem:[#allocation66_spill] sm:$0xff] %v6462_v29  ;;  %v3002_v17 = vperm.slane %v6194_v54, 6  ;;  %v6477_v20 = vmax.f32 %v2975_v59, 0.0  ;;  %v3003_v7 = vperm.slane %v6196_v30, 6  ;;  %v3004_v49 = vperm.slane %v6198_v31, 6 }
 0x140   : > { %9829 = vst [vmem:[#allocation67_spill] sm:$0xff] %v6464_v4  ;;  %v3005_v43 = vperm.slane %v6201_v33, 6  ;;  %v6482_v8 = vmax.f32 %v2976_v13, 0.0  ;;  %v6484_v56 = vmax.f32 %v2977_v2, 0.0  ;;  %v3006_v61 = vperm.slane %v6203_v38, 6 }
 0x141   : > { %9830 = vst [vmem:[#allocation68_spill] sm:$0xff] %v6466_v36  ;;  %v3007_v12 = vperm.slane %v6205_v39, 6  ;;  %v6488_v52 = vmax.f32 %v2978_v5, 0.0  ;;  %v6490_v6 = vmax.f32 %v2979_v24, 0.0  ;;  %v6492_v1 = vmax.f32 %v2980_v57, 0.0 }
 0x142   : > { %9831 = vst [vmem:[#allocation69_spill] sm:$0xff] %v6468_v16  ;;  %v6494_v44 = vmax.f32 %v2981_v34, 0.0  ;;  %v6496_v35 = vmax.f32 %v2982_v51, 0.0  ;;  %v3008_v47 = vsub.f32 %v6208_v40, %v3000_v42  ;;  %v3009_v0 = vsub.f32 %v6208_v40, %v3001_v9 }
 0x143   : > { %9832 = vst [vmem:[#allocation70_spill] sm:$0xff] %v6470_v63  ;;  %v3010_v45 = vsub.f32 %v6208_v40, %v3002_v17  ;;  %v6501_v11 = vmax.f32 %v2983_v22, 0.0  ;;  %v3011_v59 = vsub.f32 %v6208_v40, %v3003_v7  ;;  %v3012_v13 = vsub.f32 %v6208_v40, %v3004_v49 }
 0x144   : > { %9833 = vst [vmem:[#allocation71_spill] sm:$0xff] %v6472_v60  ;;  %v3013_v2 = vsub.f32 %v6208_v40, %v3005_v43  ;;  %v3014_v5 = vsub.f32 %v6208_v40, %v3006_v61  ;;  %v3015_v24 = vsub.f32 %v6208_v40, %v3007_v12  ;;  %v3016_v57 = vsub.f32 %v6215_v10, %v3000_v42 }
 0x145   : > { %9834 = vst [vmem:[#allocation72_spill] sm:$0xff] %v6477_v20  ;;  %v3017_v34 = vsub.f32 %v6215_v10, %v3001_v9  ;;  %v3018_v51 = vsub.f32 %v6215_v10, %v3002_v17  ;;  %v3019_v20 = vsub.f32 %v6215_v10, %v3003_v7  ;;  %v3020_v22 = vsub.f32 %v6215_v10, %v3004_v49 }
 0x146   : > { %9835 = vst [vmem:[#allocation73_spill] sm:$0xff] %v6482_v8  ;;  %v3024_v60 = vand.u32 2147483647, %v3008_v47  ;;  %v3026_v63 = vand.u32 2147483647, %v3010_v45 }
 0x147   : > { %9836 = vst [vmem:[#allocation74_spill] sm:$0xff] %v6484_v56  ;;  %v3027_v16 = vand.u32 2147483647, %v3011_v59  ;;  %v3029_v42 = vand.u32 2147483647, %v3013_v2 }
 0x148   : > { %9837 = vst [vmem:[#allocation75_spill] sm:$0xff] %v6488_v52  ;;  %v3030_v36 = vand.u32 2147483647, %v3014_v5  ;;  %v3031_v9 = vand.u32 2147483647, %v3015_v24 }
 0x149   : > { %9838 = vst [vmem:[#allocation76_spill] sm:$0xff] %v6490_v6  ;;  %v3028_v6 = vand.u32 2147483647, %v3012_v13  ;;  %v3032_v52 = vand.u32 2147483647, %v3016_v57  ;;  %v3043_v47 = vsub.f32 1.0, %v3027_v16 }
 0x14a   : > { %9839 = vst [vmem:[#allocation77_spill] sm:$0xff] %v6492_v1  ;;  %v3023_v1 = vsub.f32 %v6215_v10, %v3007_v12  ;;  %v3033_v17 = vand.u32 2147483647, %v3017_v34  ;;  %v3034_v4 = vand.u32 2147483647, %v3018_v51  ;;  %v3045_v50 = vsub.f32 1.0, %v3029_v42 }
 0x14b   : > { %9840 = vst [vmem:[#allocation78_spill] sm:$0xff] %v6494_v44  ;;  %v3025_v44 = vand.u32 2147483647, %v3009_v0  ;;  %v3035_v7 = vand.u32 2147483647, %v3019_v20  ;;  %v3040_v0 = vsub.f32 1.0, %v3024_v60 }
 0x14c   : > { %9841 = vst [vmem:[#allocation79_spill] sm:$0xff] %v6496_v35  ;;  %v3022_v35 = vsub.f32 %v6215_v10, %v3006_v61  ;;  %v3036_v56 = vand.u32 2147483647, %v3020_v22  ;;  %v3042_v61 = vsub.f32 1.0, %v3026_v63  ;;  %v3044_v45 = vsub.f32 1.0, %v3028_v6 }
 0x14d   : > { %9842 = vst [vmem:[#allocation80_spill] sm:$0xff] %v6501_v11  ;;  %v3021_v11 = vsub.f32 %v6215_v10, %v3005_v43  ;;  %v3039_v43 = vand.u32 2147483647, %v3023_v1  ;;  %v3041_v8 = vsub.f32 1.0, %v3025_v44  ;;  %v3046_v12 = vsub.f32 1.0, %v3030_v36 }
 0x14e   : > { %v3038_v29 = vand.u32 2147483647, %v3022_v35  ;;  %v3047_v59 = vsub.f32 1.0, %v3031_v9  ;;  %v3048_v13 = vsub.f32 1.0, %v3032_v52  ;;  %v3049_v2 = vsub.f32 1.0, %v3033_v17 }
 0x14f   : > { %v3037_v49 = vand.u32 2147483647, %v3021_v11  ;;  %v3050_v5 = vsub.f32 1.0, %v3034_v4  ;;  %v3051_v24 = vsub.f32 1.0, %v3035_v7  ;;  %v3052_v57 = vsub.f32 1.0, %v3036_v56 }
 0x150   : > { %v3054_v51 = vsub.f32 1.0, %v3038_v29  ;;  %v3055_v20 = vsub.f32 1.0, %v3039_v43  ;;  %v3057_v22 = vmax.f32 %v3041_v8, 0.0  ;;  %v3058_v11 = vmax.f32 %v3042_v61, 0.0 }
 0x151   : > { %v3053_v34 = vsub.f32 1.0, %v3037_v49  ;;  %v3059_v35 = vmax.f32 %v3043_v47, 0.0  ;;  %v6516_v1 = vmax.f32 %v3040_v0, 0.0  ;;  %v3060_v63 = vmax.f32 %v3044_v45, 0.0 }
 0x152   : > { %v3061_v16 = vmax.f32 %v3045_v50, 0.0  ;;  %v3062_v60 = vmax.f32 %v3046_v12, 0.0  ;;  %v3063_v6 = vmax.f32 %v3047_v59, 0.0  ;;  %v6518_v44 = vmax.f32 %v3048_v13, 0.0 }
 0x153   : > { %9843 = vst [vmem:[#allocation81_spill] sm:$0xff] %v6516_v1  ;;  %v3065_v36 = vmax.f32 %v3049_v2, 0.0  ;;  %v3066_v52 = vmax.f32 %v3050_v5, 0.0  ;;  %v3067_v42 = vmax.f32 %v3051_v24, 0.0  ;;  %v3068_v4 = vmax.f32 %v3052_v57, 0.0 }
 0x154   : > { %9844 = vst [vmem:[#allocation82_spill] sm:$0xff] %v6518_v44  ;;  %v3069_v9 = vmax.f32 %v3053_v34, 0.0  ;;  %v3070_v56 = vmax.f32 %v3054_v51, 0.0  ;;  %v3071_v17 = vmax.f32 %v3055_v20, 0.0  ;;  %v6520_v29 = vrot.slane %v3057_v22, 7 }
 0x155   : > { %v6522_v8 = vrot.slane %v3058_v11, 6  ;;  %v6524_v7 = vrot.slane %v3059_v35, 5  ;;  %v6526_v49 = vrot.slane %v3060_v63, 4  ;;  %v6528_v50 = vrot.slane %v3061_v16, 3 }
 0x156   : > { %9845 = vst [vmem:[#allocation83_spill] sm:$0xff] %v6520_v29  ;;  %v6530_v43 = vrot.slane %v3062_v60, 2  ;;  %v4089_v61 = vperm.slane %v6190_v53, 3  ;;  %v4090_v47 = vperm.slane %v6192_v23, 3  ;;  %v4091_v0 = vperm.slane %v6194_v54, 3 }
 0x157   : > { %9846 = vst [vmem:[#allocation84_spill] sm:$0xff] %v6522_v8  ;;  %v4092_v45 = vperm.slane %v6196_v30, 3  ;;  %v4093_v12 = vperm.slane %v6198_v31, 3  ;;  %v6537_v59 = vrot.slane %v3063_v6, 1  ;;  %v4094_v13 = vperm.slane %v6201_v33, 3 }
 0x158   : > { %9847 = vst [vmem:[#allocation85_spill] sm:$0xff] %v6524_v7  ;;  %v4095_v2 = vperm.slane %v6203_v38, 3  ;;  %v4096_v5 = vperm.slane %v6205_v39, 3  ;;  %v6542_v24 = vrot.slane %v3065_v36, 7  ;;  %v6544_v57 = vrot.slane %v3066_v52, 6 }
 0x159   : > { %9848 = vst [vmem:[#allocation86_spill] sm:$0xff] %v6526_v49  ;;  %v6546_v34 = vrot.slane %v3067_v42, 5  ;;  %v6548_v51 = vrot.slane %v3068_v4, 4  ;;  %v6550_v20 = vrot.slane %v3069_v9, 3  ;;  %v6552_v22 = vrot.slane %v3070_v56, 2 }
 0x15a   : > { %9849 = vst [vmem:[#allocation87_spill] sm:$0xff] %v6528_v50  ;;  %v4097_v11 = vsub.f32 %v6208_v40, %v4089_v61  ;;  %v4098_v35 = vsub.f32 %v6208_v40, %v4090_v47  ;;  %v6556_v63 = vrot.slane %v3071_v17, 1  ;;  %v4099_v16 = vsub.f32 %v6208_v40, %v4091_v0 }
 0x15b   : > { %9850 = vst [vmem:[#allocation88_spill] sm:$0xff] %v6530_v43  ;;  %v4100_v60 = vsub.f32 %v6208_v40, %v4092_v45  ;;  %v4101_v6 = vsub.f32 %v6208_v40, %v4093_v12  ;;  %v4102_v36 = vsub.f32 %v6208_v40, %v4094_v13  ;;  %v4103_v52 = vsub.f32 %v6208_v40, %v4095_v2 }
 0x15c   : > { %9851 = vst [vmem:[#allocation89_spill] sm:$0xff] %v6537_v59  ;;  %v4104_v42 = vsub.f32 %v6208_v40, %v4096_v5  ;;  %v4105_v4 = vsub.f32 %v6215_v10, %v4089_v61  ;;  %v4106_v9 = vsub.f32 %v6215_v10, %v4090_v47  ;;  %v4107_v56 = vsub.f32 %v6215_v10, %v4091_v0 }
 0x15d   : > { %9852 = vst [vmem:[#allocation90_spill] sm:$0xff] %v6542_v24  ;;  %v4108_v17 = vsub.f32 %v6215_v10, %v4092_v45  ;;  %v4115_v24 = vand.u32 2147483647, %v4099_v16  ;;  %v4116_v44 = vand.u32 2147483647, %v4100_v60 }
 0x15e   : > { %9853 = vst [vmem:[#allocation91_spill] sm:$0xff] %v6544_v57  ;;  %v4114_v57 = vand.u32 2147483647, %v4098_v35  ;;  %v4117_v43 = vand.u32 2147483647, %v4101_v6 }
 0x15f   : > { %9854 = vst [vmem:[#allocation92_spill] sm:$0xff] %v6546_v34  ;;  %v4112_v34 = vsub.f32 %v6215_v10, %v4096_v5  ;;  %v4118_v61 = vand.u32 2147483647, %v4102_v36  ;;  %v4119_v59 = vand.u32 2147483647, %v4103_v52  ;;  %v4132_v35 = vsub.f32 1.0, %v4116_v44 }
 0x160   : > { %9855 = vst [vmem:[#allocation93_spill] sm:$0xff] %v6548_v51  ;;  %v4111_v51 = vsub.f32 %v6215_v10, %v4095_v2  ;;  %v4120_v47 = vand.u32 2147483647, %v4104_v42  ;;  %v4121_v49 = vand.u32 2147483647, %v4105_v4  ;;  %v4130_v2 = vsub.f32 1.0, %v4114_v57 }
 0x161   : > { %9856 = vst [vmem:[#allocation94_spill] sm:$0xff] %v6550_v20  ;;  %v4113_v20 = vand.u32 2147483647, %v4097_v11  ;;  %v4122_v0 = vand.u32 2147483647, %v4106_v9  ;;  %v4131_v11 = vsub.f32 1.0, %v4115_v24 }
 0x162   : > { %9857 = vst [vmem:[#allocation95_spill] sm:$0xff] %v6552_v22  ;;  %v4109_v22 = vsub.f32 %v6215_v10, %v4093_v12  ;;  %v4123_v50 = vand.u32 2147483647, %v4107_v56  ;;  %v4124_v45 = vand.u32 2147483647, %v4108_v17  ;;  %v4133_v1 = vsub.f32 1.0, %v4117_v43 }
 0x163   : > { %9858 = vst [vmem:[#allocation96_spill] sm:$0xff] %v6556_v63  ;;  %v4110_v63 = vsub.f32 %v6215_v10, %v4094_v13  ;;  %v4127_v7 = vand.u32 2147483647, %v4111_v51  ;;  %v4128_v13 = vand.u32 2147483647, %v4112_v34  ;;  %v4129_v29 = vsub.f32 1.0, %v4113_v20 }
 0x164   : > { %v4125_v8 = vand.u32 2147483647, %v4109_v22  ;;  %v4134_v5 = vsub.f32 1.0, %v4118_v61  ;;  %v4135_v16 = vsub.f32 1.0, %v4119_v59  ;;  %v4136_v60 = vsub.f32 1.0, %v4120_v47 }
 0x165   : > { %v4126_v12 = vand.u32 2147483647, %v4110_v63  ;;  %v4137_v6 = vsub.f32 1.0, %v4121_v49  ;;  %v4138_v36 = vsub.f32 1.0, %v4122_v0  ;;  %v4139_v52 = vsub.f32 1.0, %v4123_v50 }
 0x166   : > { %v4140_v42 = vsub.f32 1.0, %v4124_v45  ;;  %v4141_v4 = vsub.f32 1.0, %v4125_v8  ;;  %v6572_v56 = vsub.f32 1.0, %v4127_v7  ;;  %v6574_v22 = vsub.f32 1.0, %v4128_v13 }
 0x167   : > { %v4142_v9 = vsub.f32 1.0, %v4126_v12  ;;  %v6576_v51 = vmax.f32 %v4129_v29, 0.0  ;;  %v6578_v34 = vmax.f32 %v4130_v2, 0.0  ;;  %v6580_v24 = vmax.f32 %v4131_v11, 0.0 }
 0x168   : > { %9859 = vst [vmem:[#allocation97_spill] sm:$0xff] %v6572_v56  ;;  %v6582_v44 = vmax.f32 %v4132_v35, 0.0  ;;  %v6584_v43 = vmax.f32 %v4133_v1, 0.0  ;;  %v6586_v49 = vmax.f32 %v4134_v5, 0.0  ;;  %v6588_v50 = vmax.f32 %v4135_v16, 0.0 }
 0x169   : > { %9860 = vst [vmem:[#allocation98_spill] sm:$0xff] %v6574_v22  ;;  %v6590_v8 = vmax.f32 %v4136_v60, 0.0  ;;  %v6592_v7 = vmax.f32 %v4137_v6, 0.0  ;;  %v6594_v59 = vmax.f32 %v4138_v36, 0.0  ;;  %v4161_v29 = vperm.slane %v6190_v53, 7 }
 0x16a   : > { %9861 = vst [vmem:[#allocation99_spill] sm:$0xff] %v6576_v51  ;;  %v4162_v57 = vperm.slane %v6192_v23, 7  ;;  %v4163_v20 = vperm.slane %v6194_v54, 7  ;;  %v4164_v63 = vperm.slane %v6196_v30, 7  ;;  %v4165_v1 = vperm.slane %v6198_v31, 7 }
 0x16b   : > { %9862 = vst [vmem:[#allocation100_spill] sm:$0xff] %v6578_v34  ;;  %v4166_v17 = vperm.slane %v6201_v33, 7  ;;  %v4167_v61 = vperm.slane %v6203_v38, 7  ;;  %v4168_v47 = vperm.slane %v6205_v39, 7  ;;  %v6604_v0 = vmax.f32 %v4139_v52, 0.0 }
 0x16c   : > { %9863 = vst [vmem:[#allocation101_spill] sm:$0xff] %v6580_v24  ;;  %v6606_v45 = vmax.f32 %v4140_v42, 0.0  ;;  %v6608_v12 = vmax.f32 %v4141_v4, 0.0  ;;  %v4169_v53 = vsub.f32 %v6208_v40, %v4161_v29  ;;  %v6611_v23 = vmax.f32 %v4142_v9, 0.0 }
 0x16d   : > { %9864 = vst [vmem:[#allocation102_spill] sm:$0xff] %v6582_v44  ;;  %v4170_v54 = vsub.f32 %v6208_v40, %v4162_v57  ;;  %v4171_v30 = vsub.f32 %v6208_v40, %v4163_v20  ;;  %v4172_v31 = vsub.f32 %v6208_v40, %v4164_v63  ;;  %v4173_v33 = vsub.f32 %v6208_v40, %v4165_v1 }
 0x16e   : > { %9865 = vst [vmem:[#allocation103_spill] sm:$0xff] %v6584_v43  ;;  %v4174_v38 = vsub.f32 %v6208_v40, %v4166_v17  ;;  %v4175_v39 = vsub.f32 %v6208_v40, %v4167_v61  ;;  %v4176_v13 = vsub.f32 %v6208_v40, %v4168_v47  ;;  %v4177_v2 = vsub.f32 %v6215_v10, %v4161_v29 }
 0x16f   : > { %9866 = vst [vmem:[#allocation104_spill] sm:$0xff] %v6586_v49  ;;  %v4178_v11 = vsub.f32 %v6215_v10, %v4162_v57  ;;  %v4179_v35 = vsub.f32 %v6215_v10, %v4163_v20  ;;  %v4180_v5 = vsub.f32 %v6215_v10, %v4164_v63  ;;  %v4181_v16 = vsub.f32 %v6215_v10, %v4165_v1 }
 0x170   : > { %9867 = vst [vmem:[#allocation105_spill] sm:$0xff] %v6588_v50  ;;  %v4182_v60 = vsub.f32 %v6215_v10, %v4166_v17  ;;  %v4183_v6 = vsub.f32 %v6215_v10, %v4167_v61  ;;  %v4185_v36 = vand.u32 2147483647, %v4169_v53  ;;  %v4184_v52 = vsub.f32 %v6215_v10, %v4168_v47 }
 0x171   : > { %9868 = vst [vmem:[#allocation106_spill] sm:$0xff] %v6590_v8  ;;  %v4186_v42 = vand.u32 2147483647, %v4170_v54  ;;  %v4187_v4 = vand.u32 2147483647, %v4171_v30 }
 0x172   : > { %9869 = vst [vmem:[#allocation107_spill] sm:$0xff] %v6592_v7  ;;  %v4188_v40 = vand.u32 2147483647, %v4172_v31  ;;  %v4189_v9 = vand.u32 2147483647, %v4173_v33  ;;  %v4201_v31 = vsub.f32 1.0, %v4185_v36 }
 0x173   : > { %9870 = vst [vmem:[#allocation108_spill] sm:$0xff] %v6594_v59  ;;  %v4190_v29 = vand.u32 2147483647, %v4174_v38  ;;  %v4191_v8 = vand.u32 2147483647, %v4175_v39  ;;  %v4202_v43 = vsub.f32 1.0, %v4186_v42 }
 0x174   : > { %9871 = vst [vmem:[#allocation109_spill] sm:$0xff] %v6604_v0  ;;  %v4192_v57 = vand.u32 2147483647, %v4176_v13  ;;  %v4193_v50 = vand.u32 2147483647, %v4177_v2  ;;  %v4203_v61 = vsub.f32 1.0, %v4187_v4 }
 0x175   : > { %9872 = vst [vmem:[#allocation110_spill] sm:$0xff] %v6606_v45  ;;  %v4194_v20 = vand.u32 2147483647, %v4178_v11  ;;  %v4196_v63 = vand.u32 2147483647, %v4180_v5  ;;  %v4204_v53 = vsub.f32 1.0, %v4188_v40 }
 0x176   : > { %9873 = vst [vmem:[#allocation111_spill] sm:$0xff] %v6608_v12  ;;  %v4197_v49 = vand.u32 2147483647, %v4181_v16  ;;  %v4198_v1 = vand.u32 2147483647, %v4182_v60  ;;  %v4205_v45 = vsub.f32 1.0, %v4189_v9 }
 0x177   : > { %9874 = vst [vmem:[#allocation112_spill] sm:$0xff] %v6611_v23  ;;  %v4195_v23 = vand.u32 2147483647, %v4179_v35  ;;  %v4199_v12 = vand.u32 2147483647, %v4183_v6  ;;  %v4206_v10 = vsub.f32 1.0, %v4190_v29 }
 0x178   : > { %v4200_v17 = vand.u32 2147483647, %v4184_v52  ;;  %v4207_v47 = vsub.f32 1.0, %v4191_v8  ;;  %v4208_v54 = vsub.f32 1.0, %v4192_v57  ;;  %v4210_v30 = vsub.f32 1.0, %v4194_v20 }
 0x179   : > { %v4211_v33 = vsub.f32 1.0, %v4195_v23  ;;  %v4212_v38 = vsub.f32 1.0, %v4196_v63  ;;  %v4213_v39 = vsub.f32 1.0, %v4197_v49  ;;  %v4209_v13 = vsub.f32 1.0, %v4193_v50 }
 0x17a   : > { %v6628_v2 = vsub.f32 1.0, %v4198_v1  ;;  %v6630_v11 = vsub.f32 1.0, %v4199_v12  ;;  %v6632_v35 = vsub.f32 1.0, %v4200_v17  ;;  %v4218_v5 = vmax.f32 %v4202_v43, 0.0 }
 0x17b   : > { %v4219_v16 = vmax.f32 %v4203_v61, 0.0  ;;  %v4220_v60 = vmax.f32 %v4204_v53, 0.0  ;;  %v4221_v6 = vmax.f32 %v4205_v45, 0.0  ;;  %v4222_v52 = vmax.f32 %v4206_v10, 0.0 }
 0x17c   : > { %v4223_v42 = vmax.f32 %v4207_v47, 0.0  ;;  %v4224_v8 = vmax.f32 %v4208_v54, 0.0  ;;  %v4226_v4 = vmax.f32 %v4210_v30, 0.0  ;;  %v6634_v40 = vmax.f32 %v4201_v31, 0.0 }
 0x17d   : > { %v4227_v23 = vmax.f32 %v4211_v33, 0.0  ;;  %v4228_v36 = vmax.f32 %v4212_v38, 0.0  ;;  %v4229_v49 = vmax.f32 %v4213_v39, 0.0  ;;  %v6636_v50 = vmax.f32 %v4209_v13, 0.0 }
 0x17e   : > { %v6641_v29 = vrot.slane %v4218_v5, 7  ;;  %v6643_v45 = vrot.slane %v4219_v16, 6  ;;  %v6645_v57 = vrot.slane %v4220_v60, 5  ;;  %v6647_v20 = vrot.slane %v4221_v6, 4 }
 0x17f   : > { %v6649_v63 = vrot.slane %v4222_v52, 3  ;;  %v6651_v1 = vrot.slane %v4223_v42, 2  ;;  %v6653_v17 = vrot.slane %v4224_v8, 1  ;;  %v6655_v61 = vrot.slane %v4226_v4, 7 }
 0x180   : > { %v6657_v53 = vrot.slane %v4227_v23, 6  ;;  %v6659_v10 = vrot.slane %v4228_v36, 5  ;;  %v6661_v47 = vrot.slane %v4229_v49, 4  ;;  %v836_v54 = vsel %vm783_vm3, %v6296_v37, %v6292_v58 }
 0x181   : > { %v837_v30 = vsel %vm775_vm0, %v6298_v32, %v6300_v41  ;;  %v839_v33 = vsel %vm777_vm1, %v6302_v3, %v6304_v55  ;;  %v840_v38 = vsel %vm781_vm2, %v6308_v14, %v6313_v62  ;;  %v899_v39 = vsel %vm783_vm3, %v6318_v25, %v6294_v48 }
 0x182   : > { %9875 = vst [vmem:[#allocation113_spill] sm:$0xff] %v6657_v53  ;;  %v838_v31 = vsel %vm9712_vm5, %v837_v30, %v836_v54  ;;  %v841_v13 = vsel %vm9709_vm4, %v839_v33, %v840_v38  ;;  %v900_v5 = vsel %vm775_vm0, %v6320_v26, %v6322_v27  ;;  %v902_v16 = vsel %vm777_vm1, %v6324_v28, %v6326_v18 }
 0x183   : > { %9876 = vst [vmem:[#allocation114_spill] sm:$0xff] %v6659_v10  ;;  %v903_v60 = vsel %vm781_vm2, %v6328_v19, %v6332_v46  ;;  %v842_v6 = vsel %vm9700_vm6, %v841_v13, %v838_v31  ;;  %v901_v52 = vsel %vm9712_vm5, %v900_v5, %v899_v39  ;;  %v828_v54 = vsel %vm769_vm10, %v6292_v58, %v6296_v37  ;;  %v9878_v5 = vld [vmem:[#allocation19_spill] sm:$0xff] }
 0x184   : > { %9877 = vst [vmem:[#allocation115_spill] sm:$0xff] %v6661_v47  ;;  %v904_v42 = vsel %vm9709_vm4, %v902_v16, %v903_v60  ;;  %v6692_v8 = vrot.slane %v842_v6, 7  ;;  %v829_v33 = vsel %vm761_vm7, %v6298_v32, %v6300_v41  ;;  %v831_v38 = vsel %vm763_vm8, %v6302_v3, %v6304_v55  ;;  %v9879_v60 = vld [vmem:[#allocation27_spill] sm:$0xff] }
 0x185   : > { %v905_v4 = vsel %vm9700_vm6, %v904_v42, %v901_v52  ;;  %v830_v44 = vsel %vm9703_vm12, %v829_v33, %v828_v54  ;;  %v892_v54 = vsel %vm761_vm7, %v6320_v26, %v6322_v27  ;;  %v894_v33 = vsel %vm763_vm8, %v6324_v28, %v6326_v18 }
 0x186   : > { %v6695_v23 = vrot.slane %v905_v4, 7  ;;  %v963_v36 = vperm.slane %v6692_v8, 0  ;;  %v964_v49 = vperm.slane %v6692_v8, 1  ;;  %vm787_vm6 = vcmask 1044481  }
 0x188   : > { %v1027_v30 = vperm.slane %v6695_v23, 0  ;;  %v1028_v31 = vperm.slane %v6695_v23, 1  ;;  %v1275_v39 = vmul.f32 %v963_v36, %v6236_v21  ;;  %v1283_v13 = vmul.f32 %v963_v36, %v6258_v15 }
 0x189   : > { %v1276_v16 = vmul.f32 %v964_v49, %v9878_v5  ;;  %v1284_v6 = vmul.f32 %v964_v49, %v9879_v60  ;;  %v832_v36 = vsel %vm767_vm9, %v6308_v14, %v6313_v62 }
 0x18a   : > { %v1403_v52 = vmul.f32 %v1027_v30, %v6236_v21  ;;  %v1411_v42 = vmul.f32 %v1027_v30, %v6258_v15  ;;  %v1404_v4 = vmul.f32 %v1028_v31, %v9878_v5  ;;  %v1412_v43 = vmul.f32 %v1028_v31, %v9879_v60 }
 0x18b   : > { %v1475_v9 = vpack.c.bf16 %v1283_v13, %v1275_v39  ;;  %v1476_v12 = vpack.c.bf16 %v1284_v6, %v1276_v16  ;;  %v833_v49 = vsel %vm792_vm11, %v831_v38, %v832_v36  ;;  %v891_v30 = vsel %vm769_vm10, %v6294_v48, %v6318_v25 }
 0x18c   : > { %v1539_v0 = vpack.c.bf16 %v1411_v42, %v1403_v52  ;;  %v1540_v24 = vpack.c.bf16 %v1412_v43, %v1404_v4  ;;  %v834_v31 = vsel %vm9702_vm13, %v833_v49, %v830_v44  ;;  %v893_v38 = vsel %vm9703_vm12, %v892_v54, %v891_v30 }
 0x18d   : > { %1551 = vmatpush.bf16.msra.mxu0 %v1475_v9  ;;  %1577 = vmatpush.bf16.msra.mxu2 %v1476_v12  ;;  %v6733_v43 = vrot.slane %v834_v31, 6  ;;  %v895_v12 = vsel %vm767_vm9, %v6328_v19, %v6332_v46  ;;  %v820_v9 = vsel %vm781_vm2, %v6292_v58, %v6296_v37  ;;  %v823_v52 = vsel %vm775_vm0, %v6302_v3, %v6304_v55 }
 0x18e   : > { %1564 = vmatpush.bf16.msra.mxu1 %v1539_v0  ;;  %1590 = vmatpush.bf16.msra.mxu3 %v1540_v24  ;;  %v896_v44 = vsel %vm792_vm11, %v894_v33, %v895_v12  ;;  %v821_v24 = vsel %vm783_vm3, %v6300_v41, %v6298_v32  ;;  %v824_v42 = vsel %vm777_vm1, %v6308_v14, %v6313_v62  ;;  %vm9706_vm12 = vcmask 1043456  }
 0x18f   : > { %v955_v0 = vperm.slane %v6733_v43, 0  ;;  %v897_v39 = vsel %vm9702_vm13, %v896_v44, %v893_v38  ;;  %v956_v13 = vperm.slane %v6733_v43, 1  ;;  %v822_v16 = vsel %vm9701_vm15, %v820_v9, %v821_v24 }
 0x190   : > { %v6750_v6 = vrot.slane %v897_v39, 6  ;;  %v883_v4 = vsel %vm781_vm2, %v6294_v48, %v6318_v25  ;;  %v825_v38 = vsel %vm779_vm14, %v823_v52, %v824_v42  ;;  %v884_v12 = vsel %vm783_vm3, %v6322_v27, %v6320_v26 }
 0x191   : > { %v1259_v36 = vmul.f32 %v955_v0, %v6236_v21  ;;  %v1267_v49 = vmul.f32 %v955_v0, %v6258_v15  ;;  %v1260_v30 = vmul.f32 %v956_v13, %v9878_v5  ;;  %v1268_v31 = vmul.f32 %v956_v13, %v9879_v60 }
 0x192   : > { %v1019_v54 = vperm.slane %v6750_v6, 0  ;;  %v1020_v33 = vperm.slane %v6750_v6, 1  ;;  %v826_v24 = vsel %vm787_vm6, %v825_v38, %v822_v16  ;;  %v885_v0 = vsel %vm9701_vm15, %v883_v4, %v884_v12 }
 0x193   : > { %v1467_v44 = vpack.c.bf16 %v1267_v49, %v1259_v36  ;;  %v1468_v9 = vpack.c.bf16 %v1268_v31, %v1260_v30  ;;  %v6777_v52 = vrot.slane %v826_v24, 5  ;;  %v886_v42 = vsel %vm775_vm0, %v6324_v28, %v6326_v18 }
 0x194   : > { %v1387_v39 = vmul.f32 %v1019_v54, %v6236_v21  ;;  %v1395_v13 = vmul.f32 %v1019_v54, %v6258_v15  ;;  %v1388_v22 = vmul.f32 %v1020_v33, %v9878_v5  ;;  %v1396_v56 = vmul.f32 %v1020_v33, %v9879_v60 }
 0x195   : > { %1552 = vmatpush.bf16.msra.mxu0 %v1467_v44  ;;  %1578 = vmatpush.bf16.msra.mxu2 %v1468_v9  ;;  %v887_v16 = vsel %vm777_vm1, %v6328_v19, %v6332_v46  ;;  %vm765_vm15 = vcmask 1041408   ;;  %vm771_vm13 = vcmask 1045508   ;;  %v947_v30 = vperm.slane %v6777_v52, 0 }
 0x196   : > { %v1531_v4 = vpack.c.bf16 %v1395_v13, %v1387_v39  ;;  %v1532_v36 = vpack.c.bf16 %v1396_v56, %v1388_v22  ;;  %v888_v49 = vsel %vm779_vm14, %v886_v42, %v887_v16  ;;  %v948_v54 = vperm.slane %v6777_v52, 1 }
 0x197   : > { %v889_v31 = vsel %vm787_vm6, %v888_v49, %v885_v0  ;;  %v812_v38 = vsel %vm767_vm9, %v6292_v58, %v6296_v37  ;;  %v813_v56 = vsel %vm769_vm10, %v6298_v32, %v6300_v41  ;;  %v815_v22 = vsel %vm761_vm7, %v6302_v3, %v6304_v55 }
 0x198   : > { %1565 = vmatpush.bf16.msra.mxu1 %v1531_v4  ;;  %1591 = vmatpush.bf16.msra.mxu3 %v1532_v36  ;;  %v6789_v33 = vrot.slane %v889_v31, 5  ;;  %v1243_v12 = vmul.f32 %v947_v30, %v6236_v21  ;;  %v1251_v44 = vmul.f32 %v947_v30, %v6258_v15  ;;  %v1244_v9 = vmul.f32 %v948_v54, %v9878_v5 }
 0x199   : > { %v1252_v24 = vmul.f32 %v948_v54, %v9879_v60  ;;  %v814_v13 = vsel %vm771_vm13, %v812_v38, %v813_v56  ;;  %v816_v42 = vsel %vm763_vm8, %v6308_v14, %v6313_v62  ;;  %v875_v49 = vsel %vm767_vm9, %v6294_v48, %v6318_v25 }
 0x19a   : > { %v1011_v0 = vperm.slane %v6789_v33, 0  ;;  %v1012_v39 = vperm.slane %v6789_v33, 1  ;;  %v1459_v16 = vpack.c.bf16 %v1251_v44, %v1243_v12  ;;  %v817_v36 = vsel %vm765_vm15, %v815_v22, %v816_v42 }
 0x19b   : > { %v1460_v4 = vpack.c.bf16 %v1252_v24, %v1244_v9  ;;  %v9880_v56 = vmax.f32 %v6628_v2, 0.0  ;;  %v818_v22 = vsel %vm9706_vm12, %v817_v36, %v814_v13  ;;  %v876_v12 = vsel %vm769_vm10, %v6320_v26, %v6322_v27 }
 0x19c   : > { %v1371_v30 = vmul.f32 %v1011_v0, %v6236_v21  ;;  %v1379_v31 = vmul.f32 %v1011_v0, %v6258_v15  ;;  %v1372_v54 = vmul.f32 %v1012_v39, %v9878_v5  ;;  %v1380_v38 = vmul.f32 %v1012_v39, %v9879_v60  ;;  %1553 = vmatpush.bf16.msra.mxu0 %v1459_v16 }
 0x19d   : > { %v6820_v59 = vrot.slane %v9880_v56, 3  ;;  %1579 = vmatpush.bf16.msra.mxu2 %v1460_v4  ;;  %v878_v44 = vsel %vm761_vm7, %v6324_v28, %v6326_v18  ;;  %v6829_v0 = vrot.slane %v818_v22, 4  ;;  %v877_v2 = vsel %vm771_vm13, %v875_v49, %v876_v12 }
 0x19e   : > { %v1523_v9 = vpack.c.bf16 %v1379_v31, %v1371_v30  ;;  %v1524_v24 = vpack.c.bf16 %v1380_v38, %v1372_v54  ;;  %v879_v39 = vsel %vm763_vm8, %v6328_v19, %v6332_v46  ;;  %v801_v13 = vsel %vm777_vm1, %v6292_v58, %v6296_v37 }
 0x19f   : > { %9881 = vst [vmem:[#allocation19_spill] sm:$0xff] %v6820_v59  ;;  %v802_v42 = vsel %vm781_vm2, %v6298_v32, %v6300_v41  ;;  %v805_v16 = vsel %vm783_vm3, %v6304_v55, %v6302_v3  ;;  %v939_v4 = vperm.slane %v6829_v0, 0  ;;  %v880_v36 = vsel %vm765_vm15, %v878_v44, %v879_v39 }
 0x1a0   : > { %1566 = vmatpush.bf16.msra.mxu1 %v1523_v9  ;;  %1592 = vmatpush.bf16.msra.mxu3 %v1524_v24  ;;  %v940_v49 = vperm.slane %v6829_v0, 1  ;;  %v804_v30 = vsel %vm9709_vm4, %v801_v13, %v802_v42  ;;  %v881_v31 = vsel %vm9706_vm12, %v880_v36, %v877_v2  ;;  %v806_v54 = vsel %vm775_vm0, %v6308_v14, %v6313_v62 }
 0x1a1   : > { %v867_v38 = vsel %vm777_vm1, %v6294_v48, %v6318_v25  ;;  %v868_v56 = vsel %vm781_vm2, %v6320_v26, %v6322_v27  ;;  %v1227_v22 = vmul.f32 %v939_v4, %v6236_v21  ;;  %v1235_v12 = vmul.f32 %v939_v4, %v6258_v15 }
 0x1a2   : > { %v6860_v44 = vrot.slane %v881_v31, 4  ;;  %v1228_v9 = vmul.f32 %v940_v49, %v9878_v5  ;;  %v1236_v24 = vmul.f32 %v940_v49, %v9879_v60  ;;  %v808_v2 = vsel %vm9712_vm5, %v806_v54, %v805_v16 }
 0x1a3   : > { %v869_v39 = vsel %vm9709_vm4, %v867_v38, %v868_v56  ;;  %v870_v13 = vsel %vm783_vm3, %v6326_v18, %v6324_v28  ;;  %v1451_v42 = vpack.c.bf16 %v1235_v12, %v1227_v22  ;;  %vm9882_vm12 = vcmask 1046531  }
 0x1a4   : > { %v1003_v36 = vperm.slane %v6860_v44, 0  ;;  %v1004_v34 = vperm.slane %v6860_v44, 1  ;;  %v810_v4 = vsel %vm9882_vm12, %v804_v30, %v808_v2  ;;  %v1452_v31 = vpack.c.bf16 %v1236_v24, %v1228_v9 }
 0x1a5   : > { %v6872_v7 = vrot.slane %v810_v4, 3  ;;  %v871_v16 = vsel %vm775_vm0, %v6328_v19, %v6332_v46  ;;  %v790_v49 = vsel %vm763_vm8, %v6292_v58, %v6296_v37  ;;  %1554 = vmatpush.bf16.msra.mxu0 %v1451_v42  ;;  %v791_v24 = vsel %vm767_vm9, %v6298_v32, %v6300_v41 }
 0x1a6   : > { %v1355_v54 = vmul.f32 %v1003_v36, %v6236_v21  ;;  %v1363_v38 = vmul.f32 %v1003_v36, %v6258_v15  ;;  %v1356_v56 = vmul.f32 %v1004_v34, %v9878_v5  ;;  %v1364_v30 = vmul.f32 %v1004_v34, %v9879_v60  ;;  %1580 = vmatpush.bf16.msra.mxu2 %v1452_v31 }
 0x1a7   : > { %v931_v22 = vperm.slane %v6872_v7, 0  ;;  %v872_v12 = vsel %vm9712_vm5, %v871_v16, %v870_v13  ;;  %v932_v9 = vperm.slane %v6872_v7, 1  ;;  %v793_v36 = vsel %vm792_vm11, %v790_v49, %v791_v24 }
 0x1a8   : > { %v1515_v2 = vpack.c.bf16 %v1363_v38, %v1355_v54  ;;  %v1516_v42 = vpack.c.bf16 %v1364_v30, %v1356_v56  ;;  %v873_v4 = vsel %vm9882_vm12, %v869_v39, %v872_v12  ;;  %v794_v54 = vsel %vm769_vm10, %v6302_v3, %v6304_v55 }
 0x1a9   : > { %v1211_v51 = vmul.f32 %v931_v22, %v6236_v21  ;;  %v1219_v34 = vmul.f32 %v931_v22, %v6258_v15  ;;  %v6894_v31 = vrot.slane %v873_v4, 3  ;;  %v1212_v13 = vmul.f32 %v932_v9, %v9878_v5 }
 0x1aa   : > { %1567 = vmatpush.bf16.msra.mxu1 %v1515_v2  ;;  %1593 = vmatpush.bf16.msra.mxu3 %v1516_v42  ;;  %v1220_v16 = vmul.f32 %v932_v9, %v9879_v60  ;;  %v795_v39 = vsel %vm761_vm7, %v6308_v14, %v6313_v62  ;;  %vm9883_vm12 = vcmask 1045504   ;;  %vm9884_vm4 = vcmask 1045506  }
 0x1ab   : > { %v1443_v38 = vpack.c.bf16 %v1219_v34, %v1211_v51  ;;  %v995_v56 = vperm.slane %v6894_v31, 0  ;;  %v996_v30 = vperm.slane %v6894_v31, 1  ;;  %v797_v22 = vsel %vm9883_vm12, %v795_v39, %v794_v54 }
 0x1ac   : > { %v1444_v12 = vpack.c.bf16 %v1220_v16, %v1212_v13  ;;  %v799_v9 = vsel %vm9884_vm4, %v793_v36, %v797_v22  ;;  %v859_v24 = vsel %vm763_vm8, %v6294_v48, %v6318_v25  ;;  %v860_v2 = vsel %vm767_vm9, %v6320_v26, %v6322_v27  ;;  %vm9885_vm4 = vmmov %vm9883_vm12 }
 0x1ad   : > { %1555 = vmatpush.bf16.msra.mxu0 %v1443_v38  ;;  %v1339_v51 = vmul.f32 %v995_v56, %v6236_v21  ;;  %v1347_v42 = vmul.f32 %v995_v56, %v6258_v15  ;;  %v1340_v4 = vmul.f32 %v996_v30, %v9878_v5  ;;  %v1348_v34 = vmul.f32 %v996_v30, %v9879_v60 }
 0x1ae   : > { %1581 = vmatpush.bf16.msra.mxu2 %v1444_v12  ;;  %v6919_v13 = vrot.slane %v799_v9, 2  ;;  %v861_v36 = vsel %vm792_vm11, %v859_v24, %v860_v2  ;;  %v862_v16 = vsel %vm769_vm10, %v6324_v28, %v6326_v18  ;;  %v863_v54 = vsel %vm761_vm7, %v6328_v19, %v6332_v46 }
 0x1af   : > { %v1507_v39 = vpack.c.bf16 %v1347_v42, %v1339_v51  ;;  %v1508_v38 = vpack.c.bf16 %v1348_v34, %v1340_v4  ;;  %v864_v56 = vsel %vm9885_vm4, %v863_v54, %v862_v16  ;;  %v776_v30 = vsel %vm775_vm0, %v6292_v58, %v6296_v37 }
 0x1b0   : > { %v923_v22 = vperm.slane %v6919_v13, 0  ;;  %vm9886_vm12 = vcmask 1045506   ;;  %v924_v9 = vperm.slane %v6919_v13, 1  ;;  %v778_v24 = vsel %vm777_vm1, %v6298_v32, %v6300_v41 }
 0x1b1   : > { %v865_v12 = vsel %vm9886_vm12, %v861_v36, %v864_v56  ;;  %1568 = vmatpush.bf16.msra.mxu1 %v1507_v39  ;;  %1594 = vmatpush.bf16.msra.mxu3 %v1508_v38  ;;  %v780_v51 = vsel %vm779_vm14, %v776_v30, %v778_v24  ;;  %v782_v42 = vsel %vm781_vm2, %v6302_v3, %v6304_v55  ;;  %vm9887_vm4 = vcmask 1046533  }
 0x1b2   : > { %v6938_v2 = vrot.slane %v865_v12, 2  ;;  %v784_v4 = vsel %vm783_vm3, %v6313_v62, %v6308_v14  ;;  %v1195_v34 = vmul.f32 %v923_v22, %v6236_v21  ;;  %v1203_v36 = vmul.f32 %v923_v22, %v6258_v15  ;;  %vm9888_vm12 = vmmov %vm9887_vm4 }
 0x1b3   : > { %v1196_v16 = vmul.f32 %v924_v9, %v9878_v5  ;;  %v1204_v54 = vmul.f32 %v924_v9, %v9879_v60  ;;  %v786_v56 = vsel %vm9887_vm4, %v782_v42, %v784_v4  ;;  %v851_v30 = vsel %vm775_vm0, %v6294_v48, %v6318_v25 }
 0x1b4   : > { %v987_v39 = vperm.slane %v6938_v2, 0  ;;  %v988_v38 = vperm.slane %v6938_v2, 1  ;;  %v1435_v12 = vpack.c.bf16 %v1203_v36, %v1195_v34  ;;  %v788_v49 = vsel %vm787_vm6, %v780_v51, %v786_v56 }
 0x1b5   : > { %v1436_v24 = vpack.c.bf16 %v1204_v54, %v1196_v16  ;;  %v852_v22 = vsel %vm777_vm1, %v6320_v26, %v6322_v27  ;;  %v6965_v4 = vrot.slane %v788_v49, 1  ;;  %v854_v51 = vsel %vm781_vm2, %v6324_v28, %v6326_v18 }
 0x1b6   : > { %v1323_v9 = vmul.f32 %v987_v39, %v6236_v21  ;;  %v1331_v47 = vmul.f32 %v987_v39, %v6258_v15  ;;  %v1324_v59 = vmul.f32 %v988_v38, %v9878_v5  ;;  %v1332_v42 = vmul.f32 %v988_v38, %v9879_v60  ;;  %1556 = vmatpush.bf16.msra.mxu0 %v1435_v12 }
 0x1b7   : > { %1582 = vmatpush.bf16.msra.mxu2 %v1436_v24  ;;  %v853_v34 = vsel %vm779_vm14, %v851_v30, %v852_v22  ;;  %v855_v36 = vsel %vm783_vm3, %v6332_v46, %v6328_v19  ;;  %v762_v38 = vsel %vm761_vm7, %v6292_v58, %v6296_v37  ;;  %v915_v49 = vperm.slane %v6965_v4, 0 }
 0x1b8   : > { %v1499_v16 = vpack.c.bf16 %v1331_v47, %v1323_v9  ;;  %v1500_v54 = vpack.c.bf16 %v1332_v42, %v1324_v59  ;;  %v856_v39 = vsel %vm9888_vm12, %v854_v51, %v855_v36  ;;  %v916_v30 = vperm.slane %v6965_v4, 1 }
 0x1b9   : > { %v857_v56 = vsel %vm787_vm6, %v853_v34, %v856_v39  ;;  %v764_v12 = vsel %vm763_vm8, %v6298_v32, %v6300_v41  ;;  %v768_v58 = vsel %vm767_vm9, %v6302_v3, %v6304_v55  ;;  %v770_v37 = vsel %vm769_vm10, %v6308_v14, %v6313_v62 }
 0x1ba   : > { %1569 = vmatpush.bf16.msra.mxu1 %v1499_v16  ;;  %1595 = vmatpush.bf16.msra.mxu3 %v1500_v54  ;;  %v6984_v47 = vrot.slane %v857_v56, 1  ;;  %v766_v59 = vsel %vm765_vm15, %v762_v38, %v764_v12  ;;  %v1179_v24 = vmul.f32 %v915_v49, %v6236_v21  ;;  %v1187_v22 = vmul.f32 %v915_v49, %v6258_v15 }
 0x1bb   : > { %v1180_v32 = vmul.f32 %v916_v30, %v9878_v5  ;;  %v1188_v41 = vmul.f32 %v916_v30, %v9879_v60  ;;  %v772_v34 = vsel %vm771_vm13, %v768_v58, %v770_v37  ;;  %v844_v3 = vsel %vm761_vm7, %v6294_v48, %v6318_v25  ;;  %v9891_v37 = vld [vmem:[#allocation20_spill] sm:$0xff] }
 0x1bc   : > { %v979_v9 = vperm.slane %v6984_v47, 0  ;;  %v980_v42 = vperm.slane %v6984_v47, 1  ;;  %v1427_v55 = vpack.c.bf16 %v1187_v22, %v1179_v24  ;;  %vm9889_vm4 = vcmask 1043456  }
 0x1bd   : > { %v1428_v14 = vpack.c.bf16 %v1188_v41, %v1180_v32  ;;  %v7004_v62 = vsel %vm9889_vm4, %v766_v59, %v772_v34  ;;  %v845_v51 = vsel %vm763_vm8, %v6320_v26, %v6322_v27  ;;  %v847_v38 = vsel %vm767_vm9, %v6324_v28, %v6326_v18  ;;  %vm9890_vm12 = vmmov %vm9889_vm4  ;;  %v9893_v41 = vld [vmem:[#allocation28_spill] sm:$0xff] }
 0x1be   : > { %v1307_v36 = vmul.f32 %v979_v9, %v6236_v21  ;;  %v1315_v16 = vmul.f32 %v979_v9, %v6258_v15  ;;  %v1308_v54 = vmul.f32 %v980_v42, %v9878_v5  ;;  %v1316_v39 = vmul.f32 %v980_v42, %v9879_v60  ;;  %1557 = vmatpush.bf16.msra.mxu0 %v1427_v55 }
 0x1bf   : > { %1583 = vmatpush.bf16.msra.mxu2 %v1428_v14  ;;  %v907_v48 = vperm.slane %v7004_v62, 0  ;;  %v846_v25 = vsel %vm765_vm15, %v844_v3, %v845_v51  ;;  %v848_v26 = vsel %vm769_vm10, %v6328_v19, %v6332_v46  ;;  %v908_v30 = vperm.slane %v7004_v62, 1 }
 0x1c0   : > { %v1491_v27 = vpack.c.bf16 %v1315_v16, %v1307_v36  ;;  %v1492_v49 = vpack.c.bf16 %v1316_v39, %v1308_v54  ;;  %v849_v56 = vsel %vm771_vm13, %v847_v38, %v848_v26  ;;  %v9892_v28 = vperm.slane %v6692_v8, 2  ;;  %v9895_v38 = vld [vmem:[#allocation21_spill] sm:$0xff] }
 0x1c1   : > { %v1163_v12 = vmul.f32 %v907_v48, %v6236_v21  ;;  %v1171_v59 = vmul.f32 %v907_v48, %v6258_v15  ;;  %v7026_v58 = vsel %vm9890_vm12, %v846_v25, %v849_v56  ;;  %v1164_v46 = vmul.f32 %v908_v30, %v9878_v5 }
 0x1c2   : > { %v1277_v18 = vmul.f32 %v9892_v28, %v9891_v37  ;;  %1570 = vmatpush.bf16.msra.mxu1 %v1491_v27  ;;  %1596 = vmatpush.bf16.msra.mxu3 %v1492_v49  ;;  %v971_v19 = vperm.slane %v7026_v58, 0  ;;  %v1172_v24 = vmul.f32 %v908_v30, %v9879_v60  ;;  %v972_v22 = vperm.slane %v7026_v58, 1  ;;  %v9896_v27 = vld [vmem:[#allocation29_spill] sm:$0xff] }
 0x1c3   : > { %v1419_v32 = vpack.c.bf16 %v1171_v59, %v1163_v12  ;;  %v9894_v9 = vmov %v9892_v28  ;;  %v1029_v34 = vperm.slane %v6695_v23, 2  ;;  %v966_v3 = vperm.slane %v6692_v8, 3 }
 0x1c4   : > { %v1285_v42 = vmul.f32 %v9894_v9, %v9893_v41  ;;  %v1291_v55 = vmul.f32 %v971_v19, %v6236_v21  ;;  %v1299_v14 = vmul.f32 %v971_v19, %v6258_v15  ;;  %v1420_v51 = vpack.c.bf16 %v1172_v24, %v1164_v46 }
 0x1c5   : > { %v1292_v36 = vmul.f32 %v972_v22, %v9878_v5  ;;  %1558 = vmatpush.bf16.msra.mxu0 %v1419_v32  ;;  %v1300_v16 = vmul.f32 %v972_v22, %v9879_v60  ;;  %v1405_v39 = vmul.f32 %v1029_v34, %v9891_v37  ;;  %v1413_v48 = vmul.f32 %v1029_v34, %v9893_v41 }
 0x1c6   : > { %v1477_v54 = vpack.c.bf16 %v1285_v42, %v1277_v18  ;;  %v1483_v25 = vpack.c.bf16 %v1299_v14, %v1291_v55  ;;  %1584 = vmatpush.bf16.msra.mxu2 %v1420_v51  ;;  %v1278_v26 = vmul.f32 %v966_v3, %v9895_v38  ;;  %v1286_v49 = vmul.f32 %v966_v3, %v9896_v27 }
 0x1c7   : > { %v1030_v21 = vperm.slane %v6695_v23, 3  ;;  %v1484_v15 = vpack.c.bf16 %v1300_v16, %v1292_v36  ;;  %v1541_v56 = vpack.c.bf16 %v1413_v48, %v1405_v39  ;;  %v957_v5 = vperm.slane %v6733_v43, 2 }
 0x1c8   : > { %v1021_v60 = vperm.slane %v6750_v6, 2  ;;  %1571 = vmatpush.bf16.msra.mxu1 %v1483_v25  ;;  %v1478_v30 = vpack.c.bf16 %v1286_v49, %v1278_v26  ;;  %v958_v28 = vperm.slane %v6733_v43, 3  ;;  %v1022_v24 = vperm.slane %v6750_v6, 3 }
 0x1c9   : > { %1603 = vmatpush.bf16.msrb.mxu0 %v1477_v54  ;;  %v1406_v12 = vmul.f32 %v1030_v21, %v9895_v38  ;;  %v1414_v59 = vmul.f32 %v1030_v21, %v9896_v27  ;;  %1597 = vmatpush.bf16.msra.mxu3 %v1484_v15  ;;  %v1261_v18 = vmul.f32 %v957_v5, %v9891_v37  ;;  %v949_v14 = vperm.slane %v6777_v52, 2 }
 0x1ca   : > { %v1269_v19 = vmul.f32 %v957_v5, %v9893_v41  ;;  %v1389_v46 = vmul.f32 %v1021_v60, %v9891_v37  ;;  %1629 = vmatpush.bf16.msrb.mxu2 %v1478_v30  ;;  %v1397_v32 = vmul.f32 %v1021_v60, %v9893_v41  ;;  %v1262_v9 = vmul.f32 %v958_v28, %v9895_v38 }
 0x1cb   : > { %v1542_v22 = vpack.c.bf16 %v1414_v59, %v1406_v12  ;;  %v1270_v42 = vmul.f32 %v958_v28, %v9896_v27  ;;  %v1390_v3 = vmul.f32 %v1022_v24, %v9895_v38  ;;  %v1398_v55 = vmul.f32 %v1022_v24, %v9896_v27 }
 0x1cc   : > { %1616 = vmatpush.bf16.msrb.mxu1 %v1541_v56  ;;  %v1469_v34 = vpack.c.bf16 %v1269_v19, %v1261_v18  ;;  %v1533_v51 = vpack.c.bf16 %v1397_v32, %v1389_v46  ;;  %v1013_v16 = vperm.slane %v6789_v33, 2  ;;  %v950_v54 = vperm.slane %v6777_v52, 3 }
 0x1cd   : > { %1642 = vmatpush.bf16.msrb.mxu3 %v1542_v22  ;;  %v1470_v36 = vpack.c.bf16 %v1270_v42, %v1262_v9  ;;  %v1534_v39 = vpack.c.bf16 %v1398_v55, %v1390_v3  ;;  %v1245_v48 = vmul.f32 %v949_v14, %v9891_v37  ;;  %v1253_v25 = vmul.f32 %v949_v14, %v9893_v41 }
 0x1ce   : > { %1604 = vmatpush.bf16.msrb.mxu0 %v1469_v34  ;;  %v1014_v26 = vperm.slane %v6789_v33, 3  ;;  %v1373_v49 = vmul.f32 %v1013_v16, %v9891_v37  ;;  %v1381_v21 = vmul.f32 %v1013_v16, %v9893_v41  ;;  %v1246_v15 = vmul.f32 %v950_v54, %v9895_v38 }
 0x1cf   : > { %1630 = vmatpush.bf16.msrb.mxu2 %v1470_v36  ;;  %v941_v56 = vperm.slane %v6829_v0, 2  ;;  %v1461_v5 = vpack.c.bf16 %v1253_v25, %v1245_v48  ;;  %v1254_v60 = vmul.f32 %v950_v54, %v9896_v27  ;;  %v1005_v19 = vperm.slane %v6860_v44, 2 }
 0x1d0   : > { %1617 = vmatpush.bf16.msrb.mxu1 %v1533_v51  ;;  %v1374_v30 = vmul.f32 %v1014_v26, %v9895_v38  ;;  %v1382_v12 = vmul.f32 %v1014_v26, %v9896_v27  ;;  %v1525_v59 = vpack.c.bf16 %v1381_v21, %v1373_v49  ;;  %v942_v22 = vperm.slane %v6829_v0, 3 }
 0x1d1   : > { %1643 = vmatpush.bf16.msrb.mxu3 %v1534_v39  ;;  %v1229_v28 = vmul.f32 %v941_v56, %v9891_v37  ;;  %v1237_v18 = vmul.f32 %v941_v56, %v9893_v41  ;;  %v1462_v46 = vpack.c.bf16 %v1254_v60, %v1246_v15  ;;  %v1006_v32 = vperm.slane %v6860_v44, 3 }
 0x1d2   : > { %1605 = vmatpush.bf16.msrb.mxu0 %v1461_v5  ;;  %v1526_v24 = vpack.c.bf16 %v1382_v12, %v1374_v30  ;;  %v1357_v42 = vmul.f32 %v1005_v19, %v9891_v37  ;;  %v1365_v34 = vmul.f32 %v1005_v19, %v9893_v41  ;;  %v933_v3 = vperm.slane %v6872_v7, 2 }
 0x1d3   : > { %v1453_v9 = vpack.c.bf16 %v1237_v18, %v1229_v28  ;;  %1631 = vmatpush.bf16.msrb.mxu2 %v1462_v46  ;;  %v1230_v55 = vmul.f32 %v942_v22, %v9895_v38  ;;  %v1238_v14 = vmul.f32 %v942_v22, %v9896_v27  ;;  %v1358_v51 = vmul.f32 %v1006_v32, %v9895_v38  ;;  %v1547_v18 = vld [vmem:[%s5927_s15] sm:$0xff] }
 0x1d4   : > { %1618 = vmatpush.bf16.msrb.mxu1 %v1525_v59  ;;  %v1366_v36 = vmul.f32 %v1006_v32, %v9896_v27  ;;  %v1517_v16 = vpack.c.bf16 %v1365_v34, %v1357_v42  ;;  %v1213_v54 = vmul.f32 %v933_v3, %v9891_v37  ;;  %v1221_v39 = vmul.f32 %v933_v3, %v9893_v41  ;;  %v1548_v3 = vld [vmem:[%s5927_s15 + $0x8] sm:$0xff] }
 0x1d5   : > { %1644 = vmatpush.bf16.msrb.mxu3 %v1526_v24  ;;  %v997_v48 = vperm.slane %v6894_v31, 2  ;;  %v1454_v25 = vpack.c.bf16 %v1238_v14, %v1230_v55  ;;  %v934_v49 = vperm.slane %v6872_v7, 3  ;;  %v998_v21 = vperm.slane %v6894_v31, 3 }
 0x1d6   : > { %1606 = vmatpush.bf16.msrb.mxu0 %v1453_v9  ;;  %v1518_v26 = vpack.c.bf16 %v1366_v36, %v1358_v51  ;;  %v1445_v15 = vpack.c.bf16 %v1221_v39, %v1213_v54  ;;  %v925_v60 = vperm.slane %v6919_v13, 2  ;;  %v989_v22 = vperm.slane %v6938_v2, 2 }
 0x1d7   : > { %v1341_v56 = vmul.f32 %v997_v48, %v9891_v37  ;;  %v1349_v5 = vmul.f32 %v997_v48, %v9893_v41  ;;  %1632 = vmatpush.bf16.msrb.mxu2 %v1454_v25  ;;  %v1214_v30 = vmul.f32 %v934_v49, %v9895_v38  ;;  %v1222_v12 = vmul.f32 %v934_v49, %v9896_v27 }
 0x1d8   : > { %1619 = vmatpush.bf16.msrb.mxu1 %v1517_v16  ;;  %v1342_v59 = vmul.f32 %v998_v21, %v9895_v38  ;;  %v1350_v28 = vmul.f32 %v998_v21, %v9896_v27  ;;  %v1197_v46 = vmul.f32 %v925_v60, %v9891_v37  ;;  %v1205_v24 = vmul.f32 %v925_v60, %v9893_v41 }
 0x1d9   : > { %1645 = vmatpush.bf16.msrb.mxu3 %v1518_v26  ;;  %v1509_v19 = vpack.c.bf16 %v1349_v5, %v1341_v56  ;;  %v1446_v32 = vpack.c.bf16 %v1222_v12, %v1214_v30  ;;  %v926_v42 = vperm.slane %v6919_v13, 3  ;;  %v990_v34 = vperm.slane %v6938_v2, 3 }
 0x1da   : > { %1607 = vmatpush.bf16.msrb.mxu0 %v1445_v15  ;;  %v1510_v9 = vpack.c.bf16 %v1350_v28, %v1342_v59  ;;  %v1437_v55 = vpack.c.bf16 %v1205_v24, %v1197_v46  ;;  %v1325_v14 = vmul.f32 %v989_v22, %v9891_v37  ;;  %v1333_v51 = vmul.f32 %v989_v22, %v9893_v41 }
 0x1db   : > { %v7109_v36 = vpack.c.bf16 %v1547_v18, %v1547_v18  ;;  %1633 = vmatpush.bf16.msrb.mxu2 %v1446_v32  ;;  %v1198_v16 = vmul.f32 %v926_v42, %v9895_v38  ;;  %v1206_v54 = vmul.f32 %v926_v42, %v9896_v27  ;;  %v1326_v39 = vmul.f32 %v990_v34, %v9895_v38 }
 0x1dc   : > { %1620 = vmatpush.bf16.msrb.mxu1 %v1509_v19  ;;  %v1334_v48 = vmul.f32 %v990_v34, %v9896_v27  ;;  %v1501_v25 = vpack.c.bf16 %v1333_v51, %v1325_v14  ;;  %v7116_v26 = vpack.c.bf16 %v1548_v3, %v1548_v3  ;;  %v917_v49 = vperm.slane %v6965_v4, 2 }
 0x1dd   : > { %1646 = vmatpush.bf16.msrb.mxu3 %v1510_v9  ;;  %1585 = vmatmul.bf16.vlgmr.msra.gmra.mxu2 %v7109_v36  ;;  %v981_v21 = vperm.slane %v6984_v47, 2  ;;  %v1438_v15 = vpack.c.bf16 %v1206_v54, %v1198_v16  ;;  %v918_v5 = vperm.slane %v6965_v4, 3  ;;  %v982_v60 = vperm.slane %v6984_v47, 3 }
 0x1de   : > { %1608 = vmatpush.bf16.msrb.mxu0 %v1437_v55  ;;  %v1502_v56 = vpack.c.bf16 %v1334_v48, %v1326_v39  ;;  %1598 = vmatmul.bf16.vlgmr.msra.gmra.mxu3 %v7116_v26  ;;  %v1181_v30 = vmul.f32 %v917_v49, %v9891_v37  ;;  %v1189_v12 = vmul.f32 %v917_v49, %v9893_v41  ;;  %v909_v28 = vperm.slane %v7004_v62, 2 }
 0x1df   : > { %v1309_v59 = vmul.f32 %v981_v21, %v9891_v37  ;;  %1634 = vmatpush.bf16.msrb.mxu2 %v1438_v15  ;;  %v1317_v18 = vmul.f32 %v981_v21, %v9893_v41  ;;  %v1182_v19 = vmul.f32 %v918_v5, %v9895_v38  ;;  %v1190_v46 = vmul.f32 %v918_v5, %v9896_v27 }
 0x1e0   : > { %1621 = vmatpush.bf16.msrb.mxu1 %v1501_v25  ;;  %v1310_v24 = vmul.f32 %v982_v60, %v9895_v38  ;;  %v1429_v22 = vpack.c.bf16 %v1189_v12, %v1181_v30  ;;  %v1318_v32 = vmul.f32 %v982_v60, %v9896_v27  ;;  %1559 = vmatmul.bf16.vlgmr.msra.gmra.mxu0 %v7109_v36  ;;  %v973_v42 = vperm.slane %v7026_v58, 2  ;;  %v9897_v60 = vld [vmem:[#allocation22_spill] sm:$0xff] }
 0x1e1   : > { %1647 = vmatpush.bf16.msrb.mxu3 %v1502_v56  ;;  %v1165_v9 = vmul.f32 %v909_v28, %v9891_v37  ;;  %v1493_v34 = vpack.c.bf16 %v1317_v18, %v1309_v59  ;;  %v1430_v3 = vpack.c.bf16 %v1190_v46, %v1182_v19  ;;  %1572 = vmatmul.bf16.vlgmr.msra.gmra.mxu1 %v7116_v26  ;;  %v910_v14 = vperm.slane %v7004_v62, 3  ;;  %v9898_v12 = vld [vmem:[#allocation30_spill] sm:$0xff] }
 0x1e2   : > { %v1173_v55 = vmul.f32 %v909_v28, %v9893_v41  ;;  %1609 = vmatpush.bf16.msrb.mxu0 %v1429_v22  ;;  %v1494_v51 = vpack.c.bf16 %v1318_v32, %v1310_v24  ;;  %v1293_v16 = vmul.f32 %v973_v42, %v9891_v37  ;;  %v1301_v54 = vmul.f32 %v973_v42, %v9893_v41  ;;  %v9900_v32 = vld [vmem:[#allocation31_spill] sm:$0xff] }
 0x1e3   : > { %v974_v39 = vperm.slane %v7026_v58, 3  ;;  %1635 = vmatpush.bf16.msrb.mxu2 %v1430_v3  ;;  %v1166_v25 = vmul.f32 %v910_v14, %v9895_v38  ;;  %v1174_v49 = vmul.f32 %v910_v14, %v9896_v27  ;;  %v967_v21 = vperm.slane %v6692_v8, 4 }
 0x1e4   : > { %1622 = vmatpush.bf16.msrb.mxu1 %v1493_v34  ;;  %v1421_v48 = vpack.c.bf16 %v1173_v55, %v1165_v9  ;;  %v1485_v15 = vpack.c.bf16 %v1301_v54, %v1293_v16  ;;  %v1031_v37 = vperm.slane %v6695_v23, 4  ;;  %v968_v28 = vperm.slane %v6692_v8, 5 }
 0x1e5   : > { %1648 = vmatpush.bf16.msrb.mxu3 %v1494_v51  ;;  %v1294_v56 = vmul.f32 %v974_v39, %v9895_v38  ;;  %v1302_v5 = vmul.f32 %v974_v39, %v9896_v27  ;;  %v1422_v41 = vpack.c.bf16 %v1174_v49, %v1166_v25  ;;  %v1279_v30 = vmul.f32 %v967_v21, %v9897_v60  ;;  %v9899_v27 = vld [vmem:[#allocation24_spill] sm:$0xff] }
 0x1e6   : > { %v1287_v59 = vmul.f32 %v967_v21, %v9898_v12  ;;  %1610 = vmatpush.bf16.msrb.mxu0 %v1421_v48  ;;  %v1407_v19 = vmul.f32 %v1031_v37, %v9897_v60  ;;  %v1415_v46 = vmul.f32 %v1031_v37, %v9898_v12  ;;  %v1032_v24 = vperm.slane %v6695_v23, 5 }
 0x1e7   : > { %v1486_v18 = vpack.c.bf16 %v1302_v5, %v1294_v56  ;;  %1636 = vmatpush.bf16.msrb.mxu2 %v1422_v41  ;;  %v1280_v22 = vmul.f32 %v968_v28, %v9899_v27  ;;  %v1288_v9 = vmul.f32 %v968_v28, %v9900_v32  ;;  %v959_v42 = vperm.slane %v6733_v43, 4 }
 0x1e8   : > { %1623 = vmatpush.bf16.msrb.mxu1 %v1485_v15  ;;  %v1479_v38 = vpack.c.bf16 %v1287_v59, %v1279_v30  ;;  %v1543_v34 = vpack.c.bf16 %v1415_v46, %v1407_v19  ;;  %v1408_v3 = vmul.f32 %v1032_v24, %v9899_v27  ;;  %v1416_v55 = vmul.f32 %v1032_v24, %v9900_v32 }
 0x1e9   : > { %1649 = vmatpush.bf16.msrb.mxu3 %v1486_v18  ;;  %v1023_v14 = vperm.slane %v6750_v6, 4  ;;  %v1480_v51 = vpack.c.bf16 %v1288_v9, %v1280_v22  ;;  %v1263_v16 = vmul.f32 %v959_v42, %v9897_v60  ;;  %v1271_v54 = vmul.f32 %v959_v42, %v9898_v12 }
 0x1ea   : > { %1655 = vmatpush.bf16.msra.mxu0 %v1479_v38  ;;  %v960_v39 = vperm.slane %v6733_v43, 5  ;;  %v1544_v48 = vpack.c.bf16 %v1416_v55, %v1408_v3  ;;  %v1024_v21 = vperm.slane %v6750_v6, 5  ;;  %v951_v37 = vperm.slane %v6777_v52, 4 }
 0x1eb   : > { %v1391_v25 = vmul.f32 %v1023_v14, %v9897_v60  ;;  %v1399_v49 = vmul.f32 %v1023_v14, %v9898_v12  ;;  %1681 = vmatpush.bf16.msra.mxu2 %v1480_v51  ;;  %v1471_v15 = vpack.c.bf16 %v1271_v54, %v1263_v16  ;;  %v1015_v28 = vperm.slane %v6789_v33, 4 }
 0x1ec   : > { %1668 = vmatpush.bf16.msra.mxu1 %v1543_v34  ;;  %v1264_v56 = vmul.f32 %v960_v39, %v9899_v27  ;;  %v1272_v5 = vmul.f32 %v960_v39, %v9900_v32  ;;  %v1392_v30 = vmul.f32 %v1024_v21, %v9899_v27  ;;  %v1400_v59 = vmul.f32 %v1024_v21, %v9900_v32 }
 0x1ed   : > { %1694 = vmatpush.bf16.msra.mxu3 %v1544_v48  ;;  %v1535_v41 = vpack.c.bf16 %v1399_v49, %v1391_v25  ;;  %1637 = vmatmul.bf16.vlgmr.msrb.gmra.mxu2 %v7109_v36  ;;  %v1247_v19 = vmul.f32 %v951_v37, %v9897_v60  ;;  %v1255_v46 = vmul.f32 %v951_v37, %v9898_v12  ;;  %v952_v24 = vperm.slane %v6777_v52, 5 }
 0x1ee   : > { %1656 = vmatpush.bf16.msra.mxu0 %v1471_v15  ;;  %v1472_v18 = vpack.c.bf16 %v1272_v5, %v1264_v56  ;;  %v1536_v38 = vpack.c.bf16 %v1400_v59, %v1392_v30  ;;  %v1375_v22 = vmul.f32 %v1015_v28, %v9897_v60  ;;  %v1383_v9 = vmul.f32 %v1015_v28, %v9898_v12 }
 0x1ef   : > { %v1016_v42 = vperm.slane %v6789_v33, 5  ;;  %1650 = vmatmul.bf16.vlgmr.msrb.gmra.mxu3 %v7116_v26  ;;  %v1463_v34 = vpack.c.bf16 %v1255_v46, %v1247_v19  ;;  %v1248_v3 = vmul.f32 %v952_v24, %v9899_v27  ;;  %v1256_v55 = vmul.f32 %v952_v24, %v9900_v32 }
 0x1f0   : > { %1669 = vmatpush.bf16.msra.mxu1 %v1535_v41  ;;  %1682 = vmatpush.bf16.msra.mxu2 %v1472_v18  ;;  %v943_v14 = vperm.slane %v6829_v0, 4  ;;  %v1527_v51 = vpack.c.bf16 %v1383_v9, %v1375_v22  ;;  %v1007_v39 = vperm.slane %v6860_v44, 4  ;;  %v944_v21 = vperm.slane %v6829_v0, 5 }
 0x1f1   : > { %1695 = vmatpush.bf16.msra.mxu3 %v1536_v38  ;;  %v1376_v16 = vmul.f32 %v1016_v42, %v9899_v27  ;;  %v1384_v54 = vmul.f32 %v1016_v42, %v9900_v32  ;;  %1611 = vmatmul.bf16.vlgmr.msrb.gmra.mxu0 %v7109_v36  ;;  %v1464_v48 = vpack.c.bf16 %v1256_v55, %v1248_v3  ;;  %v1008_v37 = vperm.slane %v6860_v44, 5 }
 0x1f2   : > { %1657 = vmatpush.bf16.msra.mxu0 %v1463_v34  ;;  %v1231_v25 = vmul.f32 %v943_v14, %v9897_v60  ;;  %v1239_v49 = vmul.f32 %v943_v14, %v9898_v12  ;;  %1624 = vmatmul.bf16.vlgmr.msrb.gmra.mxu1 %v7116_v26  ;;  %v1359_v56 = vmul.f32 %v1007_v39, %v9897_v60  ;;  %v935_v28 = vperm.slane %v6872_v7, 4 }
 0x1f3   : > { %v1528_v15 = vpack.c.bf16 %v1384_v54, %v1376_v16  ;;  %v1367_v5 = vmul.f32 %v1007_v39, %v9898_v12  ;;  %v1232_v30 = vmul.f32 %v944_v21, %v9899_v27  ;;  %v1240_v59 = vmul.f32 %v944_v21, %v9900_v32 }
 0x1f4   : > { %1670 = vmatpush.bf16.msra.mxu1 %v1527_v51  ;;  %1683 = vmatpush.bf16.msra.mxu2 %v1464_v48  ;;  %v1455_v41 = vpack.c.bf16 %v1239_v49, %v1231_v25  ;;  %v1360_v19 = vmul.f32 %v1008_v37, %v9899_v27  ;;  %v1368_v46 = vmul.f32 %v1008_v37, %v9900_v32  ;;  %v999_v24 = vperm.slane %v6894_v31, 4 }
 0x1f5   : > { %1696 = vmatpush.bf16.msra.mxu3 %v1528_v15  ;;  %v1519_v18 = vpack.c.bf16 %v1367_v5, %v1359_v56  ;;  %v1456_v38 = vpack.c.bf16 %v1240_v59, %v1232_v30  ;;  %v1215_v22 = vmul.f32 %v935_v28, %v9897_v60  ;;  %v1223_v9 = vmul.f32 %v935_v28, %v9898_v12 }
 0x1f6   : > { %1658 = vmatpush.bf16.msra.mxu0 %v1455_v41  ;;  %v936_v42 = vperm.slane %v6872_v7, 5  ;;  %v1520_v34 = vpack.c.bf16 %v1368_v46, %v1360_v19  ;;  %v1343_v3 = vmul.f32 %v999_v24, %v9897_v60  ;;  %v1351_v55 = vmul.f32 %v999_v24, %v9898_v12 }
 0x1f7   : > { %v1000_v14 = vperm.slane %v6894_v31, 5  ;;  %v1447_v51 = vpack.c.bf16 %v1223_v9, %v1215_v22  ;;  %v927_v39 = vperm.slane %v6919_v13, 4  ;;  %v991_v21 = vperm.slane %v6938_v2, 4 }
 0x1f8   : > { %1671 = vmatpush.bf16.msra.mxu1 %v1519_v18  ;;  %1684 = vmatpush.bf16.msra.mxu2 %v1456_v38  ;;  %v1216_v16 = vmul.f32 %v936_v42, %v9899_v27  ;;  %v1224_v54 = vmul.f32 %v936_v42, %v9900_v32  ;;  %v1511_v48 = vpack.c.bf16 %v1351_v55, %v1343_v3  ;;  %v928_v37 = vperm.slane %v6919_v13, 5 }
 0x1f9   : > { %1697 = vmatpush.bf16.msra.mxu3 %v1520_v34  ;;  %v1344_v25 = vmul.f32 %v1000_v14, %v9899_v27  ;;  %v1352_v49 = vmul.f32 %v1000_v14, %v9900_v32  ;;  %v1199_v56 = vmul.f32 %v927_v39, %v9897_v60  ;;  %v1207_v5 = vmul.f32 %v927_v39, %v9898_v12 }
 0x1fa   : > { %1659 = vmatpush.bf16.msra.mxu0 %v1447_v51  ;;  %v1448_v15 = vpack.c.bf16 %v1224_v54, %v1216_v16  ;;  %v1327_v30 = vmul.f32 %v991_v21, %v9897_v60  ;;  %v1335_v59 = vmul.f32 %v991_v21, %v9898_v12  ;;  %v992_v28 = vperm.slane %v6938_v2, 5 }
 0x1fb   : > { %v1512_v41 = vpack.c.bf16 %v1352_v49, %v1344_v25  ;;  %v1439_v18 = vpack.c.bf16 %v1207_v5, %v1199_v56  ;;  %v1200_v19 = vmul.f32 %v928_v37, %v9899_v27  ;;  %v1208_v46 = vmul.f32 %v928_v37, %v9900_v32 }
 0x1fc   : > { %1672 = vmatpush.bf16.msra.mxu1 %v1511_v48  ;;  %1685 = vmatpush.bf16.msra.mxu2 %v1448_v15  ;;  %v919_v24 = vperm.slane %v6965_v4, 4  ;;  %v1503_v38 = vpack.c.bf16 %v1335_v59, %v1327_v30  ;;  %v1328_v22 = vmul.f32 %v992_v28, %v9899_v27  ;;  %v1336_v9 = vmul.f32 %v992_v28, %v9900_v32 }
 0x1fd   : > { %1698 = vmatpush.bf16.msra.mxu3 %v1512_v41  ;;  %v983_v42 = vperm.slane %v6984_v47, 4  ;;  %v1440_v34 = vpack.c.bf16 %v1208_v46, %v1200_v19  ;;  %v920_v14 = vperm.slane %v6965_v4, 5  ;;  %v984_v39 = vperm.slane %v6984_v47, 5 }
 0x1fe   : > { %1660 = vmatpush.bf16.msra.mxu0 %v1439_v18  ;;  %v1183_v3 = vmul.f32 %v919_v24, %v9897_v60  ;;  %v1191_v55 = vmul.f32 %v919_v24, %v9898_v12  ;;  %v1504_v51 = vpack.c.bf16 %v1336_v9, %v1328_v22  ;;  %v911_v21 = vperm.slane %v7004_v62, 4 }
 0x1ff   : > { %v1311_v16 = vmul.f32 %v983_v42, %v9897_v60  ;;  %v1319_v54 = vmul.f32 %v983_v42, %v9898_v12  ;;  %v1184_v25 = vmul.f32 %v920_v14, %v9899_v27  ;;  %v1192_v49 = vmul.f32 %v920_v14, %v9900_v32  ;;  %v9901_v14 = vld [vmem:[#allocation25_spill] sm:$0xff] }
 0x200   : > { %1673 = vmatpush.bf16.msra.mxu1 %v1503_v38  ;;  %1686 = vmatpush.bf16.msra.mxu2 %v1440_v34  ;;  %v1431_v48 = vpack.c.bf16 %v1191_v55, %v1183_v3  ;;  %v1312_v56 = vmul.f32 %v984_v39, %v9899_v27  ;;  %v1320_v5 = vmul.f32 %v984_v39, %v9900_v32  ;;  %v975_v37 = vperm.slane %v7026_v58, 4 }
 0x201   : > { %1699 = vmatpush.bf16.msra.mxu3 %v1504_v51  ;;  %v1495_v15 = vpack.c.bf16 %v1319_v54, %v1311_v16  ;;  %v1432_v41 = vpack.c.bf16 %v1192_v49, %v1184_v25  ;;  %v1167_v30 = vmul.f32 %v911_v21, %v9897_v60  ;;  %v1175_v59 = vmul.f32 %v911_v21, %v9898_v12  ;;  %v9902_v16 = vld [vmem:[#allocation23_spill] sm:$0xff]  ;;  %v9903_v21 = vld [vmem:[#allocation26_spill] sm:$0xff] }
 0x202   : > { %1661 = vmatpush.bf16.msra.mxu0 %v1431_v48  ;;  %v912_v28 = vperm.slane %v7004_v62, 5  ;;  %v1496_v18 = vpack.c.bf16 %v1320_v5, %v1312_v56  ;;  %v1295_v19 = vmul.f32 %v975_v37, %v9897_v60  ;;  %v1303_v46 = vmul.f32 %v975_v37, %v9898_v12  ;;  %v9904_v56 = vld [vmem:[#allocation32_spill] sm:$0xff] }
 0x203   : > { %v976_v24 = vperm.slane %v7026_v58, 5  ;;  %v1423_v38 = vpack.c.bf16 %v1175_v59, %v1167_v30  ;;  %v969_v42 = vperm.slane %v6692_v8, 6  ;;  %v1033_v60 = vperm.slane %v6695_v23, 6 }
 0x204   : > { %1674 = vmatpush.bf16.msra.mxu1 %v1495_v15  ;;  %1687 = vmatpush.bf16.msra.mxu2 %v1432_v41  ;;  %v1168_v22 = vmul.f32 %v912_v28, %v9899_v27  ;;  %v1176_v9 = vmul.f32 %v912_v28, %v9900_v32  ;;  %v1487_v34 = vpack.c.bf16 %v1303_v46, %v1295_v19  ;;  %v970_v39 = vperm.slane %v6692_v8, 7 }
 0x205   : > { %1700 = vmatpush.bf16.msra.mxu3 %v1496_v18  ;;  %v1296_v3 = vmul.f32 %v976_v24, %v9899_v27  ;;  %v1304_v55 = vmul.f32 %v976_v24, %v9900_v32  ;;  %v1281_v51 = vmul.f32 %v969_v42, %v9901_v14  ;;  %v1289_v54 = vmul.f32 %v969_v42, %v9902_v16 }
 0x206   : > { %1662 = vmatpush.bf16.msra.mxu0 %v1423_v38  ;;  %v1424_v12 = vpack.c.bf16 %v1176_v9, %v1168_v22  ;;  %v1409_v25 = vmul.f32 %v1033_v60, %v9901_v14  ;;  %v1417_v49 = vmul.f32 %v1033_v60, %v9902_v16  ;;  %v1034_v27 = vperm.slane %v6695_v23, 7 }
 0x207   : > { %v1488_v48 = vpack.c.bf16 %v1304_v55, %v1296_v3  ;;  %v1481_v32 = vpack.c.bf16 %v1289_v54, %v1281_v51  ;;  %v1282_v15 = vmul.f32 %v970_v39, %v9903_v21  ;;  %v1290_v5 = vmul.f32 %v970_v39, %v9904_v56 }
 0x208   : > { %1675 = vmatpush.bf16.msra.mxu1 %v1487_v34  ;;  %1688 = vmatpush.bf16.msra.mxu2 %v1424_v12  ;;  %v961_v37 = vperm.slane %v6733_v43, 6  ;;  %v1545_v41 = vpack.c.bf16 %v1417_v49, %v1409_v25  ;;  %v1410_v8 = vmul.f32 %v1034_v27, %v9903_v21  ;;  %v1418_v30 = vmul.f32 %v1034_v27, %v9904_v56 }
 0x209   : > { %1701 = vmatpush.bf16.msra.mxu3 %v1488_v48  ;;  %v1025_v59 = vperm.slane %v6750_v6, 6  ;;  %1663 = vmatmul.bf16.vlgmr.msra.gmra.mxu0 %v7109_v36  ;;  %v1482_v23 = vpack.c.bf16 %v1290_v5, %v1282_v15  ;;  %v962_v19 = vperm.slane %v6733_v43, 7  ;;  %v1026_v22 = vperm.slane %v6750_v6, 7 }
 0x20a   : > { %1707 = vmatpush.bf16.msrb.mxu0 %v1481_v32  ;;  %v1265_v28 = vmul.f32 %v961_v37, %v9901_v14  ;;  %v1273_v18 = vmul.f32 %v961_v37, %v9902_v16  ;;  %v1546_v46 = vpack.c.bf16 %v1418_v30, %v1410_v8  ;;  %v953_v43 = vperm.slane %v6777_v52, 6 }
 0x20b   : > { %1676 = vmatmul.bf16.vlgmr.msra.gmra.mxu1 %v7116_v26  ;;  %v1393_v24 = vmul.f32 %v1025_v59, %v9901_v14  ;;  %v1401_v38 = vmul.f32 %v1025_v59, %v9902_v16  ;;  %1689 = vmatmul.bf16.vlgmr.msra.gmra.mxu2 %v7109_v36  ;;  %v1266_v42 = vmul.f32 %v962_v19, %v9903_v21  ;;  %v1017_v6 = vperm.slane %v6789_v33, 6 }
 0x20c   : > { %1720 = vmatpush.bf16.msrb.mxu1 %v1545_v41  ;;  %1733 = vmatpush.bf16.msrb.mxu2 %v1482_v23  ;;  %v1473_v9 = vpack.c.bf16 %v1273_v18, %v1265_v28  ;;  %v1274_v34 = vmul.f32 %v962_v19, %v9904_v56  ;;  %v1394_v55 = vmul.f32 %v1026_v22, %v9903_v21  ;;  %v954_v39 = vperm.slane %v6777_v52, 7 }
 0x20d   : > { %1702 = vmatmul.bf16.vlgmr.msra.gmra.mxu3 %v7116_v26  ;;  %v1537_v3 = vpack.c.bf16 %v1401_v38, %v1393_v24  ;;  %v1402_v60 = vmul.f32 %v1026_v22, %v9904_v56  ;;  %v1249_v51 = vmul.f32 %v953_v43, %v9901_v14  ;;  %v1257_v54 = vmul.f32 %v953_v43, %v9902_v16 }
 0x20e   : > { %1746 = vmatpush.bf16.msrb.mxu3 %v1546_v46  ;;  %1708 = vmatpush.bf16.msrb.mxu0 %v1473_v9  ;;  %v1474_v12 = vpack.c.bf16 %v1274_v34, %v1266_v42  ;;  %v1377_v25 = vmul.f32 %v1017_v6, %v9901_v14  ;;  %v1385_v49 = vmul.f32 %v1017_v6, %v9902_v16  ;;  %v1018_v27 = vperm.slane %v6789_v33, 7 }
 0x20f   : > { %v1538_v48 = vpack.c.bf16 %v1402_v60, %v1394_v55  ;;  %v1465_v32 = vpack.c.bf16 %v1257_v54, %v1249_v51  ;;  %v1250_v15 = vmul.f32 %v954_v39, %v9903_v21  ;;  %v1258_v5 = vmul.f32 %v954_v39, %v9904_v56 }
 0x210   : > { %1721 = vmatpush.bf16.msrb.mxu1 %v1537_v3  ;;  %1734 = vmatpush.bf16.msrb.mxu2 %v1474_v12  ;;  %v945_v37 = vperm.slane %v6829_v0, 6  ;;  %v1529_v41 = vpack.c.bf16 %v1385_v49, %v1377_v25  ;;  %v1378_v52 = vmul.f32 %v1018_v27, %v9903_v21  ;;  %v1386_v8 = vmul.f32 %v1018_v27, %v9904_v56 }
 0x211   : > { %v1009_v30 = vperm.slane %v6860_v44, 6  ;;  %v1466_v59 = vpack.c.bf16 %v1258_v5, %v1250_v15  ;;  %v946_v28 = vperm.slane %v6829_v0, 7  ;;  %v1010_v24 = vperm.slane %v6860_v44, 7 }
 0x212   : > { %1747 = vmatpush.bf16.msrb.mxu3 %v1538_v48  ;;  %1709 = vmatpush.bf16.msrb.mxu0 %v1465_v32  ;;  %v1233_v33 = vmul.f32 %v945_v37, %v9901_v14  ;;  %v1241_v23 = vmul.f32 %v945_v37, %v9902_v16  ;;  %v1530_v18 = vpack.c.bf16 %v1386_v8, %v1378_v52  ;;  %v937_v42 = vperm.slane %v6872_v7, 6 }
 0x213   : > { %v1361_v19 = vmul.f32 %v1009_v30, %v9901_v14  ;;  %v1369_v46 = vmul.f32 %v1009_v30, %v9902_v16  ;;  %v1234_v22 = vmul.f32 %v946_v28, %v9903_v21  ;;  %v1242_v9 = vmul.f32 %v946_v28, %v9904_v56 }
 0x214   : > { %1722 = vmatpush.bf16.msrb.mxu1 %v1529_v41  ;;  %1735 = vmatpush.bf16.msrb.mxu2 %v1466_v59  ;;  %v1457_v38 = vpack.c.bf16 %v1241_v23, %v1233_v33  ;;  %v1362_v0 = vmul.f32 %v1010_v24, %v9903_v21  ;;  %v1370_v43 = vmul.f32 %v1010_v24, %v9904_v56  ;;  %v1001_v3 = vperm.slane %v6894_v31, 6 }
 0x215   : > { %v1521_v34 = vpack.c.bf16 %v1369_v46, %v1361_v19  ;;  %v1458_v55 = vpack.c.bf16 %v1242_v9, %v1234_v22  ;;  %v1217_v44 = vmul.f32 %v937_v42, %v9901_v14  ;;  %v1225_v60 = vmul.f32 %v937_v42, %v9902_v16 }
 0x216   : > { %1748 = vmatpush.bf16.msrb.mxu3 %v1530_v18  ;;  %1710 = vmatpush.bf16.msrb.mxu0 %v1457_v38  ;;  %v938_v6 = vperm.slane %v6872_v7, 7  ;;  %v1522_v12 = vpack.c.bf16 %v1370_v43, %v1362_v0  ;;  %v1345_v51 = vmul.f32 %v1001_v3, %v9901_v14  ;;  %v1353_v54 = vmul.f32 %v1001_v3, %v9902_v16 }
 0x217   : > { %v1002_v39 = vperm.slane %v6894_v31, 7  ;;  %v1449_v48 = vpack.c.bf16 %v1225_v60, %v1217_v44  ;;  %v929_v27 = vperm.slane %v6919_v13, 6  ;;  %v993_v5 = vperm.slane %v6938_v2, 6 }
 0x218   : > { %1723 = vmatpush.bf16.msrb.mxu1 %v1521_v34  ;;  %1736 = vmatpush.bf16.msrb.mxu2 %v1458_v55  ;;  %v1218_v25 = vmul.f32 %v938_v6, %v9903_v21  ;;  %v1226_v49 = vmul.f32 %v938_v6, %v9904_v56  ;;  %v1513_v32 = vpack.c.bf16 %v1353_v54, %v1345_v51  ;;  %v930_v52 = vperm.slane %v6919_v13, 7 }
 0x219   : > { %v1346_v7 = vmul.f32 %v1002_v39, %v9903_v21  ;;  %v1354_v15 = vmul.f32 %v1002_v39, %v9904_v56  ;;  %v1201_v31 = vmul.f32 %v929_v27, %v9901_v14  ;;  %v1209_v41 = vmul.f32 %v929_v27, %v9902_v16 }
 0x21a   : > { %1749 = vmatpush.bf16.msrb.mxu3 %v1522_v12  ;;  %1711 = vmatpush.bf16.msrb.mxu0 %v1449_v48  ;;  %v1450_v37 = vpack.c.bf16 %v1226_v49, %v1218_v25  ;;  %v1329_v30 = vmul.f32 %v993_v5, %v9901_v14  ;;  %v1337_v59 = vmul.f32 %v993_v5, %v9902_v16  ;;  %v994_v33 = vperm.slane %v6938_v2, 7 }
 0x21b   : > { %v1514_v8 = vpack.c.bf16 %v1354_v15, %v1346_v7  ;;  %v1441_v23 = vpack.c.bf16 %v1209_v41, %v1201_v31  ;;  %v1202_v28 = vmul.f32 %v930_v52, %v9903_v21  ;;  %v1210_v18 = vmul.f32 %v930_v52, %v9904_v56  ;;  %v9905_v31 = vld [vmem:[#allocation49_spill] sm:$0xff]  ;;  %v9906_v41 = vld [vmem:[#allocation51_spill] sm:$0xff] }
 0x21c   : > { %1724 = vmatpush.bf16.msrb.mxu1 %v1513_v32  ;;  %1737 = vmatpush.bf16.msrb.mxu2 %v1450_v37  ;;  %v921_v19 = vperm.slane %v6965_v4, 6  ;;  %v1505_v46 = vpack.c.bf16 %v1337_v59, %v1329_v30  ;;  %v1330_v13 = vmul.f32 %v994_v33, %v9903_v21  ;;  %v1338_v24 = vmul.f32 %v994_v33, %v9904_v56  ;;  %v9907_v30 = vld [vmem:[#allocation53_spill] sm:$0xff] }
 0x21d   : > { %v985_v38 = vperm.slane %v6984_v47, 6  ;;  %v1442_v22 = vpack.c.bf16 %v1210_v18, %v1202_v28  ;;  %v922_v42 = vperm.slane %v6965_v4, 7  ;;  %v986_v3 = vperm.slane %v6984_v47, 7  ;;  %v9910_v28 = vld [vmem:[#allocation54_spill] sm:$0xff] }
 0x21e   : > { %1750 = vmatpush.bf16.msrb.mxu3 %v1514_v8  ;;  %1712 = vmatpush.bf16.msrb.mxu0 %v1441_v23  ;;  %v1185_v2 = vmul.f32 %v921_v19, %v9901_v14  ;;  %v1193_v9 = vmul.f32 %v921_v19, %v9902_v16  ;;  %v1506_v34 = vpack.c.bf16 %v1338_v24, %v1330_v13  ;;  %v913_v6 = vperm.slane %v7004_v62, 6  ;;  %v9909_v23 = vld [vmem:[#allocation55_spill] sm:$0xff]  ;;  %v9911_v19 = vld [vmem:[#allocation57_spill] sm:$0xff]  ;;  %v9914_v24 = vld [vmem:[#allocation50_spill] sm:$0xff] }
 0x21f   : > { %v1313_v0 = vmul.f32 %v985_v38, %v9901_v14  ;;  %v1321_v43 = vmul.f32 %v985_v38, %v9902_v16  ;;  %v1186_v44 = vmul.f32 %v922_v42, %v9903_v21  ;;  %v1194_v60 = vmul.f32 %v922_v42, %v9904_v56  ;;  %v9915_v38 = vld [vmem:[#allocation58_spill] sm:$0xff] }
 0x220   : > { %1725 = vmatpush.bf16.msrb.mxu1 %v1505_v46  ;;  %1738 = vmatpush.bf16.msrb.mxu2 %v1442_v22  ;;  %v1433_v55 = vpack.c.bf16 %v1193_v9, %v1185_v2  ;;  %v1314_v4 = vmul.f32 %v986_v3, %v9903_v21  ;;  %v1322_v51 = vmul.f32 %v986_v3, %v9904_v56  ;;  %v977_v54 = vperm.slane %v7026_v58, 6  ;;  %v9912_v46 = vld [vmem:[#allocation56_spill] sm:$0xff]  ;;  %v9917_v9 = vld [vmem:[#allocation59_spill] sm:$0xff]  ;;  %v9920_v3 = vld [vmem:[#allocation61_spill] sm:$0xff] }
 0x221   : > { %v1497_v12 = vpack.c.bf16 %v1321_v43, %v1313_v0  ;;  %v1434_v39 = vpack.c.bf16 %v1194_v60, %v1186_v44  ;;  %v1169_v47 = vmul.f32 %v913_v6, %v9901_v14  ;;  %v1177_v48 = vmul.f32 %v913_v6, %v9902_v16  ;;  %v9916_v2 = vld [vmem:[#allocation60_spill] sm:$0xff]  ;;  %v9919_v43 = vld [vmem:[#allocation62_spill] sm:$0xff]  ;;  %v9922_v60 = vld [vmem:[#allocation63_spill] sm:$0xff] }
 0x222   : > { %1751 = vmatpush.bf16.msrb.mxu3 %v1506_v34  ;;  %1713 = vmatpush.bf16.msrb.mxu0 %v1433_v55  ;;  %v914_v25 = vperm.slane %v7004_v62, 7  ;;  %v1498_v49 = vpack.c.bf16 %v1322_v51, %v1314_v4  ;;  %v1297_v27 = vmul.f32 %v977_v54, %v9901_v14  ;;  %v1305_v32 = vmul.f32 %v977_v54, %v9902_v16  ;;  %v9908_v16 = vld [vmem:[#allocation52_spill] sm:$0xff] }
 0x223   : > { %v978_v7 = vperm.slane %v7026_v58, 7  ;;  %v1425_v15 = vpack.c.bf16 %v1177_v48, %v1169_v47  ;;  %v1996_v52 = vsel %vm783_vm3, %v9906_v41, %v9905_v31  ;;  %v1997_v58 = vsel %vm775_vm0, %v9908_v16, %v9907_v30  ;;  %v9921_v44 = vld [vmem:[#allocation64_spill] sm:$0xff] }
 0x224   : > { %1726 = vmatpush.bf16.msrb.mxu1 %v1497_v12  ;;  %1739 = vmatpush.bf16.msrb.mxu2 %v1434_v39  ;;  %v1170_v5 = vmul.f32 %v914_v25, %v9903_v21  ;;  %v1178_v37 = vmul.f32 %v914_v25, %v9904_v56  ;;  %v1489_v62 = vpack.c.bf16 %v1305_v32, %v1297_v27  ;;  %vm9913_vm4 = vcmask 1044483  }
 0x225   : > { %v1298_v8 = vmul.f32 %v978_v7, %v9903_v21  ;;  %v1306_v14 = vmul.f32 %v978_v7, %v9904_v56  ;;  %v1998_v33 = vsel %vm9712_vm5, %v1997_v58, %v1996_v52  ;;  %v1999_v18 = vsel %vm777_vm1, %v9910_v28, %v9909_v23 }
 0x226   : > { %1752 = vmatpush.bf16.msrb.mxu3 %v1498_v49  ;;  %1714 = vmatpush.bf16.msrb.mxu0 %v1425_v15  ;;  %v1426_v59 = vpack.c.bf16 %v1178_v37, %v1170_v5  ;;  %v2000_v13 = vsel %vm781_vm2, %v9912_v46, %v9911_v19  ;;  %v2059_v22 = vsel %vm783_vm3, %v9915_v38, %v9914_v24  ;;  %vm9918_vm12 = vcmask 1046531  }
 0x227   : > { %v1490_v21 = vpack.c.bf16 %v1306_v14, %v1298_v8  ;;  %v2001_v56 = vsel %vm9913_vm4, %v1999_v18, %v2000_v13  ;;  %v2060_v42 = vsel %vm775_vm0, %v9917_v9, %v9916_v2  ;;  %v2062_v55 = vsel %vm777_vm1, %v9920_v3, %v9919_v43  ;;  %v9926_v14 = vld [vmem:[#allocation41_spill] sm:$0xff]  ;;  %v9928_v18 = vld [vmem:[#allocation42_spill] sm:$0xff] }
 0x228   : > { %1727 = vmatpush.bf16.msrb.mxu1 %v1489_v62  ;;  %1740 = vmatpush.bf16.msrb.mxu2 %v1426_v59  ;;  %v2002_v34 = vsel %vm9918_vm12, %v2001_v56, %v1998_v33  ;;  %v2061_v0 = vsel %vm9712_vm5, %v2060_v42, %v2059_v22  ;;  %v2063_v6 = vsel %vm781_vm2, %v9922_v60, %v9921_v44  ;;  %vm9923_vm5 = vcmask 1045504   ;;  %v9925_v62 = vld [vmem:[#allocation33_spill] sm:$0xff]  ;;  %v9927_v59 = vld [vmem:[#allocation34_spill] sm:$0xff] }
 0x229   : > { %v7373_v12 = vrot.slane %v2002_v34, 7  ;;  %v2064_v4 = vsel %vm9913_vm4, %v2062_v55, %v2063_v6  ;;  %v1988_v51 = vsel %vm769_vm10, %v9905_v31, %v9906_v41  ;;  %v1989_v54 = vsel %vm761_vm7, %v9908_v16, %v9907_v30  ;;  %1715 = vmatmul.bf16.vlgmr.msrb.gmra.mxu0 %v7109_v36 }
 0x22a   : > { %1753 = vmatpush.bf16.msrb.mxu3 %v1490_v21  ;;  %v2065_v39 = vsel %vm9918_vm12, %v2064_v4, %v2061_v0  ;;  %v1990_v47 = vsel %vm9923_vm5, %v1989_v54, %v1988_v51  ;;  %v1991_v48 = vsel %vm763_vm8, %v9910_v28, %v9909_v23  ;;  %v1992_v25 = vsel %vm767_vm9, %v9912_v46, %v9911_v19 }
 0x22b   : > { %1728 = vmatmul.bf16.vlgmr.msrb.gmra.mxu1 %v7116_v26  ;;  %v2123_v49 = vperm.slane %v7373_v12, 0  ;;  %v7393_v27 = vrot.slane %v2065_v39, 7  ;;  %v2124_v32 = vperm.slane %v7373_v12, 1  ;;  %v1993_v7 = vsel %vm792_vm11, %v1991_v48, %v1992_v25  ;;  %1741 = vmatmul.bf16.vlgmr.msrb.gmra.mxu2 %v7109_v36 }
 0x22c   : > { %vm9924_vm5 = vcmask 1045506   ;;  %v2051_v5 = vsel %vm769_vm10, %v9914_v24, %v9915_v38  ;;  %v2052_v37 = vsel %vm761_vm7, %v9917_v9, %v9916_v2  ;;  %v2054_v52 = vsel %vm763_vm8, %v9920_v3, %v9919_v43 }
 0x22d   : > { %v1994_v15 = vsel %vm9924_vm5, %v1993_v7, %v1990_v47  ;;  %1754 = vmatmul.bf16.vlgmr.msrb.gmra.mxu3 %v7116_v26  ;;  %v2435_v8 = vmul.f32 %v2123_v49, %v9925_v62  ;;  %v2443_v36 = vmul.f32 %v2123_v49, %v9926_v14  ;;  %v2187_v58 = vperm.slane %v7393_v27, 0  ;;  %vm9930_vm12 = vmmov %vm9924_vm5 }
 0x22e   : > { %v2436_v33 = vmul.f32 %v2124_v32, %v9927_v59  ;;  %v2444_v13 = vmul.f32 %v2124_v32, %v9928_v18  ;;  %v2188_v21 = vperm.slane %v7393_v27, 1  ;;  %v7415_v56 = vrot.slane %v1994_v15, 6 }
 0x22f   : > { %vm9929_vm4 = vcmask 1045504   ;;  %v2635_v42 = vpack.c.bf16 %v2443_v36, %v2435_v8  ;;  %v2563_v34 = vmul.f32 %v2187_v58, %v9925_v62  ;;  %v2571_v26 = vmul.f32 %v2187_v58, %v9926_v14 }
 0x230   : > { %v2053_v22 = vsel %vm9929_vm4, %v2052_v37, %v2051_v5  ;;  %v2055_v0 = vsel %vm767_vm9, %v9922_v60, %v9921_v44  ;;  %v2636_v55 = vpack.c.bf16 %v2444_v13, %v2436_v33  ;;  %v2564_v6 = vmul.f32 %v2188_v21, %v9927_v59 }
 0x231   : > { %v2572_v4 = vmul.f32 %v2188_v21, %v9928_v18  ;;  %v2115_v51 = vperm.slane %v7415_v56, 0  ;;  %2711 = vmatpush.bf16.msra.mxu0 %v2635_v42  ;;  %v2699_v54 = vpack.c.bf16 %v2571_v26, %v2563_v34  ;;  %v2056_v39 = vsel %vm792_vm11, %v2054_v52, %v2055_v0 }
 0x232   : > { %v2116_v47 = vperm.slane %v7415_v56, 1  ;;  %v1980_v48 = vsel %vm781_vm2, %v9905_v31, %v9906_v41  ;;  %2737 = vmatpush.bf16.msra.mxu2 %v2636_v55  ;;  %v2057_v7 = vsel %vm9930_vm12, %v2056_v39, %v2053_v22  ;;  %v1981_v52 = vsel %vm783_vm3, %v9907_v30, %v9908_v16 }
 0x233   : > { %v2700_v25 = vpack.c.bf16 %v2572_v4, %v2564_v6  ;;  %v2419_v49 = vmul.f32 %v2115_v51, %v9925_v62  ;;  %v2427_v32 = vmul.f32 %v2115_v51, %v9926_v14  ;;  %2724 = vmatpush.bf16.msra.mxu1 %v2699_v54  ;;  %v7434_v15 = vrot.slane %v2057_v7, 6 }
 0x234   : > { %v2420_v5 = vmul.f32 %v2116_v47, %v9927_v59  ;;  %v2428_v37 = vmul.f32 %v2116_v47, %v9928_v18  ;;  %vm9931_vm5 = vcmask 1046533   ;;  %v1983_v58 = vsel %vm775_vm0, %v9910_v28, %v9909_v23 }
 0x235   : > { %2750 = vmatpush.bf16.msra.mxu3 %v2700_v25  ;;  %v2627_v8 = vpack.c.bf16 %v2427_v32, %v2419_v49  ;;  %v1982_v36 = vsel %vm9931_vm5, %v1980_v48, %v1981_v52  ;;  %v1984_v33 = vsel %vm777_vm1, %v9912_v46, %v9911_v19  ;;  %v2179_v13 = vperm.slane %v7434_v15, 0  ;;  %vm9932_vm4 = vmmov %vm9931_vm5 }
 0x236   : > { %v2628_v21 = vpack.c.bf16 %v2428_v37, %v2420_v5  ;;  %v2180_v22 = vperm.slane %v7434_v15, 1  ;;  %v1985_v42 = vsel %vm779_vm14, %v1983_v58, %v1984_v33  ;;  %v2043_v26 = vsel %vm781_vm2, %v9914_v24, %v9915_v38 }
 0x237   : > { %2712 = vmatpush.bf16.msra.mxu0 %v2627_v8  ;;  %v1986_v34 = vsel %vm787_vm6, %v1985_v42, %v1982_v36  ;;  %v2044_v0 = vsel %vm783_vm3, %v9916_v2, %v9917_v9  ;;  %v2046_v55 = vsel %vm775_vm0, %v9920_v3, %v9919_v43  ;;  %v2547_v6 = vmul.f32 %v2179_v13, %v9925_v62 }
 0x238   : > { %v2555_v4 = vmul.f32 %v2179_v13, %v9926_v14  ;;  %2738 = vmatpush.bf16.msra.mxu2 %v2628_v21  ;;  %v2548_v51 = vmul.f32 %v2180_v22, %v9927_v59  ;;  %v2556_v54 = vmul.f32 %v2180_v22, %v9928_v18  ;;  %v7465_v39 = vrot.slane %v1986_v34, 5 }
 0x239   : > { %v2045_v47 = vsel %vm9932_vm4, %v2043_v26, %v2044_v0  ;;  %v2047_v48 = vsel %vm777_vm1, %v9922_v60, %v9921_v44  ;;  %v1972_v25 = vsel %vm767_vm9, %v9905_v31, %v9906_v41  ;;  %v1973_v5 = vsel %vm769_vm10, %v9908_v16, %v9907_v30 }
 0x23a   : > { %v2691_v49 = vpack.c.bf16 %v2555_v4, %v2547_v6  ;;  %v2692_v32 = vpack.c.bf16 %v2556_v54, %v2548_v51  ;;  %v2048_v7 = vsel %vm779_vm14, %v2046_v55, %v2047_v48  ;;  %v2107_v37 = vperm.slane %v7465_v39, 0 }
 0x23b   : > { %v2049_v52 = vsel %vm787_vm6, %v2048_v7, %v2045_v47  ;;  %v2108_v8 = vperm.slane %v7465_v39, 1  ;;  %v1974_v36 = vsel %vm771_vm13, %v1972_v25, %v1973_v5  ;;  %v1975_v33 = vsel %vm761_vm7, %v9910_v28, %v9909_v23 }
 0x23c   : > { %2725 = vmatpush.bf16.msra.mxu1 %v2691_v49  ;;  %2751 = vmatpush.bf16.msra.mxu3 %v2692_v32  ;;  %v7482_v58 = vrot.slane %v2049_v52, 5  ;;  %v1976_v13 = vsel %vm763_vm8, %v9912_v46, %v9911_v19  ;;  %v2035_v21 = vsel %vm767_vm9, %v9914_v24, %v9915_v38  ;;  %v2403_v22 = vmul.f32 %v2107_v37, %v9925_v62 }
 0x23d   : > { %v2411_v42 = vmul.f32 %v2107_v37, %v9926_v14  ;;  %v2404_v34 = vmul.f32 %v2108_v8, %v9927_v59  ;;  %v2412_v26 = vmul.f32 %v2108_v8, %v9928_v18  ;;  %v1977_v6 = vsel %vm765_vm15, %v1975_v33, %v1976_v13 }
 0x23e   : > { %v2171_v0 = vperm.slane %v7482_v58, 0  ;;  %v2172_v55 = vperm.slane %v7482_v58, 1  ;;  %v2036_v4 = vsel %vm769_vm10, %v9917_v9, %v9916_v2  ;;  %vm9933_vm12 = vcmask 1043456  }
 0x23f   : > { %v2619_v51 = vpack.c.bf16 %v2411_v42, %v2403_v22  ;;  %v2620_v54 = vpack.c.bf16 %v2412_v26, %v2404_v34  ;;  %v1978_v47 = vsel %vm9933_vm12, %v1977_v6, %v1974_v36  ;;  %v2037_v48 = vsel %vm771_vm13, %v2035_v21, %v2036_v4  ;;  %vm9934_vm5 = vmmov %vm9933_vm12 }
 0x240   : > { %v2531_v25 = vmul.f32 %v2171_v0, %v9925_v62  ;;  %v2539_v49 = vmul.f32 %v2171_v0, %v9926_v14  ;;  %v2532_v32 = vmul.f32 %v2172_v55, %v9927_v59  ;;  %v2540_v7 = vmul.f32 %v2172_v55, %v9928_v18 }
 0x241   : > { %2713 = vmatpush.bf16.msra.mxu0 %v2619_v51  ;;  %2739 = vmatpush.bf16.msra.mxu2 %v2620_v54  ;;  %v7509_v5 = vrot.slane %v1978_v47, 4  ;;  %v2038_v37 = vsel %vm761_vm7, %v9920_v3, %v9919_v43  ;;  %v2039_v52 = vsel %vm763_vm8, %v9922_v60, %v9921_v44  ;;  %v1964_v8 = vsel %vm777_vm1, %v9905_v31, %v9906_v41 }
 0x242   : > { %v2683_v36 = vpack.c.bf16 %v2539_v49, %v2531_v25  ;;  %v2684_v33 = vpack.c.bf16 %v2540_v7, %v2532_v32  ;;  %v2040_v13 = vsel %vm765_vm15, %v2038_v37, %v2039_v52  ;;  %v1965_v21 = vsel %vm781_vm2, %v9908_v16, %v9907_v30 }
 0x243   : > { %v2099_v22 = vperm.slane %v7509_v5, 0  ;;  %v2041_v42 = vsel %vm9934_vm5, %v2040_v13, %v2037_v48  ;;  %v2100_v34 = vperm.slane %v7509_v5, 1  ;;  %vm9935_vm4 = vcmask 1044483  }
 0x244   : > { %v1966_v26 = vsel %vm9935_vm4, %v1964_v8, %v1965_v21  ;;  %2726 = vmatpush.bf16.msra.mxu1 %v2683_v36  ;;  %2752 = vmatpush.bf16.msra.mxu3 %v2684_v33  ;;  %v7528_v0 = vrot.slane %v2041_v42, 4  ;;  %v1967_v55 = vsel %vm783_vm3, %v9909_v23, %v9910_v28  ;;  %v1968_v6 = vsel %vm775_vm0, %v9912_v46, %v9911_v19 }
 0x245   : > { %v2027_v4 = vsel %vm777_vm1, %v9914_v24, %v9915_v38  ;;  %v2387_v51 = vmul.f32 %v2099_v22, %v9925_v62  ;;  %v2395_v54 = vmul.f32 %v2099_v22, %v9926_v14  ;;  %v2388_v47 = vmul.f32 %v2100_v34, %v9927_v59 }
 0x246   : > { %v2396_v48 = vmul.f32 %v2100_v34, %v9928_v18  ;;  %v2163_v25 = vperm.slane %v7528_v0, 0  ;;  %v2164_v49 = vperm.slane %v7528_v0, 1  ;;  %vm9936_vm12 = vcmask 1046529  }
 0x247   : > { %v1969_v32 = vsel %vm9936_vm12, %v1968_v6, %v1967_v55  ;;  %v2028_v7 = vsel %vm781_vm2, %v9917_v9, %v9916_v2  ;;  %v2611_v37 = vpack.c.bf16 %v2395_v54, %v2387_v51  ;;  %vm9937_vm5 = vcmask 1046531  }
 0x248   : > { %v2612_v52 = vpack.c.bf16 %v2396_v48, %v2388_v47  ;;  %v1970_v8 = vsel %vm9937_vm5, %v1966_v26, %v1969_v32  ;;  %v2029_v36 = vsel %vm9935_vm4, %v2027_v4, %v2028_v7  ;;  %v2515_v33 = vmul.f32 %v2163_v25, %v9925_v62 }
 0x249   : > { %v2523_v13 = vmul.f32 %v2163_v25, %v9926_v14  ;;  %v2516_v21 = vmul.f32 %v2164_v49, %v9927_v59  ;;  %v2524_v22 = vmul.f32 %v2164_v49, %v9928_v18  ;;  %2714 = vmatpush.bf16.msra.mxu0 %v2611_v37  ;;  %v7555_v42 = vrot.slane %v1970_v8, 3 }
 0x24a   : > { %2740 = vmatpush.bf16.msra.mxu2 %v2612_v52  ;;  %v2030_v34 = vsel %vm783_vm3, %v9919_v43, %v9920_v3  ;;  %v2031_v26 = vsel %vm775_vm0, %v9922_v60, %v9921_v44  ;;  %v1956_v55 = vsel %vm763_vm8, %v9905_v31, %v9906_v41  ;;  %v1957_v54 = vsel %vm767_vm9, %v9908_v16, %v9907_v30 }
 0x24b   : > { %v2675_v6 = vpack.c.bf16 %v2523_v13, %v2515_v33  ;;  %v2676_v4 = vpack.c.bf16 %v2524_v22, %v2516_v21  ;;  %v2032_v51 = vsel %vm9936_vm12, %v2031_v26, %v2030_v34  ;;  %v2091_v47 = vperm.slane %v7555_v42, 0 }
 0x24c   : > { %v2033_v48 = vsel %vm9937_vm5, %v2029_v36, %v2032_v51  ;;  %v2092_v25 = vperm.slane %v7555_v42, 1  ;;  %v1958_v49 = vsel %vm792_vm11, %v1956_v55, %v1957_v54  ;;  %v1959_v7 = vsel %vm769_vm10, %v9910_v28, %v9909_v23 }
 0x24d   : > { %2727 = vmatpush.bf16.msra.mxu1 %v2675_v6  ;;  %2753 = vmatpush.bf16.msra.mxu3 %v2676_v4  ;;  %v7574_v32 = vrot.slane %v2033_v48, 3  ;;  %v1960_v37 = vsel %vm761_vm7, %v9912_v46, %v9911_v19  ;;  %v2019_v52 = vsel %vm763_vm8, %v9914_v24, %v9915_v38  ;;  %v2371_v8 = vmul.f32 %v2091_v47, %v9925_v62 }
 0x24e   : > { %v2379_v36 = vmul.f32 %v2091_v47, %v9926_v14  ;;  %v2372_v33 = vmul.f32 %v2092_v25, %v9927_v59  ;;  %v2380_v13 = vmul.f32 %v2092_v25, %v9928_v18  ;;  %vm9938_vm4 = vcmask 1045504  }
 0x24f   : > { %v2155_v21 = vperm.slane %v7574_v32, 0  ;;  %v2156_v22 = vperm.slane %v7574_v32, 1  ;;  %v1961_v34 = vsel %vm9938_vm4, %v1960_v37, %v1959_v7  ;;  %v2020_v26 = vsel %vm767_vm9, %v9917_v9, %v9916_v2  ;;  %vm9940_vm5 = vmmov %vm9938_vm4 }
 0x250   : > { %v2603_v55 = vpack.c.bf16 %v2379_v36, %v2371_v8  ;;  %v2604_v6 = vpack.c.bf16 %v2380_v13, %v2372_v33  ;;  %vm9939_vm12 = vcmask 1045506   ;;  %v2021_v51 = vsel %vm792_vm11, %v2019_v52, %v2020_v26 }
 0x251   : > { %v1962_v4 = vsel %vm9939_vm12, %v1958_v49, %v1961_v34  ;;  %v2499_v54 = vmul.f32 %v2155_v21, %v9925_v62  ;;  %v2507_v47 = vmul.f32 %v2155_v21, %v9926_v14  ;;  %v2500_v48 = vmul.f32 %v2156_v22, %v9927_v59  ;;  %vm9941_vm4 = vmmov %vm9939_vm12 }
 0x252   : > { %v2508_v25 = vmul.f32 %v2156_v22, %v9928_v18  ;;  %2715 = vmatpush.bf16.msra.mxu0 %v2603_v55  ;;  %2741 = vmatpush.bf16.msra.mxu2 %v2604_v6  ;;  %v7601_v7 = vrot.slane %v1962_v4, 2  ;;  %v2022_v37 = vsel %vm769_vm10, %v9920_v3, %v9919_v43  ;;  %v2023_v49 = vsel %vm761_vm7, %v9922_v60, %v9921_v44 }
 0x253   : > { %v1948_v52 = vsel %vm775_vm0, %v9905_v31, %v9906_v41  ;;  %v2667_v8 = vpack.c.bf16 %v2507_v47, %v2499_v54  ;;  %v2024_v33 = vsel %vm9940_vm5, %v2023_v49, %v2022_v37  ;;  %v1949_v13 = vsel %vm777_vm1, %v9908_v16, %v9907_v30 }
 0x254   : > { %v2668_v36 = vpack.c.bf16 %v2508_v25, %v2500_v48  ;;  %v2083_v21 = vperm.slane %v7601_v7, 0  ;;  %v2025_v22 = vsel %vm9941_vm4, %v2021_v51, %v2024_v33  ;;  %v2084_v34 = vperm.slane %v7601_v7, 1 }
 0x255   : > { %v1950_v26 = vsel %vm779_vm14, %v1948_v52, %v1949_v13  ;;  %2728 = vmatpush.bf16.msra.mxu1 %v2667_v8  ;;  %v7620_v55 = vrot.slane %v2025_v22, 2  ;;  %v1951_v6 = vsel %vm781_vm2, %v9910_v28, %v9909_v23  ;;  %v1952_v4 = vsel %vm783_vm3, %v9911_v19, %v9912_v46 }
 0x256   : > { %2754 = vmatpush.bf16.msra.mxu3 %v2668_v36  ;;  %v2011_v51 = vsel %vm775_vm0, %v9914_v24, %v9915_v38  ;;  %v2355_v54 = vmul.f32 %v2083_v21, %v9925_v62  ;;  %v2363_v47 = vmul.f32 %v2083_v21, %v9926_v14  ;;  %v2356_v48 = vmul.f32 %v2084_v34, %v9927_v59 }
 0x257   : > { %v2364_v25 = vmul.f32 %v2084_v34, %v9928_v18  ;;  %v2147_v37 = vperm.slane %v7620_v55, 0  ;;  %v2148_v49 = vperm.slane %v7620_v55, 1  ;;  %vm9942_vm12 = vcmask 1046533  }
 0x258   : > { %v1953_v52 = vsel %vm9942_vm12, %v1951_v6, %v1952_v4  ;;  %v2012_v8 = vsel %vm777_vm1, %v9917_v9, %v9916_v2  ;;  %v2595_v36 = vpack.c.bf16 %v2363_v47, %v2355_v54  ;;  %v2014_v4 = vsel %vm781_vm2, %v9920_v3, %v9919_v43  ;;  %vm9943_vm5 = vmmov %vm9942_vm12 }
 0x259   : > { %v2596_v33 = vpack.c.bf16 %v2364_v25, %v2356_v48  ;;  %v1954_v13 = vsel %vm787_vm6, %v1950_v26, %v1953_v52  ;;  %v2013_v21 = vsel %vm779_vm14, %v2011_v51, %v2012_v8  ;;  %v2483_v22 = vmul.f32 %v2147_v37, %v9925_v62 }
 0x25a   : > { %v2491_v34 = vmul.f32 %v2147_v37, %v9926_v14  ;;  %v2484_v53 = vmul.f32 %v2148_v49, %v9927_v59  ;;  %v2492_v10 = vmul.f32 %v2148_v49, %v9928_v18  ;;  %2716 = vmatpush.bf16.msra.mxu0 %v2595_v36  ;;  %v7647_v6 = vrot.slane %v1954_v13, 1 }
 0x25b   : > { %2742 = vmatpush.bf16.msra.mxu2 %v2596_v33  ;;  %v2015_v26 = vsel %vm783_vm3, %v9921_v44, %v9922_v60  ;;  %v1941_v51 = vsel %vm761_vm7, %v9905_v31, %v9906_v41  ;;  %v1942_v25 = vsel %vm763_vm8, %v9908_v16, %v9907_v30  ;;  %v2004_v31 = vsel %vm761_vm7, %v9914_v24, %v9915_v38 }
 0x25c   : > { %v2659_v54 = vpack.c.bf16 %v2491_v34, %v2483_v22  ;;  %v2660_v47 = vpack.c.bf16 %v2492_v10, %v2484_v53  ;;  %v2016_v48 = vsel %vm9943_vm5, %v2014_v4, %v2015_v26  ;;  %v2075_v37 = vperm.slane %v7647_v6, 0 }
 0x25d   : > { %v2017_v49 = vsel %vm787_vm6, %v2013_v21, %v2016_v48  ;;  %v2076_v52 = vperm.slane %v7647_v6, 1  ;;  %v1943_v8 = vsel %vm765_vm15, %v1941_v51, %v1942_v25  ;;  %v1944_v53 = vsel %vm767_vm9, %v9910_v28, %v9909_v23 }
 0x25e   : > { %2729 = vmatpush.bf16.msra.mxu1 %v2659_v54  ;;  %2755 = vmatpush.bf16.msra.mxu3 %v2660_v47  ;;  %v7666_v36 = vrot.slane %v2017_v49, 1  ;;  %v1945_v10 = vsel %vm769_vm10, %v9912_v46, %v9911_v19  ;;  %v2339_v41 = vmul.f32 %v2075_v37, %v9925_v62  ;;  %v2347_v30 = vmul.f32 %v2075_v37, %v9926_v14 }
 0x25f   : > { %v2340_v16 = vmul.f32 %v2076_v52, %v9927_v59  ;;  %v2348_v33 = vmul.f32 %v2076_v52, %v9928_v18  ;;  %v1946_v28 = vsel %vm771_vm13, %v1944_v53, %v1945_v10  ;;  %v2005_v19 = vsel %vm763_vm8, %v9917_v9, %v9916_v2  ;;  %v9946_v53 = vld [vmem:[#allocation35_spill] sm:$0xff] }
 0x260   : > { %v2139_v13 = vperm.slane %v7666_v36, 0  ;;  %v2140_v23 = vperm.slane %v7666_v36, 1  ;;  %v2587_v46 = vpack.c.bf16 %v2347_v30, %v2339_v41  ;;  %vm9944_vm4 = vcmask 1043456   ;;  %v9947_v41 = vld [vmem:[#allocation43_spill] sm:$0xff] }
 0x261   : > { %v2588_v24 = vpack.c.bf16 %v2348_v33, %v2340_v16  ;;  %v7688_v38 = vsel %vm9944_vm4, %v1943_v8, %v1946_v28  ;;  %v2006_v21 = vsel %vm765_vm15, %v2004_v31, %v2005_v19  ;;  %v2007_v2 = vsel %vm767_vm9, %v9920_v3, %v9919_v43  ;;  %vm9945_vm12 = vmmov %vm9944_vm4 }
 0x262   : > { %v2467_v22 = vmul.f32 %v2139_v13, %v9925_v62  ;;  %v2475_v34 = vmul.f32 %v2139_v13, %v9926_v14  ;;  %v2468_v4 = vmul.f32 %v2140_v23, %v9927_v59  ;;  %v2476_v26 = vmul.f32 %v2140_v23, %v9928_v18  ;;  %2717 = vmatpush.bf16.msra.mxu0 %v2587_v46 }
 0x263   : > { %2743 = vmatpush.bf16.msra.mxu2 %v2588_v24  ;;  %v2067_v51 = vperm.slane %v7688_v38, 0  ;;  %v2008_v9 = vsel %vm769_vm10, %v9922_v60, %v9921_v44  ;;  %v2068_v54 = vperm.slane %v7688_v38, 1  ;;  %v2125_v37 = vperm.slane %v7373_v12, 2 }
 0x264   : > { %v2651_v47 = vpack.c.bf16 %v2475_v34, %v2467_v22  ;;  %v2652_v48 = vpack.c.bf16 %v2476_v26, %v2468_v4  ;;  %v2009_v25 = vsel %vm771_vm13, %v2007_v2, %v2008_v9  ;;  %v2189_v16 = vperm.slane %v7393_v27, 2  ;;  %v9948_v4 = vld [vmem:[#allocation36_spill] sm:$0xff] }
 0x265   : > { %v2323_v49 = vmul.f32 %v2067_v51, %v9925_v62  ;;  %v2331_v52 = vmul.f32 %v2067_v51, %v9926_v14  ;;  %v7708_v8 = vsel %vm9945_vm12, %v2006_v21, %v2009_v25  ;;  %v2324_v43 = vmul.f32 %v2068_v54, %v9927_v59  ;;  %v9949_v51 = vld [vmem:[#allocation44_spill] sm:$0xff] }
 0x266   : > { %2730 = vmatpush.bf16.msra.mxu1 %v2651_v47  ;;  %2756 = vmatpush.bf16.msra.mxu3 %v2652_v48  ;;  %v2131_v3 = vperm.slane %v7708_v8, 0  ;;  %v2332_v44 = vmul.f32 %v2068_v54, %v9928_v18  ;;  %v2132_v60 = vperm.slane %v7708_v8, 1  ;;  %v2437_v10 = vmul.f32 %v2125_v37, %v9946_v53 }
 0x267   : > { %v2579_v31 = vpack.c.bf16 %v2331_v52, %v2323_v49  ;;  %v2445_v30 = vmul.f32 %v2125_v37, %v9947_v41  ;;  %v2126_v33 = vperm.slane %v7373_v12, 3  ;;  %v2565_v21 = vmul.f32 %v2189_v16, %v9946_v53 }
 0x268   : > { %v2451_v13 = vmul.f32 %v2131_v3, %v9925_v62  ;;  %v2459_v23 = vmul.f32 %v2131_v3, %v9926_v14  ;;  %v2580_v28 = vpack.c.bf16 %v2332_v44, %v2324_v43  ;;  %v2452_v19 = vmul.f32 %v2132_v60, %v9927_v59 }
 0x269   : > { %2718 = vmatpush.bf16.msra.mxu0 %v2579_v31  ;;  %v2460_v46 = vmul.f32 %v2132_v60, %v9928_v18  ;;  %v2637_v24 = vpack.c.bf16 %v2445_v30, %v2437_v10  ;;  %v2573_v22 = vmul.f32 %v2189_v16, %v9947_v41  ;;  %v2438_v26 = vmul.f32 %v2126_v33, %v9948_v4 }
 0x26a   : > { %v2643_v34 = vpack.c.bf16 %v2459_v23, %v2451_v13  ;;  %2744 = vmatpush.bf16.msra.mxu2 %v2580_v28  ;;  %v2446_v2 = vmul.f32 %v2126_v33, %v9949_v51  ;;  %v2190_v62 = vperm.slane %v7393_v27, 3  ;;  %v2117_v59 = vperm.slane %v7415_v56, 2 }
 0x26b   : > { %v2644_v14 = vpack.c.bf16 %v2460_v46, %v2452_v19  ;;  %v2701_v9 = vpack.c.bf16 %v2573_v22, %v2565_v21  ;;  %v2181_v18 = vperm.slane %v7434_v15, 2  ;;  %v2118_v25 = vperm.slane %v7415_v56, 3 }
 0x26c   : > { %2731 = vmatpush.bf16.msra.mxu1 %v2643_v34  ;;  %v2638_v54 = vpack.c.bf16 %v2446_v2, %v2438_v26  ;;  %v2566_v47 = vmul.f32 %v2190_v62, %v9948_v4  ;;  %v2574_v48 = vmul.f32 %v2190_v62, %v9949_v51  ;;  %v2421_v37 = vmul.f32 %v2117_v59, %v9946_v53 }
 0x26d   : > { %2763 = vmatpush.bf16.msrb.mxu0 %v2637_v24  ;;  %2757 = vmatpush.bf16.msra.mxu3 %v2644_v14  ;;  %v2429_v49 = vmul.f32 %v2117_v59, %v9947_v41  ;;  %v2549_v52 = vmul.f32 %v2181_v18, %v9946_v53  ;;  %v2182_v43 = vperm.slane %v7434_v15, 3  ;;  %v2557_v44 = vmul.f32 %v2181_v18, %v9947_v41 }
 0x26e   : > { %2789 = vmatpush.bf16.msrb.mxu2 %v2638_v54  ;;  %v2702_v3 = vpack.c.bf16 %v2574_v48, %v2566_v47  ;;  %v2422_v60 = vmul.f32 %v2118_v25, %v9948_v4  ;;  %v2430_v10 = vmul.f32 %v2118_v25, %v9949_v51  ;;  %v2109_v33 = vperm.slane %v7465_v39, 2 }
 0x26f   : > { %v2629_v31 = vpack.c.bf16 %v2429_v49, %v2421_v37  ;;  %v2550_v30 = vmul.f32 %v2182_v43, %v9948_v4  ;;  %v2558_v16 = vmul.f32 %v2182_v43, %v9949_v51  ;;  %v2693_v13 = vpack.c.bf16 %v2557_v44, %v2549_v52  ;;  %v7757_v37 = vpop.f32.mrf.mxu0  ;;  %v7759_v49 = vpop.f32.mrf.mxu1 }
 0x270   : > { %2776 = vmatpush.bf16.msrb.mxu1 %v2701_v9  ;;  %v2630_v23 = vpack.c.bf16 %v2430_v10, %v2422_v60  ;;  %v2173_v28 = vperm.slane %v7482_v58, 2  ;;  %v2110_v19 = vperm.slane %v7465_v39, 3  ;;  %v2405_v24 = vmul.f32 %v2109_v33, %v9946_v53  ;;  %v7763_v60 = vpop.f32.mrf.mxu2  ;;  %v7765_v10 = vpop.f32.mrf.mxu3 }
 0x271   : > { %2802 = vmatpush.bf16.msrb.mxu3 %v2702_v3  ;;  %2764 = vmatpush.bf16.msrb.mxu0 %v2629_v31  ;;  %v2694_v46 = vpack.c.bf16 %v2558_v16, %v2550_v30  ;;  %v2413_v21 = vmul.f32 %v2109_v33, %v9947_v41  ;;  %v2174_v22 = vperm.slane %v7482_v58, 3  ;;  %v2101_v62 = vperm.slane %v7509_v5, 2 }
 0x272   : > { %2790 = vmatpush.bf16.msrb.mxu2 %v2630_v23  ;;  %v2533_v34 = vmul.f32 %v2173_v28, %v9946_v53  ;;  %v2541_v26 = vmul.f32 %v2173_v28, %v9947_v41  ;;  %v2406_v2 = vmul.f32 %v2110_v19, %v9948_v4  ;;  %v2414_v9 = vmul.f32 %v2110_v19, %v9949_v51 }
 0x273   : > { %v2621_v14 = vpack.c.bf16 %v2413_v21, %v2405_v24  ;;  %v2534_v59 = vmul.f32 %v2174_v22, %v9948_v4  ;;  %v2542_v18 = vmul.f32 %v2174_v22, %v9949_v51  ;;  %v2389_v47 = vmul.f32 %v2101_v62, %v9946_v53 }
 0x274   : > { %2777 = vmatpush.bf16.msrb.mxu1 %v2693_v13  ;;  %v2685_v54 = vpack.c.bf16 %v2541_v26, %v2533_v34  ;;  %v2397_v48 = vmul.f32 %v2101_v62, %v9947_v41  ;;  %v2165_v25 = vperm.slane %v7528_v0, 2  ;;  %v2622_v52 = vpack.c.bf16 %v2414_v9, %v2406_v2 }
 0x275   : > { %2803 = vmatpush.bf16.msrb.mxu3 %v2694_v46  ;;  %2765 = vmatpush.bf16.msrb.mxu0 %v2621_v14  ;;  %v2686_v43 = vpack.c.bf16 %v2542_v18, %v2534_v59  ;;  %v2102_v3 = vperm.slane %v7509_v5, 3  ;;  %v2166_v44 = vperm.slane %v7528_v0, 3  ;;  %v2093_v33 = vperm.slane %v7555_v42, 2 }
 0x276   : > { %v2613_v31 = vpack.c.bf16 %v2397_v48, %v2389_v47  ;;  %v2517_v30 = vmul.f32 %v2165_v25, %v9946_v53  ;;  %v2525_v16 = vmul.f32 %v2165_v25, %v9947_v41  ;;  %2791 = vmatpush.bf16.msrb.mxu2 %v2622_v52  ;;  %v2157_v22 = vperm.slane %v7574_v32, 2  ;;  %v2707_v52 = vld [vmem:[%s5927_s15 + $0x10] sm:$0xff] }
 0x277   : > { %v2390_v13 = vmul.f32 %v2102_v3, %v9948_v4  ;;  %v2398_v23 = vmul.f32 %v2102_v3, %v9949_v51  ;;  %v2518_v28 = vmul.f32 %v2166_v44, %v9948_v4  ;;  %v2526_v19 = vmul.f32 %v2166_v44, %v9949_v51 }
 0x278   : > { %2778 = vmatpush.bf16.msrb.mxu1 %v2685_v54  ;;  %v2677_v46 = vpack.c.bf16 %v2525_v16, %v2517_v30  ;;  %v2373_v24 = vmul.f32 %v2093_v33, %v9946_v53  ;;  %v2381_v21 = vmul.f32 %v2093_v33, %v9947_v41  ;;  %v2094_v2 = vperm.slane %v7555_v42, 3  ;;  %v1562_v30 = vpop.f32.mrf.mxu0  ;;  %v1575_v16 = vpop.f32.mrf.mxu1 }
 0x279   : > { %2804 = vmatpush.bf16.msrb.mxu3 %v2686_v43  ;;  %2766 = vmatpush.bf16.msrb.mxu0 %v2613_v31  ;;  %v2614_v34 = vpack.c.bf16 %v2398_v23, %v2390_v13  ;;  %v2678_v26 = vpack.c.bf16 %v2526_v19, %v2518_v28  ;;  %v2158_v62 = vperm.slane %v7574_v32, 3  ;;  %v2501_v9 = vmul.f32 %v2157_v22, %v9946_v53  ;;  %v2708_v19 = vld [vmem:[%s5927_s15 + $0x18] sm:$0xff] }
 0x27a   : > { %v2605_v14 = vpack.c.bf16 %v2381_v21, %v2373_v24  ;;  %v2509_v59 = vmul.f32 %v2157_v22, %v9947_v41  ;;  %v2085_v18 = vperm.slane %v7601_v7, 2  ;;  %v2374_v54 = vmul.f32 %v2094_v2, %v9948_v4  ;;  %v1601_v24 = vpop.f32.mrf.mxu3 }
 0x27b   : > { %2792 = vmatpush.bf16.msrb.mxu2 %v2614_v34  ;;  %v2382_v47 = vmul.f32 %v2094_v2, %v9949_v51  ;;  %v2502_v48 = vmul.f32 %v2158_v62, %v9948_v4  ;;  %v2510_v25 = vmul.f32 %v2158_v62, %v9949_v51  ;;  %v2149_v31 = vperm.slane %v7620_v55, 2 }
 0x27c   : > { %2779 = vmatpush.bf16.msrb.mxu1 %v2677_v46  ;;  %v2669_v43 = vpack.c.bf16 %v2509_v59, %v2501_v9  ;;  %v2357_v3 = vmul.f32 %v2085_v18, %v9946_v53  ;;  %v2365_v44 = vmul.f32 %v2085_v18, %v9947_v41  ;;  %v2086_v23 = vperm.slane %v7601_v7, 3  ;;  %v1588_v46 = vpop.f32.mrf.mxu2 }
 0x27d   : > { %2805 = vmatpush.bf16.msrb.mxu3 %v2678_v26  ;;  %2767 = vmatpush.bf16.msrb.mxu0 %v2605_v14  ;;  %v2606_v33 = vpack.c.bf16 %v2382_v47, %v2374_v54  ;;  %v2670_v13 = vpack.c.bf16 %v2510_v25, %v2502_v48  ;;  %v2150_v28 = vperm.slane %v7620_v55, 3  ;;  %v2485_v22 = vmul.f32 %v2149_v31, %v9946_v53 }
 0x27e   : > { %v2597_v21 = vpack.c.bf16 %v2365_v44, %v2357_v3  ;;  %v2493_v34 = vmul.f32 %v2149_v31, %v9947_v41  ;;  %v7795_v26 = vpack.c.bf16 %v2707_v52, %v2707_v52  ;;  %v2358_v2 = vmul.f32 %v2086_v23, %v9948_v4 }
 0x27f   : > { %2793 = vmatpush.bf16.msrb.mxu2 %v2606_v33  ;;  %v2366_v62 = vmul.f32 %v2086_v23, %v9949_v51  ;;  %v2486_v14 = vmul.f32 %v2150_v28, %v9948_v4  ;;  %v2494_v9 = vmul.f32 %v2150_v28, %v9949_v51  ;;  %v7802_v18 = vpack.c.bf16 %v2708_v19, %v2708_v19 }
 0x280   : > { %2780 = vmatpush.bf16.msrb.mxu1 %v2669_v43  ;;  %v2661_v59 = vpack.c.bf16 %v2493_v34, %v2485_v22  ;;  %2745 = vmatmul.bf16.vlgmr.msra.gmra.mxu2 %v7795_v26  ;;  %v2077_v54 = vperm.slane %v7647_v6, 2  ;;  %v2141_v47 = vperm.slane %v7666_v36, 2  ;;  %v2078_v52 = vperm.slane %v7647_v6, 3 }
 0x281   : > { %2806 = vmatpush.bf16.msrb.mxu3 %v2670_v13  ;;  %2768 = vmatpush.bf16.msrb.mxu0 %v2597_v21  ;;  %v2598_v48 = vpack.c.bf16 %v2366_v62, %v2358_v2  ;;  %v2662_v25 = vpack.c.bf16 %v2494_v9, %v2486_v14  ;;  %v2142_v43 = vperm.slane %v7666_v36, 3  ;;  %v2069_v30 = vperm.slane %v7688_v38, 2 }
 0x282   : > { %2758 = vmatmul.bf16.vlgmr.msra.gmra.mxu3 %v7802_v18  ;;  %v2341_v3 = vmul.f32 %v2077_v54, %v9946_v53  ;;  %v2349_v44 = vmul.f32 %v2077_v54, %v9947_v41  ;;  %v2469_v31 = vmul.f32 %v2141_v47, %v9946_v53  ;;  %v2477_v16 = vmul.f32 %v2141_v47, %v9947_v41 }
 0x283   : > { %2794 = vmatpush.bf16.msrb.mxu2 %v2598_v48  ;;  %v2342_v33 = vmul.f32 %v2078_v52, %v9948_v4  ;;  %v2350_v13 = vmul.f32 %v2078_v52, %v9949_v51  ;;  %v2470_v23 = vmul.f32 %v2142_v43, %v9948_v4  ;;  %v2478_v19 = vmul.f32 %v2142_v43, %v9949_v51 }
 0x284   : > { %2781 = vmatpush.bf16.msrb.mxu1 %v2661_v59  ;;  %v2589_v28 = vpack.c.bf16 %v2349_v44, %v2341_v3  ;;  %2719 = vmatmul.bf16.vlgmr.msra.gmra.mxu0 %v7795_v26  ;;  %v2325_v46 = vmul.f32 %v2069_v30, %v9946_v53  ;;  %v2133_v24 = vperm.slane %v7708_v8, 2  ;;  %v2653_v21 = vpack.c.bf16 %v2477_v16, %v2469_v31  ;;  %v9950_v44 = vld [vmem:[#allocation37_spill] sm:$0xff] }
 0x285   : > { %2807 = vmatpush.bf16.msrb.mxu3 %v2662_v25  ;;  %v2590_v22 = vpack.c.bf16 %v2350_v13, %v2342_v33  ;;  %2732 = vmatmul.bf16.vlgmr.msra.gmra.mxu1 %v7802_v18  ;;  %v2333_v34 = vmul.f32 %v2069_v30, %v9947_v41  ;;  %v2070_v2 = vperm.slane %v7688_v38, 3  ;;  %v2654_v62 = vpack.c.bf16 %v2478_v19, %v2470_v23  ;;  %v9951_v30 = vld [vmem:[#allocation45_spill] sm:$0xff]  ;;  %v9952_v19 = vld [vmem:[#allocation38_spill] sm:$0xff] }
 0x286   : > { %2769 = vmatpush.bf16.msrb.mxu0 %v2589_v28  ;;  %v2453_v14 = vmul.f32 %v2133_v24, %v9946_v53  ;;  %v2461_v9 = vmul.f32 %v2133_v24, %v9947_v41  ;;  %v2134_v59 = vperm.slane %v7708_v8, 3  ;;  %v2127_v25 = vperm.slane %v7373_v12, 4  ;;  %v9953_v24 = vld [vmem:[#allocation46_spill] sm:$0xff] }
 0x287   : > { %2795 = vmatpush.bf16.msrb.mxu2 %v2590_v22  ;;  %v2581_v54 = vpack.c.bf16 %v2333_v34, %v2325_v46  ;;  %v2326_v47 = vmul.f32 %v2070_v2, %v9948_v4  ;;  %v2334_v48 = vmul.f32 %v2070_v2, %v9949_v51  ;;  %v2191_v53 = vperm.slane %v7393_v27, 4 }
 0x288   : > { %2782 = vmatpush.bf16.msrb.mxu1 %v2653_v21  ;;  %v2645_v52 = vpack.c.bf16 %v2461_v9, %v2453_v14  ;;  %v2454_v43 = vmul.f32 %v2134_v59, %v9948_v4  ;;  %v2462_v3 = vmul.f32 %v2134_v59, %v9949_v51  ;;  %v2439_v31 = vmul.f32 %v2127_v25, %v9950_v44 }
 0x289   : > { %2808 = vmatpush.bf16.msrb.mxu3 %v2654_v62  ;;  %v2582_v41 = vpack.c.bf16 %v2334_v48, %v2326_v47  ;;  %v2447_v16 = vmul.f32 %v2127_v25, %v9951_v30  ;;  %v2128_v33 = vperm.slane %v7373_v12, 5  ;;  %v2567_v23 = vmul.f32 %v2191_v53, %v9950_v44 }
 0x28a   : > { %2770 = vmatpush.bf16.msrb.mxu0 %v2581_v54  ;;  %v2646_v13 = vpack.c.bf16 %v2462_v3, %v2454_v43  ;;  %v2575_v28 = vmul.f32 %v2191_v53, %v9951_v30  ;;  %v2192_v4 = vperm.slane %v7393_v27, 5  ;;  %v2119_v22 = vperm.slane %v7415_v56, 4 }
 0x28b   : > { %2796 = vmatpush.bf16.msrb.mxu2 %v2582_v41  ;;  %v2639_v51 = vpack.c.bf16 %v2447_v16, %v2439_v31  ;;  %v2440_v46 = vmul.f32 %v2128_v33, %v9952_v19  ;;  %v2448_v21 = vmul.f32 %v2128_v33, %v9953_v24  ;;  %v2183_v14 = vperm.slane %v7434_v15, 4 }
 0x28c   : > { %2783 = vmatpush.bf16.msrb.mxu1 %v2645_v52  ;;  %v2703_v34 = vpack.c.bf16 %v2575_v28, %v2567_v23  ;;  %v2568_v2 = vmul.f32 %v2192_v4, %v9952_v19  ;;  %v2576_v62 = vmul.f32 %v2192_v4, %v9953_v24  ;;  %v2423_v59 = vmul.f32 %v2119_v22, %v9950_v44 }
 0x28d   : > { %2809 = vmatpush.bf16.msrb.mxu3 %v2646_v13  ;;  %v2640_v9 = vpack.c.bf16 %v2448_v21, %v2440_v46  ;;  %v2431_v54 = vmul.f32 %v2119_v22, %v9951_v30  ;;  %v2120_v47 = vperm.slane %v7415_v56, 5  ;;  %v2551_v25 = vmul.f32 %v2183_v14, %v9950_v44 }
 0x28e   : > { %2815 = vmatpush.bf16.msra.mxu0 %v2639_v51  ;;  %v2704_v48 = vpack.c.bf16 %v2576_v62, %v2568_v2  ;;  %v2559_v52 = vmul.f32 %v2183_v14, %v9951_v30  ;;  %v2184_v43 = vperm.slane %v7434_v15, 5  ;;  %v1574_v31 = vadd.f32 %v7759_v49, %v7757_v37 }
 0x28f   : > { %2841 = vmatpush.bf16.msra.mxu2 %v2640_v9  ;;  %v2631_v3 = vpack.c.bf16 %v2431_v54, %v2423_v59  ;;  %v2424_v53 = vmul.f32 %v2120_v47, %v9952_v19  ;;  %v2432_v41 = vmul.f32 %v2120_v47, %v9953_v24  ;;  %v1600_v23 = vadd.f32 %v7765_v10, %v7763_v60 }
 0x290   : > { %2828 = vmatpush.bf16.msra.mxu1 %v2703_v34  ;;  %v2695_v16 = vpack.c.bf16 %v2559_v52, %v2551_v25  ;;  %v2552_v33 = vmul.f32 %v2184_v43, %v9952_v19  ;;  %v2560_v13 = vmul.f32 %v2184_v43, %v9953_v24  ;;  %1759 = vst [vmem:[%s7860_s25] sm:$0xff] %v1574_v31  ;;  %v2111_v4 = vperm.slane %v7465_v39, 4  ;;  %v7883_v52 = vpop.f32.mrf.mxu0  ;;  %v7885_v43 = vpop.f32.mrf.mxu1 }
 0x291   : > { %2854 = vmatpush.bf16.msra.mxu3 %v2704_v48  ;;  %v2632_v28 = vpack.c.bf16 %v2432_v41, %v2424_v53  ;;  %v2175_v37 = vperm.slane %v7482_v58, 4  ;;  %v2112_v49 = vperm.slane %v7465_v39, 5  ;;  %2797 = vmatmul.bf16.vlgmr.msrb.gmra.mxu2 %v7795_v26  ;;  %1760 = vst [vmem:[%s7860_s25 + $0x8] sm:$0xff] %v1600_v23  ;;  %v2176_v60 = vperm.slane %v7482_v58, 5 }
 0x292   : > { %2816 = vmatpush.bf16.msra.mxu0 %v2631_v3  ;;  %v2696_v51 = vpack.c.bf16 %v2560_v13, %v2552_v33  ;;  %v2103_v10 = vperm.slane %v7509_v5, 4  ;;  %v2167_v46 = vperm.slane %v7528_v0, 4  ;;  %2810 = vmatmul.bf16.vlgmr.msrb.gmra.mxu3 %v7802_v18  ;;  %v2407_v21 = vmul.f32 %v2111_v4, %v9950_v44  ;;  %v7892_v33 = vpop.f32.mrf.mxu3 }
 0x293   : > { %2842 = vmatpush.bf16.msra.mxu2 %v2632_v28  ;;  %v2415_v22 = vmul.f32 %v2111_v4, %v9951_v30  ;;  %v2535_v34 = vmul.f32 %v2175_v37, %v9950_v44  ;;  %v2543_v2 = vmul.f32 %v2175_v37, %v9951_v30  ;;  %v2408_v62 = vmul.f32 %v2112_v49, %v9952_v19 }
 0x294   : > { %2829 = vmatpush.bf16.msra.mxu1 %v2695_v16  ;;  %v2416_v14 = vmul.f32 %v2112_v49, %v9953_v24  ;;  %v2536_v9 = vmul.f32 %v2176_v60, %v9952_v19  ;;  %v2544_v59 = vmul.f32 %v2176_v60, %v9953_v24  ;;  %v2391_v48 = vmul.f32 %v2103_v10, %v9950_v44  ;;  %v7890_v16 = vpop.f32.mrf.mxu2 }
 0x295   : > { %2855 = vmatpush.bf16.msra.mxu3 %v2696_v51  ;;  %v2623_v54 = vpack.c.bf16 %v2415_v22, %v2407_v21  ;;  %v2687_v47 = vpack.c.bf16 %v2543_v2, %v2535_v34  ;;  %v2399_v25 = vmul.f32 %v2103_v10, %v9951_v30  ;;  %2771 = vmatmul.bf16.vlgmr.msrb.gmra.mxu0 %v7795_v26  ;;  %v2104_v23 = vperm.slane %v7509_v5, 5 }
 0x296   : > { %v2624_v3 = vpack.c.bf16 %v2416_v14, %v2408_v62  ;;  %v2688_v53 = vpack.c.bf16 %v2544_v59, %v2536_v9  ;;  %v2519_v41 = vmul.f32 %v2167_v46, %v9950_v44  ;;  %v2527_v31 = vmul.f32 %v2167_v46, %v9951_v30  ;;  %2784 = vmatmul.bf16.vlgmr.msrb.gmra.mxu1 %v7802_v18 }
 0x297   : > { %2817 = vmatpush.bf16.msra.mxu0 %v2623_v54  ;;  %v2615_v13 = vpack.c.bf16 %v2399_v25, %v2391_v48  ;;  %v2168_v28 = vperm.slane %v7528_v0, 5  ;;  %v2095_v4 = vperm.slane %v7555_v42, 4  ;;  %v2159_v49 = vperm.slane %v7574_v32, 4 }
 0x298   : > { %2830 = vmatpush.bf16.msra.mxu1 %v2687_v47  ;;  %2843 = vmatpush.bf16.msra.mxu2 %v2624_v3  ;;  %v2679_v37 = vpack.c.bf16 %v2527_v31, %v2519_v41  ;;  %v2096_v51 = vperm.slane %v7555_v42, 5  ;;  %v2160_v60 = vperm.slane %v7574_v32, 5  ;;  %v2392_v10 = vmul.f32 %v2104_v23, %v9952_v19 }
 0x299   : > { %2856 = vmatpush.bf16.msra.mxu3 %v2688_v53  ;;  %v2400_v46 = vmul.f32 %v2104_v23, %v9953_v24  ;;  %v2520_v21 = vmul.f32 %v2168_v28, %v9952_v19  ;;  %v2528_v22 = vmul.f32 %v2168_v28, %v9953_v24  ;;  %v2375_v34 = vmul.f32 %v2095_v4, %v9950_v44  ;;  %v1614_v28 = vpop.f32.mrf.mxu0 }
 0x29a   : > { %v2383_v2 = vmul.f32 %v2095_v4, %v9951_v30  ;;  %v2503_v62 = vmul.f32 %v2159_v49, %v9950_v44  ;;  %v2511_v14 = vmul.f32 %v2159_v49, %v9951_v30  ;;  %v2376_v54 = vmul.f32 %v2096_v51, %v9952_v19  ;;  %v1627_v4 = vpop.f32.mrf.mxu1 }
 0x29b   : > { %2818 = vmatpush.bf16.msra.mxu0 %v2615_v13  ;;  %v2616_v9 = vpack.c.bf16 %v2400_v46, %v2392_v10  ;;  %v2680_v59 = vpack.c.bf16 %v2528_v22, %v2520_v21  ;;  %v2087_v47 = vperm.slane %v7601_v7, 4  ;;  %v2384_v3 = vmul.f32 %v2096_v51, %v9953_v24  ;;  %v1653_v21 = vpop.f32.mrf.mxu3 }
 0x29c   : > { %2831 = vmatpush.bf16.msra.mxu1 %v2679_v37  ;;  %v2607_v48 = vpack.c.bf16 %v2383_v2, %v2375_v34  ;;  %v2671_v25 = vpack.c.bf16 %v2511_v14, %v2503_v62  ;;  %v2504_v53 = vmul.f32 %v2160_v60, %v9952_v19  ;;  %v2512_v41 = vmul.f32 %v2160_v60, %v9953_v24  ;;  %v1640_v46 = vpop.f32.mrf.mxu2 }
 0x29d   : > { %2844 = vmatpush.bf16.msra.mxu2 %v2616_v9  ;;  %2857 = vmatpush.bf16.msra.mxu3 %v2680_v59  ;;  %v2359_v31 = vmul.f32 %v2087_v47, %v9950_v44  ;;  %v2367_v13 = vmul.f32 %v2087_v47, %v9951_v30  ;;  %v2151_v23 = vperm.slane %v7620_v55, 4  ;;  %v2608_v37 = vpack.c.bf16 %v2384_v3, %v2376_v54 }
 0x29e   : > { %v2088_v49 = vperm.slane %v7601_v7, 5  ;;  %v2152_v10 = vperm.slane %v7620_v55, 5  ;;  %v2079_v51 = vperm.slane %v7647_v6, 4  ;;  %v2672_v60 = vpack.c.bf16 %v2512_v41, %v2504_v53 }
 0x29f   : > { %2819 = vmatpush.bf16.msra.mxu0 %v2607_v48  ;;  %v2599_v22 = vpack.c.bf16 %v2367_v13, %v2359_v31  ;;  %v2487_v34 = vmul.f32 %v2151_v23, %v9950_v44  ;;  %v2143_v2 = vperm.slane %v7666_v36, 4  ;;  %v2495_v62 = vmul.f32 %v2151_v23, %v9951_v30 }
 0x2a0   : > { %2832 = vmatpush.bf16.msra.mxu1 %v2671_v25  ;;  %v2360_v14 = vmul.f32 %v2088_v49, %v9952_v19  ;;  %v2368_v9 = vmul.f32 %v2088_v49, %v9953_v24  ;;  %v2488_v59 = vmul.f32 %v2152_v10, %v9952_v19  ;;  %v2496_v54 = vmul.f32 %v2152_v10, %v9953_v24 }
 0x2a1   : > { %2845 = vmatpush.bf16.msra.mxu2 %v2608_v37  ;;  %2858 = vmatpush.bf16.msra.mxu3 %v2672_v60  ;;  %v2343_v47 = vmul.f32 %v2079_v51, %v9950_v44  ;;  %v2351_v48 = vmul.f32 %v2079_v51, %v9951_v30  ;;  %v2080_v25 = vperm.slane %v7647_v6, 5  ;;  %v2663_v3 = vpack.c.bf16 %v2495_v62, %v2487_v34 }
 0x2a2   : > { %v2600_v53 = vpack.c.bf16 %v2368_v9, %v2360_v14  ;;  %v2471_v41 = vmul.f32 %v2143_v2, %v9950_v44  ;;  %v2479_v31 = vmul.f32 %v2143_v2, %v9951_v30  ;;  %v2664_v13 = vpack.c.bf16 %v2496_v54, %v2488_v59 }
 0x2a3   : > { %2820 = vmatpush.bf16.msra.mxu0 %v2599_v22  ;;  %v2591_v23 = vpack.c.bf16 %v2351_v48, %v2343_v47  ;;  %v2344_v28 = vmul.f32 %v2080_v25, %v9952_v19  ;;  %v2352_v4 = vmul.f32 %v2080_v25, %v9953_v24  ;;  %v2144_v49 = vperm.slane %v7666_v36, 5 }
 0x2a4   : > { %2833 = vmatpush.bf16.msra.mxu1 %v2663_v3  ;;  %v2655_v37 = vpack.c.bf16 %v2479_v31, %v2471_v41  ;;  %v2071_v10 = vperm.slane %v7688_v38, 4  ;;  %v2135_v51 = vperm.slane %v7708_v8, 4  ;;  %v2072_v21 = vperm.slane %v7688_v38, 5 }
 0x2a5   : > { %2846 = vmatpush.bf16.msra.mxu2 %v2600_v53  ;;  %2859 = vmatpush.bf16.msra.mxu3 %v2664_v13  ;;  %v2592_v46 = vpack.c.bf16 %v2352_v4, %v2344_v28  ;;  %v2136_v60 = vperm.slane %v7708_v8, 5  ;;  %v2129_v22 = vperm.slane %v7373_v12, 6  ;;  %v2472_v34 = vmul.f32 %v2144_v49, %v9952_v19  ;;  %v9954_v13 = vld [vmem:[#allocation39_spill] sm:$0xff] }
 0x2a6   : > { %v2480_v2 = vmul.f32 %v2144_v49, %v9953_v24  ;;  %v2327_v62 = vmul.f32 %v2071_v10, %v9950_v44  ;;  %v2335_v14 = vmul.f32 %v2071_v10, %v9951_v30  ;;  %v2455_v9 = vmul.f32 %v2135_v51, %v9950_v44  ;;  %v9955_v28 = vld [vmem:[#allocation47_spill] sm:$0xff] }
 0x2a7   : > { %2821 = vmatpush.bf16.msra.mxu0 %v2591_v23  ;;  %v2463_v59 = vmul.f32 %v2135_v51, %v9951_v30  ;;  %v2328_v54 = vmul.f32 %v2072_v21, %v9952_v19  ;;  %v2336_v47 = vmul.f32 %v2072_v21, %v9953_v24  ;;  %v2456_v3 = vmul.f32 %v2136_v60, %v9952_v19 }
 0x2a8   : > { %2834 = vmatpush.bf16.msra.mxu1 %v2655_v37  ;;  %v2656_v48 = vpack.c.bf16 %v2480_v2, %v2472_v34  ;;  %v2583_v25 = vpack.c.bf16 %v2335_v14, %v2327_v62  ;;  %v2464_v53 = vmul.f32 %v2136_v60, %v9953_v24  ;;  %v2441_v23 = vmul.f32 %v2129_v22, %v9954_v13  ;;  %v9956_v60 = vld [vmem:[#allocation40_spill] sm:$0xff] }
 0x2a9   : > { %2847 = vmatpush.bf16.msra.mxu2 %v2592_v46  ;;  %v2647_v41 = vpack.c.bf16 %v2463_v59, %v2455_v9  ;;  %v2584_v31 = vpack.c.bf16 %v2336_v47, %v2328_v54  ;;  %v2449_v44 = vmul.f32 %v2129_v22, %v9955_v28  ;;  %v2193_v4 = vperm.slane %v7393_v27, 6  ;;  %v9957_v34 = vld [vmem:[#allocation48_spill] sm:$0xff] }
 0x2aa   : > { %2860 = vmatpush.bf16.msra.mxu3 %v2656_v48  ;;  %v2648_v30 = vpack.c.bf16 %v2464_v53, %v2456_v3  ;;  %v2130_v49 = vperm.slane %v7373_v12, 7  ;;  %v2194_v37 = vperm.slane %v7393_v27, 7  ;;  %v2121_v19 = vperm.slane %v7415_v56, 6 }
 0x2ab   : > { %2822 = vmatpush.bf16.msra.mxu0 %v2583_v25  ;;  %v2641_v10 = vpack.c.bf16 %v2449_v44, %v2441_v23  ;;  %v2185_v24 = vperm.slane %v7434_v15, 6  ;;  %v2122_v51 = vperm.slane %v7415_v56, 7  ;;  %v2569_v46 = vmul.f32 %v2193_v4, %v9954_v13 }
 0x2ac   : > { %2835 = vmatpush.bf16.msra.mxu1 %v2647_v41  ;;  %v2577_v21 = vmul.f32 %v2193_v4, %v9955_v28  ;;  %v2442_v22 = vmul.f32 %v2130_v49, %v9956_v60  ;;  %v2450_v2 = vmul.f32 %v2130_v49, %v9957_v34  ;;  %v2570_v12 = vmul.f32 %v2194_v37, %v9956_v60 }
 0x2ad   : > { %2848 = vmatpush.bf16.msra.mxu2 %v2584_v31  ;;  %v2578_v27 = vmul.f32 %v2194_v37, %v9957_v34  ;;  %v2425_v62 = vmul.f32 %v2121_v19, %v9954_v13  ;;  %v2186_v14 = vperm.slane %v7434_v15, 7  ;;  %v2433_v59 = vmul.f32 %v2121_v19, %v9955_v28 }
 0x2ae   : > { %2861 = vmatpush.bf16.msra.mxu3 %v2648_v30  ;;  %v2705_v56 = vpack.c.bf16 %v2577_v21, %v2569_v46  ;;  %v2642_v9 = vpack.c.bf16 %v2450_v2, %v2442_v22  ;;  %v2553_v54 = vmul.f32 %v2185_v24, %v9954_v13  ;;  %v2561_v48 = vmul.f32 %v2185_v24, %v9955_v28 }
 0x2af   : > { %2867 = vmatpush.bf16.msrb.mxu0 %v2641_v10  ;;  %v2706_v47 = vpack.c.bf16 %v2578_v27, %v2570_v12  ;;  %v2426_v25 = vmul.f32 %v2122_v51, %v9956_v60  ;;  %v2434_v3 = vmul.f32 %v2122_v51, %v9957_v34  ;;  %v2633_v15 = vpack.c.bf16 %v2433_v59, %v2425_v62 }
 0x2b0   : > { %2823 = vmatmul.bf16.vlgmr.msra.gmra.mxu0 %v7795_v26  ;;  %2880 = vmatpush.bf16.msrb.mxu1 %v2705_v56  ;;  %v2554_v53 = vmul.f32 %v2186_v14, %v9956_v60  ;;  %v2562_v41 = vmul.f32 %v2186_v14, %v9957_v34  ;;  %v2113_v31 = vperm.slane %v7465_v39, 6  ;;  %v2697_v23 = vpack.c.bf16 %v2561_v48, %v2553_v54 }
 0x2b1   : > { %2893 = vmatpush.bf16.msrb.mxu2 %v2642_v9  ;;  %v2634_v44 = vpack.c.bf16 %v2434_v3, %v2426_v25  ;;  %v1626_v30 = vadd.f32 %v7885_v43, %v7883_v52  ;;  %v1652_v4 = vadd.f32 %v7892_v33, %v7890_v16  ;;  %v2177_v19 = vperm.slane %v7482_v58, 6  ;;  %2862 = vmatmul.bf16.vlgmr.msra.gmra.mxu3 %v7802_v18 }
 0x2b2   : > { %2906 = vmatpush.bf16.msrb.mxu3 %v2706_v47  ;;  %v2698_v49 = vpack.c.bf16 %v2562_v41, %v2554_v53  ;;  %v2409_v37 = vmul.f32 %v2113_v31, %v9954_v13  ;;  %v2417_v10 = vmul.f32 %v2113_v31, %v9955_v28  ;;  %2849 = vmatmul.bf16.vlgmr.msra.gmra.mxu2 %v7795_v26  ;;  %v2114_v24 = vperm.slane %v7465_v39, 7 }
 0x2b3   : > { %2868 = vmatpush.bf16.msrb.mxu0 %v2633_v15  ;;  %1761 = vst [vmem:[%s7860_s25 + $0x10] sm:$0xff] %v1626_v30  ;;  %v2178_v51 = vperm.slane %v7482_v58, 7  ;;  %v2105_v52 = vperm.slane %v7509_v5, 6  ;;  %v2169_v43 = vperm.slane %v7528_v0, 6  ;;  %2836 = vmatmul.bf16.vlgmr.msra.gmra.mxu1 %v7802_v18  ;;  %v2537_v33 = vmul.f32 %v2177_v19, %v9954_v13 }
 0x2b4   : > { %2881 = vmatpush.bf16.msrb.mxu1 %v2697_v23  ;;  %1762 = vst [vmem:[%s7860_s25 + $0x18] sm:$0xff] %v1652_v4  ;;  %v2625_v16 = vpack.c.bf16 %v2417_v10, %v2409_v37  ;;  %v2545_v46 = vmul.f32 %v2177_v19, %v9955_v28  ;;  %v2410_v39 = vmul.f32 %v2114_v24, %v9956_v60  ;;  %v2106_v59 = vperm.slane %v7509_v5, 7 }
 0x2b5   : > { %2894 = vmatpush.bf16.msrb.mxu2 %v2634_v44  ;;  %v2418_v58 = vmul.f32 %v2114_v24, %v9957_v34  ;;  %v2538_v21 = vmul.f32 %v2178_v51, %v9956_v60  ;;  %v2546_v22 = vmul.f32 %v2178_v51, %v9957_v34  ;;  %v2393_v12 = vmul.f32 %v2105_v52, %v9954_v13 }
 0x2b6   : > { %2907 = vmatpush.bf16.msrb.mxu3 %v2698_v49  ;;  %v2689_v2 = vpack.c.bf16 %v2545_v46, %v2537_v33  ;;  %v2401_v27 = vmul.f32 %v2105_v52, %v9955_v28  ;;  %v2521_v62 = vmul.f32 %v2169_v43, %v9954_v13  ;;  %v2529_v9 = vmul.f32 %v2169_v43, %v9955_v28 }
 0x2b7   : > { %2869 = vmatpush.bf16.msrb.mxu0 %v2625_v16  ;;  %v2626_v14 = vpack.c.bf16 %v2418_v58, %v2410_v39  ;;  %v2690_v56 = vpack.c.bf16 %v2546_v22, %v2538_v21  ;;  %v2170_v47 = vperm.slane %v7528_v0, 7  ;;  %v2097_v48 = vperm.slane %v7555_v42, 6 }
 0x2b8   : > { %2882 = vmatpush.bf16.msrb.mxu1 %v2689_v2  ;;  %v2617_v54 = vpack.c.bf16 %v2401_v27, %v2393_v12  ;;  %v2161_v25 = vperm.slane %v7574_v32, 6  ;;  %v2681_v3 = vpack.c.bf16 %v2529_v9, %v2521_v62  ;;  %v2394_v15 = vmul.f32 %v2106_v59, %v9956_v60  ;;  %v8026_v2 = vpop.f32.mrf.mxu0 }
 0x2b9   : > { %2895 = vmatpush.bf16.msrb.mxu2 %v2626_v14  ;;  %v2402_v53 = vmul.f32 %v2106_v59, %v9957_v34  ;;  %v2098_v41 = vperm.slane %v7555_v42, 7  ;;  %v2522_v5 = vmul.f32 %v2170_v47, %v9956_v60  ;;  %v2530_v31 = vmul.f32 %v2170_v47, %v9957_v34  ;;  %v8033_v14 = vpop.f32.mrf.mxu2 }
 0x2ba   : > { %2908 = vmatpush.bf16.msrb.mxu3 %v2690_v56  ;;  %v2377_v0 = vmul.f32 %v2097_v48, %v9954_v13  ;;  %v2385_v23 = vmul.f32 %v2097_v48, %v9955_v28  ;;  %v2505_v30 = vmul.f32 %v2161_v25, %v9954_v13  ;;  %v2513_v4 = vmul.f32 %v2161_v25, %v9955_v28  ;;  %v8035_v56 = vpop.f32.mrf.mxu3 }
 0x2bb   : > { %2870 = vmatpush.bf16.msrb.mxu0 %v2617_v54  ;;  %v2618_v44 = vpack.c.bf16 %v2402_v53, %v2394_v15  ;;  %v2378_v49 = vmul.f32 %v2098_v41, %v9956_v60  ;;  %v2682_v37 = vpack.c.bf16 %v2530_v31, %v2522_v5  ;;  %v2386_v42 = vmul.f32 %v2098_v41, %v9957_v34 }
 0x2bc   : > { %2883 = vmatpush.bf16.msrb.mxu1 %v2681_v3  ;;  %v2609_v10 = vpack.c.bf16 %v2385_v23, %v2377_v0  ;;  %v2162_v19 = vperm.slane %v7574_v32, 7  ;;  %v2673_v24 = vpack.c.bf16 %v2513_v4, %v2505_v30  ;;  %v2089_v51 = vperm.slane %v7601_v7, 6 }
 0x2bd   : > { %2896 = vmatpush.bf16.msrb.mxu2 %v2618_v44  ;;  %v2153_v52 = vperm.slane %v7620_v55, 6  ;;  %v2090_v43 = vperm.slane %v7601_v7, 7  ;;  %v2610_v16 = vpack.c.bf16 %v2386_v42, %v2378_v49  ;;  %v2154_v39 = vperm.slane %v7620_v55, 7  ;;  %v8028_v7 = vpop.f32.mrf.mxu1 }
 0x2be   : > { %2909 = vmatpush.bf16.msrb.mxu3 %v2682_v37  ;;  %v2506_v33 = vmul.f32 %v2162_v19, %v9956_v60  ;;  %v2514_v46 = vmul.f32 %v2162_v19, %v9957_v34  ;;  %v2361_v58 = vmul.f32 %v2089_v51, %v9954_v13  ;;  %v2369_v32 = vmul.f32 %v2089_v51, %v9955_v28 }
 0x2bf   : > { %2871 = vmatpush.bf16.msrb.mxu0 %v2609_v10  ;;  %v2489_v21 = vmul.f32 %v2153_v52, %v9954_v13  ;;  %v2497_v22 = vmul.f32 %v2153_v52, %v9955_v28  ;;  %v2362_v27 = vmul.f32 %v2090_v43, %v9956_v60  ;;  %v2370_v62 = vmul.f32 %v2090_v43, %v9957_v34  ;;  %v9958_v43 = vld [vmem:[#allocation81_spill] sm:$0xff] }
 0x2c0   : > { %2884 = vmatpush.bf16.msrb.mxu1 %v2673_v24  ;;  %v2674_v12 = vpack.c.bf16 %v2514_v46, %v2506_v33  ;;  %v2490_v55 = vmul.f32 %v2154_v39, %v9956_v60  ;;  %v2601_v9 = vpack.c.bf16 %v2369_v32, %v2361_v58  ;;  %v2498_v54 = vmul.f32 %v2154_v39, %v9957_v34  ;;  %v1666_v46 = vpop.f32.mrf.mxu0 }
 0x2c1   : > { %2897 = vmatpush.bf16.msrb.mxu2 %v2610_v16  ;;  %v2665_v59 = vpack.c.bf16 %v2497_v22, %v2489_v21  ;;  %v2081_v47 = vperm.slane %v7647_v6, 6  ;;  %v2602_v48 = vpack.c.bf16 %v2370_v62, %v2362_v27  ;;  %v2145_v25 = vperm.slane %v7666_v36, 6  ;;  %v9959_v16 = vld [vmem:[#allocation83_spill] sm:$0xff]  ;;  %v9960_v22 = vld [vmem:[#allocation85_spill] sm:$0xff]  ;;  %v1692_v62 = vpop.f32.mrf.mxu2 }
 0x2c2   : > { %2910 = vmatpush.bf16.msrb.mxu3 %v2674_v12  ;;  %v2082_v3 = vperm.slane %v7647_v6, 7  ;;  %v2146_v15 = vperm.slane %v7666_v36, 7  ;;  %v2666_v53 = vpack.c.bf16 %v2498_v54, %v2490_v55  ;;  %v2073_v31 = vperm.slane %v7688_v38, 6  ;;  %v9961_v12 = vld [vmem:[#allocation84_spill] sm:$0xff] }
 0x2c3   : > { %2872 = vmatpush.bf16.msrb.mxu0 %v2601_v9  ;;  %v2345_v41 = vmul.f32 %v2081_v47, %v9954_v13  ;;  %v2353_v5 = vmul.f32 %v2081_v47, %v9955_v28  ;;  %v2473_v0 = vmul.f32 %v2145_v25, %v9954_v13  ;;  %v2481_v23 = vmul.f32 %v2145_v25, %v9955_v28  ;;  %v9964_v47 = vld [vmem:[#allocation86_spill] sm:$0xff]  ;;  %v9965_v25 = vld [vmem:[#allocation89_spill] sm:$0xff] }
 0x2c4   : > { %2885 = vmatpush.bf16.msrb.mxu1 %v2665_v59  ;;  %v2346_v44 = vmul.f32 %v2082_v3, %v9956_v60  ;;  %v2354_v30 = vmul.f32 %v2082_v3, %v9957_v34  ;;  %v2474_v36 = vmul.f32 %v2146_v15, %v9956_v60  ;;  %v2482_v4 = vmul.f32 %v2146_v15, %v9957_v34  ;;  %v9966_v3 = vld [vmem:[#allocation88_spill] sm:$0xff] }
 0x2c5   : > { %2898 = vmatpush.bf16.msrb.mxu2 %v2602_v48  ;;  %v2593_v6 = vpack.c.bf16 %v2353_v5, %v2345_v41  ;;  %v2329_v49 = vmul.f32 %v2073_v31, %v9954_v13  ;;  %v2657_v37 = vpack.c.bf16 %v2481_v23, %v2473_v0  ;;  %v2337_v42 = vmul.f32 %v2073_v31, %v9955_v28  ;;  %v1679_v39 = vpop.f32.mrf.mxu1  ;;  %v9969_v31 = vld [vmem:[#allocation90_spill] sm:$0xff]  ;;  %v9971_v23 = vld [vmem:[#allocation92_spill] sm:$0xff] }
 0x2c6   : > { %2911 = vmatpush.bf16.msrb.mxu3 %v2666_v53  ;;  %v2594_v10 = vpack.c.bf16 %v2354_v30, %v2346_v44  ;;  %v2137_v19 = vperm.slane %v7708_v8, 6  ;;  %v2658_v24 = vpack.c.bf16 %v2482_v4, %v2474_v36  ;;  %v2074_v51 = vperm.slane %v7688_v38, 7  ;;  %v1705_v38 = vpop.f32.mrf.mxu3  ;;  %v9972_v44 = vld [vmem:[#allocation91_spill] sm:$0xff]  ;;  %v9974_v36 = vld [vmem:[#allocation93_spill] sm:$0xff] }
 0x2c7   : > { %2873 = vmatpush.bf16.msrb.mxu0 %v2593_v6  ;;  %v2138_v52 = vperm.slane %v7708_v8, 7  ;;  %v3157_v33 = vsel %vm783_vm3, %v9959_v16, %v9958_v43  ;;  %v2585_v58 = vpack.c.bf16 %v2337_v42, %v2329_v49  ;;  %v3158_v27 = vsel %vm775_vm0, %v9961_v12, %v9960_v22  ;;  %v9973_v6 = vld [vmem:[#allocation94_spill] sm:$0xff]  ;;  %v9975_v49 = vld [vmem:[#allocation96_spill] sm:$0xff] }
 0x2c8   : > { %2886 = vmatpush.bf16.msrb.mxu1 %v2657_v37  ;;  %v2457_v32 = vmul.f32 %v2137_v19, %v9954_v13  ;;  %v2465_v21 = vmul.f32 %v2137_v19, %v9955_v28  ;;  %v2330_v8 = vmul.f32 %v2074_v51, %v9956_v60  ;;  %v2338_v55 = vmul.f32 %v2074_v51, %v9957_v34  ;;  %v9963_v28 = vld [vmem:[#allocation87_spill] sm:$0xff] }
 0x2c9   : > { %2899 = vmatpush.bf16.msrb.mxu2 %v2594_v10  ;;  %v2458_v9 = vmul.f32 %v2138_v52, %v9956_v60  ;;  %v2466_v59 = vmul.f32 %v2138_v52, %v9957_v34  ;;  %vm9962_vm5 = vcmask 1046529   ;;  %v3160_v48 = vsel %vm777_vm1, %v9964_v47, %v9963_v28  ;;  %v9968_v60 = vld [vmem:[#allocation82_spill] sm:$0xff]  ;;  %v9976_v37 = vld [vmem:[#allocation95_spill] sm:$0xff] }
 0x2ca   : > { %2912 = vmatpush.bf16.msrb.mxu3 %v2658_v24  ;;  %v2649_v54 = vpack.c.bf16 %v2465_v21, %v2457_v32  ;;  %v3159_v13 = vsel %vm9962_vm5, %v3158_v27, %v3157_v33  ;;  %v3161_v15 = vsel %vm781_vm2, %v9966_v3, %v9965_v25  ;;  %v2586_v53 = vpack.c.bf16 %v2338_v55, %v2330_v8 }
 0x2cb   : > { %2874 = vmatpush.bf16.msrb.mxu0 %v2585_v58  ;;  %v2650_v41 = vpack.c.bf16 %v2466_v59, %v2458_v9  ;;  %vm9967_vm4 = vcmask 1044483   ;;  %v3220_v34 = vsel %vm783_vm3, %v9969_v31, %v9968_v60  ;;  %vm9970_vm12 = vcmask 1046531   ;;  %v9978_v9 = vld [vmem:[#allocation65_spill] sm:$0xff] }
 0x2cc   : > { %v3162_v5 = vsel %vm9967_vm4, %v3160_v48, %v3161_v15  ;;  %2887 = vmatpush.bf16.msrb.mxu1 %v2649_v54  ;;  %v3221_v30 = vsel %vm775_vm0, %v9972_v44, %v9971_v23  ;;  %v3223_v4 = vsel %vm777_vm1, %v9974_v36, %v9973_v6  ;;  %v3224_v10 = vsel %vm781_vm2, %v9976_v37, %v9975_v49  ;;  %v9979_v54 = vld [vmem:[#allocation73_spill] sm:$0xff]  ;;  %v9980_v15 = vld [vmem:[#allocation66_spill] sm:$0xff] }
 0x2cd   : > { %v3163_v0 = vsel %vm9970_vm12, %v3162_v5, %v3159_v13  ;;  %2900 = vmatpush.bf16.msrb.mxu2 %v2586_v53  ;;  %v3222_v19 = vsel %vm9962_vm5, %v3221_v30, %v3220_v34  ;;  %v3225_v24 = vsel %vm9967_vm4, %v3223_v4, %v3224_v10  ;;  %v3149_v51 = vsel %vm769_vm10, %v9958_v43, %v9959_v16 }
 0x2ce   : > { %v8089_v42 = vrot.slane %v3163_v0, 7  ;;  %2913 = vmatpush.bf16.msrb.mxu3 %v2650_v41  ;;  %v3226_v52 = vsel %vm9970_vm12, %v3225_v24, %v3222_v19  ;;  %v3150_v33 = vsel %vm761_vm7, %v9961_v12, %v9960_v22  ;;  %v3152_v46 = vsel %vm763_vm8, %v9964_v47, %v9963_v28  ;;  %2875 = vmatmul.bf16.vlgmr.msrb.gmra.mxu0 %v7795_v26  ;;  %v9981_v41 = vld [vmem:[#allocation74_spill] sm:$0xff] }
 0x2cf   : > { %v3153_v39 = vsel %vm767_vm9, %v9966_v3, %v9965_v25  ;;  %v8107_v32 = vrot.slane %v3226_v52, 7  ;;  %vm9977_vm5 = vcmask 1045504   ;;  %2888 = vmatmul.bf16.vlgmr.msrb.gmra.mxu1 %v7802_v18  ;;  %v3212_v38 = vsel %vm769_vm10, %v9968_v60, %v9969_v31 }
 0x2d0   : > { %v3284_v58 = vperm.slane %v8089_v42, 0  ;;  %v3285_v21 = vperm.slane %v8089_v42, 1  ;;  %v3151_v27 = vsel %vm9977_vm5, %v3150_v33, %v3149_v51  ;;  %v3154_v62 = vsel %vm792_vm11, %v3152_v46, %v3153_v39  ;;  %2901 = vmatmul.bf16.vlgmr.msrb.gmra.mxu2 %v7795_v26  ;;  %vm9983_vm12 = vmmov %vm9977_vm5 }
 0x2d1   : > { %v3213_v8 = vsel %vm761_vm7, %v9972_v44, %v9971_v23  ;;  %v3215_v55 = vsel %vm763_vm8, %v9974_v36, %v9973_v6  ;;  %v3348_v48 = vperm.slane %v8107_v32, 0  ;;  %2914 = vmatmul.bf16.vlgmr.msrb.gmra.mxu3 %v7802_v18  ;;  %v3349_v34 = vperm.slane %v8107_v32, 1 }
 0x2d2   : > { %v3596_v59 = vmul.f32 %v3284_v58, %v9978_v9  ;;  %v3604_v13 = vmul.f32 %v3284_v58, %v9979_v54  ;;  %v3597_v53 = vmul.f32 %v3285_v21, %v9980_v15  ;;  %v3605_v5 = vmul.f32 %v3285_v21, %v9981_v41 }
 0x2d3   : > { %vm9982_vm4 = vcmask 1045506   ;;  %v3214_v30 = vsel %vm9983_vm12, %v3213_v8, %v3212_v38  ;;  %v3724_v26 = vmul.f32 %v3348_v48, %v9978_v9  ;;  %v3732_v10 = vmul.f32 %v3348_v48, %v9979_v54 }
 0x2d4   : > { %v3155_v0 = vsel %vm9982_vm4, %v3154_v62, %v3151_v27  ;;  %v3796_v4 = vpack.c.bf16 %v3604_v13, %v3596_v59  ;;  %v3797_v24 = vpack.c.bf16 %v3605_v5, %v3597_v53  ;;  %v3725_v51 = vmul.f32 %v3349_v34, %v9980_v15  ;;  %vm9984_vm5 = vmmov %vm9982_vm4 }
 0x2d5   : > { %v8135_v19 = vrot.slane %v3155_v0, 6  ;;  %v3733_v18 = vmul.f32 %v3349_v34, %v9981_v41  ;;  %v3216_v52 = vsel %vm767_vm9, %v9976_v37, %v9975_v49  ;;  %v3860_v33 = vpack.c.bf16 %v3732_v10, %v3724_v26 }
 0x2d6   : > { %3872 = vmatpush.bf16.msra.mxu0 %v3796_v4  ;;  %v3217_v39 = vsel %vm792_vm11, %v3215_v55, %v3216_v52  ;;  %3898 = vmatpush.bf16.msra.mxu2 %v3797_v24  ;;  %v1678_v62 = vadd.f32 %v8028_v7, %v8026_v2  ;;  %v1704_v38 = vadd.f32 %v8035_v56, %v8033_v14  ;;  %v9985_v48 = vmax.f32 %v6630_v11, 0.0 }
 0x2d7   : > { %v3276_v46 = vperm.slane %v8135_v19, 0  ;;  %v3277_v58 = vperm.slane %v8135_v19, 1  ;;  %v3861_v21 = vpack.c.bf16 %v3733_v18, %v3725_v51  ;;  %v3218_v27 = vsel %vm9984_vm5, %v3217_v39, %v3214_v30  ;;  %3885 = vmatpush.bf16.msra.mxu1 %v3860_v33 }
 0x2d8   : > { %v8152_v13 = vrot.slane %v3218_v27, 6  ;;  %v8157_v53 = vrot.slane %v9985_v48, 2  ;;  %1763 = vst [vmem:[%s7860_s25 + $0x20] sm:$0xff] %v1678_v62  ;;  %v3141_v7 = vsel %vm781_vm2, %v9958_v43, %v9959_v16  ;;  %v3142_v14 = vsel %vm783_vm3, %v9960_v22, %v9961_v12 }
 0x2d9   : > { %v3580_v8 = vmul.f32 %v3276_v46, %v9978_v9  ;;  %v3588_v59 = vmul.f32 %v3276_v46, %v9979_v54  ;;  %v3581_v55 = vmul.f32 %v3277_v58, %v9980_v15  ;;  %3911 = vmatpush.bf16.msra.mxu3 %v3861_v21  ;;  %v3589_v2 = vmul.f32 %v3277_v58, %v9981_v41 }
 0x2da   : > { %9986 = vst [vmem:[#allocation27_spill] sm:$0xff] %v8157_v53  ;;  %v3340_v5 = vperm.slane %v8152_v13, 0  ;;  %v3341_v34 = vperm.slane %v8152_v13, 1  ;;  %vm9987_vm4 = vcmask 1046533   ;;  %v3144_v30 = vsel %vm775_vm0, %v9964_v47, %v9963_v28 }
 0x2db   : > { %v3788_v56 = vpack.c.bf16 %v3588_v59, %v3580_v8  ;;  %1764 = vst [vmem:[%s7860_s25 + $0x28] sm:$0xff] %v1704_v38  ;;  %v3143_v11 = vsel %vm9987_vm4, %v3141_v7, %v3142_v14  ;;  %v3789_v0 = vpack.c.bf16 %v3589_v2, %v3581_v55  ;;  %v3145_v4 = vsel %vm777_vm1, %v9966_v3, %v9965_v25  ;;  %vm9988_vm12 = vmmov %vm9987_vm4 }
 0x2dc   : > { %v3204_v26 = vsel %vm781_vm2, %v9968_v60, %v9969_v31  ;;  %v3708_v10 = vmul.f32 %v3340_v5, %v9978_v9  ;;  %v3716_v24 = vmul.f32 %v3340_v5, %v9979_v54  ;;  %v3709_v51 = vmul.f32 %v3341_v34, %v9980_v15 }
 0x2dd   : > { %3873 = vmatpush.bf16.msra.mxu0 %v3788_v56  ;;  %v3717_v18 = vmul.f32 %v3341_v34, %v9981_v41  ;;  %3899 = vmatpush.bf16.msra.mxu2 %v3789_v0  ;;  %v3146_v52 = vsel %vm779_vm14, %v3144_v30, %v3145_v4  ;;  %v3205_v33 = vsel %vm783_vm3, %v9971_v23, %v9972_v44  ;;  %v9989_v48 = vmax.f32 %v6632_v35, 0.0 }
 0x2de   : > { %v3207_v46 = vsel %vm775_vm0, %v9974_v36, %v9973_v6  ;;  %v3208_v39 = vsel %vm777_vm1, %v9976_v37, %v9975_v49  ;;  %v3852_v58 = vpack.c.bf16 %v3716_v24, %v3708_v10  ;;  %v3147_v27 = vsel %vm787_vm6, %v3146_v52, %v3143_v11 }
 0x2df   : > { %v3853_v21 = vpack.c.bf16 %v3717_v18, %v3709_v51  ;;  %v3206_v62 = vsel %vm9988_vm12, %v3204_v26, %v3205_v33  ;;  %v8196_v38 = vrot.slane %v3147_v27, 5  ;;  %v3209_v8 = vsel %vm779_vm14, %v3207_v46, %v3208_v39 }
 0x2e0   : > { %v3133_v59 = vsel %vm767_vm9, %v9958_v43, %v9959_v16  ;;  %v3134_v55 = vsel %vm769_vm10, %v9961_v12, %v9960_v22  ;;  %v8207_v2 = vrot.slane %v9989_v48, 1  ;;  %3886 = vmatpush.bf16.msra.mxu1 %v3852_v58  ;;  %v3210_v7 = vsel %vm787_vm6, %v3209_v8, %v3206_v62 }
 0x2e1   : > { %3912 = vmatpush.bf16.msra.mxu3 %v3853_v21  ;;  %v3135_v14 = vsel %vm771_vm13, %v3133_v59, %v3134_v55  ;;  %v3136_v56 = vsel %vm761_vm7, %v9964_v47, %v9963_v28  ;;  %v3268_v5 = vperm.slane %v8196_v38, 0  ;;  %v8215_v34 = vrot.slane %v3210_v7, 5 }
 0x2e2   : > { %9990 = vst [vmem:[#allocation20_spill] sm:$0xff] %v8207_v2  ;;  %v3269_v11 = vperm.slane %v8196_v38, 1  ;;  %v3137_v35 = vsel %vm763_vm8, %v9966_v3, %v9965_v25  ;;  %v3196_v30 = vsel %vm767_vm9, %v9968_v60, %v9969_v31  ;;  %v3197_v4 = vsel %vm769_vm10, %v9972_v44, %v9971_v23 }
 0x2e3   : > { %v3138_v0 = vsel %vm765_vm15, %v3136_v56, %v3137_v35  ;;  %v3199_v26 = vsel %vm761_vm7, %v9974_v36, %v9973_v6  ;;  %v3564_v10 = vmul.f32 %v3268_v5, %v9978_v9  ;;  %v3572_v24 = vmul.f32 %v3268_v5, %v9979_v54 }
 0x2e4   : > { %v3332_v51 = vperm.slane %v8215_v34, 0  ;;  %v3565_v18 = vmul.f32 %v3269_v11, %v9980_v15  ;;  %v3573_v52 = vmul.f32 %v3269_v11, %v9981_v41  ;;  %v3333_v33 = vperm.slane %v8215_v34, 1 }
 0x2e5   : > { %vm9991_vm5 = vcmask 1043456   ;;  %v3198_v39 = vsel %vm771_vm13, %v3196_v30, %v3197_v4  ;;  %v3780_v58 = vpack.c.bf16 %v3572_v24, %v3564_v10  ;;  %v3200_v48 = vsel %vm763_vm8, %v9976_v37, %v9975_v49 }
 0x2e6   : > { %v3139_v46 = vsel %vm9991_vm5, %v3138_v0, %v3135_v14  ;;  %v3692_v21 = vmul.f32 %v3332_v51, %v9978_v9  ;;  %v3700_v27 = vmul.f32 %v3332_v51, %v9979_v54  ;;  %v3781_v8 = vpack.c.bf16 %v3573_v52, %v3565_v18  ;;  %vm9992_vm4 = vmmov %vm9991_vm5 }
 0x2e7   : > { %v8241_v62 = vrot.slane %v3139_v46, 4  ;;  %v3693_v59 = vmul.f32 %v3333_v33, %v9980_v15  ;;  %v3701_v55 = vmul.f32 %v3333_v33, %v9981_v41  ;;  %3874 = vmatpush.bf16.msra.mxu0 %v3780_v58  ;;  %v3201_v56 = vsel %vm765_vm15, %v3199_v26, %v3200_v48 }
 0x2e8   : > { %v3844_v7 = vpack.c.bf16 %v3700_v27, %v3692_v21  ;;  %3900 = vmatpush.bf16.msra.mxu2 %v3781_v8  ;;  %v3202_v35 = vsel %vm9992_vm4, %v3201_v56, %v3198_v39  ;;  %v3125_v0 = vsel %vm777_vm1, %v9958_v43, %v9959_v16  ;;  %v3126_v30 = vsel %vm781_vm2, %v9961_v12, %v9960_v22 }
 0x2e9   : > { %v3260_v14 = vperm.slane %v8241_v62, 0  ;;  %v3261_v5 = vperm.slane %v8241_v62, 1  ;;  %v3845_v11 = vpack.c.bf16 %v3701_v55, %v3693_v59  ;;  %v8260_v26 = vrot.slane %v3202_v35, 4 }
 0x2ea   : > { %3887 = vmatpush.bf16.msra.mxu1 %v3844_v7  ;;  %vm9993_vm12 = vcmask 1044483   ;;  %v3128_v52 = vsel %vm783_vm3, %v9963_v28, %v9964_v47  ;;  %v3129_v33 = vsel %vm775_vm0, %v9966_v3, %v9965_v25  ;;  %vm9994_vm5 = vcmask 1046529  }
 0x2eb   : > { %v3548_v4 = vmul.f32 %v3260_v14, %v9978_v9  ;;  %v3556_v10 = vmul.f32 %v3260_v14, %v9979_v54  ;;  %v3549_v24 = vmul.f32 %v3261_v5, %v9980_v15  ;;  %3913 = vmatpush.bf16.msra.mxu3 %v3845_v11  ;;  %v3557_v51 = vmul.f32 %v3261_v5, %v9981_v41 }
 0x2ec   : > { %v3127_v18 = vsel %vm9993_vm12, %v3125_v0, %v3126_v30  ;;  %v3324_v39 = vperm.slane %v8260_v26, 0  ;;  %v3325_v58 = vperm.slane %v8260_v26, 1  ;;  %v3130_v21 = vsel %vm9994_vm5, %v3129_v33, %v3128_v52 }
 0x2ed   : > { %v3772_v46 = vpack.c.bf16 %v3556_v10, %v3548_v4  ;;  %v3773_v27 = vpack.c.bf16 %v3557_v51, %v3549_v24  ;;  %vm9995_vm4 = vcmask 1046531   ;;  %v3188_v59 = vsel %vm777_vm1, %v9968_v60, %v9969_v31 }
 0x2ee   : > { %v3131_v8 = vsel %vm9995_vm4, %v3127_v18, %v3130_v21  ;;  %v3189_v55 = vsel %vm781_vm2, %v9972_v44, %v9971_v23  ;;  %v3676_v48 = vmul.f32 %v3324_v39, %v9978_v9  ;;  %v3684_v7 = vmul.f32 %v3324_v39, %v9979_v54 }
 0x2ef   : > { %3875 = vmatpush.bf16.msra.mxu0 %v3772_v46  ;;  %v3677_v14 = vmul.f32 %v3325_v58, %v9980_v15  ;;  %v3685_v56 = vmul.f32 %v3325_v58, %v9981_v41  ;;  %3901 = vmatpush.bf16.msra.mxu2 %v3773_v27  ;;  %v8285_v5 = vrot.slane %v3131_v8, 3  ;;  %v3190_v11 = vsel %vm9993_vm12, %v3188_v59, %v3189_v55 }
 0x2f0   : > { %v3191_v35 = vsel %vm783_vm3, %v9973_v6, %v9974_v36  ;;  %v3192_v0 = vsel %vm775_vm0, %v9976_v37, %v9975_v49  ;;  %v3836_v30 = vpack.c.bf16 %v3684_v7, %v3676_v48  ;;  %v3117_v24 = vsel %vm763_vm8, %v9958_v43, %v9959_v16 }
 0x2f1   : > { %v3837_v4 = vpack.c.bf16 %v3685_v56, %v3677_v14  ;;  %v3193_v10 = vsel %vm9994_vm5, %v3192_v0, %v3191_v35  ;;  %v3252_v51 = vperm.slane %v8285_v5, 0  ;;  %v3253_v52 = vperm.slane %v8285_v5, 1 }
 0x2f2   : > { %v3194_v18 = vsel %vm9995_vm4, %v3190_v11, %v3193_v10  ;;  %v3118_v33 = vsel %vm767_vm9, %v9961_v12, %v9960_v22  ;;  %3888 = vmatpush.bf16.msra.mxu1 %v3836_v30  ;;  %v3120_v58 = vsel %vm769_vm10, %v9964_v47, %v9963_v28  ;;  %v3121_v21 = vsel %vm761_vm7, %v9966_v3, %v9965_v25 }
 0x2f3   : > { %3914 = vmatpush.bf16.msra.mxu3 %v3837_v4  ;;  %v8304_v46 = vrot.slane %v3194_v18, 3  ;;  %v3119_v39 = vsel %vm792_vm11, %v3117_v24, %v3118_v33  ;;  %v3532_v27 = vmul.f32 %v3252_v51, %v9978_v9  ;;  %v3540_v8 = vmul.f32 %v3252_v51, %v9979_v54 }
 0x2f4   : > { %v3533_v59 = vmul.f32 %v3253_v52, %v9980_v15  ;;  %v3541_v55 = vmul.f32 %v3253_v52, %v9981_v41  ;;  %vm9996_vm12 = vcmask 1045504   ;;  %v3180_v56 = vsel %vm763_vm8, %v9968_v60, %v9969_v31 }
 0x2f5   : > { %v3316_v48 = vperm.slane %v8304_v46, 0  ;;  %v3317_v7 = vperm.slane %v8304_v46, 1  ;;  %v3122_v14 = vsel %vm9996_vm12, %v3121_v21, %v3120_v58  ;;  %v3764_v11 = vpack.c.bf16 %v3540_v8, %v3532_v27  ;;  %vm9998_vm4 = vmmov %vm9996_vm12 }
 0x2f6   : > { %v3765_v35 = vpack.c.bf16 %v3541_v55, %v3533_v59  ;;  %vm9997_vm5 = vcmask 1045506   ;;  %v3181_v30 = vsel %vm767_vm9, %v9972_v44, %v9971_v23  ;;  %v3183_v33 = vsel %vm769_vm10, %v9974_v36, %v9973_v6  ;;  %v8344_v59 = vpop.f32.mrf.mxu0  ;;  %v8346_v55 = vpop.f32.mrf.mxu1 }
 0x2f7   : > { %v3123_v0 = vsel %vm9997_vm5, %v3119_v39, %v3122_v14  ;;  %v3660_v4 = vmul.f32 %v3316_v48, %v9978_v9  ;;  %v3668_v10 = vmul.f32 %v3316_v48, %v9979_v54  ;;  %v3661_v24 = vmul.f32 %v3317_v7, %v9980_v15  ;;  %3876 = vmatpush.bf16.msra.mxu0 %v3764_v11  ;;  %vm9999_vm12 = vmmov %vm9997_vm5  ;;  %v8354_v11 = vpop.f32.mrf.mxu2 }
 0x2f8   : > { %v3669_v51 = vmul.f32 %v3317_v7, %v9981_v41  ;;  %3902 = vmatpush.bf16.msra.mxu2 %v3765_v35  ;;  %v8331_v18 = vrot.slane %v3123_v0, 2  ;;  %v3182_v52 = vsel %vm792_vm11, %v3180_v56, %v3181_v30  ;;  %v3184_v39 = vsel %vm761_vm7, %v9976_v37, %v9975_v49  ;;  %v8356_v35 = vpop.f32.mrf.mxu3 }
 0x2f9   : > { %v3828_v58 = vpack.c.bf16 %v3668_v10, %v3660_v4  ;;  %v3185_v27 = vsel %vm9998_vm4, %v3184_v39, %v3183_v33  ;;  %v3109_v8 = vsel %vm775_vm0, %v9958_v43, %v9959_v16  ;;  %v3110_v56 = vsel %vm777_vm1, %v9961_v12, %v9960_v22 }
 0x2fa   : > { %v3829_v21 = vpack.c.bf16 %v3669_v51, %v3661_v24  ;;  %v3244_v48 = vperm.slane %v8331_v18, 0  ;;  %v3186_v7 = vsel %vm9999_vm12, %v3182_v52, %v3185_v27  ;;  %v3245_v14 = vperm.slane %v8331_v18, 1 }
 0x2fb   : > { %3889 = vmatpush.bf16.msra.mxu1 %v3828_v58  ;;  %v8358_v0 = vrot.slane %v3186_v7, 2  ;;  %v3111_v30 = vsel %vm779_vm14, %v3109_v8, %v3110_v56  ;;  %v3112_v4 = vsel %vm781_vm2, %v9964_v47, %v9963_v28  ;;  %v3113_v10 = vsel %vm783_vm3, %v9965_v25, %v9966_v3 }
 0x2fc   : > { %3915 = vmatpush.bf16.msra.mxu3 %v3829_v21  ;;  %v3516_v24 = vmul.f32 %v3244_v48, %v9978_v9  ;;  %v3524_v51 = vmul.f32 %v3244_v48, %v9979_v54  ;;  %v3517_v52 = vmul.f32 %v3245_v14, %v9980_v15  ;;  %v3525_v33 = vmul.f32 %v3245_v14, %v9981_v41 }
 0x2fd   : > { %v3308_v39 = vperm.slane %v8358_v0, 0  ;;  %v3309_v58 = vperm.slane %v8358_v0, 1  ;;  %vm10000_vm5 = vcmask 1046533   ;;  %v3172_v27 = vsel %vm775_vm0, %v9968_v60, %v9969_v31 }
 0x2fe   : > { %v3114_v21 = vsel %vm10000_vm5, %v3112_v4, %v3113_v10  ;;  %v3756_v8 = vpack.c.bf16 %v3524_v51, %v3516_v24  ;;  %v3757_v7 = vpack.c.bf16 %v3525_v33, %v3517_v52  ;;  %v3173_v48 = vsel %vm777_vm1, %v9972_v44, %v9971_v23  ;;  %vm10001_vm4 = vmmov %vm10000_vm5 }
 0x2ff   : > { %v3115_v56 = vsel %vm787_vm6, %v3111_v30, %v3114_v21  ;;  %v3644_v14 = vmul.f32 %v3308_v39, %v9978_v9  ;;  %v3652_v53 = vmul.f32 %v3308_v39, %v9979_v54  ;;  %v3645_v2 = vmul.f32 %v3309_v58, %v9980_v15  ;;  %v1718_v21 = vpop.f32.mrf.mxu0 }
 0x300   : > { %v3653_v4 = vmul.f32 %v3309_v58, %v9981_v41  ;;  %3877 = vmatpush.bf16.msra.mxu0 %v3756_v8  ;;  %3903 = vmatpush.bf16.msra.mxu2 %v3757_v7  ;;  %v8385_v10 = vrot.slane %v3115_v56, 1  ;;  %v3174_v24 = vsel %vm779_vm14, %v3172_v27, %v3173_v48  ;;  %v3175_v30 = vsel %vm781_vm2, %v9974_v36, %v9973_v6  ;;  %v1731_v8 = vpop.f32.mrf.mxu1 }
 0x301   : > { %v3176_v51 = vsel %vm783_vm3, %v9975_v49, %v9976_v37  ;;  %v3820_v52 = vpack.c.bf16 %v3652_v53, %v3644_v14  ;;  %v3102_v58 = vsel %vm761_vm7, %v9958_v43, %v9959_v16  ;;  %v3103_v48 = vsel %vm763_vm8, %v9961_v12, %v9960_v22  ;;  %v1744_v53 = vpop.f32.mrf.mxu2 }
 0x302   : > { %v3821_v33 = vpack.c.bf16 %v3653_v4, %v3645_v2  ;;  %v3177_v39 = vsel %vm10001_vm4, %v3175_v30, %v3176_v51  ;;  %v3236_v27 = vperm.slane %v8385_v10, 0  ;;  %v3237_v56 = vperm.slane %v8385_v10, 1  ;;  %v1757_v2 = vpop.f32.mrf.mxu3 }
 0x303   : > { %v3178_v7 = vsel %vm787_vm6, %v3174_v24, %v3177_v39  ;;  %3890 = vmatpush.bf16.msra.mxu1 %v3820_v52  ;;  %v3104_v43 = vsel %vm765_vm15, %v3102_v58, %v3103_v48  ;;  %v3105_v16 = vsel %vm767_vm9, %v9964_v47, %v9963_v28  ;;  %v3106_v4 = vsel %vm769_vm10, %v9966_v3, %v9965_v25 }
 0x304   : > { %3916 = vmatpush.bf16.msra.mxu3 %v3821_v33  ;;  %v8404_v14 = vrot.slane %v3178_v7, 1  ;;  %v3500_v24 = vmul.f32 %v3236_v27, %v9978_v9  ;;  %v3508_v22 = vmul.f32 %v3236_v27, %v9979_v54  ;;  %v3501_v12 = vmul.f32 %v3237_v56, %v9980_v15 }
 0x305   : > { %v3509_v30 = vmul.f32 %v3237_v56, %v9981_v41  ;;  %v3107_v33 = vsel %vm771_vm13, %v3105_v16, %v3106_v4  ;;  %v3165_v28 = vsel %vm761_vm7, %v9968_v60, %v9969_v31  ;;  %vm10002_vm12 = vcmask 1043456  }
 0x306   : > { %v3300_v51 = vperm.slane %v8404_v14, 0  ;;  %v3301_v52 = vperm.slane %v8404_v14, 1  ;;  %v3748_v47 = vpack.c.bf16 %v3508_v22, %v3500_v24  ;;  %v8424_v3 = vsel %vm10002_vm12, %v3104_v43, %v3107_v33  ;;  %vm10003_vm5 = vmmov %vm10002_vm12  ;;  %v10004_v22 = vld [vmem:[#allocation67_spill] sm:$0xff] }
 0x307   : > { %v3749_v25 = vpack.c.bf16 %v3509_v30, %v3501_v12  ;;  %v3166_v39 = vsel %vm763_vm8, %v9972_v44, %v9971_v23  ;;  %v3228_v60 = vperm.slane %v8424_v3, 0  ;;  %v3168_v7 = vsel %vm767_vm9, %v9974_v36, %v9973_v6  ;;  %v10005_v30 = vld [vmem:[#allocation75_spill] sm:$0xff] }
 0x308   : > { %v3628_v58 = vmul.f32 %v3300_v51, %v9978_v9  ;;  %v3636_v21 = vmul.f32 %v3300_v51, %v9979_v54  ;;  %v3629_v8 = vmul.f32 %v3301_v52, %v9980_v15  ;;  %v3637_v27 = vmul.f32 %v3301_v52, %v9981_v41  ;;  %3878 = vmatpush.bf16.msra.mxu0 %v3748_v47 }
 0x309   : > { %3904 = vmatpush.bf16.msra.mxu2 %v3749_v25  ;;  %v3167_v31 = vsel %vm765_vm15, %v3165_v28, %v3166_v39  ;;  %v3169_v23 = vsel %vm769_vm10, %v9976_v37, %v9975_v49  ;;  %v3229_v53 = vperm.slane %v8424_v3, 1  ;;  %v3484_v2 = vmul.f32 %v3228_v60, %v9978_v9 }
 0x30a   : > { %v3812_v44 = vpack.c.bf16 %v3636_v21, %v3628_v58  ;;  %v3813_v56 = vpack.c.bf16 %v3637_v27, %v3629_v8  ;;  %v3170_v48 = vsel %vm771_vm13, %v3168_v7, %v3169_v23  ;;  %v3492_v43 = vmul.f32 %v3228_v60, %v9979_v54  ;;  %v10006_v23 = vld [vmem:[#allocation68_spill] sm:$0xff] }
 0x30b   : > { %v8446_v16 = vsel %vm10003_vm5, %v3167_v31, %v3170_v48  ;;  %v3286_v4 = vperm.slane %v8089_v42, 2  ;;  %v3485_v36 = vmul.f32 %v3229_v53, %v9980_v15  ;;  %v3493_v49 = vmul.f32 %v3229_v53, %v9981_v41 }
 0x30c   : > { %3891 = vmatpush.bf16.msra.mxu1 %v3812_v44  ;;  %3917 = vmatpush.bf16.msra.mxu3 %v3813_v56  ;;  %v3292_v6 = vperm.slane %v8446_v16, 0  ;;  %v3293_v37 = vperm.slane %v8446_v16, 1  ;;  %v3740_v24 = vpack.c.bf16 %v3492_v43, %v3484_v2  ;;  %v3350_v52 = vperm.slane %v8107_v32, 2  ;;  %v10007_v56 = vld [vmem:[#allocation76_spill] sm:$0xff] }
 0x30d   : > { %v3598_v12 = vmul.f32 %v3286_v4, %v10004_v22  ;;  %v3606_v51 = vmul.f32 %v3286_v4, %v10005_v30  ;;  %v3741_v47 = vpack.c.bf16 %v3493_v49, %v3485_v36  ;;  %v3287_v60 = vperm.slane %v8089_v42, 3 }
 0x30e   : > { %v3612_v33 = vmul.f32 %v3292_v6, %v9978_v9  ;;  %v3620_v28 = vmul.f32 %v3292_v6, %v9979_v54  ;;  %v3613_v25 = vmul.f32 %v3293_v37, %v9980_v15  ;;  %3879 = vmatpush.bf16.msra.mxu0 %v3740_v24  ;;  %v3621_v39 = vmul.f32 %v3293_v37, %v9981_v41 }
 0x30f   : > { %v3798_v58 = vpack.c.bf16 %v3606_v51, %v3598_v12  ;;  %v3726_v21 = vmul.f32 %v3350_v52, %v10004_v22  ;;  %v3734_v8 = vmul.f32 %v3350_v52, %v10005_v30  ;;  %3905 = vmatpush.bf16.msra.mxu2 %v3741_v47  ;;  %v3351_v31 = vperm.slane %v8107_v32, 3 }
 0x310   : > { %v3804_v27 = vpack.c.bf16 %v3620_v28, %v3612_v33  ;;  %v3278_v9 = vperm.slane %v8135_v19, 2  ;;  %v3805_v54 = vpack.c.bf16 %v3621_v39, %v3613_v25  ;;  %v3342_v15 = vperm.slane %v8152_v13, 2 }
 0x311   : > { %v3862_v7 = vpack.c.bf16 %v3734_v8, %v3726_v21  ;;  %v3279_v41 = vperm.slane %v8135_v19, 3  ;;  %v3599_v44 = vmul.f32 %v3287_v60, %v10006_v23  ;;  %v3607_v48 = vmul.f32 %v3287_v60, %v10007_v56 }
 0x312   : > { %3924 = vmatpush.bf16.msrb.mxu0 %v3798_v58  ;;  %3892 = vmatpush.bf16.msra.mxu1 %v3804_v27  ;;  %v3727_v53 = vmul.f32 %v3351_v31, %v10006_v23  ;;  %v3735_v2 = vmul.f32 %v3351_v31, %v10007_v56  ;;  %v3582_v43 = vmul.f32 %v3278_v9, %v10004_v22  ;;  %v3343_v36 = vperm.slane %v8152_v13, 3 }
 0x313   : > { %3918 = vmatpush.bf16.msra.mxu3 %v3805_v54  ;;  %v3590_v4 = vmul.f32 %v3278_v9, %v10005_v30  ;;  %v3710_v6 = vmul.f32 %v3342_v15, %v10004_v22  ;;  %v3799_v49 = vpack.c.bf16 %v3607_v48, %v3599_v44  ;;  %v3718_v24 = vmul.f32 %v3342_v15, %v10005_v30 }
 0x314   : > { %v3863_v37 = vpack.c.bf16 %v3735_v2, %v3727_v53  ;;  %v3583_v12 = vmul.f32 %v3279_v41, %v10006_v23  ;;  %v3591_v52 = vmul.f32 %v3279_v41, %v10007_v56  ;;  %v3711_v33 = vmul.f32 %v3343_v36, %v10006_v23 }
 0x315   : > { %v3790_v51 = vpack.c.bf16 %v3590_v4, %v3582_v43  ;;  %v3719_v28 = vmul.f32 %v3343_v36, %v10007_v56  ;;  %3950 = vmatpush.bf16.msrb.mxu2 %v3799_v49  ;;  %v3854_v47 = vpack.c.bf16 %v3718_v24, %v3710_v6  ;;  %v1730_v25 = vadd.f32 %v8346_v55, %v8344_v59  ;;  %v8502_v6 = vpop.f32.mrf.mxu0  ;;  %v8504_v36 = vpop.f32.mrf.mxu1 }
 0x316   : > { %3937 = vmatpush.bf16.msrb.mxu1 %v3862_v7  ;;  %v1756_v39 = vadd.f32 %v8356_v35, %v8354_v11  ;;  %v3270_v58 = vperm.slane %v8196_v38, 2  ;;  %v3791_v21 = vpack.c.bf16 %v3591_v52, %v3583_v12  ;;  %v3334_v27 = vperm.slane %v8215_v34, 2  ;;  %v8511_v52 = vpop.f32.mrf.mxu3 }
 0x317   : > { %3963 = vmatpush.bf16.msrb.mxu3 %v3863_v37  ;;  %3925 = vmatpush.bf16.msrb.mxu0 %v3790_v51  ;;  %v3855_v8 = vpack.c.bf16 %v3719_v28, %v3711_v33  ;;  %v3271_v60 = vperm.slane %v8196_v38, 3  ;;  %1765 = vst [vmem:[%s7860_s25 + $0x30] sm:$0xff] %v1730_v25  ;;  %v3335_v59 = vperm.slane %v8215_v34, 3  ;;  %v3262_v55 = vperm.slane %v8241_v62, 2  ;;  %v8509_v51 = vpop.f32.mrf.mxu2 }
 0x318   : > { %v3566_v31 = vmul.f32 %v3270_v58, %v10004_v22  ;;  %v3574_v9 = vmul.f32 %v3270_v58, %v10005_v30  ;;  %1766 = vst [vmem:[%s7860_s25 + $0x38] sm:$0xff] %v1756_v39  ;;  %v3694_v11 = vmul.f32 %v3334_v27, %v10004_v22  ;;  %v3702_v35 = vmul.f32 %v3334_v27, %v10005_v30 }
 0x319   : > { %v3567_v54 = vmul.f32 %v3271_v60, %v10006_v23  ;;  %v3575_v7 = vmul.f32 %v3271_v60, %v10007_v56  ;;  %3951 = vmatpush.bf16.msrb.mxu2 %v3791_v21  ;;  %v3695_v41 = vmul.f32 %v3335_v59, %v10006_v23  ;;  %v3703_v44 = vmul.f32 %v3335_v59, %v10007_v56 }
 0x31a   : > { %3938 = vmatpush.bf16.msrb.mxu1 %v3854_v47  ;;  %v3782_v15 = vpack.c.bf16 %v3574_v9, %v3566_v31  ;;  %v3326_v48 = vperm.slane %v8260_v26, 2  ;;  %v3846_v53 = vpack.c.bf16 %v3702_v35, %v3694_v11  ;;  %v3550_v43 = vmul.f32 %v3262_v55, %v10004_v22 }
 0x31b   : > { %3964 = vmatpush.bf16.msrb.mxu3 %v3855_v8  ;;  %v3783_v2 = vpack.c.bf16 %v3575_v7, %v3567_v54  ;;  %v3558_v4 = vmul.f32 %v3262_v55, %v10005_v30  ;;  %v3847_v49 = vpack.c.bf16 %v3703_v44, %v3695_v41  ;;  %v3263_v12 = vperm.slane %v8241_v62, 3 }
 0x31c   : > { %3926 = vmatpush.bf16.msrb.mxu0 %v3782_v15  ;;  %v3678_v37 = vmul.f32 %v3326_v48, %v10004_v22  ;;  %v3686_v24 = vmul.f32 %v3326_v48, %v10005_v30  ;;  %v3327_v28 = vperm.slane %v8260_v26, 3  ;;  %v3254_v47 = vperm.slane %v8285_v5, 2 }
 0x31d   : > { %v3774_v33 = vpack.c.bf16 %v3558_v4, %v3550_v43  ;;  %v3318_v25 = vperm.slane %v8304_v46, 2  ;;  %3952 = vmatpush.bf16.msrb.mxu2 %v3783_v2  ;;  %v3551_v58 = vmul.f32 %v3263_v12, %v10006_v23  ;;  %v3559_v21 = vmul.f32 %v3263_v12, %v10007_v56  ;;  %v2722_v12 = vpop.f32.mrf.mxu0 }
 0x31e   : > { %3939 = vmatpush.bf16.msrb.mxu1 %v3846_v53  ;;  %v3838_v39 = vpack.c.bf16 %v3686_v24, %v3678_v37  ;;  %v3255_v8 = vperm.slane %v8285_v5, 3  ;;  %v3679_v27 = vmul.f32 %v3327_v28, %v10006_v23  ;;  %v3687_v60 = vmul.f32 %v3327_v28, %v10007_v56  ;;  %v3868_v24 = vld [vmem:[%s5927_s15 + $0x20] sm:$0xff] }
 0x31f   : > { %3965 = vmatpush.bf16.msrb.mxu3 %v3847_v49  ;;  %v3534_v31 = vmul.f32 %v3254_v47, %v10004_v22  ;;  %v3542_v9 = vmul.f32 %v3254_v47, %v10005_v30  ;;  %v3775_v59 = vpack.c.bf16 %v3559_v21, %v3551_v58  ;;  %v3662_v55 = vmul.f32 %v3318_v25, %v10004_v22  ;;  %v3869_v58 = vld [vmem:[%s5927_s15 + $0x28] sm:$0xff]  ;;  %v2748_v21 = vpop.f32.mrf.mxu2 }
 0x320   : > { %3927 = vmatpush.bf16.msrb.mxu0 %v3774_v33  ;;  %v3670_v11 = vmul.f32 %v3318_v25, %v10005_v30  ;;  %v3535_v35 = vmul.f32 %v3255_v8, %v10006_v23  ;;  %v3839_v54 = vpack.c.bf16 %v3687_v60, %v3679_v27  ;;  %v3543_v15 = vmul.f32 %v3255_v8, %v10007_v56  ;;  %v2735_v33 = vpop.f32.mrf.mxu1  ;;  %v2761_v8 = vpop.f32.mrf.mxu3 }
 0x321   : > { %v3766_v7 = vpack.c.bf16 %v3542_v9, %v3534_v31  ;;  %v3319_v41 = vperm.slane %v8304_v46, 3  ;;  %3953 = vmatpush.bf16.msrb.mxu2 %v3775_v59  ;;  %v3246_v48 = vperm.slane %v8331_v18, 2  ;;  %v3310_v53 = vperm.slane %v8358_v0, 2 }
 0x322   : > { %3940 = vmatpush.bf16.msrb.mxu1 %v3838_v39  ;;  %v3830_v44 = vpack.c.bf16 %v3670_v11, %v3662_v55  ;;  %v3247_v2 = vperm.slane %v8331_v18, 3  ;;  %v3767_v43 = vpack.c.bf16 %v3543_v15, %v3535_v35  ;;  %v3311_v37 = vperm.slane %v8358_v0, 3 }
 0x323   : > { %3966 = vmatpush.bf16.msrb.mxu3 %v3839_v54  ;;  %v3663_v4 = vmul.f32 %v3319_v41, %v10006_v23  ;;  %v3671_v49 = vmul.f32 %v3319_v41, %v10007_v56  ;;  %v3518_v28 = vmul.f32 %v3246_v48, %v10004_v22  ;;  %v3526_v47 = vmul.f32 %v3246_v48, %v10005_v30 }
 0x324   : > { %3928 = vmatpush.bf16.msrb.mxu0 %v3766_v7  ;;  %v3646_v25 = vmul.f32 %v3310_v53, %v10004_v22  ;;  %v3654_v39 = vmul.f32 %v3310_v53, %v10005_v30  ;;  %v3519_v60 = vmul.f32 %v3247_v2, %v10006_v23  ;;  %v3527_v31 = vmul.f32 %v3247_v2, %v10007_v56 }
 0x325   : > { %v3831_v27 = vpack.c.bf16 %v3671_v49, %v3663_v4  ;;  %v3647_v9 = vmul.f32 %v3311_v37, %v10006_v23  ;;  %3954 = vmatpush.bf16.msrb.mxu2 %v3767_v43  ;;  %v3758_v59 = vpack.c.bf16 %v3526_v47, %v3518_v28  ;;  %v3655_v11 = vmul.f32 %v3311_v37, %v10007_v56 }
 0x326   : > { %3941 = vmatpush.bf16.msrb.mxu1 %v3830_v44  ;;  %v3822_v55 = vpack.c.bf16 %v3654_v39, %v3646_v25  ;;  %v8544_v35 = vpack.c.bf16 %v3868_v24, %v3868_v24  ;;  %v3759_v54 = vpack.c.bf16 %v3527_v31, %v3519_v60  ;;  %v8546_v7 = vpack.c.bf16 %v3869_v58, %v3869_v58 }
 0x327   : > { %3967 = vmatpush.bf16.msrb.mxu3 %v3831_v27  ;;  %v3238_v15 = vperm.slane %v8385_v10, 2  ;;  %v3302_v41 = vperm.slane %v8404_v14, 2  ;;  %v3823_v44 = vpack.c.bf16 %v3655_v11, %v3647_v9  ;;  %v3239_v48 = vperm.slane %v8385_v10, 3 }
 0x328   : > { %3929 = vmatpush.bf16.msrb.mxu0 %v3758_v59  ;;  %3906 = vmatmul.bf16.vlgmr.msra.gmra.mxu2 %v8544_v35  ;;  %v3303_v53 = vperm.slane %v8404_v14, 3  ;;  %v3230_v2 = vperm.slane %v8424_v3, 2  ;;  %v3294_v37 = vperm.slane %v8446_v16, 2  ;;  %v3231_v58 = vperm.slane %v8424_v3, 3 }
 0x329   : > { %3919 = vmatmul.bf16.vlgmr.msra.gmra.mxu3 %v8546_v7  ;;  %v3502_v43 = vmul.f32 %v3238_v15, %v10004_v22  ;;  %v3510_v4 = vmul.f32 %v3238_v15, %v10005_v30  ;;  %v3630_v49 = vmul.f32 %v3302_v41, %v10004_v22  ;;  %3955 = vmatpush.bf16.msrb.mxu2 %v3759_v54  ;;  %v3295_v54 = vperm.slane %v8446_v16, 3 }
 0x32a   : > { %3942 = vmatpush.bf16.msrb.mxu1 %v3822_v55  ;;  %v3638_v24 = vmul.f32 %v3302_v41, %v10005_v30  ;;  %v3503_v12 = vmul.f32 %v3239_v48, %v10006_v23  ;;  %v3511_v33 = vmul.f32 %v3239_v48, %v10007_v56  ;;  %v3631_v28 = vmul.f32 %v3303_v53, %v10006_v23 }
 0x32b   : > { %3968 = vmatpush.bf16.msrb.mxu3 %v3823_v44  ;;  %v3750_v47 = vpack.c.bf16 %v3510_v4, %v3502_v43  ;;  %v3639_v25 = vmul.f32 %v3303_v53, %v10007_v56  ;;  %3880 = vmatmul.bf16.vlgmr.msra.gmra.mxu0 %v8544_v35  ;;  %v3486_v39 = vmul.f32 %v3230_v2, %v10004_v22  ;;  %v3288_v15 = vperm.slane %v8089_v42, 4  ;;  %v10008_v43 = vld [vmem:[#allocation69_spill] sm:$0xff] }
 0x32c   : > { %v3814_v21 = vpack.c.bf16 %v3638_v24, %v3630_v49  ;;  %v3751_v8 = vpack.c.bf16 %v3511_v33, %v3503_v12  ;;  %3893 = vmatmul.bf16.vlgmr.msra.gmra.mxu1 %v8546_v7  ;;  %v3494_v27 = vmul.f32 %v3230_v2, %v10005_v30  ;;  %v3614_v60 = vmul.f32 %v3294_v37, %v10004_v22  ;;  %v10009_v49 = vld [vmem:[#allocation77_spill] sm:$0xff]  ;;  %v10010_v33 = vld [vmem:[#allocation70_spill] sm:$0xff] }
 0x32d   : > { %3930 = vmatpush.bf16.msrb.mxu0 %v3750_v47  ;;  %v3815_v31 = vpack.c.bf16 %v3639_v25, %v3631_v28  ;;  %v3622_v9 = vmul.f32 %v3294_v37, %v10005_v30  ;;  %v3487_v59 = vmul.f32 %v3231_v58, %v10006_v23  ;;  %v3495_v55 = vmul.f32 %v3231_v58, %v10007_v56  ;;  %v10011_v47 = vld [vmem:[#allocation78_spill] sm:$0xff] }
 0x32e   : > { %3943 = vmatpush.bf16.msrb.mxu1 %v3814_v21  ;;  %3956 = vmatpush.bf16.msrb.mxu2 %v3751_v8  ;;  %v3742_v11 = vpack.c.bf16 %v3494_v27, %v3486_v39  ;;  %v3352_v41 = vperm.slane %v8107_v32, 4  ;;  %v3289_v48 = vperm.slane %v8089_v42, 5  ;;  %v3353_v30 = vperm.slane %v8107_v32, 5 }
 0x32f   : > { %3969 = vmatpush.bf16.msrb.mxu3 %v3815_v31  ;;  %v3806_v44 = vpack.c.bf16 %v3622_v9, %v3614_v60  ;;  %v3743_v22 = vpack.c.bf16 %v3495_v55, %v3487_v59  ;;  %v3615_v53 = vmul.f32 %v3295_v54, %v10006_v23  ;;  %v3623_v2 = vmul.f32 %v3295_v54, %v10007_v56 }
 0x330   : > { %v3600_v4 = vmul.f32 %v3288_v15, %v10008_v43  ;;  %v3608_v37 = vmul.f32 %v3288_v15, %v10009_v49  ;;  %v3728_v24 = vmul.f32 %v3352_v41, %v10008_v43  ;;  %v3736_v12 = vmul.f32 %v3352_v41, %v10009_v49 }
 0x331   : > { %3931 = vmatpush.bf16.msrb.mxu0 %v3742_v11  ;;  %v3601_v28 = vmul.f32 %v3289_v48, %v10010_v33  ;;  %v3609_v25 = vmul.f32 %v3289_v48, %v10011_v47  ;;  %v3807_v39 = vpack.c.bf16 %v3623_v2, %v3615_v53  ;;  %v3729_v23 = vmul.f32 %v3353_v30, %v10010_v33 }
 0x332   : > { %3944 = vmatpush.bf16.msrb.mxu1 %v3806_v44  ;;  %3957 = vmatpush.bf16.msrb.mxu2 %v3743_v22  ;;  %v3800_v58 = vpack.c.bf16 %v3608_v37, %v3600_v4  ;;  %v3280_v56 = vperm.slane %v8135_v19, 4  ;;  %v3864_v21 = vpack.c.bf16 %v3736_v12, %v3728_v24  ;;  %v3737_v27 = vmul.f32 %v3353_v30, %v10011_v47 }
 0x333   : > { %v3801_v8 = vpack.c.bf16 %v3609_v25, %v3601_v28  ;;  %v3344_v60 = vperm.slane %v8152_v13, 4  ;;  %3970 = vmatpush.bf16.msrb.mxu3 %v3807_v39  ;;  %v3281_v59 = vperm.slane %v8135_v19, 5  ;;  %v3345_v55 = vperm.slane %v8152_v13, 5 }
 0x334   : > { %v3584_v31 = vmul.f32 %v3280_v56, %v10008_v43  ;;  %v3592_v9 = vmul.f32 %v3280_v56, %v10009_v49  ;;  %v3865_v11 = vpack.c.bf16 %v3737_v27, %v3729_v23  ;;  %v3272_v41 = vperm.slane %v8196_v38, 4 }
 0x335   : > { %3976 = vmatpush.bf16.msra.mxu0 %v3800_v58  ;;  %v3712_v54 = vmul.f32 %v3344_v60, %v10008_v43  ;;  %v3720_v15 = vmul.f32 %v3344_v60, %v10009_v49  ;;  %v3585_v22 = vmul.f32 %v3281_v59, %v10010_v33  ;;  %v3593_v48 = vmul.f32 %v3281_v59, %v10011_v47 }
 0x336   : > { %3989 = vmatpush.bf16.msra.mxu1 %v3864_v21  ;;  %4002 = vmatpush.bf16.msra.mxu2 %v3801_v8  ;;  %v3792_v44 = vpack.c.bf16 %v3592_v9, %v3584_v31  ;;  %v3713_v30 = vmul.f32 %v3345_v55, %v10010_v33  ;;  %v3721_v2 = vmul.f32 %v3345_v55, %v10011_v47  ;;  %v3336_v25 = vperm.slane %v8215_v34, 4 }
 0x337   : > { %4015 = vmatpush.bf16.msra.mxu3 %v3865_v11  ;;  %v3856_v53 = vpack.c.bf16 %v3720_v15, %v3712_v54  ;;  %v2734_v4 = vadd.f32 %v8504_v36, %v8502_v6  ;;  %v2760_v37 = vadd.f32 %v8511_v52, %v8509_v51  ;;  %v3793_v24 = vpack.c.bf16 %v3593_v48, %v3585_v22  ;;  %v8625_v11 = vpop.f32.mrf.mxu0  ;;  %v8627_v54 = vpop.f32.mrf.mxu1 }
 0x338   : > { %v3568_v12 = vmul.f32 %v3272_v41, %v10008_v43  ;;  %v3576_v28 = vmul.f32 %v3272_v41, %v10009_v49  ;;  %3958 = vmatmul.bf16.vlgmr.msrb.gmra.mxu2 %v8544_v35  ;;  %v3857_v39 = vpack.c.bf16 %v3721_v2, %v3713_v30  ;;  %v3273_v58 = vperm.slane %v8196_v38, 5  ;;  %v8633_v48 = vpop.f32.mrf.mxu2  ;;  %v8635_v30 = vpop.f32.mrf.mxu3 }
 0x339   : > { %3977 = vmatpush.bf16.msra.mxu0 %v3792_v44  ;;  %5417 = vst [vmem:[%s7860_s25 + $0x40] sm:$0xff] %v2734_v4  ;;  %v3337_v6 = vperm.slane %v8215_v34, 5  ;;  %v3264_v36 = vperm.slane %v8241_v62, 4  ;;  %3971 = vmatmul.bf16.vlgmr.msrb.gmra.mxu3 %v8546_v7  ;;  %v3696_v52 = vmul.f32 %v3336_v25, %v10008_v43  ;;  %v3704_v23 = vmul.f32 %v3336_v25, %v10009_v49 }
 0x33a   : > { %3990 = vmatpush.bf16.msra.mxu1 %v3856_v53  ;;  %4003 = vmatpush.bf16.msra.mxu2 %v3793_v24  ;;  %5418 = vst [vmem:[%s7860_s25 + $0x48] sm:$0xff] %v2760_v37  ;;  %v3784_v51 = vpack.c.bf16 %v3576_v28, %v3568_v12  ;;  %v3328_v56 = vperm.slane %v8260_v26, 4  ;;  %v3569_v21 = vmul.f32 %v3273_v58, %v10010_v33  ;;  %v3265_v22 = vperm.slane %v8241_v62, 5 }
 0x33b   : > { %4016 = vmatpush.bf16.msra.mxu3 %v3857_v39  ;;  %v3577_v8 = vmul.f32 %v3273_v58, %v10011_v47  ;;  %v3697_v27 = vmul.f32 %v3337_v6, %v10010_v33  ;;  %v3705_v60 = vmul.f32 %v3337_v6, %v10011_v47  ;;  %v3848_v31 = vpack.c.bf16 %v3704_v23, %v3696_v52 }
 0x33c   : > { %v3552_v9 = vmul.f32 %v3264_v36, %v10008_v43  ;;  %v3560_v59 = vmul.f32 %v3264_v36, %v10009_v49  ;;  %v3680_v55 = vmul.f32 %v3328_v56, %v10008_v43  ;;  %v3688_v44 = vmul.f32 %v3328_v56, %v10009_v49  ;;  %3932 = vmatmul.bf16.vlgmr.msrb.gmra.mxu0 %v8544_v35 }
 0x33d   : > { %3978 = vmatpush.bf16.msra.mxu0 %v3784_v51  ;;  %v3785_v15 = vpack.c.bf16 %v3577_v8, %v3569_v21  ;;  %v3849_v41 = vpack.c.bf16 %v3705_v60, %v3697_v27  ;;  %3945 = vmatmul.bf16.vlgmr.msrb.gmra.mxu1 %v8546_v7  ;;  %v3329_v2 = vperm.slane %v8260_v26, 5  ;;  %v3256_v4 = vperm.slane %v8285_v5, 4 }
 0x33e   : > { %3991 = vmatpush.bf16.msra.mxu1 %v3848_v31  ;;  %v3776_v53 = vpack.c.bf16 %v3560_v59, %v3552_v9  ;;  %v3320_v37 = vperm.slane %v8304_v46, 4  ;;  %v3840_v24 = vpack.c.bf16 %v3688_v44, %v3680_v55  ;;  %v3553_v12 = vmul.f32 %v3265_v22, %v10010_v33 }
 0x33f   : > { %4004 = vmatpush.bf16.msra.mxu2 %v3785_v15  ;;  %4017 = vmatpush.bf16.msra.mxu3 %v3849_v41  ;;  %v3561_v28 = vmul.f32 %v3265_v22, %v10011_v47  ;;  %v3257_v25 = vperm.slane %v8285_v5, 5  ;;  %v3681_v39 = vmul.f32 %v3329_v2, %v10010_v33  ;;  %v3689_v58 = vmul.f32 %v3329_v2, %v10011_v47  ;;  %v2787_v2 = vpop.f32.mrf.mxu1 }
 0x340   : > { %v3536_v6 = vmul.f32 %v3256_v4, %v10008_v43  ;;  %v3544_v36 = vmul.f32 %v3256_v4, %v10009_v49  ;;  %v3664_v52 = vmul.f32 %v3320_v37, %v10008_v43  ;;  %v3672_v23 = vmul.f32 %v3320_v37, %v10009_v49 }
 0x341   : > { %3979 = vmatpush.bf16.msra.mxu0 %v3776_v53  ;;  %v3777_v51 = vpack.c.bf16 %v3561_v28, %v3553_v12  ;;  %v3537_v56 = vmul.f32 %v3257_v25, %v10010_v33  ;;  %v3841_v21 = vpack.c.bf16 %v3689_v58, %v3681_v39  ;;  %v3545_v27 = vmul.f32 %v3257_v25, %v10011_v47  ;;  %v2774_v53 = vpop.f32.mrf.mxu0  ;;  %v2800_v28 = vpop.f32.mrf.mxu2 }
 0x342   : > { %3992 = vmatpush.bf16.msra.mxu1 %v3840_v24  ;;  %v3768_v8 = vpack.c.bf16 %v3544_v36, %v3536_v6  ;;  %v3321_v60 = vperm.slane %v8304_v46, 5  ;;  %v3832_v31 = vpack.c.bf16 %v3672_v23, %v3664_v52  ;;  %v3248_v9 = vperm.slane %v8331_v18, 4  ;;  %v2813_v25 = vpop.f32.mrf.mxu3 }
 0x343   : > { %4005 = vmatpush.bf16.msra.mxu2 %v3777_v51  ;;  %v3312_v59 = vperm.slane %v8358_v0, 4  ;;  %v3249_v55 = vperm.slane %v8331_v18, 5  ;;  %4018 = vmatpush.bf16.msra.mxu3 %v3841_v21  ;;  %v3769_v15 = vpack.c.bf16 %v3545_v27, %v3537_v56  ;;  %v3313_v22 = vperm.slane %v8358_v0, 5 }
 0x344   : > { %v3665_v41 = vmul.f32 %v3321_v60, %v10010_v33  ;;  %v3673_v44 = vmul.f32 %v3321_v60, %v10011_v47  ;;  %v3520_v4 = vmul.f32 %v3248_v9, %v10008_v43  ;;  %v3528_v37 = vmul.f32 %v3248_v9, %v10009_v49 }
 0x345   : > { %3980 = vmatpush.bf16.msra.mxu0 %v3768_v8  ;;  %v3648_v24 = vmul.f32 %v3312_v59, %v10008_v43  ;;  %v3656_v12 = vmul.f32 %v3312_v59, %v10009_v49  ;;  %v3521_v58 = vmul.f32 %v3249_v55, %v10010_v33  ;;  %v3529_v6 = vmul.f32 %v3249_v55, %v10011_v47 }
 0x346   : > { %3993 = vmatpush.bf16.msra.mxu1 %v3832_v31  ;;  %v3833_v39 = vpack.c.bf16 %v3673_v44, %v3665_v41  ;;  %v3649_v36 = vmul.f32 %v3313_v22, %v10010_v33  ;;  %v3760_v51 = vpack.c.bf16 %v3528_v37, %v3520_v4  ;;  %v3657_v23 = vmul.f32 %v3313_v22, %v10011_v47 }
 0x347   : > { %4006 = vmatpush.bf16.msra.mxu2 %v3769_v15  ;;  %v3824_v52 = vpack.c.bf16 %v3656_v12, %v3648_v24  ;;  %v3240_v56 = vperm.slane %v8385_v10, 4  ;;  %v3761_v21 = vpack.c.bf16 %v3529_v6, %v3521_v58  ;;  %v3304_v8 = vperm.slane %v8404_v14, 4 }
 0x348   : > { %4019 = vmatpush.bf16.msra.mxu3 %v3833_v39  ;;  %v3241_v27 = vperm.slane %v8385_v10, 5  ;;  %v3305_v60 = vperm.slane %v8404_v14, 5  ;;  %v3825_v31 = vpack.c.bf16 %v3657_v23, %v3649_v36  ;;  %v3232_v55 = vperm.slane %v8424_v3, 4 }
 0x349   : > { %3981 = vmatpush.bf16.msra.mxu0 %v3760_v51  ;;  %v3504_v9 = vmul.f32 %v3240_v56, %v10008_v43  ;;  %v3512_v59 = vmul.f32 %v3240_v56, %v10009_v49  ;;  %v3632_v15 = vmul.f32 %v3304_v8, %v10008_v43  ;;  %v3640_v41 = vmul.f32 %v3304_v8, %v10009_v49 }
 0x34a   : > { %3994 = vmatpush.bf16.msra.mxu1 %v3824_v52  ;;  %v3505_v44 = vmul.f32 %v3241_v27, %v10010_v33  ;;  %v3513_v22 = vmul.f32 %v3241_v27, %v10011_v47  ;;  %v3633_v2 = vmul.f32 %v3305_v60, %v10010_v33  ;;  %v3641_v4 = vmul.f32 %v3305_v60, %v10011_v47 }
 0x34b   : > { %4007 = vmatpush.bf16.msra.mxu2 %v3761_v21  ;;  %v3752_v53 = vpack.c.bf16 %v3512_v59, %v3504_v9  ;;  %v3488_v37 = vmul.f32 %v3232_v55, %v10008_v43  ;;  %v3816_v24 = vpack.c.bf16 %v3640_v41, %v3632_v15  ;;  %v3496_v28 = vmul.f32 %v3232_v55, %v10009_v49  ;;  %v10012_v9 = vld [vmem:[#allocation71_spill] sm:$0xff] }
 0x34c   : > { %4020 = vmatpush.bf16.msra.mxu3 %v3825_v31  ;;  %v3753_v12 = vpack.c.bf16 %v3513_v22, %v3505_v44  ;;  %v3296_v25 = vperm.slane %v8446_v16, 4  ;;  %v3817_v39 = vpack.c.bf16 %v3641_v4, %v3633_v2  ;;  %v3233_v58 = vperm.slane %v8424_v3, 5  ;;  %v10013_v55 = vld [vmem:[#allocation79_spill] sm:$0xff] }
 0x34d   : > { %3982 = vmatpush.bf16.msra.mxu0 %v3752_v53  ;;  %v3297_v6 = vperm.slane %v8446_v16, 5  ;;  %v3290_v36 = vperm.slane %v8089_v42, 6  ;;  %v3744_v51 = vpack.c.bf16 %v3496_v28, %v3488_v37  ;;  %v3354_v56 = vperm.slane %v8107_v32, 6  ;;  %v10014_v37 = vld [vmem:[#allocation72_spill] sm:$0xff] }
 0x34e   : > { %3995 = vmatpush.bf16.msra.mxu1 %v3816_v24  ;;  %v3616_v52 = vmul.f32 %v3296_v25, %v10008_v43  ;;  %v3624_v23 = vmul.f32 %v3296_v25, %v10009_v49  ;;  %v3489_v21 = vmul.f32 %v3233_v58, %v10010_v33  ;;  %v3497_v8 = vmul.f32 %v3233_v58, %v10011_v47 }
 0x34f   : > { %4008 = vmatpush.bf16.msra.mxu2 %v3753_v12  ;;  %v3617_v27 = vmul.f32 %v3297_v6, %v10010_v33  ;;  %v3625_v60 = vmul.f32 %v3297_v6, %v10011_v47  ;;  %v3602_v59 = vmul.f32 %v3290_v36, %v10012_v9  ;;  %v3610_v15 = vmul.f32 %v3290_v36, %v10013_v55  ;;  %v10015_v12 = vld [vmem:[#allocation80_spill] sm:$0xff] }
 0x350   : > { %4021 = vmatpush.bf16.msra.mxu3 %v3817_v39  ;;  %v3808_v31 = vpack.c.bf16 %v3624_v23, %v3616_v52  ;;  %v3730_v43 = vmul.f32 %v3354_v56, %v10012_v9  ;;  %v3745_v49 = vpack.c.bf16 %v3497_v8, %v3489_v21  ;;  %v3738_v44 = vmul.f32 %v3354_v56, %v10013_v55 }
 0x351   : > { %3983 = vmatpush.bf16.msra.mxu0 %v3744_v51  ;;  %v3809_v41 = vpack.c.bf16 %v3625_v60, %v3617_v27  ;;  %v3291_v22 = vperm.slane %v8089_v42, 7  ;;  %v3802_v53 = vpack.c.bf16 %v3610_v15, %v3602_v59  ;;  %v3355_v33 = vperm.slane %v8107_v32, 7 }
 0x352   : > { %3996 = vmatpush.bf16.msra.mxu1 %v3808_v31  ;;  %v3282_v47 = vperm.slane %v8135_v19, 6  ;;  %v3346_v2 = vperm.slane %v8152_v13, 6  ;;  %v3866_v4 = vpack.c.bf16 %v3738_v44, %v3730_v43  ;;  %v3283_v25 = vperm.slane %v8135_v19, 7 }
 0x353   : > { %4009 = vmatpush.bf16.msra.mxu2 %v3745_v49  ;;  %v3603_v24 = vmul.f32 %v3291_v22, %v10014_v37  ;;  %v3611_v28 = vmul.f32 %v3291_v22, %v10015_v12  ;;  %v3731_v42 = vmul.f32 %v3355_v33, %v10014_v37  ;;  %v3739_v39 = vmul.f32 %v3355_v33, %v10015_v12 }
 0x354   : > { %4022 = vmatpush.bf16.msra.mxu3 %v3809_v41  ;;  %v3586_v32 = vmul.f32 %v3282_v47, %v10012_v9  ;;  %v3347_v58 = vperm.slane %v8152_v13, 7  ;;  %v3594_v36 = vmul.f32 %v3282_v47, %v10013_v55  ;;  %v3714_v51 = vmul.f32 %v3346_v2, %v10012_v9  ;;  %3984 = vmatmul.bf16.vlgmr.msra.gmra.mxu0 %v8544_v35 }
 0x355   : > { %4028 = vmatpush.bf16.msrb.mxu0 %v3802_v53  ;;  %v3803_v6 = vpack.c.bf16 %v3611_v28, %v3603_v24  ;;  %v3722_v52 = vmul.f32 %v3346_v2, %v10013_v55  ;;  %v3867_v23 = vpack.c.bf16 %v3739_v39, %v3731_v42  ;;  %v3587_v19 = vmul.f32 %v3283_v25, %v10014_v37 }
 0x356   : > { %4041 = vmatpush.bf16.msrb.mxu1 %v3866_v4  ;;  %v3595_v56 = vmul.f32 %v3283_v25, %v10015_v12  ;;  %v3715_v21 = vmul.f32 %v3347_v58, %v10014_v37  ;;  %4010 = vmatmul.bf16.vlgmr.msra.gmra.mxu2 %v8544_v35  ;;  %v3794_v13 = vpack.c.bf16 %v3594_v36, %v3586_v32  ;;  %v3274_v15 = vperm.slane %v8196_v38, 6 }
 0x357   : > { %4054 = vmatpush.bf16.msrb.mxu2 %v3803_v6  ;;  %v3858_v8 = vpack.c.bf16 %v3722_v52, %v3714_v51  ;;  %v3723_v27 = vmul.f32 %v3347_v58, %v10015_v12  ;;  %v2786_v60 = vadd.f32 %v8627_v54, %v8625_v11  ;;  %v2812_v59 = vadd.f32 %v8635_v30, %v8633_v48 }
 0x358   : > { %4067 = vmatpush.bf16.msrb.mxu3 %v3867_v23  ;;  %v3795_v31 = vpack.c.bf16 %v3595_v56, %v3587_v19  ;;  %v3338_v43 = vperm.slane %v8215_v34, 6  ;;  %v3275_v41 = vperm.slane %v8196_v38, 7  ;;  %v3339_v44 = vperm.slane %v8215_v34, 7  ;;  %3997 = vmatmul.bf16.vlgmr.msra.gmra.mxu1 %v8546_v7 }
 0x359   : > { %4029 = vmatpush.bf16.msrb.mxu0 %v3794_v13  ;;  %v3859_v49 = vpack.c.bf16 %v3723_v27, %v3715_v21  ;;  %5419 = vst [vmem:[%s7860_s25 + $0x50] sm:$0xff] %v2786_v60  ;;  %v3266_v11 = vperm.slane %v8241_v62, 6  ;;  %v3570_v54 = vmul.f32 %v3274_v15, %v10012_v9  ;;  %v3578_v48 = vmul.f32 %v3274_v15, %v10013_v55 }
 0x35a   : > { %4042 = vmatpush.bf16.msrb.mxu1 %v3858_v8  ;;  %5420 = vst [vmem:[%s7860_s25 + $0x58] sm:$0xff] %v2812_v59  ;;  %v3698_v30 = vmul.f32 %v3338_v43, %v10012_v9  ;;  %v3706_v22 = vmul.f32 %v3338_v43, %v10013_v55  ;;  %v3571_v53 = vmul.f32 %v3275_v41, %v10014_v37  ;;  %v3330_v42 = vperm.slane %v8260_v26, 6 }
 0x35b   : > { %4055 = vmatpush.bf16.msrb.mxu2 %v3795_v31  ;;  %v3579_v33 = vmul.f32 %v3275_v41, %v10015_v12  ;;  %v3699_v38 = vmul.f32 %v3339_v44, %v10014_v37  ;;  %v3707_v34 = vmul.f32 %v3339_v44, %v10015_v12  ;;  %v3786_v47 = vpack.c.bf16 %v3578_v48, %v3570_v54 }
 0x35c   : > { %4068 = vmatpush.bf16.msrb.mxu3 %v3859_v49  ;;  %v3850_v2 = vpack.c.bf16 %v3706_v22, %v3698_v30  ;;  %v3554_v4 = vmul.f32 %v3266_v11, %v10012_v9  ;;  %v3562_v24 = vmul.f32 %v3266_v11, %v10013_v55  ;;  %v3267_v39 = vperm.slane %v8241_v62, 7 }
 0x35d   : > { %v3787_v28 = vpack.c.bf16 %v3579_v33, %v3571_v53  ;;  %v3851_v25 = vpack.c.bf16 %v3707_v34, %v3699_v38  ;;  %4023 = vmatmul.bf16.vlgmr.msra.gmra.mxu3 %v8546_v7  ;;  %4030 = vmatpush.bf16.msrb.mxu0 %v3786_v47  ;;  %v3331_v58 = vperm.slane %v8260_v26, 7  ;;  %v3258_v6 = vperm.slane %v8285_v5, 6  ;;  %v8767_v38 = vpop.f32.mrf.mxu0 }
 0x35e   : > { %4043 = vmatpush.bf16.msrb.mxu1 %v3850_v2  ;;  %v3778_v32 = vpack.c.bf16 %v3562_v24, %v3554_v4  ;;  %v3322_v36 = vperm.slane %v8304_v46, 6  ;;  %v3682_v51 = vmul.f32 %v3330_v42, %v10012_v9  ;;  %v3690_v52 = vmul.f32 %v3330_v42, %v10013_v55  ;;  %v8773_v24 = vpop.f32.mrf.mxu2 }
 0x35f   : > { %4056 = vmatpush.bf16.msrb.mxu2 %v3787_v28  ;;  %v3555_v62 = vmul.f32 %v3267_v39, %v10014_v37  ;;  %v3563_v23 = vmul.f32 %v3267_v39, %v10015_v12  ;;  %v3683_v19 = vmul.f32 %v3331_v58, %v10014_v37  ;;  %v3691_v56 = vmul.f32 %v3331_v58, %v10015_v12  ;;  %v8775_v28 = vpop.f32.mrf.mxu3 }
 0x360   : > { %4069 = vmatpush.bf16.msrb.mxu3 %v3851_v25  ;;  %v3538_v26 = vmul.f32 %v3258_v6, %v10012_v9  ;;  %v3546_v21 = vmul.f32 %v3258_v6, %v10013_v55  ;;  %v3842_v13 = vpack.c.bf16 %v3690_v52, %v3682_v51  ;;  %v3666_v27 = vmul.f32 %v3322_v36, %v10012_v9 }
 0x361   : > { %v3779_v8 = vpack.c.bf16 %v3563_v23, %v3555_v62  ;;  %v3674_v60 = vmul.f32 %v3322_v36, %v10013_v55  ;;  %4031 = vmatpush.bf16.msrb.mxu0 %v3778_v32  ;;  %v3843_v31 = vpack.c.bf16 %v3691_v56, %v3683_v19  ;;  %v3259_v15 = vperm.slane %v8285_v5, 7 }
 0x362   : > { %v3770_v59 = vpack.c.bf16 %v3546_v21, %v3538_v26  ;;  %v3323_v43 = vperm.slane %v8304_v46, 7  ;;  %4044 = vmatpush.bf16.msrb.mxu1 %v3842_v13  ;;  %v3250_v41 = vperm.slane %v8331_v18, 6  ;;  %v3314_v44 = vperm.slane %v8358_v0, 6 }
 0x363   : > { %4057 = vmatpush.bf16.msrb.mxu2 %v3779_v8  ;;  %v3834_v49 = vpack.c.bf16 %v3674_v60, %v3666_v27  ;;  %v3251_v11 = vperm.slane %v8331_v18, 7  ;;  %v3539_v54 = vmul.f32 %v3259_v15, %v10014_v37  ;;  %v3547_v48 = vmul.f32 %v3259_v15, %v10015_v12  ;;  %v8769_v18 = vpop.f32.mrf.mxu1 }
 0x364   : > { %4070 = vmatpush.bf16.msrb.mxu3 %v3843_v31  ;;  %v3667_v30 = vmul.f32 %v3323_v43, %v10014_v37  ;;  %v3675_v5 = vmul.f32 %v3323_v43, %v10015_v12  ;;  %v3522_v46 = vmul.f32 %v3250_v41, %v10012_v9  ;;  %v3530_v22 = vmul.f32 %v3250_v41, %v10013_v55 }
 0x365   : > { %v3650_v53 = vmul.f32 %v3314_v44, %v10012_v9  ;;  %v3658_v33 = vmul.f32 %v3314_v44, %v10013_v55  ;;  %4032 = vmatpush.bf16.msrb.mxu0 %v3770_v59  ;;  %v3771_v34 = vpack.c.bf16 %v3547_v48, %v3539_v54  ;;  %v3523_v2 = vmul.f32 %v3251_v11, %v10014_v37  ;;  %v2826_v44 = vpop.f32.mrf.mxu0 }
 0x366   : > { %v3835_v47 = vpack.c.bf16 %v3675_v5, %v3667_v30  ;;  %v3531_v4 = vmul.f32 %v3251_v11, %v10015_v12  ;;  %4045 = vmatpush.bf16.msrb.mxu1 %v3834_v49  ;;  %v3762_v25 = vpack.c.bf16 %v3530_v22, %v3522_v46  ;;  %v3315_v39 = vperm.slane %v8358_v0, 7  ;;  %v2852_v46 = vpop.f32.mrf.mxu2 }
 0x367   : > { %v3826_v42 = vpack.c.bf16 %v3658_v33, %v3650_v53  ;;  %v3242_v32 = vperm.slane %v8385_v10, 6  ;;  %4058 = vmatpush.bf16.msrb.mxu2 %v3771_v34  ;;  %v3306_v6 = vperm.slane %v8404_v14, 6  ;;  %v3243_v36 = vperm.slane %v8385_v10, 7  ;;  %v2865_v22 = vpop.f32.mrf.mxu3 }
 0x368   : > { %4071 = vmatpush.bf16.msrb.mxu3 %v3835_v47  ;;  %v3763_v58 = vpack.c.bf16 %v3531_v4, %v3523_v2  ;;  %v3307_v51 = vperm.slane %v8404_v14, 7  ;;  %v3651_v52 = vmul.f32 %v3315_v39, %v10014_v37  ;;  %v3659_v62 = vmul.f32 %v3315_v39, %v10015_v12  ;;  %v10018_v39 = vld [vmem:[#allocation114_spill] sm:$0xff]  ;;  %v10029_v22 = vld [vmem:[#allocation100_spill] sm:$0xff] }
 0x369   : > { %v3506_v23 = vmul.f32 %v3242_v32, %v10012_v9  ;;  %v3514_v19 = vmul.f32 %v3242_v32, %v10013_v55  ;;  %4033 = vmatpush.bf16.msrb.mxu0 %v3762_v25  ;;  %v3634_v0 = vmul.f32 %v3306_v6, %v10012_v9  ;;  %v3642_v56 = vmul.f32 %v3306_v6, %v10013_v55  ;;  %v10019_v32 = vld [vmem:[#allocation113_spill] sm:$0xff]  ;;  %v10020_v6 = vld [vmem:[#allocation19_spill] sm:$0xff] }
 0x36a   : > { %v3507_v26 = vmul.f32 %v3243_v36, %v10014_v37  ;;  %v3515_v21 = vmul.f32 %v3243_v36, %v10015_v12  ;;  %4046 = vmatpush.bf16.msrb.mxu1 %v3826_v42  ;;  %v3827_v10 = vpack.c.bf16 %v3659_v62, %v3651_v52  ;;  %v3635_v13 = vmul.f32 %v3307_v51, %v10014_v37  ;;  %v10021_v36 = vld [vmem:[#allocation115_spill] sm:$0xff] }
 0x36b   : > { %v3754_v14 = vpack.c.bf16 %v3514_v19, %v3506_v23  ;;  %v3643_v8 = vmul.f32 %v3307_v51, %v10015_v12  ;;  %4059 = vmatpush.bf16.msrb.mxu2 %v3763_v58  ;;  %v3818_v27 = vpack.c.bf16 %v3642_v56, %v3634_v0  ;;  %v3234_v31 = vperm.slane %v8424_v3, 6  ;;  %v2839_v11 = vpop.f32.mrf.mxu1  ;;  %v10023_v23 = vld [vmem:[#allocation20_spill] sm:$0xff]  ;;  %v10024_v19 = vld [vmem:[#allocation27_spill] sm:$0xff] }
 0x36c   : > { %v3755_v60 = vpack.c.bf16 %v3515_v21, %v3507_v26  ;;  %v3298_v59 = vperm.slane %v8446_v16, 6  ;;  %4072 = vmatpush.bf16.msrb.mxu3 %v3827_v10  ;;  %v3235_v43 = vperm.slane %v8424_v3, 7  ;;  %v3299_v49 = vperm.slane %v8446_v16, 7 }
 0x36d   : > { %v3819_v15 = vpack.c.bf16 %v3643_v8, %v3635_v13  ;;  %v4318_v41 = vsel %vm783_vm3, %v6641_v29, %v6634_v40  ;;  %4034 = vmatpush.bf16.msrb.mxu0 %v3754_v14  ;;  %v3490_v54 = vmul.f32 %v3234_v31, %v10012_v9  ;;  %v3498_v48 = vmul.f32 %v3234_v31, %v10013_v55 }
 0x36e   : > { %v3618_v30 = vmul.f32 %v3298_v59, %v10012_v9  ;;  %v3626_v5 = vmul.f32 %v3298_v59, %v10013_v55  ;;  %4047 = vmatpush.bf16.msrb.mxu1 %v3818_v27  ;;  %v3491_v3 = vmul.f32 %v3235_v43, %v10014_v37  ;;  %v3499_v16 = vmul.f32 %v3235_v43, %v10015_v12 }
 0x36f   : > { %v3619_v53 = vmul.f32 %v3299_v49, %v10014_v37  ;;  %v3627_v33 = vmul.f32 %v3299_v49, %v10015_v12  ;;  %4060 = vmatpush.bf16.msrb.mxu2 %v3755_v60  ;;  %v3746_v34 = vpack.c.bf16 %v3498_v48, %v3490_v54  ;;  %v4319_v9 = vsel %vm775_vm0, %v6643_v45, %v6645_v57  ;;  %v10027_v54 = vld [vmem:[#allocation99_spill] sm:$0xff] }
 0x370   : > { %v3810_v47 = vpack.c.bf16 %v3626_v5, %v3618_v30  ;;  %v4321_v55 = vsel %vm777_vm1, %v6647_v20, %v6649_v63  ;;  %4073 = vmatpush.bf16.msrb.mxu3 %v3819_v15  ;;  %v3747_v2 = vpack.c.bf16 %v3499_v16, %v3491_v3  ;;  %vm10016_vm4 = vcmask 1046529   ;;  %v10028_v30 = vld [vmem:[#allocation107_spill] sm:$0xff]  ;;  %v10030_v16 = vld [vmem:[#allocation108_spill] sm:$0xff] }
 0x371   : > { %v3811_v4 = vpack.c.bf16 %v3627_v33, %v3619_v53  ;;  %v4320_v25 = vsel %vm10016_vm4, %v4319_v9, %v4318_v41  ;;  %v4322_v37 = vsel %vm781_vm2, %v6651_v1, %v6653_v17  ;;  %4035 = vmatpush.bf16.msrb.mxu0 %v3746_v34  ;;  %vm10017_vm12 = vcmask 1044483  }
 0x372   : > { %v4323_v12 = vsel %vm10017_vm12, %v4321_v55, %v4322_v37  ;;  %v4381_v42 = vsel %vm783_vm3, %v6655_v61, %v6636_v50  ;;  %v4382_v58 = vsel %vm775_vm0, %v10019_v32, %v10018_v39  ;;  %v4384_v51 = vsel %vm777_vm1, %v10021_v36, %v10020_v6  ;;  %4048 = vmatpush.bf16.msrb.mxu1 %v3810_v47 }
 0x373   : > { %vm10022_vm5 = vcmask 1046531   ;;  %v4383_v62 = vsel %vm10016_vm4, %v4382_v58, %v4381_v42  ;;  %v4385_v0 = vsel %vm781_vm2, %v10024_v19, %v10023_v23  ;;  %v4310_v56 = vsel %vm769_vm10, %v6634_v40, %v6641_v29  ;;  %4061 = vmatpush.bf16.msrb.mxu2 %v3747_v2 }
 0x374   : > { %v4324_v52 = vsel %vm10022_vm5, %v4323_v12, %v4320_v25  ;;  %v4386_v21 = vsel %vm10017_vm12, %v4384_v51, %v4385_v0  ;;  %v4311_v10 = vsel %vm761_vm7, %v6643_v45, %v6645_v57  ;;  %v4313_v14 = vsel %vm763_vm8, %v6647_v20, %v6649_v63  ;;  %4074 = vmatpush.bf16.msrb.mxu3 %v3811_v4 }
 0x375   : > { %v8835_v26 = vrot.slane %v4324_v52, 7  ;;  %v4387_v13 = vsel %vm10022_vm5, %v4386_v21, %v4383_v62  ;;  %vm10025_vm4 = vcmask 1045504   ;;  %v4314_v27 = vsel %vm767_vm9, %v6651_v1, %v6653_v17  ;;  %4036 = vmatmul.bf16.vlgmr.msrb.gmra.mxu0 %v8544_v35  ;;  %4049 = vmatmul.bf16.vlgmr.msrb.gmra.mxu1 %v8546_v7  ;;  %v10033_v21 = vld [vmem:[#allocation97_spill] sm:$0xff] }
 0x376   : > { %v4312_v8 = vsel %vm10025_vm4, %v4311_v10, %v4310_v56  ;;  %v4373_v60 = vsel %vm769_vm10, %v6636_v50, %v6655_v61  ;;  %v8853_v59 = vrot.slane %v4387_v13, 7  ;;  %v4315_v43 = vsel %vm792_vm11, %v4313_v14, %v4314_v27  ;;  %4062 = vmatmul.bf16.vlgmr.msrb.gmra.mxu2 %v8544_v35  ;;  %vm10031_vm5 = vmmov %vm10025_vm4 }
 0x377   : > { %v4445_v31 = vperm.slane %v8835_v26, 0  ;;  %v4446_v15 = vperm.slane %v8835_v26, 1  ;;  %vm10026_vm12 = vcmask 1045506   ;;  %v4374_v41 = vsel %vm761_vm7, %v10019_v32, %v10018_v39  ;;  %4075 = vmatmul.bf16.vlgmr.msrb.gmra.mxu3 %v8546_v7 }
 0x378   : > { %v4316_v49 = vsel %vm10026_vm12, %v4315_v43, %v4312_v8  ;;  %v4376_v44 = vsel %vm763_vm8, %v10021_v36, %v10020_v6  ;;  %v4377_v11 = vsel %vm767_vm9, %v10024_v19, %v10023_v23  ;;  %v4509_v46 = vperm.slane %v8853_v59, 0  ;;  %vm10032_vm4 = vmmov %vm10026_vm12 }
 0x379   : > { %v4757_v48 = vmul.f32 %v4445_v31, %v10027_v54  ;;  %v4765_v5 = vmul.f32 %v4445_v31, %v10028_v30  ;;  %v4758_v3 = vmul.f32 %v4446_v15, %v10029_v22  ;;  %v4766_v53 = vmul.f32 %v4446_v15, %v10030_v16 }
 0x37a   : > { %v4510_v33 = vperm.slane %v8853_v59, 1  ;;  %v8877_v34 = vrot.slane %v4316_v49, 6  ;;  %v4375_v47 = vsel %vm10031_vm5, %v4374_v41, %v4373_v60  ;;  %v4885_v35 = vmul.f32 %v4509_v46, %v10027_v54 }
 0x37b   : > { %v4957_v9 = vpack.c.bf16 %v4765_v5, %v4757_v48  ;;  %v4893_v55 = vmul.f32 %v4509_v46, %v10028_v30  ;;  %v4378_v2 = vsel %vm792_vm11, %v4376_v44, %v4377_v11  ;;  %v4958_v4 = vpack.c.bf16 %v4766_v53, %v4758_v3 }
 0x37c   : > { %v4886_v25 = vmul.f32 %v4510_v33, %v10029_v22  ;;  %v4894_v7 = vmul.f32 %v4510_v33, %v10030_v16  ;;  %v4437_v37 = vperm.slane %v8877_v34, 0  ;;  %v4379_v42 = vsel %vm10032_vm4, %v4378_v2, %v4375_v47 }
 0x37d   : > { %5033 = vmatpush.bf16.msra.mxu0 %v4957_v9  ;;  %v5021_v12 = vpack.c.bf16 %v4893_v55, %v4885_v35  ;;  %v4438_v58 = vperm.slane %v8877_v34, 1  ;;  %v2838_v51 = vadd.f32 %v8769_v18, %v8767_v38  ;;  %5059 = vmatpush.bf16.msra.mxu2 %v4958_v4  ;;  %v8892_v56 = vrot.slane %v4379_v42, 6  ;;  %v10036_v4 = vld [vmem:[#allocation98_spill] sm:$0xff] }
 0x37e   : > { %v5022_v52 = vpack.c.bf16 %v4894_v7, %v4886_v25  ;;  %v4741_v62 = vmul.f32 %v4437_v37, %v10027_v54  ;;  %v4749_v0 = vmul.f32 %v4437_v37, %v10028_v30  ;;  %v8895_v10 = vmax.f32 %v10033_v21, 0.0 }
 0x37f   : > { %5046 = vmatpush.bf16.msra.mxu1 %v5021_v12  ;;  %v4742_v14 = vmul.f32 %v4438_v58, %v10029_v22  ;;  %v4750_v13 = vmul.f32 %v4438_v58, %v10030_v16  ;;  %5421 = vst [vmem:[%s7860_s25 + $0x60] sm:$0xff] %v2838_v51  ;;  %v2864_v38 = vadd.f32 %v8775_v28, %v8773_v24  ;;  %v4501_v8 = vperm.slane %v8892_v56, 0 }
 0x380   : > { %5072 = vmatpush.bf16.msra.mxu3 %v5022_v52  ;;  %v4949_v18 = vpack.c.bf16 %v4749_v0, %v4741_v62  ;;  %v4502_v27 = vperm.slane %v8892_v56, 1  ;;  %v4302_v60 = vsel %vm781_vm2, %v6634_v40, %v6641_v29  ;;  %v4303_v15 = vsel %vm783_vm3, %v6645_v57, %v6643_v45 }
 0x381   : > { %v4950_v31 = vpack.c.bf16 %v4750_v13, %v4742_v14  ;;  %5422 = vst [vmem:[%s7860_s25 + $0x68] sm:$0xff] %v2864_v38  ;;  %v4305_v24 = vsel %vm775_vm0, %v6647_v20, %v6649_v63  ;;  %v4306_v28 = vsel %vm777_vm1, %v6651_v1, %v6653_v17  ;;  %v4869_v43 = vmul.f32 %v4501_v8, %v10027_v54 }
 0x382   : > { %5034 = vmatpush.bf16.msra.mxu0 %v4949_v18  ;;  %v4877_v49 = vmul.f32 %v4501_v8, %v10028_v30  ;;  %v4870_v41 = vmul.f32 %v4502_v27, %v10029_v22  ;;  %v4878_v44 = vmul.f32 %v4502_v27, %v10030_v16  ;;  %vm10034_vm12 = vcmask 1046533  }
 0x383   : > { %5060 = vmatpush.bf16.msra.mxu2 %v4950_v31  ;;  %v4304_v11 = vsel %vm10034_vm12, %v4302_v60, %v4303_v15  ;;  %v4307_v48 = vsel %vm779_vm14, %v4305_v24, %v4306_v28  ;;  %v4365_v5 = vsel %vm781_vm2, %v6636_v50, %v6655_v61  ;;  %v4366_v46 = vsel %vm783_vm3, %v10018_v39, %v10019_v32  ;;  %vm10035_vm5 = vmmov %vm10034_vm12 }
 0x384   : > { %v5013_v3 = vpack.c.bf16 %v4877_v49, %v4869_v43  ;;  %v5014_v53 = vpack.c.bf16 %v4878_v44, %v4870_v41  ;;  %v4308_v33 = vsel %vm787_vm6, %v4307_v48, %v4304_v11  ;;  %v4367_v47 = vsel %vm10035_vm5, %v4365_v5, %v4366_v46 }
 0x385   : > { %v8931_v9 = vrot.slane %v4308_v33, 5  ;;  %v4368_v35 = vsel %vm775_vm0, %v10021_v36, %v10020_v6  ;;  %v4369_v55 = vsel %vm777_vm1, %v10024_v19, %v10023_v23  ;;  %v4294_v2 = vsel %vm767_vm9, %v6634_v40, %v6641_v29 }
 0x386   : > { %v8943_v25 = vmax.f32 %v10036_v4, 0.0  ;;  %5047 = vmatpush.bf16.msra.mxu1 %v5013_v3  ;;  %5073 = vmatpush.bf16.msra.mxu3 %v5014_v53  ;;  %v4370_v7 = vsel %vm779_vm14, %v4368_v35, %v4369_v55  ;;  %v4295_v37 = vsel %vm769_vm10, %v6643_v45, %v6645_v57  ;;  %v4297_v12 = vsel %vm761_vm7, %v6647_v20, %v6649_v63 }
 0x387   : > { %v4429_v42 = vperm.slane %v8931_v9, 0  ;;  %v4371_v58 = vsel %vm787_vm6, %v4370_v7, %v4367_v47  ;;  %v4430_v51 = vperm.slane %v8931_v9, 1  ;;  %v4296_v52 = vsel %vm771_vm13, %v4294_v2, %v4295_v37 }
 0x388   : > { %v8956_v62 = vrot.slane %v4371_v58, 5  ;;  %v4298_v0 = vsel %vm763_vm8, %v6651_v1, %v6653_v17  ;;  %v4357_v21 = vsel %vm767_vm9, %v6636_v50, %v6655_v61  ;;  %v4358_v14 = vsel %vm769_vm10, %v10019_v32, %v10018_v39 }
 0x389   : > { %v4725_v13 = vmul.f32 %v4429_v42, %v10027_v54  ;;  %v4733_v38 = vmul.f32 %v4429_v42, %v10028_v30  ;;  %v4726_v18 = vmul.f32 %v4430_v51, %v10029_v22  ;;  %v4734_v8 = vmul.f32 %v4430_v51, %v10030_v16 }
 0x38a   : > { %v4493_v27 = vperm.slane %v8956_v62, 0  ;;  %v4494_v60 = vperm.slane %v8956_v62, 1  ;;  %v4299_v31 = vsel %vm765_vm15, %v4297_v12, %v4298_v0  ;;  %v4359_v15 = vsel %vm771_vm13, %v4357_v21, %v4358_v14 }
 0x38b   : > { %v4941_v24 = vpack.c.bf16 %v4733_v38, %v4725_v13  ;;  %v4942_v28 = vpack.c.bf16 %v4734_v8, %v4726_v18  ;;  %vm10037_vm4 = vcmask 1043456   ;;  %v4360_v49 = vsel %vm761_vm7, %v10021_v36, %v10020_v6 }
 0x38c   : > { %v4300_v43 = vsel %vm10037_vm4, %v4299_v31, %v4296_v52  ;;  %v4853_v41 = vmul.f32 %v4493_v27, %v10027_v54  ;;  %v4861_v44 = vmul.f32 %v4493_v27, %v10028_v30  ;;  %v4854_v11 = vmul.f32 %v4494_v60, %v10029_v22  ;;  %vm10039_vm5 = vmmov %vm10037_vm4 }
 0x38d   : > { %v4862_v48 = vmul.f32 %v4494_v60, %v10030_v16  ;;  %5035 = vmatpush.bf16.msra.mxu0 %v4941_v24  ;;  %5061 = vmatpush.bf16.msra.mxu2 %v4942_v28  ;;  %v8983_v5 = vrot.slane %v4300_v43, 4  ;;  %v4361_v46 = vsel %vm763_vm8, %v10024_v19, %v10023_v23  ;;  %v4286_v3 = vsel %vm777_vm1, %v6634_v40, %v6641_v29 }
 0x38e   : > { %v4287_v53 = vsel %vm781_vm2, %v6643_v45, %v6645_v57  ;;  %v5005_v33 = vpack.c.bf16 %v4861_v44, %v4853_v41  ;;  %v4362_v35 = vsel %vm765_vm15, %v4360_v49, %v4361_v46  ;;  %vm10038_vm12 = vcmask 1044483  }
 0x38f   : > { %v5006_v47 = vpack.c.bf16 %v4862_v48, %v4854_v11  ;;  %v4288_v55 = vsel %vm10038_vm12, %v4286_v3, %v4287_v53  ;;  %v4421_v2 = vperm.slane %v8983_v5, 0  ;;  %v4363_v4 = vsel %vm10039_vm5, %v4362_v35, %v4359_v15 }
 0x390   : > { %v4422_v7 = vperm.slane %v8983_v5, 1  ;;  %v4289_v37 = vsel %vm783_vm3, %v6649_v63, %v6647_v20  ;;  %5048 = vmatpush.bf16.msra.mxu1 %v5005_v33  ;;  %v9002_v12 = vrot.slane %v4363_v4, 4  ;;  %v4290_v42 = vsel %vm775_vm0, %v6651_v1, %v6653_v17 }
 0x391   : > { %5074 = vmatpush.bf16.msra.mxu3 %v5006_v47  ;;  %v4349_v58 = vsel %vm777_vm1, %v6636_v50, %v6655_v61  ;;  %v4350_v51 = vsel %vm781_vm2, %v10019_v32, %v10018_v39  ;;  %v4709_v52 = vmul.f32 %v4421_v2, %v10027_v54  ;;  %v4717_v0 = vmul.f32 %v4421_v2, %v10028_v30 }
 0x392   : > { %v4710_v21 = vmul.f32 %v4422_v7, %v10029_v22  ;;  %v4718_v14 = vmul.f32 %v4422_v7, %v10030_v16  ;;  %v4485_v13 = vperm.slane %v9002_v12, 0  ;;  %v4486_v38 = vperm.slane %v9002_v12, 1 }
 0x393   : > { %vm10040_vm4 = vcmask 1046529   ;;  %v4351_v8 = vsel %vm10038_vm12, %v4349_v58, %v4350_v51  ;;  %v4933_v27 = vpack.c.bf16 %v4717_v0, %v4709_v52  ;;  %vm10041_vm5 = vcmask 1046531  }
 0x394   : > { %v4291_v18 = vsel %vm10040_vm4, %v4290_v42, %v4289_v37  ;;  %v4934_v60 = vpack.c.bf16 %v4718_v14, %v4710_v21  ;;  %v4352_v15 = vsel %vm783_vm3, %v10020_v6, %v10021_v36  ;;  %v4837_v24 = vmul.f32 %v4485_v13, %v10027_v54  ;;  %vm10042_vm12 = vmmov %vm10041_vm5 }
 0x395   : > { %v4292_v31 = vsel %vm10041_vm5, %v4288_v55, %v4291_v18  ;;  %v4845_v28 = vmul.f32 %v4485_v13, %v10028_v30  ;;  %v4838_v43 = vmul.f32 %v4486_v38, %v10029_v22  ;;  %v4846_v49 = vmul.f32 %v4486_v38, %v10030_v16  ;;  %5036 = vmatpush.bf16.msra.mxu0 %v4933_v27 }
 0x396   : > { %5062 = vmatpush.bf16.msra.mxu2 %v4934_v60  ;;  %v9029_v41 = vrot.slane %v4292_v31, 3  ;;  %v4353_v44 = vsel %vm775_vm0, %v10024_v19, %v10023_v23  ;;  %v4278_v11 = vsel %vm763_vm8, %v6634_v40, %v6641_v29  ;;  %v4279_v48 = vsel %vm767_vm9, %v6643_v45, %v6645_v57 }
 0x397   : > { %v4997_v46 = vpack.c.bf16 %v4845_v28, %v4837_v24  ;;  %v4998_v3 = vpack.c.bf16 %v4846_v49, %v4838_v43  ;;  %v4354_v53 = vsel %vm10040_vm4, %v4353_v44, %v4352_v15  ;;  %v4280_v33 = vsel %vm792_vm11, %v4278_v11, %v4279_v48 }
 0x398   : > { %v4413_v47 = vperm.slane %v9029_v41, 0  ;;  %v4355_v35 = vsel %vm10042_vm12, %v4351_v8, %v4354_v53  ;;  %v4414_v55 = vperm.slane %v9029_v41, 1  ;;  %v4281_v2 = vsel %vm769_vm10, %v6647_v20, %v6649_v63 }
 0x399   : > { %5049 = vmatpush.bf16.msra.mxu1 %v4997_v46  ;;  %5075 = vmatpush.bf16.msra.mxu3 %v4998_v3  ;;  %v9048_v4 = vrot.slane %v4355_v35, 3  ;;  %v4282_v7 = vsel %vm761_vm7, %v6651_v1, %v6653_v17  ;;  %v4341_v37 = vsel %vm763_vm8, %v6636_v50, %v6655_v61  ;;  %v4342_v42 = vsel %vm767_vm9, %v10019_v32, %v10018_v39 }
 0x39a   : > { %v4693_v58 = vmul.f32 %v4413_v47, %v10027_v54  ;;  %v4701_v51 = vmul.f32 %v4413_v47, %v10028_v30  ;;  %v4694_v52 = vmul.f32 %v4414_v55, %v10029_v22  ;;  %v4702_v0 = vmul.f32 %v4414_v55, %v10030_v16  ;;  %v9090_v47 = vpop.f32.mrf.mxu1 }
 0x39b   : > { %v4477_v21 = vperm.slane %v9048_v4, 0  ;;  %v4478_v14 = vperm.slane %v9048_v4, 1  ;;  %vm10043_vm5 = vcmask 1045504   ;;  %v4343_v38 = vsel %vm792_vm11, %v4341_v37, %v4342_v42  ;;  %v9098_v37 = vpop.f32.mrf.mxu2  ;;  %v9100_v42 = vpop.f32.mrf.mxu3 }
 0x39c   : > { %v4283_v13 = vsel %vm10043_vm5, %v4282_v7, %v4281_v2  ;;  %v4925_v18 = vpack.c.bf16 %v4701_v51, %v4693_v58  ;;  %v4926_v8 = vpack.c.bf16 %v4702_v0, %v4694_v52  ;;  %vm10044_vm4 = vcmask 1045506   ;;  %vm10045_vm11 = vmmov %vm10043_vm5 }
 0x39d   : > { %v4284_v27 = vsel %vm10044_vm4, %v4280_v33, %v4283_v13  ;;  %v4344_v60 = vsel %vm769_vm10, %v10021_v36, %v10020_v6  ;;  %v4821_v31 = vmul.f32 %v4477_v21, %v10027_v54  ;;  %v4829_v15 = vmul.f32 %v4477_v21, %v10028_v30  ;;  %v9088_v33 = vpop.f32.mrf.mxu0  ;;  %vm10046_vm12 = vmmov %vm10044_vm4 }
 0x39e   : > { %v4822_v24 = vmul.f32 %v4478_v14, %v10029_v22  ;;  %v4830_v28 = vmul.f32 %v4478_v14, %v10030_v16  ;;  %5037 = vmatpush.bf16.msra.mxu0 %v4925_v18  ;;  %5063 = vmatpush.bf16.msra.mxu2 %v4926_v8  ;;  %v9075_v43 = vrot.slane %v4284_v27, 2  ;;  %v4345_v49 = vsel %vm761_vm7, %v10024_v19, %v10023_v23 }
 0x39f   : > { %v4270_v44 = vsel %vm775_vm0, %v6634_v40, %v6641_v29  ;;  %v4271_v11 = vsel %vm777_vm1, %v6643_v45, %v6645_v57  ;;  %v4989_v48 = vpack.c.bf16 %v4829_v15, %v4821_v31  ;;  %v4346_v3 = vsel %vm10045_vm11, %v4345_v49, %v4344_v60 }
 0x3a0   : > { %v4990_v46 = vpack.c.bf16 %v4830_v28, %v4822_v24  ;;  %v4272_v53 = vsel %vm779_vm14, %v4270_v44, %v4271_v11  ;;  %v4405_v35 = vperm.slane %v9075_v43, 0  ;;  %v4347_v55 = vsel %vm10046_vm12, %v4343_v38, %v4346_v3 }
 0x3a1   : > { %v4406_v2 = vperm.slane %v9075_v43, 1  ;;  %v4273_v7 = vsel %vm781_vm2, %v6647_v20, %v6649_v63  ;;  %5050 = vmatpush.bf16.msra.mxu1 %v4989_v48  ;;  %v9102_v58 = vrot.slane %v4347_v55, 2  ;;  %v4274_v51 = vsel %vm783_vm3, %v6653_v17, %v6651_v1 }
 0x3a2   : > { %5076 = vmatpush.bf16.msra.mxu3 %v4990_v46  ;;  %v4333_v52 = vsel %vm775_vm0, %v6636_v50, %v6655_v61  ;;  %v4334_v0 = vsel %vm777_vm1, %v10019_v32, %v10018_v39  ;;  %v4677_v21 = vmul.f32 %v4405_v35, %v10027_v54  ;;  %v4685_v14 = vmul.f32 %v4405_v35, %v10028_v30 }
 0x3a3   : > { %v4678_v13 = vmul.f32 %v4406_v2, %v10029_v22  ;;  %v4686_v38 = vmul.f32 %v4406_v2, %v10030_v16  ;;  %v4469_v18 = vperm.slane %v9102_v58, 0  ;;  %v4470_v8 = vperm.slane %v9102_v58, 1 }
 0x3a4   : > { %vm10047_vm5 = vcmask 1046533   ;;  %v4335_v60 = vsel %vm779_vm14, %v4333_v52, %v4334_v0  ;;  %v4917_v31 = vpack.c.bf16 %v4685_v14, %v4677_v21  ;;  %v4336_v28 = vsel %vm781_vm2, %v10021_v36, %v10020_v6  ;;  %v2891_v0 = vpop.f32.mrf.mxu1 }
 0x3a5   : > { %v4275_v27 = vsel %vm10047_vm5, %v4273_v7, %v4274_v51  ;;  %v4918_v15 = vpack.c.bf16 %v4686_v38, %v4678_v13  ;;  %v4805_v49 = vmul.f32 %v4469_v18, %v10027_v54  ;;  %v4813_v44 = vmul.f32 %v4469_v18, %v10028_v30  ;;  %vm10048_vm0 = vmmov %vm10047_vm5  ;;  %v2878_v52 = vpop.f32.mrf.mxu0 }
 0x3a6   : > { %v4276_v24 = vsel %vm787_vm6, %v4272_v53, %v4275_v27  ;;  %v4806_v11 = vmul.f32 %v4470_v8, %v10029_v22  ;;  %v4814_v48 = vmul.f32 %v4470_v8, %v10030_v16  ;;  %5038 = vmatpush.bf16.msra.mxu0 %v4917_v31  ;;  %v4337_v3 = vsel %vm783_vm3, %v10023_v23, %v10024_v19 }
 0x3a7   : > { %5064 = vmatpush.bf16.msra.mxu2 %v4918_v15  ;;  %v9129_v46 = vrot.slane %v4276_v24, 1  ;;  %v4263_v53 = vsel %vm761_vm7, %v6634_v40, %v6641_v29  ;;  %v4264_v35 = vsel %vm763_vm8, %v6643_v45, %v6645_v57  ;;  %v4981_v55 = vpack.c.bf16 %v4813_v44, %v4805_v49  ;;  %v2904_v29 = vpop.f32.mrf.mxu2  ;;  %v2917_v45 = vpop.f32.mrf.mxu3 }
 0x3a8   : > { %v4982_v2 = vpack.c.bf16 %v4814_v48, %v4806_v11  ;;  %v4338_v7 = vsel %vm10048_vm0, %v4336_v28, %v4337_v3  ;;  %v4265_v51 = vsel %vm765_vm15, %v4263_v53, %v4264_v35  ;;  %v4266_v40 = vsel %vm767_vm9, %v6647_v20, %v6649_v63 }
 0x3a9   : > { %v4397_v21 = vperm.slane %v9129_v46, 0  ;;  %v4339_v14 = vsel %vm787_vm6, %v4335_v60, %v4338_v7  ;;  %v4398_v13 = vperm.slane %v9129_v46, 1  ;;  %5051 = vmatpush.bf16.msra.mxu1 %v4981_v55  ;;  %v4267_v38 = vsel %vm769_vm10, %v6651_v1, %v6653_v17 }
 0x3aa   : > { %5077 = vmatpush.bf16.msra.mxu3 %v4982_v2  ;;  %v9148_v57 = vrot.slane %v4339_v14, 1  ;;  %v4326_v18 = vsel %vm761_vm7, %v6636_v50, %v6655_v61  ;;  %v4327_v8 = vsel %vm763_vm8, %v10019_v32, %v10018_v39  ;;  %v4268_v17 = vsel %vm771_vm13, %v4266_v40, %v4267_v38  ;;  %v10052_v40 = vld [vmem:[#allocation109_spill] sm:$0xff] }
 0x3ab   : > { %v4661_v20 = vmul.f32 %v4397_v21, %v10027_v54  ;;  %v4669_v63 = vmul.f32 %v4397_v21, %v10028_v30  ;;  %v4662_v27 = vmul.f32 %v4398_v13, %v10029_v22  ;;  %v4670_v60 = vmul.f32 %v4398_v13, %v10030_v16  ;;  %v10051_v21 = vld [vmem:[#allocation101_spill] sm:$0xff] }
 0x3ac   : > { %v4461_v31 = vperm.slane %v9148_v57, 0  ;;  %v4462_v1 = vperm.slane %v9148_v57, 1  ;;  %v4328_v50 = vsel %vm765_vm15, %v4326_v18, %v4327_v8  ;;  %vm10049_vm1 = vcmask 1043456  }
 0x3ad   : > { %v4909_v61 = vpack.c.bf16 %v4669_v63, %v4661_v20  ;;  %v4910_v15 = vpack.c.bf16 %v4670_v60, %v4662_v27  ;;  %v9168_v39 = vsel %vm10049_vm1, %v4265_v51, %v4268_v17  ;;  %v4329_v32 = vsel %vm767_vm9, %v10021_v36, %v10020_v6  ;;  %vm10050_vm2 = vmmov %vm10049_vm1 }
 0x3ae   : > { %v4789_v24 = vmul.f32 %v4461_v31, %v10027_v54  ;;  %v4797_v28 = vmul.f32 %v4461_v31, %v10028_v30  ;;  %v4790_v49 = vmul.f32 %v4462_v1, %v10029_v22  ;;  %v4798_v44 = vmul.f32 %v4462_v1, %v10030_v16 }
 0x3af   : > { %5039 = vmatpush.bf16.msra.mxu0 %v4909_v61  ;;  %5065 = vmatpush.bf16.msra.mxu2 %v4910_v15  ;;  %v4389_v11 = vperm.slane %v9168_v39, 0  ;;  %v4330_v48 = vsel %vm769_vm10, %v10024_v19, %v10023_v23  ;;  %v4390_v3 = vperm.slane %v9168_v39, 1  ;;  %v4447_v6 = vperm.slane %v8835_v26, 2 }
 0x3b0   : > { %v4973_v36 = vpack.c.bf16 %v4797_v28, %v4789_v24  ;;  %v4974_v53 = vpack.c.bf16 %v4798_v44, %v4790_v49  ;;  %v4331_v35 = vsel %vm771_vm13, %v4329_v32, %v4330_v48  ;;  %v4511_v55 = vperm.slane %v8853_v59, 2 }
 0x3b1   : > { %v4645_v2 = vmul.f32 %v4389_v11, %v10027_v54  ;;  %v4653_v7 = vmul.f32 %v4389_v11, %v10028_v30  ;;  %v9188_v51 = vsel %vm10050_vm2, %v4328_v50, %v4331_v35  ;;  %v4646_v52 = vmul.f32 %v4390_v3, %v10029_v22 }
 0x3b2   : > { %5052 = vmatpush.bf16.msra.mxu1 %v4973_v36  ;;  %5078 = vmatpush.bf16.msra.mxu3 %v4974_v53  ;;  %v4453_v23 = vperm.slane %v9188_v51, 0  ;;  %v4654_v19 = vmul.f32 %v4390_v3, %v10030_v16  ;;  %v4454_v0 = vperm.slane %v9188_v51, 1  ;;  %v4759_v14 = vmul.f32 %v4447_v6, %v10051_v21 }
 0x3b3   : > { %v4901_v13 = vpack.c.bf16 %v4653_v7, %v4645_v2  ;;  %v4767_v29 = vmul.f32 %v4447_v6, %v10052_v40  ;;  %v4887_v45 = vmul.f32 %v4511_v55, %v10051_v21  ;;  %v4895_v38 = vmul.f32 %v4511_v55, %v10052_v40 }
 0x3b4   : > { %v4773_v18 = vmul.f32 %v4453_v23, %v10027_v54  ;;  %v4781_v8 = vmul.f32 %v4453_v23, %v10028_v30  ;;  %v4902_v20 = vpack.c.bf16 %v4654_v19, %v4646_v52  ;;  %v4774_v63 = vmul.f32 %v4454_v0, %v10029_v22  ;;  %v10053_v30 = vld [vmem:[#allocation102_spill] sm:$0xff] }
 0x3b5   : > { %5040 = vmatpush.bf16.msra.mxu0 %v4901_v13  ;;  %v4782_v27 = vmul.f32 %v4454_v0, %v10030_v16  ;;  %v4959_v60 = vpack.c.bf16 %v4767_v29, %v4759_v14  ;;  %v5023_v31 = vpack.c.bf16 %v4895_v38, %v4887_v45  ;;  %v4448_v1 = vperm.slane %v8835_v26, 3  ;;  %v10054_v22 = vld [vmem:[#allocation110_spill] sm:$0xff] }
 0x3b6   : > { %v4965_v17 = vpack.c.bf16 %v4781_v8, %v4773_v18  ;;  %5066 = vmatpush.bf16.msra.mxu2 %v4902_v20  ;;  %v4512_v50 = vperm.slane %v8853_v59, 3  ;;  %v4439_v61 = vperm.slane %v8877_v34, 2  ;;  %v4503_v54 = vperm.slane %v8892_v56, 2 }
 0x3b7   : > { %v4966_v15 = vpack.c.bf16 %v4782_v27, %v4774_v63  ;;  %v4760_v32 = vmul.f32 %v4448_v1, %v10053_v30  ;;  %v4768_v24 = vmul.f32 %v4448_v1, %v10054_v22  ;;  %v4440_v16 = vperm.slane %v8877_v34, 3 }
 0x3b8   : > { %5053 = vmatpush.bf16.msra.mxu1 %v4965_v17  ;;  %v4888_v28 = vmul.f32 %v4512_v50, %v10053_v30  ;;  %v4896_v49 = vmul.f32 %v4512_v50, %v10054_v22  ;;  %v4743_v44 = vmul.f32 %v4439_v61, %v10051_v21  ;;  %v4751_v11 = vmul.f32 %v4439_v61, %v10052_v40 }
 0x3b9   : > { %5085 = vmatpush.bf16.msrb.mxu0 %v4959_v60  ;;  %5079 = vmatpush.bf16.msra.mxu3 %v4966_v15  ;;  %v4960_v48 = vpack.c.bf16 %v4768_v24, %v4760_v32  ;;  %v4871_v3 = vmul.f32 %v4503_v54, %v10051_v21  ;;  %v4879_v6 = vmul.f32 %v4503_v54, %v10052_v40  ;;  %v4504_v36 = vperm.slane %v8892_v56, 3  ;;  %v9243_v24 = vpop.f32.mrf.mxu0 }
 0x3ba   : > { %v5024_v53 = vpack.c.bf16 %v4896_v49, %v4888_v28  ;;  %v4951_v35 = vpack.c.bf16 %v4751_v11, %v4743_v44  ;;  %v4744_v55 = vmul.f32 %v4440_v16, %v10053_v30  ;;  %v4752_v2 = vmul.f32 %v4440_v16, %v10054_v22  ;;  %v9245_v16 = vpop.f32.mrf.mxu1 }
 0x3bb   : > { %5111 = vmatpush.bf16.msrb.mxu2 %v4960_v48  ;;  %v5015_v7 = vpack.c.bf16 %v4879_v6, %v4871_v3  ;;  %v4872_v52 = vmul.f32 %v4504_v36, %v10053_v30  ;;  %v4880_v23 = vmul.f32 %v4504_v36, %v10054_v22  ;;  %v2890_v19 = vadd.f32 %v9090_v47, %v9088_v33  ;;  %v9250_v48 = vpop.f32.mrf.mxu2  ;;  %v9252_v3 = vpop.f32.mrf.mxu3 }
 0x3bc   : > { %5098 = vmatpush.bf16.msrb.mxu1 %v5023_v31  ;;  %v4952_v0 = vpack.c.bf16 %v4752_v2, %v4744_v55  ;;  %v2916_v14 = vadd.f32 %v9100_v42, %v9098_v37  ;;  %v4431_v13 = vperm.slane %v8931_v9, 2  ;;  %v4495_v29 = vperm.slane %v8956_v62, 2 }
 0x3bd   : > { %5124 = vmatpush.bf16.msrb.mxu3 %v5024_v53  ;;  %5086 = vmatpush.bf16.msrb.mxu0 %v4951_v35  ;;  %v5016_v45 = vpack.c.bf16 %v4880_v23, %v4872_v52  ;;  %5423 = vst [vmem:[%s7860_s25 + $0x70] sm:$0xff] %v2890_v19  ;;  %v4432_v38 = vperm.slane %v8931_v9, 3  ;;  %v4496_v18 = vperm.slane %v8956_v62, 3  ;;  %v4423_v8 = vperm.slane %v8983_v5, 2 }
 0x3be   : > { %5424 = vst [vmem:[%s7860_s25 + $0x78] sm:$0xff] %v2916_v14  ;;  %v4727_v33 = vmul.f32 %v4431_v13, %v10051_v21  ;;  %v4735_v47 = vmul.f32 %v4431_v13, %v10052_v40  ;;  %v4855_v37 = vmul.f32 %v4495_v29, %v10051_v21  ;;  %v4863_v42 = vmul.f32 %v4495_v29, %v10052_v40 }
 0x3bf   : > { %5112 = vmatpush.bf16.msrb.mxu2 %v4952_v0  ;;  %v4728_v20 = vmul.f32 %v4432_v38, %v10053_v30  ;;  %v4736_v63 = vmul.f32 %v4432_v38, %v10054_v22  ;;  %v4856_v27 = vmul.f32 %v4496_v18, %v10053_v30  ;;  %v4864_v60 = vmul.f32 %v4496_v18, %v10054_v22 }
 0x3c0   : > { %5099 = vmatpush.bf16.msrb.mxu1 %v5015_v7  ;;  %v4943_v31 = vpack.c.bf16 %v4735_v47, %v4727_v33  ;;  %v5007_v1 = vpack.c.bf16 %v4863_v42, %v4855_v37  ;;  %v4711_v17 = vmul.f32 %v4423_v8, %v10051_v21  ;;  %v4719_v50 = vmul.f32 %v4423_v8, %v10052_v40 }
 0x3c1   : > { %5125 = vmatpush.bf16.msrb.mxu3 %v5016_v45  ;;  %v4944_v61 = vpack.c.bf16 %v4736_v63, %v4728_v20  ;;  %v5008_v54 = vpack.c.bf16 %v4864_v60, %v4856_v27  ;;  %v4487_v15 = vperm.slane %v9002_v12, 2  ;;  %v4424_v32 = vperm.slane %v8983_v5, 3  ;;  %v5029_v27 = vld [vmem:[%s5927_s15 + $0x30] sm:$0xff] }
 0x3c2   : > { %5087 = vmatpush.bf16.msrb.mxu0 %v4943_v31  ;;  %v4935_v28 = vpack.c.bf16 %v4719_v50, %v4711_v17  ;;  %v4488_v49 = vperm.slane %v9002_v12, 3  ;;  %v4415_v44 = vperm.slane %v9029_v41, 2  ;;  %v4479_v11 = vperm.slane %v9048_v4, 2  ;;  %v5030_v50 = vld [vmem:[%s5927_s15 + $0x38] sm:$0xff] }
 0x3c3   : > { %5113 = vmatpush.bf16.msrb.mxu2 %v4944_v61  ;;  %v4839_v6 = vmul.f32 %v4487_v15, %v10051_v21  ;;  %v4847_v36 = vmul.f32 %v4487_v15, %v10052_v40  ;;  %v4712_v53 = vmul.f32 %v4424_v32, %v10053_v30  ;;  %v4720_v35 = vmul.f32 %v4424_v32, %v10054_v22  ;;  %v3883_v61 = vpop.f32.mrf.mxu0 }
 0x3c4   : > { %5100 = vmatpush.bf16.msrb.mxu1 %v5007_v1  ;;  %v4840_v55 = vmul.f32 %v4488_v49, %v10053_v30  ;;  %v4848_v2 = vmul.f32 %v4488_v49, %v10054_v22  ;;  %v4695_v7 = vmul.f32 %v4415_v44, %v10051_v21  ;;  %v4703_v52 = vmul.f32 %v4415_v44, %v10052_v40  ;;  %v3909_v44 = vpop.f32.mrf.mxu2 }
 0x3c5   : > { %5126 = vmatpush.bf16.msrb.mxu3 %v5008_v54  ;;  %v4999_v23 = vpack.c.bf16 %v4847_v36, %v4839_v6  ;;  %v4936_v19 = vpack.c.bf16 %v4720_v35, %v4712_v53  ;;  %v4823_v0 = vmul.f32 %v4479_v11, %v10051_v21  ;;  %v4831_v14 = vmul.f32 %v4479_v11, %v10052_v40  ;;  %v3896_v54 = vpop.f32.mrf.mxu1  ;;  %v3922_v11 = vpop.f32.mrf.mxu3 }
 0x3c6   : > { %5088 = vmatpush.bf16.msrb.mxu0 %v4935_v28  ;;  %v5000_v13 = vpack.c.bf16 %v4848_v2, %v4840_v55  ;;  %v4927_v29 = vpack.c.bf16 %v4703_v52, %v4695_v7  ;;  %v4416_v45 = vperm.slane %v9029_v41, 3  ;;  %v4480_v38 = vperm.slane %v9048_v4, 3 }
 0x3c7   : > { %5114 = vmatpush.bf16.msrb.mxu2 %v4936_v19  ;;  %v4991_v18 = vpack.c.bf16 %v4831_v14, %v4823_v0  ;;  %v4407_v8 = vperm.slane %v9075_v43, 2  ;;  %v4471_v33 = vperm.slane %v9102_v58, 2  ;;  %v4408_v47 = vperm.slane %v9075_v43, 3 }
 0x3c8   : > { %5101 = vmatpush.bf16.msrb.mxu1 %v4999_v23  ;;  %v4696_v37 = vmul.f32 %v4416_v45, %v10053_v30  ;;  %v4704_v42 = vmul.f32 %v4416_v45, %v10054_v22  ;;  %v4824_v20 = vmul.f32 %v4480_v38, %v10053_v30  ;;  %v4832_v63 = vmul.f32 %v4480_v38, %v10054_v22 }
 0x3c9   : > { %5127 = vmatpush.bf16.msrb.mxu3 %v5000_v13  ;;  %v4679_v60 = vmul.f32 %v4407_v8, %v10051_v21  ;;  %v4687_v31 = vmul.f32 %v4407_v8, %v10052_v40  ;;  %v4807_v1 = vmul.f32 %v4471_v33, %v10051_v21  ;;  %v4815_v17 = vmul.f32 %v4471_v33, %v10052_v40 }
 0x3ca   : > { %5089 = vmatpush.bf16.msrb.mxu0 %v4927_v29  ;;  %v4928_v15 = vpack.c.bf16 %v4704_v42, %v4696_v37  ;;  %v4992_v32 = vpack.c.bf16 %v4832_v63, %v4824_v20  ;;  %v4680_v28 = vmul.f32 %v4408_v47, %v10053_v30  ;;  %v4688_v49 = vmul.f32 %v4408_v47, %v10054_v22 }
 0x3cb   : > { %v4919_v6 = vpack.c.bf16 %v4687_v31, %v4679_v60  ;;  %v4983_v36 = vpack.c.bf16 %v4815_v17, %v4807_v1  ;;  %v4472_v53 = vperm.slane %v9102_v58, 3  ;;  %v9282_v35 = vpack.c.bf16 %v5029_v27, %v5029_v27 }
 0x3cc   : > { %5102 = vmatpush.bf16.msrb.mxu1 %v4991_v18  ;;  %5115 = vmatpush.bf16.msrb.mxu2 %v4928_v15  ;;  %v4920_v55 = vpack.c.bf16 %v4688_v49, %v4680_v28  ;;  %v9284_v2 = vpack.c.bf16 %v5030_v50, %v5030_v50  ;;  %v4399_v7 = vperm.slane %v9129_v46, 2  ;;  %v4463_v52 = vperm.slane %v9148_v57, 2 }
 0x3cd   : > { %5128 = vmatpush.bf16.msrb.mxu3 %v4992_v32  ;;  %v4808_v23 = vmul.f32 %v4472_v53, %v10053_v30  ;;  %v4816_v19 = vmul.f32 %v4472_v53, %v10054_v22  ;;  %5067 = vmatmul.bf16.vlgmr.msra.gmra.mxu2 %v9282_v35  ;;  %v4400_v0 = vperm.slane %v9129_v46, 3  ;;  %v4464_v14 = vperm.slane %v9148_v57, 3  ;;  %v10055_v53 = vld [vmem:[#allocation103_spill] sm:$0xff] }
 0x3ce   : > { %5041 = vmatmul.bf16.vlgmr.msra.gmra.mxu0 %v9282_v35  ;;  %5080 = vmatmul.bf16.vlgmr.msra.gmra.mxu3 %v9284_v2  ;;  %v4663_v13 = vmul.f32 %v4399_v7, %v10051_v21  ;;  %v4671_v29 = vmul.f32 %v4399_v7, %v10052_v40  ;;  %v4791_v45 = vmul.f32 %v4463_v52, %v10051_v21  ;;  %v4391_v38 = vperm.slane %v9168_v39, 2  ;;  %v10056_v7 = vld [vmem:[#allocation111_spill] sm:$0xff] }
 0x3cf   : > { %5090 = vmatpush.bf16.msrb.mxu0 %v4919_v6  ;;  %v4984_v18 = vpack.c.bf16 %v4816_v19, %v4808_v23  ;;  %v4799_v8 = vmul.f32 %v4463_v52, %v10052_v40  ;;  %v4664_v33 = vmul.f32 %v4400_v0, %v10053_v30  ;;  %v4672_v47 = vmul.f32 %v4400_v0, %v10054_v22 }
 0x3d0   : > { %5103 = vmatpush.bf16.msrb.mxu1 %v4983_v36  ;;  %5116 = vmatpush.bf16.msrb.mxu2 %v4920_v55  ;;  %v4911_v37 = vpack.c.bf16 %v4671_v29, %v4663_v13  ;;  %v4792_v42 = vmul.f32 %v4464_v14, %v10053_v30  ;;  %v4800_v20 = vmul.f32 %v4464_v14, %v10054_v22  ;;  %v4455_v63 = vperm.slane %v9188_v51, 2  ;;  %v10057_v14 = vld [vmem:[#allocation104_spill] sm:$0xff] }
 0x3d1   : > { %5054 = vmatmul.bf16.vlgmr.msra.gmra.mxu1 %v9284_v2  ;;  %5129 = vmatpush.bf16.msrb.mxu3 %v4984_v18  ;;  %v4975_v27 = vpack.c.bf16 %v4799_v8, %v4791_v45  ;;  %v4912_v60 = vpack.c.bf16 %v4672_v47, %v4664_v33  ;;  %v4647_v31 = vmul.f32 %v4391_v38, %v10051_v21  ;;  %v4392_v54 = vperm.slane %v9168_v39, 3 }
 0x3d2   : > { %v4655_v1 = vmul.f32 %v4391_v38, %v10052_v40  ;;  %v4976_v17 = vpack.c.bf16 %v4800_v20, %v4792_v42  ;;  %v4775_v50 = vmul.f32 %v4455_v63, %v10051_v21  ;;  %v4783_v61 = vmul.f32 %v4455_v63, %v10052_v40  ;;  %v10058_v38 = vld [vmem:[#allocation112_spill] sm:$0xff] }
 0x3d3   : > { %5091 = vmatpush.bf16.msrb.mxu0 %v4911_v37  ;;  %v4456_v32 = vperm.slane %v9188_v51, 3  ;;  %v4449_v28 = vperm.slane %v8835_v26, 4  ;;  %v4513_v49 = vperm.slane %v8853_v59, 4  ;;  %v4648_v11 = vmul.f32 %v4392_v54, %v10053_v30 }
 0x3d4   : > { %5104 = vmatpush.bf16.msrb.mxu1 %v4975_v27  ;;  %v4903_v15 = vpack.c.bf16 %v4655_v1, %v4647_v31  ;;  %5117 = vmatpush.bf16.msrb.mxu2 %v4912_v60  ;;  %v4967_v44 = vpack.c.bf16 %v4783_v61, %v4775_v50  ;;  %v4656_v6 = vmul.f32 %v4392_v54, %v10054_v22  ;;  %v4450_v21 = vperm.slane %v8835_v26, 5 }
 0x3d5   : > { %5130 = vmatpush.bf16.msrb.mxu3 %v4976_v17  ;;  %v4776_v40 = vmul.f32 %v4456_v32, %v10053_v30  ;;  %v4784_v36 = vmul.f32 %v4456_v32, %v10054_v22  ;;  %v4761_v55 = vmul.f32 %v4449_v28, %v10055_v53  ;;  %v4769_v52 = vmul.f32 %v4449_v28, %v10056_v7 }
 0x3d6   : > { %v4904_v23 = vpack.c.bf16 %v4656_v6, %v4648_v11  ;;  %v4889_v19 = vmul.f32 %v4513_v49, %v10055_v53  ;;  %v4897_v0 = vmul.f32 %v4513_v49, %v10056_v7  ;;  %v4762_v13 = vmul.f32 %v4450_v21, %v10057_v14 }
 0x3d7   : > { %5092 = vmatpush.bf16.msrb.mxu0 %v4903_v15  ;;  %v4968_v29 = vpack.c.bf16 %v4784_v36, %v4776_v40  ;;  %v4961_v45 = vpack.c.bf16 %v4769_v52, %v4761_v55  ;;  %v4770_v18 = vmul.f32 %v4450_v21, %v10058_v38  ;;  %v4514_v30 = vperm.slane %v8853_v59, 5 }
 0x3d8   : > { %5105 = vmatpush.bf16.msrb.mxu1 %v4967_v44  ;;  %5118 = vmatpush.bf16.msrb.mxu2 %v4904_v23  ;;  %v5025_v22 = vpack.c.bf16 %v4897_v0, %v4889_v19  ;;  %v4441_v8 = vperm.slane %v8877_v34, 4  ;;  %v4505_v33 = vperm.slane %v8892_v56, 4  ;;  %v4442_v47 = vperm.slane %v8877_v34, 5 }
 0x3d9   : > { %5131 = vmatpush.bf16.msrb.mxu3 %v4968_v29  ;;  %v4962_v37 = vpack.c.bf16 %v4770_v18, %v4762_v13  ;;  %v4890_v42 = vmul.f32 %v4514_v30, %v10057_v14  ;;  %v4898_v20 = vmul.f32 %v4514_v30, %v10058_v38  ;;  %v4506_v63 = vperm.slane %v8892_v56, 5 }
 0x3da   : > { %v4745_v27 = vmul.f32 %v4441_v8, %v10055_v53  ;;  %v4753_v60 = vmul.f32 %v4441_v8, %v10056_v7  ;;  %v4873_v31 = vmul.f32 %v4505_v33, %v10055_v53  ;;  %v4881_v1 = vmul.f32 %v4505_v33, %v10056_v7 }
 0x3db   : > { %5137 = vmatpush.bf16.msra.mxu0 %v4961_v45  ;;  %v5026_v17 = vpack.c.bf16 %v4898_v20, %v4890_v42  ;;  %v4746_v50 = vmul.f32 %v4442_v47, %v10057_v14  ;;  %v4754_v61 = vmul.f32 %v4442_v47, %v10058_v38  ;;  %v4874_v54 = vmul.f32 %v4506_v63, %v10057_v14  ;;  %v9369_v42 = vpop.f32.mrf.mxu1 }
 0x3dc   : > { %5150 = vmatpush.bf16.msra.mxu1 %v5025_v22  ;;  %5163 = vmatpush.bf16.msra.mxu2 %v4962_v37  ;;  %v4953_v15 = vpack.c.bf16 %v4753_v60, %v4745_v27  ;;  %v5017_v32 = vpack.c.bf16 %v4881_v1, %v4873_v31  ;;  %v4882_v28 = vmul.f32 %v4506_v63, %v10058_v38  ;;  %v4433_v6 = vperm.slane %v8931_v9, 4  ;;  %v9367_v37 = vpop.f32.mrf.mxu0  ;;  %v9374_v31 = vpop.f32.mrf.mxu2 }
 0x3dd   : > { %v3895_v49 = vadd.f32 %v9245_v16, %v9243_v24  ;;  %5176 = vmatpush.bf16.msra.mxu3 %v5026_v17  ;;  %v4954_v44 = vpack.c.bf16 %v4754_v61, %v4746_v50  ;;  %v3921_v11 = vadd.f32 %v9252_v3, %v9250_v48  ;;  %v4497_v21 = vperm.slane %v8956_v62, 4  ;;  %5119 = vmatmul.bf16.vlgmr.msrb.gmra.mxu2 %v9282_v35  ;;  %v9376_v1 = vpop.f32.mrf.mxu3 }
 0x3de   : > { %v5018_v40 = vpack.c.bf16 %v4882_v28, %v4874_v54  ;;  %v4434_v36 = vperm.slane %v8931_v9, 5  ;;  %v4498_v55 = vperm.slane %v8956_v62, 5  ;;  %v4425_v24 = vperm.slane %v8983_v5, 4  ;;  %5132 = vmatmul.bf16.vlgmr.msrb.gmra.mxu3 %v9284_v2  ;;  %5093 = vmatmul.bf16.vlgmr.msrb.gmra.mxu0 %v9282_v35 }
 0x3df   : > { %5138 = vmatpush.bf16.msra.mxu0 %v4953_v15  ;;  %5425 = vst [vmem:[%s7860_s25 + $0x80] sm:$0xff] %v3895_v49  ;;  %v4729_v16 = vmul.f32 %v4433_v6, %v10055_v53  ;;  %v4737_v48 = vmul.f32 %v4433_v6, %v10056_v7  ;;  %v4857_v3 = vmul.f32 %v4497_v21, %v10055_v53  ;;  %v4489_v52 = vperm.slane %v9002_v12, 4 }
 0x3e0   : > { %5151 = vmatpush.bf16.msra.mxu1 %v5017_v32  ;;  %5164 = vmatpush.bf16.msra.mxu2 %v4954_v44  ;;  %5426 = vst [vmem:[%s7860_s25 + $0x88] sm:$0xff] %v3921_v11  ;;  %v4865_v23 = vmul.f32 %v4497_v21, %v10056_v7  ;;  %v4730_v19 = vmul.f32 %v4434_v36, %v10057_v14  ;;  %v4426_v27 = vperm.slane %v8983_v5, 5  ;;  %v4490_v60 = vperm.slane %v9002_v12, 5 }
 0x3e1   : > { %v4738_v0 = vmul.f32 %v4434_v36, %v10058_v38  ;;  %v4858_v13 = vmul.f32 %v4498_v55, %v10057_v14  ;;  %5177 = vmatpush.bf16.msra.mxu3 %v5018_v40  ;;  %v4945_v29 = vpack.c.bf16 %v4737_v48, %v4729_v16  ;;  %v4866_v45 = vmul.f32 %v4498_v55, %v10058_v38 }
 0x3e2   : > { %v4713_v18 = vmul.f32 %v4425_v24, %v10055_v53  ;;  %v4721_v30 = vmul.f32 %v4425_v24, %v10056_v7  ;;  %v5009_v22 = vpack.c.bf16 %v4865_v23, %v4857_v3  ;;  %v4841_v33 = vmul.f32 %v4489_v52, %v10055_v53  ;;  %5106 = vmatmul.bf16.vlgmr.msrb.gmra.mxu1 %v9284_v2 }
 0x3e3   : > { %v4946_v8 = vpack.c.bf16 %v4738_v0, %v4730_v19  ;;  %v4849_v47 = vmul.f32 %v4489_v52, %v10056_v7  ;;  %5139 = vmatpush.bf16.msra.mxu0 %v4945_v29  ;;  %v5010_v20 = vpack.c.bf16 %v4866_v45, %v4858_v13  ;;  %v4417_v50 = vperm.slane %v9029_v41, 4 }
 0x3e4   : > { %v4937_v63 = vpack.c.bf16 %v4721_v30, %v4713_v18  ;;  %5152 = vmatpush.bf16.msra.mxu1 %v5009_v22  ;;  %v4481_v61 = vperm.slane %v9048_v4, 4  ;;  %v4418_v54 = vperm.slane %v9029_v41, 5  ;;  %v4714_v15 = vmul.f32 %v4426_v27, %v10057_v14  ;;  %v3935_v22 = vpop.f32.mrf.mxu0 }
 0x3e5   : > { %5165 = vmatpush.bf16.msra.mxu2 %v4946_v8  ;;  %v5001_v17 = vpack.c.bf16 %v4849_v47, %v4841_v33  ;;  %5178 = vmatpush.bf16.msra.mxu3 %v5010_v20  ;;  %v4722_v32 = vmul.f32 %v4426_v27, %v10058_v38  ;;  %v4842_v28 = vmul.f32 %v4490_v60, %v10057_v14  ;;  %v4482_v3 = vperm.slane %v9048_v4, 5  ;;  %v3948_v8 = vpop.f32.mrf.mxu1  ;;  %v3961_v27 = vpop.f32.mrf.mxu2 }
 0x3e6   : > { %v4850_v49 = vmul.f32 %v4490_v60, %v10058_v38  ;;  %v4697_v44 = vmul.f32 %v4417_v50, %v10055_v53  ;;  %v4705_v11 = vmul.f32 %v4417_v50, %v10056_v7  ;;  %v4825_v6 = vmul.f32 %v4481_v61, %v10055_v53  ;;  %v3974_v60 = vpop.f32.mrf.mxu3 }
 0x3e7   : > { %v4833_v21 = vmul.f32 %v4481_v61, %v10056_v7  ;;  %5140 = vmatpush.bf16.msra.mxu0 %v4937_v63  ;;  %v4938_v40 = vpack.c.bf16 %v4722_v32, %v4714_v15  ;;  %v4698_v55 = vmul.f32 %v4418_v54, %v10057_v14  ;;  %v4706_v24 = vmul.f32 %v4418_v54, %v10058_v38 }
 0x3e8   : > { %v5002_v36 = vpack.c.bf16 %v4850_v49, %v4842_v28  ;;  %5153 = vmatpush.bf16.msra.mxu1 %v5001_v17  ;;  %v4929_v16 = vpack.c.bf16 %v4705_v11, %v4697_v44  ;;  %v4409_v52 = vperm.slane %v9075_v43, 4  ;;  %v4473_v19 = vperm.slane %v9102_v58, 4 }
 0x3e9   : > { %v4993_v48 = vpack.c.bf16 %v4833_v21, %v4825_v6  ;;  %5166 = vmatpush.bf16.msra.mxu2 %v4938_v40  ;;  %v4930_v23 = vpack.c.bf16 %v4706_v24, %v4698_v55  ;;  %v4410_v0 = vperm.slane %v9075_v43, 5  ;;  %v4474_v13 = vperm.slane %v9102_v58, 5 }
 0x3ea   : > { %5179 = vmatpush.bf16.msra.mxu3 %v5002_v36  ;;  %v4826_v29 = vmul.f32 %v4482_v3, %v10057_v14  ;;  %v4834_v45 = vmul.f32 %v4482_v3, %v10058_v38  ;;  %v4681_v18 = vmul.f32 %v4409_v52, %v10055_v53  ;;  %v4689_v30 = vmul.f32 %v4409_v52, %v10056_v7 }
 0x3eb   : > { %5141 = vmatpush.bf16.msra.mxu0 %v4929_v16  ;;  %v4809_v33 = vmul.f32 %v4473_v19, %v10055_v53  ;;  %v4817_v47 = vmul.f32 %v4473_v19, %v10056_v7  ;;  %v4682_v20 = vmul.f32 %v4410_v0, %v10057_v14  ;;  %v4690_v63 = vmul.f32 %v4410_v0, %v10058_v38 }
 0x3ec   : > { %5154 = vmatpush.bf16.msra.mxu1 %v4993_v48  ;;  %v4994_v17 = vpack.c.bf16 %v4834_v45, %v4826_v29  ;;  %v4921_v50 = vpack.c.bf16 %v4689_v30, %v4681_v18  ;;  %v4810_v61 = vmul.f32 %v4474_v13, %v10057_v14  ;;  %v4818_v54 = vmul.f32 %v4474_v13, %v10058_v38 }
 0x3ed   : > { %5167 = vmatpush.bf16.msra.mxu2 %v4930_v23  ;;  %v4985_v15 = vpack.c.bf16 %v4817_v47, %v4809_v33  ;;  %v4922_v32 = vpack.c.bf16 %v4690_v63, %v4682_v20  ;;  %v4401_v28 = vperm.slane %v9129_v46, 4  ;;  %v4465_v49 = vperm.slane %v9148_v57, 4 }
 0x3ee   : > { %5180 = vmatpush.bf16.msra.mxu3 %v4994_v17  ;;  %v4986_v44 = vpack.c.bf16 %v4818_v54, %v4810_v61  ;;  %v4402_v11 = vperm.slane %v9129_v46, 5  ;;  %v4466_v6 = vperm.slane %v9148_v57, 5  ;;  %v4393_v21 = vperm.slane %v9168_v39, 4  ;;  %v10059_v61 = vld [vmem:[#allocation105_spill] sm:$0xff] }
 0x3ef   : > { %5142 = vmatpush.bf16.msra.mxu0 %v4921_v50  ;;  %v4665_v40 = vmul.f32 %v4401_v28, %v10055_v53  ;;  %v4673_v36 = vmul.f32 %v4401_v28, %v10056_v7  ;;  %v4793_v55 = vmul.f32 %v4465_v49, %v10055_v53  ;;  %v4801_v24 = vmul.f32 %v4465_v49, %v10056_v7 }
 0x3f0   : > { %5155 = vmatpush.bf16.msra.mxu1 %v4985_v15  ;;  %v4666_v16 = vmul.f32 %v4402_v11, %v10057_v14  ;;  %v4674_v48 = vmul.f32 %v4402_v11, %v10058_v38  ;;  %v4794_v3 = vmul.f32 %v4466_v6, %v10057_v14  ;;  %v4802_v52 = vmul.f32 %v4466_v6, %v10058_v38 }
 0x3f1   : > { %5168 = vmatpush.bf16.msra.mxu2 %v4922_v32  ;;  %v4913_v23 = vpack.c.bf16 %v4673_v36, %v4665_v40  ;;  %v4977_v19 = vpack.c.bf16 %v4801_v24, %v4793_v55  ;;  %v4649_v0 = vmul.f32 %v4393_v21, %v10055_v53  ;;  %v4657_v13 = vmul.f32 %v4393_v21, %v10056_v7  ;;  %v10060_v36 = vld [vmem:[#allocation106_spill] sm:$0xff] }
 0x3f2   : > { %5181 = vmatpush.bf16.msra.mxu3 %v4986_v44  ;;  %v4914_v29 = vpack.c.bf16 %v4674_v48, %v4666_v16  ;;  %v4978_v45 = vpack.c.bf16 %v4802_v52, %v4794_v3  ;;  %v4457_v18 = vperm.slane %v9188_v51, 4  ;;  %v4394_v30 = vperm.slane %v9168_v39, 5 }
 0x3f3   : > { %5143 = vmatpush.bf16.msra.mxu0 %v4913_v23  ;;  %v4905_v22 = vpack.c.bf16 %v4657_v13, %v4649_v0  ;;  %v4458_v8 = vperm.slane %v9188_v51, 5  ;;  %v4451_v33 = vperm.slane %v8835_v26, 6  ;;  %v4515_v47 = vperm.slane %v8853_v59, 6 }
 0x3f4   : > { %5156 = vmatpush.bf16.msra.mxu1 %v4977_v19  ;;  %v4777_v20 = vmul.f32 %v4457_v18, %v10055_v53  ;;  %v4785_v63 = vmul.f32 %v4457_v18, %v10056_v7  ;;  %v4650_v27 = vmul.f32 %v4394_v30, %v10057_v14  ;;  %v4658_v60 = vmul.f32 %v4394_v30, %v10058_v38 }
 0x3f5   : > { %5169 = vmatpush.bf16.msra.mxu2 %v4914_v29  ;;  %v4778_v17 = vmul.f32 %v4458_v8, %v10057_v14  ;;  %v4786_v50 = vmul.f32 %v4458_v8, %v10058_v38  ;;  %v4763_v54 = vmul.f32 %v4451_v33, %v10059_v61  ;;  %v4771_v15 = vmul.f32 %v4451_v33, %v8895_v10  ;;  %v9461_v33 = vpop.f32.mrf.mxu0 }
 0x3f6   : > { %5182 = vmatpush.bf16.msra.mxu3 %v4978_v45  ;;  %v4969_v32 = vpack.c.bf16 %v4785_v63, %v4777_v20  ;;  %v4906_v28 = vpack.c.bf16 %v4658_v60, %v4650_v27  ;;  %v4891_v53 = vmul.f32 %v4515_v47, %v10059_v61  ;;  %v4899_v7 = vmul.f32 %v4515_v47, %v8895_v10  ;;  %v9463_v47 = vpop.f32.mrf.mxu1 }
 0x3f7   : > { %5144 = vmatpush.bf16.msra.mxu0 %v4905_v22  ;;  %v4970_v49 = vpack.c.bf16 %v4786_v50, %v4778_v17  ;;  %v4963_v44 = vpack.c.bf16 %v4771_v15, %v4763_v54  ;;  %v4452_v11 = vperm.slane %v8835_v26, 7  ;;  %v4516_v14 = vperm.slane %v8853_v59, 7  ;;  %v9468_v17 = vpop.f32.mrf.mxu2 }
 0x3f8   : > { %5157 = vmatpush.bf16.msra.mxu1 %v4969_v32  ;;  %v5027_v38 = vpack.c.bf16 %v4899_v7, %v4891_v53  ;;  %v4443_v6 = vperm.slane %v8877_v34, 6  ;;  %v4507_v21 = vperm.slane %v8892_v56, 6  ;;  %v4444_v40 = vperm.slane %v8877_v34, 7 }
 0x3f9   : > { %5170 = vmatpush.bf16.msra.mxu2 %v4906_v28  ;;  %v4764_v55 = vmul.f32 %v4452_v11, %v10060_v36  ;;  %v4772_v24 = vmul.f32 %v4452_v11, %v8943_v25  ;;  %v4892_v16 = vmul.f32 %v4516_v14, %v10060_v36  ;;  %v4508_v26 = vperm.slane %v8892_v56, 7 }
 0x3fa   : > { %5183 = vmatpush.bf16.msra.mxu3 %v4970_v49  ;;  %v4900_v59 = vmul.f32 %v4516_v14, %v8943_v25  ;;  %v4747_v48 = vmul.f32 %v4443_v6, %v10059_v61  ;;  %v4755_v3 = vmul.f32 %v4443_v6, %v8895_v10  ;;  %v4435_v34 = vperm.slane %v8931_v9, 6  ;;  %5145 = vmatmul.bf16.vlgmr.msra.gmra.mxu0 %v9282_v35 }
 0x3fb   : > { %5189 = vmatpush.bf16.msrb.mxu0 %v4963_v44  ;;  %v4964_v52 = vpack.c.bf16 %v4772_v24, %v4764_v55  ;;  %v4875_v23 = vmul.f32 %v4507_v21, %v10059_v61  ;;  %v4883_v19 = vmul.f32 %v4507_v21, %v8895_v10  ;;  %v4748_v0 = vmul.f32 %v4444_v40, %v10060_v36 }
 0x3fc   : > { %5202 = vmatpush.bf16.msrb.mxu1 %v5027_v38  ;;  %v5028_v56 = vpack.c.bf16 %v4900_v59, %v4892_v16  ;;  %v4955_v13 = vpack.c.bf16 %v4755_v3, %v4747_v48  ;;  %v4756_v29 = vmul.f32 %v4444_v40, %v8943_v25  ;;  %v4876_v45 = vmul.f32 %v4508_v26, %v10060_v36 }
 0x3fd   : > { %5171 = vmatmul.bf16.vlgmr.msra.gmra.mxu2 %v9282_v35  ;;  %v5019_v18 = vpack.c.bf16 %v4883_v19, %v4875_v23  ;;  %v4884_v30 = vmul.f32 %v4508_v26, %v8943_v25  ;;  %v3947_v22 = vadd.f32 %v9369_v42, %v9367_v37  ;;  %v3973_v8 = vadd.f32 %v9376_v1, %v9374_v31  ;;  %v9470_v37 = vpop.f32.mrf.mxu3 }
 0x3fe   : > { %5215 = vmatpush.bf16.msrb.mxu2 %v4964_v52  ;;  %5228 = vmatpush.bf16.msrb.mxu3 %v5028_v56  ;;  %v4956_v20 = vpack.c.bf16 %v4756_v29, %v4748_v0  ;;  %v4731_v63 = vmul.f32 %v4435_v34, %v10059_v61  ;;  %v4739_v27 = vmul.f32 %v4435_v34, %v8895_v10  ;;  %v4499_v60 = vperm.slane %v8956_v62, 6  ;;  %v3987_v34 = vpop.f32.mrf.mxu0  ;;  %v4000_v52 = vpop.f32.mrf.mxu1 }
 0x3ff   : > { %5190 = vmatpush.bf16.msrb.mxu0 %v4955_v13  ;;  %v5020_v42 = vpack.c.bf16 %v4884_v30, %v4876_v45  ;;  %5427 = vst [vmem:[%s7860_s25 + $0x90] sm:$0xff] %v3947_v22  ;;  %5184 = vmatmul.bf16.vlgmr.msra.gmra.mxu3 %v9284_v2  ;;  %v4436_v31 = vperm.slane %v8931_v9, 7  ;;  %v4500_v1 = vperm.slane %v8956_v62, 7  ;;  %v4427_v50 = vperm.slane %v8983_v5, 6 }
 0x400   : > { %5203 = vmatpush.bf16.msrb.mxu1 %v5019_v18  ;;  %5428 = vst [vmem:[%s7860_s25 + $0x98] sm:$0xff] %v3973_v8  ;;  %v4947_v54 = vpack.c.bf16 %v4739_v27, %v4731_v63  ;;  %v4859_v15 = vmul.f32 %v4499_v60, %v10059_v61  ;;  %v4867_v32 = vmul.f32 %v4499_v60, %v8895_v10  ;;  %v4491_v28 = vperm.slane %v9002_v12, 6 }
 0x401   : > { %5158 = vmatmul.bf16.vlgmr.msra.gmra.mxu1 %v9284_v2  ;;  %v4732_v53 = vmul.f32 %v4436_v31, %v10060_v36  ;;  %v4740_v7 = vmul.f32 %v4436_v31, %v8943_v25  ;;  %v4860_v9 = vmul.f32 %v4500_v1, %v10060_v36  ;;  %v4868_v62 = vmul.f32 %v4500_v1, %v8943_v25 }
 0x402   : > { %5216 = vmatpush.bf16.msrb.mxu2 %v4956_v20  ;;  %5229 = vmatpush.bf16.msrb.mxu3 %v5020_v42  ;;  %v5011_v49 = vpack.c.bf16 %v4867_v32, %v4859_v15  ;;  %v4715_v44 = vmul.f32 %v4427_v50, %v10059_v61  ;;  %v4723_v11 = vmul.f32 %v4427_v50, %v8895_v10  ;;  %v4428_v14 = vperm.slane %v8983_v5, 7 }
 0x403   : > { %5191 = vmatpush.bf16.msrb.mxu0 %v4947_v54  ;;  %v4948_v38 = vpack.c.bf16 %v4740_v7, %v4732_v53  ;;  %v5012_v6 = vpack.c.bf16 %v4868_v62, %v4860_v9  ;;  %v4843_v21 = vmul.f32 %v4491_v28, %v10059_v61  ;;  %v4851_v40 = vmul.f32 %v4491_v28, %v8895_v10 }
 0x404   : > { %5204 = vmatpush.bf16.msrb.mxu1 %v5011_v49  ;;  %v4939_v55 = vpack.c.bf16 %v4723_v11, %v4715_v44  ;;  %v4716_v24 = vmul.f32 %v4428_v14, %v10060_v36  ;;  %v4724_v16 = vmul.f32 %v4428_v14, %v8943_v25  ;;  %v4492_v26 = vperm.slane %v9002_v12, 7  ;;  %v4013_v12 = vpop.f32.mrf.mxu2 }
 0x405   : > { %v5003_v59 = vpack.c.bf16 %v4851_v40, %v4843_v21  ;;  %v4419_v48 = vperm.slane %v9029_v41, 6  ;;  %v4483_v5 = vperm.slane %v9048_v4, 6  ;;  %v4420_v3 = vperm.slane %v9029_v41, 7  ;;  %v4026_v13 = vpop.f32.mrf.mxu3 }
 0x406   : > { %5217 = vmatpush.bf16.msrb.mxu2 %v4948_v38  ;;  %5230 = vmatpush.bf16.msrb.mxu3 %v5012_v6  ;;  %v4940_v23 = vpack.c.bf16 %v4724_v16, %v4716_v24  ;;  %v4844_v19 = vmul.f32 %v4492_v26, %v10060_v36  ;;  %v4852_v0 = vmul.f32 %v4492_v26, %v8943_v25  ;;  %v4484_v56 = vperm.slane %v9048_v4, 7  ;;  %v4037_v11 = vpop.f32.mrf.mxu0  ;;  %v4050_v14 = vpop.f32.mrf.mxu1 }
 0x407   : > { %5192 = vmatpush.bf16.msrb.mxu0 %v4939_v55  ;;  %v4699_v29 = vmul.f32 %v4419_v48, %v10059_v61  ;;  %v4707_v45 = vmul.f32 %v4419_v48, %v8895_v10  ;;  %v4827_v18 = vmul.f32 %v4483_v5, %v10059_v61  ;;  %v4835_v41 = vmul.f32 %v4483_v5, %v8895_v10 }
 0x408   : > { %5205 = vmatpush.bf16.msrb.mxu1 %v5003_v59  ;;  %v5004_v30 = vpack.c.bf16 %v4852_v0, %v4844_v19  ;;  %v4700_v22 = vmul.f32 %v4420_v3, %v10060_v36  ;;  %v4708_v8 = vmul.f32 %v4420_v3, %v8943_v25  ;;  %v4828_v20 = vmul.f32 %v4484_v56, %v10060_v36 }
 0x409   : > { %v4931_v4 = vpack.c.bf16 %v4707_v45, %v4699_v29  ;;  %v4995_v63 = vpack.c.bf16 %v4835_v41, %v4827_v18  ;;  %v4836_v27 = vmul.f32 %v4484_v56, %v8943_v25  ;;  %v4411_v60 = vperm.slane %v9075_v43, 6 }
 0x40a   : > { %5218 = vmatpush.bf16.msrb.mxu2 %v4940_v23  ;;  %5231 = vmatpush.bf16.msrb.mxu3 %v5004_v30  ;;  %v4932_v42 = vpack.c.bf16 %v4708_v8, %v4700_v22  ;;  %v4475_v31 = vperm.slane %v9102_v58, 6  ;;  %v4412_v1 = vperm.slane %v9075_v43, 7  ;;  %v4476_v50 = vperm.slane %v9102_v58, 7 }
 0x40b   : > { %5193 = vmatpush.bf16.msrb.mxu0 %v4931_v4  ;;  %v4996_v54 = vpack.c.bf16 %v4836_v27, %v4828_v20  ;;  %v4683_v15 = vmul.f32 %v4411_v60, %v10059_v61  ;;  %v4691_v32 = vmul.f32 %v4411_v60, %v8895_v10  ;;  %v4403_v28 = vperm.slane %v9129_v46, 6 }
 0x40c   : > { %5206 = vmatpush.bf16.msrb.mxu1 %v4995_v63  ;;  %v4811_v53 = vmul.f32 %v4475_v31, %v10059_v61  ;;  %v4819_v7 = vmul.f32 %v4475_v31, %v8895_v10  ;;  %v4684_v9 = vmul.f32 %v4412_v1, %v10060_v36  ;;  %v4692_v62 = vmul.f32 %v4412_v1, %v8943_v25  ;;  %v4063_v55 = vpop.f32.mrf.mxu2 }
 0x40d   : > { %v4923_v43 = vpack.c.bf16 %v4691_v32, %v4683_v15  ;;  %v4812_v58 = vmul.f32 %v4476_v50, %v10060_v36  ;;  %v4820_v49 = vmul.f32 %v4476_v50, %v8943_v25  ;;  %v4667_v44 = vmul.f32 %v4403_v28, %v10059_v61  ;;  %v4076_v24 = vpop.f32.mrf.mxu3 }
 0x40e   : > { %5219 = vmatpush.bf16.msrb.mxu2 %v4932_v42  ;;  %5232 = vmatpush.bf16.msrb.mxu3 %v4996_v54  ;;  %v4987_v38 = vpack.c.bf16 %v4819_v7, %v4811_v53  ;;  %v4924_v6 = vpack.c.bf16 %v4692_v62, %v4684_v9  ;;  %v4675_v21 = vmul.f32 %v4403_v28, %v8895_v10  ;;  %v4467_v40 = vperm.slane %v9148_v57, 6  ;;  %v4039_v63 = vpop.f32.mrf.mxu0  ;;  %v4052_v27 = vpop.f32.mrf.mxu1 }
 0x40f   : > { %5194 = vmatpush.bf16.msrb.mxu0 %v4923_v43  ;;  %v4988_v16 = vpack.c.bf16 %v4820_v49, %v4812_v58  ;;  %v4404_v26 = vperm.slane %v9129_v46, 7  ;;  %v4468_v59 = vperm.slane %v9148_v57, 7  ;;  %v4395_v48 = vperm.slane %v9168_v39, 6 }
 0x410   : > { %5207 = vmatpush.bf16.msrb.mxu1 %v4987_v38  ;;  %v4915_v5 = vpack.c.bf16 %v4675_v21, %v4667_v44  ;;  %v4795_v3 = vmul.f32 %v4467_v40, %v10059_v61  ;;  %v4803_v34 = vmul.f32 %v4467_v40, %v8895_v10  ;;  %v4459_v52 = vperm.slane %v9188_v51, 6 }
 0x411   : > { %v4668_v23 = vmul.f32 %v4404_v26, %v10060_v36  ;;  %v4676_v19 = vmul.f32 %v4404_v26, %v8943_v25  ;;  %v4796_v0 = vmul.f32 %v4468_v59, %v10060_v36  ;;  %v4804_v46 = vmul.f32 %v4468_v59, %v8943_v25 }
 0x412   : > { %5220 = vmatpush.bf16.msrb.mxu2 %v4924_v6  ;;  %5233 = vmatpush.bf16.msrb.mxu3 %v4988_v16  ;;  %v4979_v57 = vpack.c.bf16 %v4803_v34, %v4795_v3  ;;  %v4651_v56 = vmul.f32 %v4395_v48, %v10059_v61  ;;  %v4659_v12 = vmul.f32 %v4395_v48, %v8895_v10  ;;  %v4396_v41 = vperm.slane %v9168_v39, 7 }
 0x413   : > { %v4779_v13 = vmul.f32 %v4459_v52, %v10059_v61  ;;  %5195 = vmatpush.bf16.msrb.mxu0 %v4915_v5  ;;  %v4916_v29 = vpack.c.bf16 %v4676_v19, %v4668_v23  ;;  %v4980_v45 = vpack.c.bf16 %v4804_v46, %v4796_v0  ;;  %v4787_v18 = vmul.f32 %v4459_v52, %v8895_v10 }
 0x414   : > { %5208 = vmatpush.bf16.msrb.mxu1 %v4979_v57  ;;  %v4907_v30 = vpack.c.bf16 %v4659_v12, %v4651_v56  ;;  %v4460_v22 = vperm.slane %v9188_v51, 7  ;;  %v3999_v8 = vadd.f32 %v9463_v47, %v9461_v33  ;;  %v4025_v20 = vadd.f32 %v9470_v37, %v9468_v17  ;;  %v4065_v17 = vpop.f32.mrf.mxu2 }
 0x415   : > { %v4971_v61 = vpack.c.bf16 %v4787_v18, %v4779_v13  ;;  %v4652_v4 = vmul.f32 %v4396_v41, %v10060_v36  ;;  %v4660_v10 = vmul.f32 %v4396_v41, %v8943_v25  ;;  %v4051_v39 = vadd.f32 %v4050_v14, %v4037_v11  ;;  %v4078_v37 = vpop.f32.mrf.mxu3 }
 0x416   : > { %5221 = vmatpush.bf16.msrb.mxu2 %v4916_v29  ;;  %5234 = vmatpush.bf16.msrb.mxu3 %v4980_v45  ;;  %v4780_v51 = vmul.f32 %v4460_v22, %v10060_v36  ;;  %v4788_v33 = vmul.f32 %v4460_v22, %v8943_v25  ;;  %5429 = vst [vmem:[%s7860_s25 + $0xa0] sm:$0xff] %v3999_v8 }
 0x417   : > { %v4077_v47 = vadd.f32 %v4076_v24, %v4063_v55  ;;  %5196 = vmatpush.bf16.msrb.mxu0 %v4907_v30  ;;  %v4908_v60 = vpack.c.bf16 %v4660_v10, %v4652_v4  ;;  %5430 = vst [vmem:[%s7860_s25 + $0xa8] sm:$0xff] %v4025_v20 }
 0x418   : > { %5209 = vmatpush.bf16.msrb.mxu1 %v4971_v61  ;;  %v4972_v42 = vpack.c.bf16 %v4788_v33, %v4780_v51  ;;  %5431 = vst [vmem:[%s7860_s25 + $0xb0] sm:$0xff] %v4051_v39 }
 0x419   : > { %5432 = vst [vmem:[%s7860_s25 + $0xb8] sm:$0xff] %v4077_v47 }
 0x41a   : > { %5222 = vmatpush.bf16.msrb.mxu2 %v4908_v60  ;;  %5235 = vmatpush.bf16.msrb.mxu3 %v4972_v42 }
 0x41b   : > { %5197 = vmatmul.bf16.vlgmr.msrb.gmra.mxu0 %v9282_v35  ;;  %5210 = vmatmul.bf16.vlgmr.msrb.gmra.mxu1 %v9284_v2 }
 0x41d   : > { %5223 = vmatmul.bf16.vlgmr.msrb.gmra.mxu2 %v9282_v35  ;;  %5236 = vmatmul.bf16.vlgmr.msrb.gmra.mxu3 %v9284_v2 }
 0x44b   : > { %v5042_v25 = vpop.f32.mrf.mxu0 }
 0x44e   : > { %v5055_v36 = vpop.f32.mrf.mxu1 }
 0x44f   : > { %v5056_v31 = vadd.f32 %v5055_v36, %v5042_v25 }
 0x450   : > { %v5068_v1 = vpop.f32.mrf.mxu2 }
 0x451   : > { %5433 = vst [vmem:[%s7860_s25 + $0xc0] sm:$0xff] %v5056_v31  ;;  %v5081_v50 = vpop.f32.mrf.mxu3 }
 0x452   : > { %v5082_v54 = vadd.f32 %v5081_v50, %v5068_v1 }
 0x453   : > { %v5044_v15 = vpop.f32.mrf.mxu0 }
 0x454   : > { %5434 = vst [vmem:[%s7860_s25 + $0xc8] sm:$0xff] %v5082_v54 }
 0x456   : > { %v5057_v32 = vpop.f32.mrf.mxu1 }
 0x458   : > { %v5070_v28 = vpop.f32.mrf.mxu2 }
 0x459   : > { %v5083_v53 = vpop.f32.mrf.mxu3 }
 0x45b   : > { %v5094_v7 = vpop.f32.mrf.mxu0 }
 0x45f   : > { %v5107_v9 = vpop.f32.mrf.mxu1 }
 0x460   : > { %v5120_v35 = vpop.f32.mrf.mxu2  ;;  %v5108_v62 = vadd.f32 %v5107_v9, %v5094_v7 }
 0x461   : > { %v5133_v2 = vpop.f32.mrf.mxu3 }
 0x462   : > { %5435 = vst [vmem:[%s7860_s25 + $0xd0] sm:$0xff] %v5108_v62  ;;  %v5134_v43 = vadd.f32 %v5133_v2, %v5120_v35 }
 0x463   : > { %v5096_v58 = vpop.f32.mrf.mxu0 }
 0x464   : > { %5436 = vst [vmem:[%s7860_s25 + $0xd8] sm:$0xff] %v5134_v43 }
 0x467   : > { %v5109_v49 = vpop.f32.mrf.mxu1 }
 0x468   : > { %v5122_v44 = vpop.f32.mrf.mxu2 }
 0x469   : > { %v5135_v11 = vpop.f32.mrf.mxu3 }
 0x477   : > { %v5146_v14 = vpop.f32.mrf.mxu0 }
 0x47e   : > { %v5159_v38 = vpop.f32.mrf.mxu1 }
 0x47f   : > { %v5160_v6 = vadd.f32 %v5159_v38, %v5146_v14  ;;  %v5148_v40 = vpop.f32.mrf.mxu0 }
 0x480   : > { %v5172_v21 = vpop.f32.mrf.mxu2 }
 0x481   : > { %5437 = vst [vmem:[%s7860_s25 + $0xe0] sm:$0xff] %v5160_v6 }
 0x482   : > { %v5185_v55 = vpop.f32.mrf.mxu3 }
 0x483   : > { %v5186_v24 = vadd.f32 %v5185_v55, %v5172_v21 }
 0x485   : > { %5438 = vst [vmem:[%s7860_s25 + $0xe8] sm:$0xff] %v5186_v24 }
 0x486   : > { %v5161_v16 = vpop.f32.mrf.mxu1 }
 0x488   : > { %v5174_v26 = vpop.f32.mrf.mxu2 }
 0x48a   : > { %v5187_v59 = vpop.f32.mrf.mxu3 }
 0x498   : > { %v5198_v48 = vpop.f32.mrf.mxu0  ;;  %v5211_v5 = vpop.f32.mrf.mxu1 }
 0x499   : > { %v5212_v3 = vadd.f32 %v5211_v5, %v5198_v48 }
 0x49b   : > { %5439 = vst [vmem:[%s7860_s25 + $0xf0] sm:$0xff] %v5212_v3 }
 0x4a0   : > { %v5224_v34 = vpop.f32.mrf.mxu2  ;;  %v5200_v52 = vpop.f32.mrf.mxu0 }
 0x4a1   : > { %v5237_v23 = vpop.f32.mrf.mxu3  ;;  %v5213_v19 = vpop.f32.mrf.mxu1 }
 0x4a2   : > { %v5238_v0 = vadd.f32 %v5237_v23, %v5224_v34 }
 0x4a4   : > { %5440 = vst [vmem:[%s7860_s25 + $0xf8] sm:$0xff] %v5238_v0 }
 0x4a5   : > { %5705 = shalt.err (!%p5702_p1)
}
 0x4a6   : > { %s5786_s23 = smov 1024   ;;  %s5787_s2 = smov 64  }
 0x4a7   : > { %5461 = dma.vmem_to_hbm [thread:$0]  (%p5865_p8), %s5266_s29, 4096, %s5268_s6, %s5251_s7, %s5786_s23, %s5786_s23, %s5787_s2  }
 0x4a8   : > { %v5226_v46 = vpop.f32.mrf.mxu2 }
 0x4a9   : > { %v5239_v57 = vpop.f32.mrf.mxu3 }
 0x4aa PF: > { %s10061_s3 = sld [smem:[#allocation16_spill]]  ;;  %p5478_p2 = pnand %p5404_p13, %p5869_p9 }
 0x4ac   : > { %p5479_p4 = pneg %p5478_p2 }
 0x4b0   : > { %s5282_s0 = sand.u32 1, %s10061_s3  }
 0x4b1   : > { %s5283_s27 = scalar_lea.sflag [#allocation4], %s5282_s0 }
 0x4b2   : > { %5747 = dma.done.wait (%p5479_p4), %s5283_s27, 4096  }
 0x4b3   : > { %5749 = vsyncadd (%p5479_p4), %s5283_s27, 4294963200  ;;  %s24_s20 = sadd.s32 1, %s5772_s20   ;;  %s10063_s26 = sld [smem:[#allocation18_spill]] }
 0x4b4   : > { %p21_p6 = scmp.ge.s32.totalorder %s24_s20, 4   ;;  %s10064_s15 = smov %s5756_s16 }
 0x4b5   : > { %s10065_s16 = smov %s5760_s17  ;;  %s10066_s17 = smov %s5910_s10 }
 0x4b6   : > { %s10067_s18 = smov %s5768_s19  ;;  %23 = sbr.rel (!%p21_p6) target bundleno = 13 (0xd), region = 106 }
 0x4b9   : > { %s10068_s19 = smov %s10063_s26 }
 0x4bb   :  { %5289 = vsyncpa [#allocation3], 1 }
 0x4bc   :  { %5291 = vsyncpa [#allocation3 + $0x1], 1 }
 0x4bd   :  { %5292 = vsyncpa [#allocation6], 1 }
 0x4be   :  { %5294 = vsyncpa [#allocation6 + $0x1], 1 }
 0x4bf   :  { %5295 = vsyncpa [#allocation9], 1 }
 0x4c0   :  { %5296 = vsyncpa [#allocation4], 1 }
 0x4c1   :  { %5298 = vsyncpa [#allocation4 + $0x1], 1 }

</bundles_post_ra>
